<compile_context>
chip_gen: v7x
topology: tpu7x:2x2x1
jax: 0.10.0
libtpu: 0.0.40
codegen_flags: <defaults>
</compile_context>

<pallas_src>
import jax
import jax.numpy as jnp
from jax import lax
from jax.experimental import pallas as pl
from jax.experimental.pallas import tpu as pltpu


# ----------------------------------------------------------------------------
# Fused Pallas kernel
# ----------------------------------------------------------------------------
def _value_net_fused_kernel(x_ref,
                            c1w_ref, c1b_ref, c2w_ref, c2b_ref,
                            fc1w_ref, fc1b_ref, fc2w_ref, fc2b_ref,
                            fc3w_ref, fc3b_ref, fc4w_ref, fc4b_ref,
                            o_ref,
                            xpad_ref, h1pad_ref, flat_ref):
    """Whole ValueNet forward for one (small) batch, everything resident in VMEM.

    x_ref    : (B, H, W, 2)        NHWC input
    c*w_ref  : (9*Cin, Cout)       im2col-reshaped conv weights
    c*b_ref  : (1, Cout)
    fc*w_ref : (In, Out)           fc1w rows already in NHWC-flatten order, bf16
    fc*b_ref : (1, Out)
    o_ref    : (B, 1)
    xpad_ref : (B, H+2, W+2, 2)    scratch: zero-padded input
    h1pad_ref: (B, H+2, W+2, hid)  scratch: zero-padded conv1 output
    flat_ref : (B, H*W*64)         scratch: flattened conv2 output
    """
    B, H, W, cin = x_ref.shape
    hid = c1b_ref.shape[-1]
    c2 = c2b_ref.shape[-1]
    P = H * W

    def conv3x3_relu(pad_ref, w_ref, b_ref, c_in):
        # im2col: the 9 taps are concatenated on the lane axis so the whole
        # conv is ONE (B*H*W, 9*c_in) x (9*c_in, Cout) MXU matmul.
        xp = pad_ref[...]
        patches = jnp.concatenate(
            [xp[:, kh:kh + H, kw:kw + W, :]
             for kh in range(3) for kw in range(3)],
            axis=-1)                                   # (B, H, W, 9*c_in)
        patches = patches.reshape(B * P, 9 * c_in)     # leading-dim merge only
        y = jnp.dot(patches, w_ref[...], preferred_element_type=jnp.float32)
        return jnp.maximum(y + b_ref[...], 0.0)        # (B*P, Cout)

    # ---- conv1 (pad in VMEM scratch) ----
    xpad_ref[...] = jnp.zeros_like(xpad_ref)
    xpad_ref[:, 1:H + 1, 1:W + 1, :] = x_ref[...]
    h1 = conv3x3_relu(xpad_ref, c1w_ref, c1b_ref, cin)          # (B*P, hid)

    # ---- conv2 (pad conv1 output in VMEM scratch) ----
    h1pad_ref[...] = jnp.zeros_like(h1pad_ref)
    h1pad_ref[:, 1:H + 1, 1:W + 1, :] = h1.reshape(B, H, W, hid)
    h2 = conv3x3_relu(h1pad_ref, c2w_ref, c2b_ref, hid)         # (B*P, 64)

    # ---- flatten in NHWC order: flat[b, p*C2 + c] = h2[b, p, c] ----
    # fc1 weights were permuted offline to this order, so no transpose needed.
    h2_r = h2.reshape(B, P, c2)                 # splits leading dim only
    for p in range(P):                          # P lane-aligned stores (c2=64)
        flat_ref[:, p * c2:(p + 1) * c2] = h2_r[:, p, :]

    flat = flat_ref[...].astype(fc1w_ref.dtype)  # bf16 for the big matmul

    # ---- fc stack (f32 accumulation on the MXU) ----
    z = jnp.dot(flat, fc1w_ref[...], preferred_element_type=jnp.float32)
    z = jnp.maximum(z + fc1b_ref[...], 0.0)
    z = jnp.maximum(jnp.dot(z, fc2w_ref[...],
                            preferred_element_type=jnp.float32) + fc2b_ref[...], 0.0)
    z = jnp.maximum(jnp.dot(z, fc3w_ref[...],
                            preferred_element_type=jnp.float32) + fc3b_ref[...], 0.0)
    y = jnp.dot(z, fc4w_ref[...], preferred_element_type=jnp.float32) + fc4b_ref[...]
    o_ref[...] = y.astype(o_ref.dtype)


_VMEM = pl.BlockSpec(memory_space=pltpu.MemorySpace.VMEM)


@jax.jit
def value_net_forward(state_nchw, kparams):
    """ValueNet forward. state_nchw: (B, 2, H, W) like the PyTorch module."""
    x = jnp.transpose(state_nchw, (0, 2, 3, 1)).astype(jnp.float32)  # NHWC
    B, H, W, cin = x.shape
    hid = kparams["c1b"].shape[-1]
    c2 = kparams["c2b"].shape[-1]

    # TODO(synk): for non-toy batch sizes, add a batch grid axis marked
    # "parallel" (dimension_semantics) so v7x's two TensorCores both do work,
    # and re-derive per-block VMEM usage against v7x's 64 MiB budget.
    return pl.pallas_call(
        _value_net_fused_kernel,
        out_shape=jax.ShapeDtypeStruct((B, 1), jnp.float32),
        in_specs=[_VMEM] * 13,
        out_specs=_VMEM,
        scratch_shapes=[
            pltpu.VMEM((B, H + 2, W + 2, cin), jnp.float32),   # padded input
            pltpu.VMEM((B, H + 2, W + 2, hid), jnp.float32),   # padded conv1 out
            pltpu.VMEM((B, H * W * c2), jnp.float32),          # flattened conv2 out
        ],
        compiler_params=pltpu.CompilerParams(
            vmem_limit_bytes=32 * 1024 * 1024),
    )(x,
      kparams["c1w"], kparams["c1b"], kparams["c2w"], kparams["c2b"],
      kparams["fc1w"], kparams["fc1b"], kparams["fc2w"], kparams["fc2b"],
      kparams["fc3w"], kparams["fc3b"], kparams["fc4w"], kparams["fc4b"])


# ----------------------------------------------------------------------------
# Parameters (PyTorch layout) + one-time repack for the kernel
# ----------------------------------------------------------------------------
def init_params(key, state_dim, hidden_channels):
    """PyTorch-equivalent parameters: conv HWIO, linear (In, Out), biases (1, Out).
    fc1_w rows are in NCHW-flatten order (c*H*W + h*W + w), like torch."""
    layer2 = 64
    ks = jax.random.split(key, 12)
    scale = 0.05

    def n(k, shape):
        return (scale * jax.random.normal(k, shape)).astype(jnp.float32)

    return {
        "conv1_w": n(ks[0], (3, 3, 2, hidden_channels)),
        "conv1_b": n(ks[1], (1, hidden_channels)),
        "conv2_w": n(ks[2], (3, 3, hidden_channels, layer2)),
        "conv2_b": n(ks[3], (1, layer2)),
        "fc1_w": n(ks[4], (layer2 * state_dim, 256)),
        "fc1_b": n(ks[5], (1, 256)),
        "fc2_w": n(ks[6], (256, 128)),
        "fc2_b": n(ks[7], (1, 128)),
        "fc3_w": n(ks[8], (128, 64)),
        "fc3_b": n(ks[9], (1, 64)),
        "fc4_w": n(ks[10], (64, 1)),
        "fc4_b": n(ks[11], (1, 1)),
    }


def prepare_params(params):
    """Offline, one-time repack of PyTorch-layout params for the fused kernel."""
    cin = params["conv1_w"].shape[2]
    hid = params["conv1_w"].shape[3]
    c2 = params["conv2_w"].shape[3]
    n1 = params["fc1_w"].shape[1]
    hw = params["fc1_w"].shape[0] // c2           # H*W (= state_dim)

    # Conv kernels as im2col matrices (9*Cin, Cout), K ordered (kh, kw, ci).
    c1w = params["conv1_w"].reshape(9 * cin, hid)
    c2w = params["conv2_w"].reshape(9 * hid, c2)

    # Permute fc1 rows from NCHW-flatten (c*HW + p) to NHWC-flatten (p*C2 + c)
    # so the kernel's natural NHWC flatten needs no transpose.
    fc1 = params["fc1_w"].reshape(c2, hw, n1).transpose(1, 0, 2).reshape(hw * c2, n1)

    return {
        "c1w": c1w, "c1b": params["conv1_b"],
        "c2w": c2w, "c2b": params["conv2_b"],
        # fc1_w dominates HBM->VMEM traffic (4 MiB f32) -> keep it in bf16.
        "fc1w": fc1.astype(jnp.bfloat16), "fc1b": params["fc1_b"],
        "fc2w": params["fc2_w"], "fc2b": params["fc2_b"],
        "fc3w": params["fc3_w"], "fc3b": params["fc3_b"],
        "fc4w": params["fc4_w"], "fc4b": params["fc4_b"],
    }


# ----------------------------------------------------------------------------
# Pure-JAX reference (same math, including bf16 fc1 weights) for correctness
# ----------------------------------------------------------------------------
def _reference_forward(state_nchw, params):
    x = jnp.transpose(state_nchw, (0, 2, 3, 1)).astype(jnp.float32)

    def conv(x, w, b):
        y = lax.conv_general_dilated(
            x, w, window_strides=(1, 1), padding="SAME",
            dimension_numbers=("NHWC", "HWIO", "NHWC"))
        return jnp.maximum(y + b[0], 0.0)

    h1 = conv(x, params["conv1_w"], params["conv1_b"])
    h2 = conv(h1, params["conv2_w"], params["conv2_b"])
    B, H, W, C = h2.shape
    flat = jnp.transpose(h2, (0, 3, 1, 2)).reshape(B, C * H * W)   # NCHW flatten
    # fc1 in bf16 (matches the kernel's intentional bf16 fc1 weights).
    z = jnp.dot(flat.astype(jnp.bfloat16),
                params["fc1_w"].astype(jnp.bfloat16),
                preferred_element_type=jnp.float32) + params["fc1_b"][0]
    z = jnp.maximum(z, 0.0)
    z = jnp.maximum(z @ params["fc2_w"] + params["fc2_b"][0], 0.0)
    z = jnp.maximum(z @ params["fc3_w"] + params["fc3_b"][0], 0.0)
    return z @ params["fc4_w"] + params["fc4_b"][0]


if __name__ == "__main__":
    # Small shapes consistent with the module: state_dim = H*W, 2 input channels.
    B, H, W = 2, 8, 8
    state_dim = H * W          # 64
    hidden_channels = 16

    key = jax.random.PRNGKey(0)
    k_param, k_input = jax.random.split(key)
    torch_params = init_params(k_param, state_dim, hidden_channels)
    kparams = prepare_params(torch_params)
    state = jax.random.normal(k_input, (B, 2, H, W), dtype=jnp.float32)  # NCHW

    out = jax.block_until_ready(value_net_forward(state, kparams))
    ref = _reference_forward(state, torch_params)

    assert out.shape == (B, 1)
    assert jnp.allclose(out, ref, atol=1e-3, rtol=1e-3), (out, ref)

    print("KERNEL_OK")
</pallas_src>

<mosaic_0001>
module attributes {stable_mosaic.version = 11 : i64} {
  func.func @_value_net_fused_kernel(%arg0: memref<2x8x8x2xf32, #tpu.memory_space<vmem>>, %arg1: memref<18x16xf32, #tpu.memory_space<vmem>>, %arg2: memref<1x16xf32, #tpu.memory_space<vmem>>, %arg3: memref<144x64xf32, #tpu.memory_space<vmem>>, %arg4: memref<1x64xf32, #tpu.memory_space<vmem>>, %arg5: memref<4096x256xbf16, #tpu.memory_space<vmem>>, %arg6: memref<1x256xf32, #tpu.memory_space<vmem>>, %arg7: memref<256x128xf32, #tpu.memory_space<vmem>>, %arg8: memref<1x128xf32, #tpu.memory_space<vmem>>, %arg9: memref<128x64xf32, #tpu.memory_space<vmem>>, %arg10: memref<1x64xf32, #tpu.memory_space<vmem>>, %arg11: memref<64x1xf32, #tpu.memory_space<vmem>>, %arg12: memref<1x1xf32, #tpu.memory_space<vmem>>, %arg13: memref<2x1xf32, #tpu.memory_space<vmem>>, %arg14: memref<2x10x10x2xf32, #tpu.memory_space<vmem>>, %arg15: memref<2x10x10x16xf32, #tpu.memory_space<vmem>>, %arg16: memref<2x4096xf32, #tpu.memory_space<vmem>>) attributes {dimension_semantics = [], scalar_prefetch = 0 : i64, scratch_operands = 3 : i64, tpu.core_type = #tpu.core_type<tc>} {
    %cst = arith.constant 0.000000e+00 : f32
    %0 = vector.broadcast %cst : f32 to vector<2x10x10x2xf32>
    %c0 = arith.constant 0 : index
    %c0_0 = arith.constant 0 : index
    %c0_1 = arith.constant 0 : index
    %c0_2 = arith.constant 0 : index
    %1 = vector.load %arg14[%c0, %c0_0, %c0_1, %c0_2] : memref<2x10x10x2xf32, #tpu.memory_space<vmem>>, vector<2x10x10x2xf32>
    tpu.vector_store %arg14[%c0, %c0_0, %c0_1, %c0_2], %0 {strides = array<i32>} : memref<2x10x10x2xf32, #tpu.memory_space<vmem>>, vector<2x10x10x2xf32>,
    %c0_3 = arith.constant 0 : index
    %c0_4 = arith.constant 0 : index
    %c0_5 = arith.constant 0 : index
    %c0_6 = arith.constant 0 : index
    %2 = vector.load %arg0[%c0_3, %c0_4, %c0_5, %c0_6] : memref<2x8x8x2xf32, #tpu.memory_space<vmem>>, vector<2x8x8x2xf32>
    %c0_7 = arith.constant 0 : index
    %c1 = arith.constant 1 : index
    %c1_8 = arith.constant 1 : index
    %c0_9 = arith.constant 0 : index
    %3 = vector.load %arg14[%c0_7, %c1, %c1_8, %c0_9] : memref<2x10x10x2xf32, #tpu.memory_space<vmem>>, vector<2x8x8x2xf32>
    tpu.vector_store %arg14[%c0_7, %c1, %c1_8, %c0_9], %2 {strides = array<i32>} : memref<2x10x10x2xf32, #tpu.memory_space<vmem>>, vector<2x8x8x2xf32>,
    %c0_10 = arith.constant 0 : index
    %c0_11 = arith.constant 0 : index
    %c0_12 = arith.constant 0 : index
    %c0_13 = arith.constant 0 : index
    %4 = vector.load %arg14[%c0_10, %c0_11, %c0_12, %c0_13] : memref<2x10x10x2xf32, #tpu.memory_space<vmem>>, vector<2x10x10x2xf32>
    %5 = vector.extract_strided_slice %4 {offsets = [0, 0, 0, 0], sizes = [2, 8, 8, 2], strides = [1, 1, 1, 1]} : vector<2x10x10x2xf32> to vector<2x8x8x2xf32>
    %6 = vector.extract_strided_slice %4 {offsets = [0, 0, 1, 0], sizes = [2, 8, 8, 2], strides = [1, 1, 1, 1]} : vector<2x10x10x2xf32> to vector<2x8x8x2xf32>
    %7 = vector.extract_strided_slice %4 {offsets = [0, 0, 2, 0], sizes = [2, 8, 8, 2], strides = [1, 1, 1, 1]} : vector<2x10x10x2xf32> to vector<2x8x8x2xf32>
    %8 = vector.extract_strided_slice %4 {offsets = [0, 1, 0, 0], sizes = [2, 8, 8, 2], strides = [1, 1, 1, 1]} : vector<2x10x10x2xf32> to vector<2x8x8x2xf32>
    %9 = vector.extract_strided_slice %4 {offsets = [0, 1, 1, 0], sizes = [2, 8, 8, 2], strides = [1, 1, 1, 1]} : vector<2x10x10x2xf32> to vector<2x8x8x2xf32>
    %10 = vector.extract_strided_slice %4 {offsets = [0, 1, 2, 0], sizes = [2, 8, 8, 2], strides = [1, 1, 1, 1]} : vector<2x10x10x2xf32> to vector<2x8x8x2xf32>
    %11 = vector.extract_strided_slice %4 {offsets = [0, 2, 0, 0], sizes = [2, 8, 8, 2], strides = [1, 1, 1, 1]} : vector<2x10x10x2xf32> to vector<2x8x8x2xf32>
    %12 = vector.extract_strided_slice %4 {offsets = [0, 2, 1, 0], sizes = [2, 8, 8, 2], strides = [1, 1, 1, 1]} : vector<2x10x10x2xf32> to vector<2x8x8x2xf32>
    %13 = vector.extract_strided_slice %4 {offsets = [0, 2, 2, 0], sizes = [2, 8, 8, 2], strides = [1, 1, 1, 1]} : vector<2x10x10x2xf32> to vector<2x8x8x2xf32>
    %14 = tpu.concatenate %5, %6, %7, %8, %9, %10, %11, %12, %13 in 3 : vector<2x8x8x2xf32>, vector<2x8x8x2xf32>, vector<2x8x8x2xf32>, vector<2x8x8x2xf32>, vector<2x8x8x2xf32>, vector<2x8x8x2xf32>, vector<2x8x8x2xf32>, vector<2x8x8x2xf32>, vector<2x8x8x2xf32> -> vector<2x8x8x18xf32>
    %15 = vector.shape_cast %14 : vector<2x8x8x18xf32> to vector<128x18xf32>
    %c0_14 = arith.constant 0 : index
    %c0_15 = arith.constant 0 : index
    %16 = vector.load %arg1[%c0_14, %c0_15] : memref<18x16xf32, #tpu.memory_space<vmem>>, vector<18x16xf32>
    %cst_16 = arith.constant dense<0.000000e+00> : vector<128x16xf32>
    %17 = tpu.matmul %15, %16, %cst_16 {dimension_numbers = #tpu.dot_dimension_numbers<[1], [0], [0], [1], [0, 0, 1, 1], [], []>} : vector<128x18xf32>, vector<18x16xf32>, vector<128x16xf32> -> vector<128x16xf32>
    %c0_17 = arith.constant 0 : index
    %c0_18 = arith.constant 0 : index
    %18 = vector.load %arg2[%c0_17, %c0_18] : memref<1x16xf32, #tpu.memory_space<vmem>>, vector<1x16xf32>
    %19 = vector.broadcast %18 : vector<1x16xf32> to vector<128x16xf32>
    %20 = arith.addf %17, %19 : vector<128x16xf32>
    %cst_19 = arith.constant 0.000000e+00 : f32
    %21 = vector.broadcast %cst_19 : f32 to vector<128x16xf32>
    %22 = arith.maximumf %20, %21 : vector<128x16xf32>
    %cst_20 = arith.constant 0.000000e+00 : f32
    %23 = vector.broadcast %cst_20 : f32 to vector<2x10x10x16xf32>
    %c0_21 = arith.constant 0 : index
    %c0_22 = arith.constant 0 : index
    %c0_23 = arith.constant 0 : index
    %c0_24 = arith.constant 0 : index
    %24 = vector.load %arg15[%c0_21, %c0_22, %c0_23, %c0_24] : memref<2x10x10x16xf32, #tpu.memory_space<vmem>>, vector<2x10x10x16xf32>
    tpu.vector_store %arg15[%c0_21, %c0_22, %c0_23, %c0_24], %23 {strides = array<i32>} : memref<2x10x10x16xf32, #tpu.memory_space<vmem>>, vector<2x10x10x16xf32>,
    %25 = vector.shape_cast %22 : vector<128x16xf32> to vector<2x8x8x16xf32>
    %c0_25 = arith.constant 0 : index
    %c1_26 = arith.constant 1 : index
    %c1_27 = arith.constant 1 : index
    %c0_28 = arith.constant 0 : index
    %26 = vector.load %arg15[%c0_25, %c1_26, %c1_27, %c0_28] : memref<2x10x10x16xf32, #tpu.memory_space<vmem>>, vector<2x8x8x16xf32>
    tpu.vector_store %arg15[%c0_25, %c1_26, %c1_27, %c0_28], %25 {strides = array<i32>} : memref<2x10x10x16xf32, #tpu.memory_space<vmem>>, vector<2x8x8x16xf32>,
    %c0_29 = arith.constant 0 : index
    %c0_30 = arith.constant 0 : index
    %c0_31 = arith.constant 0 : index
    %c0_32 = arith.constant 0 : index
    %27 = vector.load %arg15[%c0_29, %c0_30, %c0_31, %c0_32] : memref<2x10x10x16xf32, #tpu.memory_space<vmem>>, vector<2x10x10x16xf32>
    %28 = vector.extract_strided_slice %27 {offsets = [0, 0, 0, 0], sizes = [2, 8, 8, 16], strides = [1, 1, 1, 1]} : vector<2x10x10x16xf32> to vector<2x8x8x16xf32>
    %29 = vector.extract_strided_slice %27 {offsets = [0, 0, 1, 0], sizes = [2, 8, 8, 16], strides = [1, 1, 1, 1]} : vector<2x10x10x16xf32> to vector<2x8x8x16xf32>
    %30 = vector.extract_strided_slice %27 {offsets = [0, 0, 2, 0], sizes = [2, 8, 8, 16], strides = [1, 1, 1, 1]} : vector<2x10x10x16xf32> to vector<2x8x8x16xf32>
    %31 = vector.extract_strided_slice %27 {offsets = [0, 1, 0, 0], sizes = [2, 8, 8, 16], strides = [1, 1, 1, 1]} : vector<2x10x10x16xf32> to vector<2x8x8x16xf32>
    %32 = vector.extract_strided_slice %27 {offsets = [0, 1, 1, 0], sizes = [2, 8, 8, 16], strides = [1, 1, 1, 1]} : vector<2x10x10x16xf32> to vector<2x8x8x16xf32>
    %33 = vector.extract_strided_slice %27 {offsets = [0, 1, 2, 0], sizes = [2, 8, 8, 16], strides = [1, 1, 1, 1]} : vector<2x10x10x16xf32> to vector<2x8x8x16xf32>
    %34 = vector.extract_strided_slice %27 {offsets = [0, 2, 0, 0], sizes = [2, 8, 8, 16], strides = [1, 1, 1, 1]} : vector<2x10x10x16xf32> to vector<2x8x8x16xf32>
    %35 = vector.extract_strided_slice %27 {offsets = [0, 2, 1, 0], sizes = [2, 8, 8, 16], strides = [1, 1, 1, 1]} : vector<2x10x10x16xf32> to vector<2x8x8x16xf32>
    %36 = vector.extract_strided_slice %27 {offsets = [0, 2, 2, 0], sizes = [2, 8, 8, 16], strides = [1, 1, 1, 1]} : vector<2x10x10x16xf32> to vector<2x8x8x16xf32>
    %37 = tpu.concatenate %28, %29, %30, %31, %32, %33, %34, %35, %36 in 3 : vector<2x8x8x16xf32>, vector<2x8x8x16xf32>, vector<2x8x8x16xf32>, vector<2x8x8x16xf32>, vector<2x8x8x16xf32>, vector<2x8x8x16xf32>, vector<2x8x8x16xf32>, vector<2x8x8x16xf32>, vector<2x8x8x16xf32> -> vector<2x8x8x144xf32>
    %38 = vector.shape_cast %37 : vector<2x8x8x144xf32> to vector<128x144xf32>
    %c0_33 = arith.constant 0 : index
    %c0_34 = arith.constant 0 : index
    %39 = vector.load %arg3[%c0_33, %c0_34] : memref<144x64xf32, #tpu.memory_space<vmem>>, vector<144x64xf32>
    %cst_35 = arith.constant dense<0.000000e+00> : vector<128x64xf32>
    %40 = tpu.matmul %38, %39, %cst_35 {dimension_numbers = #tpu.dot_dimension_numbers<[1], [0], [0], [1], [0, 0, 1, 1], [], []>} : vector<128x144xf32>, vector<144x64xf32>, vector<128x64xf32> -> vector<128x64xf32>
    %c0_36 = arith.constant 0 : index
    %c0_37 = arith.constant 0 : index
    %41 = vector.load %arg4[%c0_36, %c0_37] : memref<1x64xf32, #tpu.memory_space<vmem>>, vector<1x64xf32>
    %42 = vector.broadcast %41 : vector<1x64xf32> to vector<128x64xf32>
    %43 = arith.addf %40, %42 : vector<128x64xf32>
    %cst_38 = arith.constant 0.000000e+00 : f32
    %44 = vector.broadcast %cst_38 : f32 to vector<128x64xf32>
    %45 = arith.maximumf %43, %44 : vector<128x64xf32>
    %46 = vector.shape_cast %45 : vector<128x64xf32> to vector<2x64x64xf32>
    %47 = vector.extract_strided_slice %46 {offsets = [0, 0, 0], sizes = [2, 1, 64], strides = [1, 1, 1]} : vector<2x64x64xf32> to vector<2x1x64xf32>
    %48 = vector.shape_cast %47 : vector<2x1x64xf32> to vector<2x64xf32>
    %c0_39 = arith.constant 0 : index
    %c0_40 = arith.constant 0 : index
    %49 = vector.load %arg16[%c0_39, %c0_40] : memref<2x4096xf32, #tpu.memory_space<vmem>>, vector<2x64xf32>
    tpu.vector_store %arg16[%c0_39, %c0_40], %48 {strides = array<i32>} : memref<2x4096xf32, #tpu.memory_space<vmem>>, vector<2x64xf32>,
    %50 = vector.extract_strided_slice %46 {offsets = [0, 1, 0], sizes = [2, 1, 64], strides = [1, 1, 1]} : vector<2x64x64xf32> to vector<2x1x64xf32>
    %51 = vector.shape_cast %50 : vector<2x1x64xf32> to vector<2x64xf32>
    %c0_41 = arith.constant 0 : index
    %c64 = arith.constant 64 : index
    %52 = vector.load %arg16[%c0_41, %c64] : memref<2x4096xf32, #tpu.memory_space<vmem>>, vector<2x64xf32>
    tpu.vector_store %arg16[%c0_41, %c64], %51 {strides = array<i32>} : memref<2x4096xf32, #tpu.memory_space<vmem>>, vector<2x64xf32>,
    %53 = vector.extract_strided_slice %46 {offsets = [0, 2, 0], sizes = [2, 1, 64], strides = [1, 1, 1]} : vector<2x64x64xf32> to vector<2x1x64xf32>
    %54 = vector.shape_cast %53 : vector<2x1x64xf32> to vector<2x64xf32>
    %c0_42 = arith.constant 0 : index
    %c128 = arith.constant 128 : index
    %55 = vector.load %arg16[%c0_42, %c128] : memref<2x4096xf32, #tpu.memory_space<vmem>>, vector<2x64xf32>
    tpu.vector_store %arg16[%c0_42, %c128], %54 {strides = array<i32>} : memref<2x4096xf32, #tpu.memory_space<vmem>>, vector<2x64xf32>,
    %56 = vector.extract_strided_slice %46 {offsets = [0, 3, 0], sizes = [2, 1, 64], strides = [1, 1, 1]} : vector<2x64x64xf32> to vector<2x1x64xf32>
    %57 = vector.shape_cast %56 : vector<2x1x64xf32> to vector<2x64xf32>
    %c0_43 = arith.constant 0 : index
    %c192 = arith.constant 192 : index
    %58 = vector.load %arg16[%c0_43, %c192] : memref<2x4096xf32, #tpu.memory_space<vmem>>, vector<2x64xf32>
    tpu.vector_store %arg16[%c0_43, %c192], %57 {strides = array<i32>} : memref<2x4096xf32, #tpu.memory_space<vmem>>, vector<2x64xf32>,
    %59 = vector.extract_strided_slice %46 {offsets = [0, 4, 0], sizes = [2, 1, 64], strides = [1, 1, 1]} : vector<2x64x64xf32> to vector<2x1x64xf32>
    %60 = vector.shape_cast %59 : vector<2x1x64xf32> to vector<2x64xf32>
    %c0_44 = arith.constant 0 : index
    %c256 = arith.constant 256 : index
    %61 = vector.load %arg16[%c0_44, %c256] : memref<2x4096xf32, #tpu.memory_space<vmem>>, vector<2x64xf32>
    tpu.vector_store %arg16[%c0_44, %c256], %60 {strides = array<i32>} : memref<2x4096xf32, #tpu.memory_space<vmem>>, vector<2x64xf32>,
    %62 = vector.extract_strided_slice %46 {offsets = [0, 5, 0], sizes = [2, 1, 64], strides = [1, 1, 1]} : vector<2x64x64xf32> to vector<2x1x64xf32>
    %63 = vector.shape_cast %62 : vector<2x1x64xf32> to vector<2x64xf32>
    %c0_45 = arith.constant 0 : index
    %c320 = arith.constant 320 : index
    %64 = vector.load %arg16[%c0_45, %c320] : memref<2x4096xf32, #tpu.memory_space<vmem>>, vector<2x64xf32>
    tpu.vector_store %arg16[%c0_45, %c320], %63 {strides = array<i32>} : memref<2x4096xf32, #tpu.memory_space<vmem>>, vector<2x64xf32>,
    %65 = vector.extract_strided_slice %46 {offsets = [0, 6, 0], sizes = [2, 1, 64], strides = [1, 1, 1]} : vector<2x64x64xf32> to vector<2x1x64xf32>
    %66 = vector.shape_cast %65 : vector<2x1x64xf32> to vector<2x64xf32>
    %c0_46 = arith.constant 0 : index
    %c384 = arith.constant 384 : index
    %67 = vector.load %arg16[%c0_46, %c384] : memref<2x4096xf32, #tpu.memory_space<vmem>>, vector<2x64xf32>
    tpu.vector_store %arg16[%c0_46, %c384], %66 {strides = array<i32>} : memref<2x4096xf32, #tpu.memory_space<vmem>>, vector<2x64xf32>,
    %68 = vector.extract_strided_slice %46 {offsets = [0, 7, 0], sizes = [2, 1, 64], strides = [1, 1, 1]} : vector<2x64x64xf32> to vector<2x1x64xf32>
    %69 = vector.shape_cast %68 : vector<2x1x64xf32> to vector<2x64xf32>
    %c0_47 = arith.constant 0 : index
    %c448 = arith.constant 448 : index
    %70 = vector.load %arg16[%c0_47, %c448] : memref<2x4096xf32, #tpu.memory_space<vmem>>, vector<2x64xf32>
    tpu.vector_store %arg16[%c0_47, %c448], %69 {strides = array<i32>} : memref<2x4096xf32, #tpu.memory_space<vmem>>, vector<2x64xf32>,
    %71 = vector.extract_strided_slice %46 {offsets = [0, 8, 0], sizes = [2, 1, 64], strides = [1, 1, 1]} : vector<2x64x64xf32> to vector<2x1x64xf32>
    %72 = vector.shape_cast %71 : vector<2x1x64xf32> to vector<2x64xf32>
    %c0_48 = arith.constant 0 : index
    %c512 = arith.constant 512 : index
    %73 = vector.load %arg16[%c0_48, %c512] : memref<2x4096xf32, #tpu.memory_space<vmem>>, vector<2x64xf32>
    tpu.vector_store %arg16[%c0_48, %c512], %72 {strides = array<i32>} : memref<2x4096xf32, #tpu.memory_space<vmem>>, vector<2x64xf32>,
    %74 = vector.extract_strided_slice %46 {offsets = [0, 9, 0], sizes = [2, 1, 64], strides = [1, 1, 1]} : vector<2x64x64xf32> to vector<2x1x64xf32>
    %75 = vector.shape_cast %74 : vector<2x1x64xf32> to vector<2x64xf32>
    %c0_49 = arith.constant 0 : index
    %c576 = arith.constant 576 : index
    %76 = vector.load %arg16[%c0_49, %c576] : memref<2x4096xf32, #tpu.memory_space<vmem>>, vector<2x64xf32>
    tpu.vector_store %arg16[%c0_49, %c576], %75 {strides = array<i32>} : memref<2x4096xf32, #tpu.memory_space<vmem>>, vector<2x64xf32>,
    %77 = vector.extract_strided_slice %46 {offsets = [0, 10, 0], sizes = [2, 1, 64], strides = [1, 1, 1]} : vector<2x64x64xf32> to vector<2x1x64xf32>
    %78 = vector.shape_cast %77 : vector<2x1x64xf32> to vector<2x64xf32>
    %c0_50 = arith.constant 0 : index
    %c640 = arith.constant 640 : index
    %79 = vector.load %arg16[%c0_50, %c640] : memref<2x4096xf32, #tpu.memory_space<vmem>>, vector<2x64xf32>
    tpu.vector_store %arg16[%c0_50, %c640], %78 {strides = array<i32>} : memref<2x4096xf32, #tpu.memory_space<vmem>>, vector<2x64xf32>,
    %80 = vector.extract_strided_slice %46 {offsets = [0, 11, 0], sizes = [2, 1, 64], strides = [1, 1, 1]} : vector<2x64x64xf32> to vector<2x1x64xf32>
    %81 = vector.shape_cast %80 : vector<2x1x64xf32> to vector<2x64xf32>
    %c0_51 = arith.constant 0 : index
    %c704 = arith.constant 704 : index
    %82 = vector.load %arg16[%c0_51, %c704] : memref<2x4096xf32, #tpu.memory_space<vmem>>, vector<2x64xf32>
    tpu.vector_store %arg16[%c0_51, %c704], %81 {strides = array<i32>} : memref<2x4096xf32, #tpu.memory_space<vmem>>, vector<2x64xf32>,
    %83 = vector.extract_strided_slice %46 {offsets = [0, 12, 0], sizes = [2, 1, 64], strides = [1, 1, 1]} : vector<2x64x64xf32> to vector<2x1x64xf32>
    %84 = vector.shape_cast %83 : vector<2x1x64xf32> to vector<2x64xf32>
    %c0_52 = arith.constant 0 : index
    %c768 = arith.constant 768 : index
    %85 = vector.load %arg16[%c0_52, %c768] : memref<2x4096xf32, #tpu.memory_space<vmem>>, vector<2x64xf32>
    tpu.vector_store %arg16[%c0_52, %c768], %84 {strides = array<i32>} : memref<2x4096xf32, #tpu.memory_space<vmem>>, vector<2x64xf32>,
    %86 = vector.extract_strided_slice %46 {offsets = [0, 13, 0], sizes = [2, 1, 64], strides = [1, 1, 1]} : vector<2x64x64xf32> to vector<2x1x64xf32>
    %87 = vector.shape_cast %86 : vector<2x1x64xf32> to vector<2x64xf32>
    %c0_53 = arith.constant 0 : index
    %c832 = arith.constant 832 : index
    %88 = vector.load %arg16[%c0_53, %c832] : memref<2x4096xf32, #tpu.memory_space<vmem>>, vector<2x64xf32>
    tpu.vector_store %arg16[%c0_53, %c832], %87 {strides = array<i32>} : memref<2x4096xf32, #tpu.memory_space<vmem>>, vector<2x64xf32>,
    %89 = vector.extract_strided_slice %46 {offsets = [0, 14, 0], sizes = [2, 1, 64], strides = [1, 1, 1]} : vector<2x64x64xf32> to vector<2x1x64xf32>
    %90 = vector.shape_cast %89 : vector<2x1x64xf32> to vector<2x64xf32>
    %c0_54 = arith.constant 0 : index
    %c896 = arith.constant 896 : index
    %91 = vector.load %arg16[%c0_54, %c896] : memref<2x4096xf32, #tpu.memory_space<vmem>>, vector<2x64xf32>
    tpu.vector_store %arg16[%c0_54, %c896], %90 {strides = array<i32>} : memref<2x4096xf32, #tpu.memory_space<vmem>>, vector<2x64xf32>,
    %92 = vector.extract_strided_slice %46 {offsets = [0, 15, 0], sizes = [2, 1, 64], strides = [1, 1, 1]} : vector<2x64x64xf32> to vector<2x1x64xf32>
    %93 = vector.shape_cast %92 : vector<2x1x64xf32> to vector<2x64xf32>
    %c0_55 = arith.constant 0 : index
    %c960 = arith.constant 960 : index
    %94 = vector.load %arg16[%c0_55, %c960] : memref<2x4096xf32, #tpu.memory_space<vmem>>, vector<2x64xf32>
    tpu.vector_store %arg16[%c0_55, %c960], %93 {strides = array<i32>} : memref<2x4096xf32, #tpu.memory_space<vmem>>, vector<2x64xf32>,
    %95 = vector.extract_strided_slice %46 {offsets = [0, 16, 0], sizes = [2, 1, 64], strides = [1, 1, 1]} : vector<2x64x64xf32> to vector<2x1x64xf32>
    %96 = vector.shape_cast %95 : vector<2x1x64xf32> to vector<2x64xf32>
    %c0_56 = arith.constant 0 : index
    %c1024 = arith.constant 1024 : index
    %97 = vector.load %arg16[%c0_56, %c1024] : memref<2x4096xf32, #tpu.memory_space<vmem>>, vector<2x64xf32>
    tpu.vector_store %arg16[%c0_56, %c1024], %96 {strides = array<i32>} : memref<2x4096xf32, #tpu.memory_space<vmem>>, vector<2x64xf32>,
    %98 = vector.extract_strided_slice %46 {offsets = [0, 17, 0], sizes = [2, 1, 64], strides = [1, 1, 1]} : vector<2x64x64xf32> to vector<2x1x64xf32>
    %99 = vector.shape_cast %98 : vector<2x1x64xf32> to vector<2x64xf32>
    %c0_57 = arith.constant 0 : index
    %c1088 = arith.constant 1088 : index
    %100 = vector.load %arg16[%c0_57, %c1088] : memref<2x4096xf32, #tpu.memory_space<vmem>>, vector<2x64xf32>
    tpu.vector_store %arg16[%c0_57, %c1088], %99 {strides = array<i32>} : memref<2x4096xf32, #tpu.memory_space<vmem>>, vector<2x64xf32>,
    %101 = vector.extract_strided_slice %46 {offsets = [0, 18, 0], sizes = [2, 1, 64], strides = [1, 1, 1]} : vector<2x64x64xf32> to vector<2x1x64xf32>
    %102 = vector.shape_cast %101 : vector<2x1x64xf32> to vector<2x64xf32>
    %c0_58 = arith.constant 0 : index
    %c1152 = arith.constant 1152 : index
    %103 = vector.load %arg16[%c0_58, %c1152] : memref<2x4096xf32, #tpu.memory_space<vmem>>, vector<2x64xf32>
    tpu.vector_store %arg16[%c0_58, %c1152], %102 {strides = array<i32>} : memref<2x4096xf32, #tpu.memory_space<vmem>>, vector<2x64xf32>,
    %104 = vector.extract_strided_slice %46 {offsets = [0, 19, 0], sizes = [2, 1, 64], strides = [1, 1, 1]} : vector<2x64x64xf32> to vector<2x1x64xf32>
    %105 = vector.shape_cast %104 : vector<2x1x64xf32> to vector<2x64xf32>
    %c0_59 = arith.constant 0 : index
    %c1216 = arith.constant 1216 : index
    %106 = vector.load %arg16[%c0_59, %c1216] : memref<2x4096xf32, #tpu.memory_space<vmem>>, vector<2x64xf32>
    tpu.vector_store %arg16[%c0_59, %c1216], %105 {strides = array<i32>} : memref<2x4096xf32, #tpu.memory_space<vmem>>, vector<2x64xf32>,
    %107 = vector.extract_strided_slice %46 {offsets = [0, 20, 0], sizes = [2, 1, 64], strides = [1, 1, 1]} : vector<2x64x64xf32> to vector<2x1x64xf32>
    %108 = vector.shape_cast %107 : vector<2x1x64xf32> to vector<2x64xf32>
    %c0_60 = arith.constant 0 : index
    %c1280 = arith.constant 1280 : index
    %109 = vector.load %arg16[%c0_60, %c1280] : memref<2x4096xf32, #tpu.memory_space<vmem>>, vector<2x64xf32>
    tpu.vector_store %arg16[%c0_60, %c1280], %108 {strides = array<i32>} : memref<2x4096xf32, #tpu.memory_space<vmem>>, vector<2x64xf32>,
    %110 = vector.extract_strided_slice %46 {offsets = [0, 21, 0], sizes = [2, 1, 64], strides = [1, 1, 1]} : vector<2x64x64xf32> to vector<2x1x64xf32>
    %111 = vector.shape_cast %110 : vector<2x1x64xf32> to vector<2x64xf32>
    %c0_61 = arith.constant 0 : index
    %c1344 = arith.constant 1344 : index
    %112 = vector.load %arg16[%c0_61, %c1344] : memref<2x4096xf32, #tpu.memory_space<vmem>>, vector<2x64xf32>
    tpu.vector_store %arg16[%c0_61, %c1344], %111 {strides = array<i32>} : memref<2x4096xf32, #tpu.memory_space<vmem>>, vector<2x64xf32>,
    %113 = vector.extract_strided_slice %46 {offsets = [0, 22, 0], sizes = [2, 1, 64], strides = [1, 1, 1]} : vector<2x64x64xf32> to vector<2x1x64xf32>
    %114 = vector.shape_cast %113 : vector<2x1x64xf32> to vector<2x64xf32>
    %c0_62 = arith.constant 0 : index
    %c1408 = arith.constant 1408 : index
    %115 = vector.load %arg16[%c0_62, %c1408] : memref<2x4096xf32, #tpu.memory_space<vmem>>, vector<2x64xf32>
    tpu.vector_store %arg16[%c0_62, %c1408], %114 {strides = array<i32>} : memref<2x4096xf32, #tpu.memory_space<vmem>>, vector<2x64xf32>,
    %116 = vector.extract_strided_slice %46 {offsets = [0, 23, 0], sizes = [2, 1, 64], strides = [1, 1, 1]} : vector<2x64x64xf32> to vector<2x1x64xf32>
    %117 = vector.shape_cast %116 : vector<2x1x64xf32> to vector<2x64xf32>
    %c0_63 = arith.constant 0 : index
    %c1472 = arith.constant 1472 : index
    %118 = vector.load %arg16[%c0_63, %c1472] : memref<2x4096xf32, #tpu.memory_space<vmem>>, vector<2x64xf32>
    tpu.vector_store %arg16[%c0_63, %c1472], %117 {strides = array<i32>} : memref<2x4096xf32, #tpu.memory_space<vmem>>, vector<2x64xf32>,
    %119 = vector.extract_strided_slice %46 {offsets = [0, 24, 0], sizes = [2, 1, 64], strides = [1, 1, 1]} : vector<2x64x64xf32> to vector<2x1x64xf32>
    %120 = vector.shape_cast %119 : vector<2x1x64xf32> to vector<2x64xf32>
    %c0_64 = arith.constant 0 : index
    %c1536 = arith.constant 1536 : index
    %121 = vector.load %arg16[%c0_64, %c1536] : memref<2x4096xf32, #tpu.memory_space<vmem>>, vector<2x64xf32>
    tpu.vector_store %arg16[%c0_64, %c1536], %120 {strides = array<i32>} : memref<2x4096xf32, #tpu.memory_space<vmem>>, vector<2x64xf32>,
    %122 = vector.extract_strided_slice %46 {offsets = [0, 25, 0], sizes = [2, 1, 64], strides = [1, 1, 1]} : vector<2x64x64xf32> to vector<2x1x64xf32>
    %123 = vector.shape_cast %122 : vector<2x1x64xf32> to vector<2x64xf32>
    %c0_65 = arith.constant 0 : index
    %c1600 = arith.constant 1600 : index
    %124 = vector.load %arg16[%c0_65, %c1600] : memref<2x4096xf32, #tpu.memory_space<vmem>>, vector<2x64xf32>
    tpu.vector_store %arg16[%c0_65, %c1600], %123 {strides = array<i32>} : memref<2x4096xf32, #tpu.memory_space<vmem>>, vector<2x64xf32>,
    %125 = vector.extract_strided_slice %46 {offsets = [0, 26, 0], sizes = [2, 1, 64], strides = [1, 1, 1]} : vector<2x64x64xf32> to vector<2x1x64xf32>
    %126 = vector.shape_cast %125 : vector<2x1x64xf32> to vector<2x64xf32>
    %c0_66 = arith.constant 0 : index
    %c1664 = arith.constant 1664 : index
    %127 = vector.load %arg16[%c0_66, %c1664] : memref<2x4096xf32, #tpu.memory_space<vmem>>, vector<2x64xf32>
    tpu.vector_store %arg16[%c0_66, %c1664], %126 {strides = array<i32>} : memref<2x4096xf32, #tpu.memory_space<vmem>>, vector<2x64xf32>,
    %128 = vector.extract_strided_slice %46 {offsets = [0, 27, 0], sizes = [2, 1, 64], strides = [1, 1, 1]} : vector<2x64x64xf32> to vector<2x1x64xf32>
    %129 = vector.shape_cast %128 : vector<2x1x64xf32> to vector<2x64xf32>
    %c0_67 = arith.constant 0 : index
    %c1728 = arith.constant 1728 : index
    %130 = vector.load %arg16[%c0_67, %c1728] : memref<2x4096xf32, #tpu.memory_space<vmem>>, vector<2x64xf32>
    tpu.vector_store %arg16[%c0_67, %c1728], %129 {strides = array<i32>} : memref<2x4096xf32, #tpu.memory_space<vmem>>, vector<2x64xf32>,
    %131 = vector.extract_strided_slice %46 {offsets = [0, 28, 0], sizes = [2, 1, 64], strides = [1, 1, 1]} : vector<2x64x64xf32> to vector<2x1x64xf32>
    %132 = vector.shape_cast %131 : vector<2x1x64xf32> to vector<2x64xf32>
    %c0_68 = arith.constant 0 : index
    %c1792 = arith.constant 1792 : index
    %133 = vector.load %arg16[%c0_68, %c1792] : memref<2x4096xf32, #tpu.memory_space<vmem>>, vector<2x64xf32>
    tpu.vector_store %arg16[%c0_68, %c1792], %132 {strides = array<i32>} : memref<2x4096xf32, #tpu.memory_space<vmem>>, vector<2x64xf32>,
    %134 = vector.extract_strided_slice %46 {offsets = [0, 29, 0], sizes = [2, 1, 64], strides = [1, 1, 1]} : vector<2x64x64xf32> to vector<2x1x64xf32>
    %135 = vector.shape_cast %134 : vector<2x1x64xf32> to vector<2x64xf32>
    %c0_69 = arith.constant 0 : index
    %c1856 = arith.constant 1856 : index
    %136 = vector.load %arg16[%c0_69, %c1856] : memref<2x4096xf32, #tpu.memory_space<vmem>>, vector<2x64xf32>
    tpu.vector_store %arg16[%c0_69, %c1856], %135 {strides = array<i32>} : memref<2x4096xf32, #tpu.memory_space<vmem>>, vector<2x64xf32>,
    %137 = vector.extract_strided_slice %46 {offsets = [0, 30, 0], sizes = [2, 1, 64], strides = [1, 1, 1]} : vector<2x64x64xf32> to vector<2x1x64xf32>
    %138 = vector.shape_cast %137 : vector<2x1x64xf32> to vector<2x64xf32>
    %c0_70 = arith.constant 0 : index
    %c1920 = arith.constant 1920 : index
    %139 = vector.load %arg16[%c0_70, %c1920] : memref<2x4096xf32, #tpu.memory_space<vmem>>, vector<2x64xf32>
    tpu.vector_store %arg16[%c0_70, %c1920], %138 {strides = array<i32>} : memref<2x4096xf32, #tpu.memory_space<vmem>>, vector<2x64xf32>,
    %140 = vector.extract_strided_slice %46 {offsets = [0, 31, 0], sizes = [2, 1, 64], strides = [1, 1, 1]} : vector<2x64x64xf32> to vector<2x1x64xf32>
    %141 = vector.shape_cast %140 : vector<2x1x64xf32> to vector<2x64xf32>
    %c0_71 = arith.constant 0 : index
    %c1984 = arith.constant 1984 : index
    %142 = vector.load %arg16[%c0_71, %c1984] : memref<2x4096xf32, #tpu.memory_space<vmem>>, vector<2x64xf32>
    tpu.vector_store %arg16[%c0_71, %c1984], %141 {strides = array<i32>} : memref<2x4096xf32, #tpu.memory_space<vmem>>, vector<2x64xf32>,
    %143 = vector.extract_strided_slice %46 {offsets = [0, 32, 0], sizes = [2, 1, 64], strides = [1, 1, 1]} : vector<2x64x64xf32> to vector<2x1x64xf32>
    %144 = vector.shape_cast %143 : vector<2x1x64xf32> to vector<2x64xf32>
    %c0_72 = arith.constant 0 : index
    %c2048 = arith.constant 2048 : index
    %145 = vector.load %arg16[%c0_72, %c2048] : memref<2x4096xf32, #tpu.memory_space<vmem>>, vector<2x64xf32>
    tpu.vector_store %arg16[%c0_72, %c2048], %144 {strides = array<i32>} : memref<2x4096xf32, #tpu.memory_space<vmem>>, vector<2x64xf32>,
    %146 = vector.extract_strided_slice %46 {offsets = [0, 33, 0], sizes = [2, 1, 64], strides = [1, 1, 1]} : vector<2x64x64xf32> to vector<2x1x64xf32>
    %147 = vector.shape_cast %146 : vector<2x1x64xf32> to vector<2x64xf32>
    %c0_73 = arith.constant 0 : index
    %c2112 = arith.constant 2112 : index
    %148 = vector.load %arg16[%c0_73, %c2112] : memref<2x4096xf32, #tpu.memory_space<vmem>>, vector<2x64xf32>
    tpu.vector_store %arg16[%c0_73, %c2112], %147 {strides = array<i32>} : memref<2x4096xf32, #tpu.memory_space<vmem>>, vector<2x64xf32>,
    %149 = vector.extract_strided_slice %46 {offsets = [0, 34, 0], sizes = [2, 1, 64], strides = [1, 1, 1]} : vector<2x64x64xf32> to vector<2x1x64xf32>
    %150 = vector.shape_cast %149 : vector<2x1x64xf32> to vector<2x64xf32>
    %c0_74 = arith.constant 0 : index
    %c2176 = arith.constant 2176 : index
    %151 = vector.load %arg16[%c0_74, %c2176] : memref<2x4096xf32, #tpu.memory_space<vmem>>, vector<2x64xf32>
    tpu.vector_store %arg16[%c0_74, %c2176], %150 {strides = array<i32>} : memref<2x4096xf32, #tpu.memory_space<vmem>>, vector<2x64xf32>,
    %152 = vector.extract_strided_slice %46 {offsets = [0, 35, 0], sizes = [2, 1, 64], strides = [1, 1, 1]} : vector<2x64x64xf32> to vector<2x1x64xf32>
    %153 = vector.shape_cast %152 : vector<2x1x64xf32> to vector<2x64xf32>
    %c0_75 = arith.constant 0 : index
    %c2240 = arith.constant 2240 : index
    %154 = vector.load %arg16[%c0_75, %c2240] : memref<2x4096xf32, #tpu.memory_space<vmem>>, vector<2x64xf32>
    tpu.vector_store %arg16[%c0_75, %c2240], %153 {strides = array<i32>} : memref<2x4096xf32, #tpu.memory_space<vmem>>, vector<2x64xf32>,
    %155 = vector.extract_strided_slice %46 {offsets = [0, 36, 0], sizes = [2, 1, 64], strides = [1, 1, 1]} : vector<2x64x64xf32> to vector<2x1x64xf32>
    %156 = vector.shape_cast %155 : vector<2x1x64xf32> to vector<2x64xf32>
    %c0_76 = arith.constant 0 : index
    %c2304 = arith.constant 2304 : index
    %157 = vector.load %arg16[%c0_76, %c2304] : memref<2x4096xf32, #tpu.memory_space<vmem>>, vector<2x64xf32>
    tpu.vector_store %arg16[%c0_76, %c2304], %156 {strides = array<i32>} : memref<2x4096xf32, #tpu.memory_space<vmem>>, vector<2x64xf32>,
    %158 = vector.extract_strided_slice %46 {offsets = [0, 37, 0], sizes = [2, 1, 64], strides = [1, 1, 1]} : vector<2x64x64xf32> to vector<2x1x64xf32>
    %159 = vector.shape_cast %158 : vector<2x1x64xf32> to vector<2x64xf32>
    %c0_77 = arith.constant 0 : index
    %c2368 = arith.constant 2368 : index
    %160 = vector.load %arg16[%c0_77, %c2368] : memref<2x4096xf32, #tpu.memory_space<vmem>>, vector<2x64xf32>
    tpu.vector_store %arg16[%c0_77, %c2368], %159 {strides = array<i32>} : memref<2x4096xf32, #tpu.memory_space<vmem>>, vector<2x64xf32>,
    %161 = vector.extract_strided_slice %46 {offsets = [0, 38, 0], sizes = [2, 1, 64], strides = [1, 1, 1]} : vector<2x64x64xf32> to vector<2x1x64xf32>
    %162 = vector.shape_cast %161 : vector<2x1x64xf32> to vector<2x64xf32>
    %c0_78 = arith.constant 0 : index
    %c2432 = arith.constant 2432 : index
    %163 = vector.load %arg16[%c0_78, %c2432] : memref<2x4096xf32, #tpu.memory_space<vmem>>, vector<2x64xf32>
    tpu.vector_store %arg16[%c0_78, %c2432], %162 {strides = array<i32>} : memref<2x4096xf32, #tpu.memory_space<vmem>>, vector<2x64xf32>,
    %164 = vector.extract_strided_slice %46 {offsets = [0, 39, 0], sizes = [2, 1, 64], strides = [1, 1, 1]} : vector<2x64x64xf32> to vector<2x1x64xf32>
    %165 = vector.shape_cast %164 : vector<2x1x64xf32> to vector<2x64xf32>
    %c0_79 = arith.constant 0 : index
    %c2496 = arith.constant 2496 : index
    %166 = vector.load %arg16[%c0_79, %c2496] : memref<2x4096xf32, #tpu.memory_space<vmem>>, vector<2x64xf32>
    tpu.vector_store %arg16[%c0_79, %c2496], %165 {strides = array<i32>} : memref<2x4096xf32, #tpu.memory_space<vmem>>, vector<2x64xf32>,
    %167 = vector.extract_strided_slice %46 {offsets = [0, 40, 0], sizes = [2, 1, 64], strides = [1, 1, 1]} : vector<2x64x64xf32> to vector<2x1x64xf32>
    %168 = vector.shape_cast %167 : vector<2x1x64xf32> to vector<2x64xf32>
    %c0_80 = arith.constant 0 : index
    %c2560 = arith.constant 2560 : index
    %169 = vector.load %arg16[%c0_80, %c2560] : memref<2x4096xf32, #tpu.memory_space<vmem>>, vector<2x64xf32>
    tpu.vector_store %arg16[%c0_80, %c2560], %168 {strides = array<i32>} : memref<2x4096xf32, #tpu.memory_space<vmem>>, vector<2x64xf32>,
    %170 = vector.extract_strided_slice %46 {offsets = [0, 41, 0], sizes = [2, 1, 64], strides = [1, 1, 1]} : vector<2x64x64xf32> to vector<2x1x64xf32>
    %171 = vector.shape_cast %170 : vector<2x1x64xf32> to vector<2x64xf32>
    %c0_81 = arith.constant 0 : index
    %c2624 = arith.constant 2624 : index
    %172 = vector.load %arg16[%c0_81, %c2624] : memref<2x4096xf32, #tpu.memory_space<vmem>>, vector<2x64xf32>
    tpu.vector_store %arg16[%c0_81, %c2624], %171 {strides = array<i32>} : memref<2x4096xf32, #tpu.memory_space<vmem>>, vector<2x64xf32>,
    %173 = vector.extract_strided_slice %46 {offsets = [0, 42, 0], sizes = [2, 1, 64], strides = [1, 1, 1]} : vector<2x64x64xf32> to vector<2x1x64xf32>
    %174 = vector.shape_cast %173 : vector<2x1x64xf32> to vector<2x64xf32>
    %c0_82 = arith.constant 0 : index
    %c2688 = arith.constant 2688 : index
    %175 = vector.load %arg16[%c0_82, %c2688] : memref<2x4096xf32, #tpu.memory_space<vmem>>, vector<2x64xf32>
    tpu.vector_store %arg16[%c0_82, %c2688], %174 {strides = array<i32>} : memref<2x4096xf32, #tpu.memory_space<vmem>>, vector<2x64xf32>,
    %176 = vector.extract_strided_slice %46 {offsets = [0, 43, 0], sizes = [2, 1, 64], strides = [1, 1, 1]} : vector<2x64x64xf32> to vector<2x1x64xf32>
    %177 = vector.shape_cast %176 : vector<2x1x64xf32> to vector<2x64xf32>
    %c0_83 = arith.constant 0 : index
    %c2752 = arith.constant 2752 : index
    %178 = vector.load %arg16[%c0_83, %c2752] : memref<2x4096xf32, #tpu.memory_space<vmem>>, vector<2x64xf32>
    tpu.vector_store %arg16[%c0_83, %c2752], %177 {strides = array<i32>} : memref<2x4096xf32, #tpu.memory_space<vmem>>, vector<2x64xf32>,
    %179 = vector.extract_strided_slice %46 {offsets = [0, 44, 0], sizes = [2, 1, 64], strides = [1, 1, 1]} : vector<2x64x64xf32> to vector<2x1x64xf32>
    %180 = vector.shape_cast %179 : vector<2x1x64xf32> to vector<2x64xf32>
    %c0_84 = arith.constant 0 : index
    %c2816 = arith.constant 2816 : index
    %181 = vector.load %arg16[%c0_84, %c2816] : memref<2x4096xf32, #tpu.memory_space<vmem>>, vector<2x64xf32>
    tpu.vector_store %arg16[%c0_84, %c2816], %180 {strides = array<i32>} : memref<2x4096xf32, #tpu.memory_space<vmem>>, vector<2x64xf32>,
    %182 = vector.extract_strided_slice %46 {offsets = [0, 45, 0], sizes = [2, 1, 64], strides = [1, 1, 1]} : vector<2x64x64xf32> to vector<2x1x64xf32>
    %183 = vector.shape_cast %182 : vector<2x1x64xf32> to vector<2x64xf32>
    %c0_85 = arith.constant 0 : index
    %c2880 = arith.constant 2880 : index
    %184 = vector.load %arg16[%c0_85, %c2880] : memref<2x4096xf32, #tpu.memory_space<vmem>>, vector<2x64xf32>
    tpu.vector_store %arg16[%c0_85, %c2880], %183 {strides = array<i32>} : memref<2x4096xf32, #tpu.memory_space<vmem>>, vector<2x64xf32>,
    %185 = vector.extract_strided_slice %46 {offsets = [0, 46, 0], sizes = [2, 1, 64], strides = [1, 1, 1]} : vector<2x64x64xf32> to vector<2x1x64xf32>
    %186 = vector.shape_cast %185 : vector<2x1x64xf32> to vector<2x64xf32>
    %c0_86 = arith.constant 0 : index
    %c2944 = arith.constant 2944 : index
    %187 = vector.load %arg16[%c0_86, %c2944] : memref<2x4096xf32, #tpu.memory_space<vmem>>, vector<2x64xf32>
    tpu.vector_store %arg16[%c0_86, %c2944], %186 {strides = array<i32>} : memref<2x4096xf32, #tpu.memory_space<vmem>>, vector<2x64xf32>,
    %188 = vector.extract_strided_slice %46 {offsets = [0, 47, 0], sizes = [2, 1, 64], strides = [1, 1, 1]} : vector<2x64x64xf32> to vector<2x1x64xf32>
    %189 = vector.shape_cast %188 : vector<2x1x64xf32> to vector<2x64xf32>
    %c0_87 = arith.constant 0 : index
    %c3008 = arith.constant 3008 : index
    %190 = vector.load %arg16[%c0_87, %c3008] : memref<2x4096xf32, #tpu.memory_space<vmem>>, vector<2x64xf32>
    tpu.vector_store %arg16[%c0_87, %c3008], %189 {strides = array<i32>} : memref<2x4096xf32, #tpu.memory_space<vmem>>, vector<2x64xf32>,
    %191 = vector.extract_strided_slice %46 {offsets = [0, 48, 0], sizes = [2, 1, 64], strides = [1, 1, 1]} : vector<2x64x64xf32> to vector<2x1x64xf32>
    %192 = vector.shape_cast %191 : vector<2x1x64xf32> to vector<2x64xf32>
    %c0_88 = arith.constant 0 : index
    %c3072 = arith.constant 3072 : index
    %193 = vector.load %arg16[%c0_88, %c3072] : memref<2x4096xf32, #tpu.memory_space<vmem>>, vector<2x64xf32>
    tpu.vector_store %arg16[%c0_88, %c3072], %192 {strides = array<i32>} : memref<2x4096xf32, #tpu.memory_space<vmem>>, vector<2x64xf32>,
    %194 = vector.extract_strided_slice %46 {offsets = [0, 49, 0], sizes = [2, 1, 64], strides = [1, 1, 1]} : vector<2x64x64xf32> to vector<2x1x64xf32>
    %195 = vector.shape_cast %194 : vector<2x1x64xf32> to vector<2x64xf32>
    %c0_89 = arith.constant 0 : index
    %c3136 = arith.constant 3136 : index
    %196 = vector.load %arg16[%c0_89, %c3136] : memref<2x4096xf32, #tpu.memory_space<vmem>>, vector<2x64xf32>
    tpu.vector_store %arg16[%c0_89, %c3136], %195 {strides = array<i32>} : memref<2x4096xf32, #tpu.memory_space<vmem>>, vector<2x64xf32>,
    %197 = vector.extract_strided_slice %46 {offsets = [0, 50, 0], sizes = [2, 1, 64], strides = [1, 1, 1]} : vector<2x64x64xf32> to vector<2x1x64xf32>
    %198 = vector.shape_cast %197 : vector<2x1x64xf32> to vector<2x64xf32>
    %c0_90 = arith.constant 0 : index
    %c3200 = arith.constant 3200 : index
    %199 = vector.load %arg16[%c0_90, %c3200] : memref<2x4096xf32, #tpu.memory_space<vmem>>, vector<2x64xf32>
    tpu.vector_store %arg16[%c0_90, %c3200], %198 {strides = array<i32>} : memref<2x4096xf32, #tpu.memory_space<vmem>>, vector<2x64xf32>,
    %200 = vector.extract_strided_slice %46 {offsets = [0, 51, 0], sizes = [2, 1, 64], strides = [1, 1, 1]} : vector<2x64x64xf32> to vector<2x1x64xf32>
    %201 = vector.shape_cast %200 : vector<2x1x64xf32> to vector<2x64xf32>
    %c0_91 = arith.constant 0 : index
    %c3264 = arith.constant 3264 : index
    %202 = vector.load %arg16[%c0_91, %c3264] : memref<2x4096xf32, #tpu.memory_space<vmem>>, vector<2x64xf32>
    tpu.vector_store %arg16[%c0_91, %c3264], %201 {strides = array<i32>} : memref<2x4096xf32, #tpu.memory_space<vmem>>, vector<2x64xf32>,
    %203 = vector.extract_strided_slice %46 {offsets = [0, 52, 0], sizes = [2, 1, 64], strides = [1, 1, 1]} : vector<2x64x64xf32> to vector<2x1x64xf32>
    %204 = vector.shape_cast %203 : vector<2x1x64xf32> to vector<2x64xf32>
    %c0_92 = arith.constant 0 : index
    %c3328 = arith.constant 3328 : index
    %205 = vector.load %arg16[%c0_92, %c3328] : memref<2x4096xf32, #tpu.memory_space<vmem>>, vector<2x64xf32>
    tpu.vector_store %arg16[%c0_92, %c3328], %204 {strides = array<i32>} : memref<2x4096xf32, #tpu.memory_space<vmem>>, vector<2x64xf32>,
    %206 = vector.extract_strided_slice %46 {offsets = [0, 53, 0], sizes = [2, 1, 64], strides = [1, 1, 1]} : vector<2x64x64xf32> to vector<2x1x64xf32>
    %207 = vector.shape_cast %206 : vector<2x1x64xf32> to vector<2x64xf32>
    %c0_93 = arith.constant 0 : index
    %c3392 = arith.constant 3392 : index
    %208 = vector.load %arg16[%c0_93, %c3392] : memref<2x4096xf32, #tpu.memory_space<vmem>>, vector<2x64xf32>
    tpu.vector_store %arg16[%c0_93, %c3392], %207 {strides = array<i32>} : memref<2x4096xf32, #tpu.memory_space<vmem>>, vector<2x64xf32>,
    %209 = vector.extract_strided_slice %46 {offsets = [0, 54, 0], sizes = [2, 1, 64], strides = [1, 1, 1]} : vector<2x64x64xf32> to vector<2x1x64xf32>
    %210 = vector.shape_cast %209 : vector<2x1x64xf32> to vector<2x64xf32>
    %c0_94 = arith.constant 0 : index
    %c3456 = arith.constant 3456 : index
    %211 = vector.load %arg16[%c0_94, %c3456] : memref<2x4096xf32, #tpu.memory_space<vmem>>, vector<2x64xf32>
    tpu.vector_store %arg16[%c0_94, %c3456], %210 {strides = array<i32>} : memref<2x4096xf32, #tpu.memory_space<vmem>>, vector<2x64xf32>,
    %212 = vector.extract_strided_slice %46 {offsets = [0, 55, 0], sizes = [2, 1, 64], strides = [1, 1, 1]} : vector<2x64x64xf32> to vector<2x1x64xf32>
    %213 = vector.shape_cast %212 : vector<2x1x64xf32> to vector<2x64xf32>
    %c0_95 = arith.constant 0 : index
    %c3520 = arith.constant 3520 : index
    %214 = vector.load %arg16[%c0_95, %c3520] : memref<2x4096xf32, #tpu.memory_space<vmem>>, vector<2x64xf32>
    tpu.vector_store %arg16[%c0_95, %c3520], %213 {strides = array<i32>} : memref<2x4096xf32, #tpu.memory_space<vmem>>, vector<2x64xf32>,
    %215 = vector.extract_strided_slice %46 {offsets = [0, 56, 0], sizes = [2, 1, 64], strides = [1, 1, 1]} : vector<2x64x64xf32> to vector<2x1x64xf32>
    %216 = vector.shape_cast %215 : vector<2x1x64xf32> to vector<2x64xf32>
    %c0_96 = arith.constant 0 : index
    %c3584 = arith.constant 3584 : index
    %217 = vector.load %arg16[%c0_96, %c3584] : memref<2x4096xf32, #tpu.memory_space<vmem>>, vector<2x64xf32>
    tpu.vector_store %arg16[%c0_96, %c3584], %216 {strides = array<i32>} : memref<2x4096xf32, #tpu.memory_space<vmem>>, vector<2x64xf32>,
    %218 = vector.extract_strided_slice %46 {offsets = [0, 57, 0], sizes = [2, 1, 64], strides = [1, 1, 1]} : vector<2x64x64xf32> to vector<2x1x64xf32>
    %219 = vector.shape_cast %218 : vector<2x1x64xf32> to vector<2x64xf32>
    %c0_97 = arith.constant 0 : index
    %c3648 = arith.constant 3648 : index
    %220 = vector.load %arg16[%c0_97, %c3648] : memref<2x4096xf32, #tpu.memory_space<vmem>>, vector<2x64xf32>
    tpu.vector_store %arg16[%c0_97, %c3648], %219 {strides = array<i32>} : memref<2x4096xf32, #tpu.memory_space<vmem>>, vector<2x64xf32>,
    %221 = vector.extract_strided_slice %46 {offsets = [0, 58, 0], sizes = [2, 1, 64], strides = [1, 1, 1]} : vector<2x64x64xf32> to vector<2x1x64xf32>
    %222 = vector.shape_cast %221 : vector<2x1x64xf32> to vector<2x64xf32>
    %c0_98 = arith.constant 0 : index
    %c3712 = arith.constant 3712 : index
    %223 = vector.load %arg16[%c0_98, %c3712] : memref<2x4096xf32, #tpu.memory_space<vmem>>, vector<2x64xf32>
    tpu.vector_store %arg16[%c0_98, %c3712], %222 {strides = array<i32>} : memref<2x4096xf32, #tpu.memory_space<vmem>>, vector<2x64xf32>,
    %224 = vector.extract_strided_slice %46 {offsets = [0, 59, 0], sizes = [2, 1, 64], strides = [1, 1, 1]} : vector<2x64x64xf32> to vector<2x1x64xf32>
    %225 = vector.shape_cast %224 : vector<2x1x64xf32> to vector<2x64xf32>
    %c0_99 = arith.constant 0 : index
    %c3776 = arith.constant 3776 : index
    %226 = vector.load %arg16[%c0_99, %c3776] : memref<2x4096xf32, #tpu.memory_space<vmem>>, vector<2x64xf32>
    tpu.vector_store %arg16[%c0_99, %c3776], %225 {strides = array<i32>} : memref<2x4096xf32, #tpu.memory_space<vmem>>, vector<2x64xf32>,
    %227 = vector.extract_strided_slice %46 {offsets = [0, 60, 0], sizes = [2, 1, 64], strides = [1, 1, 1]} : vector<2x64x64xf32> to vector<2x1x64xf32>
    %228 = vector.shape_cast %227 : vector<2x1x64xf32> to vector<2x64xf32>
    %c0_100 = arith.constant 0 : index
    %c3840 = arith.constant 3840 : index
    %229 = vector.load %arg16[%c0_100, %c3840] : memref<2x4096xf32, #tpu.memory_space<vmem>>, vector<2x64xf32>
    tpu.vector_store %arg16[%c0_100, %c3840], %228 {strides = array<i32>} : memref<2x4096xf32, #tpu.memory_space<vmem>>, vector<2x64xf32>,
    %230 = vector.extract_strided_slice %46 {offsets = [0, 61, 0], sizes = [2, 1, 64], strides = [1, 1, 1]} : vector<2x64x64xf32> to vector<2x1x64xf32>
    %231 = vector.shape_cast %230 : vector<2x1x64xf32> to vector<2x64xf32>
    %c0_101 = arith.constant 0 : index
    %c3904 = arith.constant 3904 : index
    %232 = vector.load %arg16[%c0_101, %c3904] : memref<2x4096xf32, #tpu.memory_space<vmem>>, vector<2x64xf32>
    tpu.vector_store %arg16[%c0_101, %c3904], %231 {strides = array<i32>} : memref<2x4096xf32, #tpu.memory_space<vmem>>, vector<2x64xf32>,
    %233 = vector.extract_strided_slice %46 {offsets = [0, 62, 0], sizes = [2, 1, 64], strides = [1, 1, 1]} : vector<2x64x64xf32> to vector<2x1x64xf32>
    %234 = vector.shape_cast %233 : vector<2x1x64xf32> to vector<2x64xf32>
    %c0_102 = arith.constant 0 : index
    %c3968 = arith.constant 3968 : index
    %235 = vector.load %arg16[%c0_102, %c3968] : memref<2x4096xf32, #tpu.memory_space<vmem>>, vector<2x64xf32>
    tpu.vector_store %arg16[%c0_102, %c3968], %234 {strides = array<i32>} : memref<2x4096xf32, #tpu.memory_space<vmem>>, vector<2x64xf32>,
    %236 = vector.extract_strided_slice %46 {offsets = [0, 63, 0], sizes = [2, 1, 64], strides = [1, 1, 1]} : vector<2x64x64xf32> to vector<2x1x64xf32>
    %237 = vector.shape_cast %236 : vector<2x1x64xf32> to vector<2x64xf32>
    %c0_103 = arith.constant 0 : index
    %c4032 = arith.constant 4032 : index
    %238 = vector.load %arg16[%c0_103, %c4032] : memref<2x4096xf32, #tpu.memory_space<vmem>>, vector<2x64xf32>
    tpu.vector_store %arg16[%c0_103, %c4032], %237 {strides = array<i32>} : memref<2x4096xf32, #tpu.memory_space<vmem>>, vector<2x64xf32>,
    %c0_104 = arith.constant 0 : index
    %c0_105 = arith.constant 0 : index
    %239 = vector.load %arg16[%c0_104, %c0_105] : memref<2x4096xf32, #tpu.memory_space<vmem>>, vector<2x4096xf32>
    %240 = arith.truncf %239 : vector<2x4096xf32> to vector<2x4096xbf16>
    %c0_106 = arith.constant 0 : index
    %c0_107 = arith.constant 0 : index
    %241 = vector.load %arg5[%c0_106, %c0_107] : memref<4096x256xbf16, #tpu.memory_space<vmem>>, vector<4096x256xbf16>
    %cst_108 = arith.constant dense<0.000000e+00> : vector<2x256xf32>
    %242 = tpu.matmul %240, %241, %cst_108 {dimension_numbers = #tpu.dot_dimension_numbers<[1], [0], [0], [1], [0, 0, 1, 1], [], []>} : vector<2x4096xbf16>, vector<4096x256xbf16>, vector<2x256xf32> -> vector<2x256xf32>
    %c0_109 = arith.constant 0 : index
    %c0_110 = arith.constant 0 : index
    %243 = vector.load %arg6[%c0_109, %c0_110] : memref<1x256xf32, #tpu.memory_space<vmem>>, vector<1x256xf32>
    %244 = vector.broadcast %243 : vector<1x256xf32> to vector<2x256xf32>
    %245 = arith.addf %242, %244 : vector<2x256xf32>
    %cst_111 = arith.constant 0.000000e+00 : f32
    %246 = vector.broadcast %cst_111 : f32 to vector<2x256xf32>
    %247 = arith.maximumf %245, %246 : vector<2x256xf32>
    %c0_112 = arith.constant 0 : index
    %c0_113 = arith.constant 0 : index
    %248 = vector.load %arg7[%c0_112, %c0_113] : memref<256x128xf32, #tpu.memory_space<vmem>>, vector<256x128xf32>
    %cst_114 = arith.constant dense<0.000000e+00> : vector<2x128xf32>
    %249 = tpu.matmul %247, %248, %cst_114 {dimension_numbers = #tpu.dot_dimension_numbers<[1], [0], [0], [1], [0, 0, 1, 1], [], []>} : vector<2x256xf32>, vector<256x128xf32>, vector<2x128xf32> -> vector<2x128xf32>
    %c0_115 = arith.constant 0 : index
    %c0_116 = arith.constant 0 : index
    %250 = vector.load %arg8[%c0_115, %c0_116] : memref<1x128xf32, #tpu.memory_space<vmem>>, vector<1x128xf32>
    %251 = vector.broadcast %250 : vector<1x128xf32> to vector<2x128xf32>
    %252 = arith.addf %249, %251 : vector<2x128xf32>
    %cst_117 = arith.constant 0.000000e+00 : f32
    %253 = vector.broadcast %cst_117 : f32 to vector<2x128xf32>
    %254 = arith.maximumf %252, %253 : vector<2x128xf32>
    %c0_118 = arith.constant 0 : index
    %c0_119 = arith.constant 0 : index
    %255 = vector.load %arg9[%c0_118, %c0_119] : memref<128x64xf32, #tpu.memory_space<vmem>>, vector<128x64xf32>
    %cst_120 = arith.constant dense<0.000000e+00> : vector<2x64xf32>
    %256 = tpu.matmul %254, %255, %cst_120 {dimension_numbers = #tpu.dot_dimension_numbers<[1], [0], [0], [1], [0, 0, 1, 1], [], []>} : vector<2x128xf32>, vector<128x64xf32>, vector<2x64xf32> -> vector<2x64xf32>
    %c0_121 = arith.constant 0 : index
    %c0_122 = arith.constant 0 : index
    %257 = vector.load %arg10[%c0_121, %c0_122] : memref<1x64xf32, #tpu.memory_space<vmem>>, vector<1x64xf32>
    %258 = vector.broadcast %257 : vector<1x64xf32> to vector<2x64xf32>
    %259 = arith.addf %256, %258 : vector<2x64xf32>
    %cst_123 = arith.constant 0.000000e+00 : f32
    %260 = vector.broadcast %cst_123 : f32 to vector<2x64xf32>
    %261 = arith.maximumf %259, %260 : vector<2x64xf32>
    %c0_124 = arith.constant 0 : index
    %c0_125 = arith.constant 0 : index
    %262 = vector.load %arg11[%c0_124, %c0_125] : memref<64x1xf32, #tpu.memory_space<vmem>>, vector<64x1xf32>
    %cst_126 = arith.constant dense<0.000000e+00> : vector<2x1xf32>
    %263 = tpu.matmul %261, %262, %cst_126 {dimension_numbers = #tpu.dot_dimension_numbers<[1], [0], [0], [1], [0, 0, 1, 1], [], []>} : vector<2x64xf32>, vector<64x1xf32>, vector<2x1xf32> -> vector<2x1xf32>
    %c0_127 = arith.constant 0 : index
    %c0_128 = arith.constant 0 : index
    %264 = vector.load %arg12[%c0_127, %c0_128] : memref<1x1xf32, #tpu.memory_space<vmem>>, vector<1x1xf32>
    %265 = vector.broadcast %264 : vector<1x1xf32> to vector<2x1xf32>
    %266 = arith.addf %263, %265 : vector<2x1xf32>
    %c0_129 = arith.constant 0 : index
    %c0_130 = arith.constant 0 : index
    %267 = vector.load %arg13[%c0_129, %c0_130] : memref<2x1xf32, #tpu.memory_space<vmem>>, vector<2x1xf32>
    tpu.vector_store %arg13[%c0_129, %c0_130], %266 {strides = array<i32>} : memref<2x1xf32, #tpu.memory_space<vmem>>, vector<2x1xf32>,
    return
  }
}

</mosaic_0001>

<bundles_post_ra>
// kernel: value_net_forward.1
= control target key start
LH: loop header
LB: loop body
LE: loop exit
PB: predicated region body
PF: predicated region fallthrough
CT: control target
= control target key end

     0   :  { %s11564_s0 = inlined_call_operand.vmem [shape: f32[2,8,8,2], index: 0, kind: input, shape index: {}]   ;;  %s11565_s1 = inlined_call_operand.vmem [shape: f32[18,16], index: 1, kind: input, shape index: {}]   ;;  %s11566_s2 = inlined_call_operand.hbm [shape: f32[1,16], index: 2, kind: input, shape index: {}]   ;;  %s11567_s3 = inlined_call_operand.vmem [shape: f32[144,64], index: 3, kind: input, shape index: {}]   ;;  %s11568_s4 = inlined_call_operand.hbm [shape: f32[1,64], index: 4, kind: input, shape index: {}]   ;;  %s11569_s5 = inlined_call_operand.hbm [shape: bf16[4096,256], index: 5, kind: input, shape index: {}]   ;;  %s11570_s6 = inlined_call_operand.hbm [shape: f32[1,256], index: 6, kind: input, shape index: {}]   ;;  %s11571_s7 = inlined_call_operand.hbm [shape: f32[256,128], index: 7, kind: input, shape index: {}]   ;;  %s11572_s8 = inlined_call_operand.hbm [shape: f32[1,128], index: 8, kind: input, shape index: {}]   ;;  %s11573_s9 = inlined_call_operand.vmem [shape: f32[128,64], index: 9, kind: input, shape index: {}]   ;;  %s11574_s10 = inlined_call_operand.hbm [shape: f32[1,64], index: 10, kind: input, shape index: {}]   ;;  %s11575_s11 = inlined_call_operand.vmem [shape: f32[64,1], index: 11, kind: input, shape index: {}]   ;;  %s11576_s12 = inlined_call_operand.<no memory space> [shape: f32[1,1], index: 12, kind: input, shape index: {}]   ;;  %s11577_s13 = inlined_call_operand.vmem [shape: f32[2,1], index: 13, kind: output, shape index: {}]  }
   0x1   :  { %v18_v0 = vstv %s11576_s12 }
   0x2   :  { %19 = vst [vmem:[#allocation5] sm:$0x1] %v18_v0 }
   0x3   :  { %20 = vsyncpa [#allocation7], 0 }
   0x4   :  { %21 = vsyncpa [#allocation9], 0 }
   0x5   :  { %22 = vsyncpa [#allocation12], 0 }
   0x6   :  { %23 = vsyncpa [#allocation15], 0  ;;  %s9324_s27 = smov [#allocation8]   ;;  %s9325_s29 = smov [#allocation11]  }
   0x7   :  { %s46_s28 = sshll.u32 %s9324_s27, 4  ;;  %s68_s30 = sshll.u32 %s9325_s29, 4  ;;  %s47_s28 = int_to_ptr.vmem [resolvable:$true] %s46_s28  ;;  %s69_s30 = int_to_ptr.vmem [resolvable:$true] %s68_s30 }
   0x8   :  { %s9162_s16 = scalar_lea.hbm %s11568_s4, 16 }
   0x9   :  { %p9163_p0 = scmp.ne.s32.totalorder %s11568_s4, %s9162_s16  ;;  %p9166_p1 = scmp.lt.u32.totalorder %s9162_s16, %s11568_s4 }
   0xb   :  { %p9168_p2 = pnand %p9166_p1, %p9163_p0 }
   0xd   :  { %9171 = shalt.err (!%p9168_p2)
}
   0xe   :  { %s9172_s20 = scalar_lea.vmem %s47_s28, 16  ;;  %s9176_s21 = scalar_lea.vmem %s47_s28, 32 }
   0xf   :  { %p9173_p3 = scmp.ne.s32.totalorder %s47_s28, %s9172_s20  ;;  %p9177_p4 = scmp.lt.s32.totalorder %s47_s28, %s47_s28 }
  0x10   :  { %p9178_p5 = scmp.lt.s32.totalorder %s9176_s21, %s9172_s20 }
  0x12   :  { %p9179_p6 = por %p9178_p5, %p9177_p4 }
  0x14   :  { %p9180_p7 = pnand %p9179_p6, %p9173_p3 }
  0x16   :  { %9183 = shalt.err (!%p9180_p7)
}
  0x17   :  { %49 = dma.hbm_to_vmem [thread:$0]  %s11568_s4, 16, %s47_s28, [#allocation9]  }
  0x18   :  { %s9184_s26 = scalar_lea.hbm %s11570_s6, 32 }
  0x19   :  { %p9185_p8 = scmp.ne.s32.totalorder %s11570_s6, %s9184_s26  ;;  %p9188_p9 = scmp.lt.u32.totalorder %s9184_s26, %s11570_s6 }
  0x1b   :  { %p9190_p10 = pnand %p9188_p9, %p9185_p8 }
  0x1d   :  { %9193 = shalt.err (!%p9190_p10)
}
  0x1e   :  { %s9194_s16 = scalar_lea.vmem %s69_s30, 32  ;;  %p9199_p12 = scmp.lt.s32.totalorder %s69_s30, %s69_s30 }
  0x1f   :  { %p9195_p11 = scmp.ne.s32.totalorder %s69_s30, %s9194_s16  ;;  %p9200_p13 = scmp.lt.s32.totalorder %s9194_s16, %s9194_s16 }
  0x21   :  { %p9201_p0 = por %p9200_p13, %p9199_p12 }
  0x23   :  { %p9202_p1 = pnand %p9201_p0, %p9195_p11 }
  0x25   :  { %9205 = shalt.err (!%p9202_p1)
}
  0x26   :  { %71 = dma.hbm_to_vmem [thread:$0]  %s11570_s6, 32, %s69_s30, [#allocation12]  }
  0x27   :  { %s9326_s17 = smov [#allocation14]   ;;  %s9327_s12 = smov [#allocation6]  }
  0x28   :  { %s90_s18 = sshll.u32 %s9326_s17, 4  ;;  %s34_s19 = sshll.u32 %s9327_s12, 4  ;;  %s91_s18 = int_to_ptr.vmem [resolvable:$true] %s90_s18  ;;  %s35_s19 = int_to_ptr.vmem [resolvable:$true] %s34_s19 }
  0x29   :  { %s9206_s22 = scalar_lea.hbm %s11572_s8, 16 }
  0x2a   :  { %p9207_p2 = scmp.ne.s32.totalorder %s11572_s8, %s9206_s22  ;;  %p9210_p3 = scmp.lt.u32.totalorder %s9206_s22, %s11572_s8 }
  0x2c   :  { %p9212_p4 = pnand %p9210_p3, %p9207_p2 }
  0x2e   :  { %9215 = shalt.err (!%p9212_p4)
}
  0x2f   :  { %s9216_s6 = scalar_lea.vmem %s91_s18, 16  ;;  %s9220_s30 = scalar_lea.vmem %s91_s18, 32 }
  0x30   :  { %p9217_p5 = scmp.ne.s32.totalorder %s91_s18, %s9216_s6  ;;  %p9221_p6 = scmp.lt.s32.totalorder %s91_s18, %s91_s18 }
  0x31   :  { %p9222_p7 = scmp.lt.s32.totalorder %s9220_s30, %s9216_s6 }
  0x33   :  { %p9223_p8 = por %p9222_p7, %p9221_p6 }
  0x35   :  { %p9224_p9 = pnand %p9223_p8, %p9217_p5 }
  0x37   :  { %9227 = shalt.err (!%p9224_p9)
}
  0x38   :  { %93 = dma.hbm_to_vmem [thread:$0]  %s11572_s8, 16, %s91_s18, [#allocation15]  }
  0x39   :  { %s9228_s16 = scalar_lea.hbm %s11566_s2, 16 }
  0x3a   :  { %p9229_p10 = scmp.ne.s32.totalorder %s11566_s2, %s9228_s16  ;;  %p9232_p11 = scmp.lt.u32.totalorder %s9228_s16, %s11566_s2 }
  0x3c   :  { %p9234_p12 = pnand %p9232_p11, %p9229_p10 }
  0x3e   :  { %9237 = shalt.err (!%p9234_p12)
}
  0x3f   :  { %s9238_s20 = scalar_lea.vmem %s35_s19, 16  ;;  %s9242_s21 = scalar_lea.vmem %s35_s19, 32 }
  0x40   :  { %p9239_p13 = scmp.ne.s32.totalorder %s35_s19, %s9238_s20  ;;  %p9243_p0 = scmp.lt.s32.totalorder %s35_s19, %s35_s19 }
  0x41   :  { %p9244_p1 = scmp.lt.s32.totalorder %s9242_s21, %s9238_s20 }
  0x43   :  { %p9245_p2 = por %p9244_p1, %p9243_p0 }
  0x45   :  { %p9246_p3 = pnand %p9245_p2, %p9239_p13 }
  0x47   :  { %9249 = shalt.err (!%p9246_p3)
}
  0x48   :  { %37 = dma.hbm_to_vmem [thread:$0]  %s11566_s2, 16, %s35_s19, [#allocation7]  }
  0x49   :  { %s9328_s22 = smov [#allocation10]   ;;  %s9250_s26 = scalar_lea.hbm %s11569_s5, 65536 }
  0x4a   :  { %s55_s23 = sshll.u32 %s9328_s22, 4  ;;  %p9251_p4 = scmp.ne.s32.totalorder %s11569_s5, %s9250_s26  ;;  %s56_s23 = int_to_ptr.vmem [resolvable:$true] %s55_s23 }
  0x4b   :  { %p9254_p5 = scmp.lt.u32.totalorder %s9250_s26, %s11569_s5 }
  0x4d   :  { %p9256_p6 = pnand %p9254_p5, %p9251_p4 }
  0x4f   :  { %9259 = shalt.err (!%p9256_p6)
}
  0x50   :  { %s9260_s14 = scalar_lea.vmem %s56_s23, 65536  ;;  %p9265_p8 = scmp.lt.s32.totalorder %s56_s23, %s56_s23 }
  0x51   :  { %p9261_p7 = scmp.ne.s32.totalorder %s56_s23, %s9260_s14  ;;  %p9266_p9 = scmp.lt.s32.totalorder %s9260_s14, %s9260_s14 }
  0x53   :  { %p9267_p10 = por %p9266_p9, %p9265_p8 }
  0x55   :  { %p9268_p11 = pnand %p9267_p10, %p9261_p7 }
  0x57   :  { %9271 = shalt.err (!%p9268_p11)
}
  0x58   :  { %s9329_s2 = smov 128   ;;  %s9330_s19 = smov 8  }
  0x59   :  { %61 = dma.hbm_to_vmem [thread:$0]  %s11569_s5, 65536, %s56_s23, [#allocation9], %s9329_s2, %s9329_s2, %s9330_s19  }
  0x5a   :  { %s9331_s4 = smov [#allocation13]   ;;  %s9332_s17 = smov [#allocation16]  }
  0x5b   :  { %s77_s28 = sshll.u32 %s9331_s4, 4  ;;  %s102_s12 = sshll.u32 %s9332_s17, 4  ;;  %s78_s28 = int_to_ptr.vmem [resolvable:$true] %s77_s28  ;;  %s103_s12 = int_to_ptr.vmem [resolvable:$true] %s102_s12 }
  0x5c   :  { %s9272_s8 = scalar_lea.hbm %s11571_s7, 4096 }
  0x5d   :  { %p9273_p12 = scmp.ne.s32.totalorder %s11571_s7, %s9272_s8  ;;  %p9276_p13 = scmp.lt.u32.totalorder %s9272_s8, %s11571_s7 }
  0x5f   :  { %p9278_p0 = pnand %p9276_p13, %p9273_p12 }
  0x61   :  { %9281 = shalt.err (!%p9278_p0)
}
  0x62   :  { %s9282_s5 = scalar_lea.vmem %s78_s28, 4096  ;;  %p9287_p2 = scmp.lt.s32.totalorder %s78_s28, %s78_s28 }
  0x63   :  { %p9283_p1 = scmp.ne.s32.totalorder %s78_s28, %s9282_s5  ;;  %p9288_p3 = scmp.lt.s32.totalorder %s9282_s5, %s9282_s5 }
  0x65   :  { %p9289_p4 = por %p9288_p3, %p9287_p2 }
  0x67   :  { %p9290_p5 = pnand %p9289_p4, %p9283_p1 }
  0x69   :  { %9293 = shalt.err (!%p9290_p5)
}
  0x6a   :  { %83 = dma.hbm_to_vmem [thread:$0]  %s11571_s7, 4096, %s78_s28, [#allocation12], %s9329_s2, %s9329_s2, %s9330_s19  }
  0x6b   :  { %s9294_s27 = scalar_lea.hbm %s11574_s10, 16 }
  0x6c   :  { %p9295_p6 = scmp.ne.s32.totalorder %s11574_s10, %s9294_s27  ;;  %p9298_p7 = scmp.lt.u32.totalorder %s9294_s27, %s11574_s10 }
  0x6e   :  { %p9300_p8 = pnand %p9298_p7, %p9295_p6 }
  0x70   :  { %9303 = shalt.err (!%p9300_p8)
}
  0x71   :  { %s9304_s4 = scalar_lea.vmem %s103_s12, 16  ;;  %s9308_s17 = scalar_lea.vmem %s103_s12, 32 }
  0x72   :  { %p9305_p9 = scmp.ne.s32.totalorder %s103_s12, %s9304_s4  ;;  %p9309_p10 = scmp.lt.s32.totalorder %s103_s12, %s103_s12 }
  0x73   :  { %p9310_p11 = scmp.lt.s32.totalorder %s9308_s17, %s9304_s4 }
  0x75   :  { %p9311_p12 = por %p9310_p11, %p9309_p10 }
  0x77   :  { %p9312_p13 = pnand %p9311_p12, %p9305_p9 }
  0x79   :  { %9315 = shalt.err (!%p9312_p13)
}
  0x7a   :  { %105 = dma.hbm_to_vmem [thread:$0]  %s11574_s10, 16, %s103_s12, [#allocation15]  }
  0x7b   :  { %9316 = dma.done.wait [#allocation7], 16  }
  0x7c   :  { %9317 = vsyncadd [#allocation7], 4294967280 }
  0x7d   :  { %9318 = dma.done.wait [#allocation9], 65552  }
  0x7e   :  { %9319 = vsyncadd [#allocation9], 4294901744 }
  0x7f   :  { %9320 = dma.done.wait [#allocation12], 4128  }
  0x80   :  { %9321 = vsyncadd [#allocation12], 4294963168 }
  0x81   :  { %9322 = dma.done.wait [#allocation15], 32  }
  0x82   :  { %9323 = vsyncadd [#allocation15], 4294967264  ;;  %vm131_vm0 = vcmask 15360   ;;  %vm133_vm1 = vcmask 9216   ;;  %v11578_v1 = vmov 0.0   ;;  %vm375_vm2 = vcmask 1045504  }
  0x83   :  { %132 = vst.msk [vmem:[#allocation2] sm:$0xff] %vm131_vm0, %v11578_v1  ;;  %135 = vst.msk [vmem:[#allocation2 + $0x10] sm:$0xff] %vm131_vm0, %v11578_v1  ;;  %v174_v2 = vld [vmem:[%s11564_s0 + $0x8] sm:$0xff]  ;;  %v173_v3 = vld [vmem:[%s11564_s0] sm:$0xff]  ;;  %vm278_vm3 = vcmask 1046528   ;;  %s9334_s15 = smov 4  }
  0x84   :  { %134 = vst.msk [vmem:[#allocation2 + $0x8] sm:$0x3] %vm133_vm1, %v11578_v1  ;;  %136 = vst.msk [vmem:[#allocation2 + $0x18] sm:$0x3] %vm133_vm1, %v11578_v1  ;;  %v175_v4 = vld [vmem:[%s11564_s0 + $0x10] sm:$0xff]  ;;  %v176_v7 = vld [vmem:[%s11564_s0 + $0x18] sm:$0xff] }
  0x85   :  { %137 = vst.msk [vmem:[#allocation2 + $0x20] sm:$0xff] %vm131_vm0, %v11578_v1  ;;  %139 = vst.msk [vmem:[#allocation2 + $0x30] sm:$0xff] %vm131_vm0, %v11578_v1  ;;  %v177_v12 = vld [vmem:[%s11564_s0 + $0x20] sm:$0xff]  ;;  %v178_v13 = vld [vmem:[%s11564_s0 + $0x28] sm:$0xff]  ;;  %s9335_s16 = smov 2   ;;  %s9336_s7 = smov 6  }
  0x86   :  { %138 = vst.msk [vmem:[#allocation2 + $0x28] sm:$0x3] %vm133_vm1, %v11578_v1  ;;  %140 = vst.msk [vmem:[#allocation2 + $0x38] sm:$0x3] %vm133_vm1, %v11578_v1  ;;  %v179_v14 = vld [vmem:[%s11564_s0 + $0x30] sm:$0xff]  ;;  %v180_v15 = vld [vmem:[%s11564_s0 + $0x38] sm:$0xff] }
  0x87   :  { %141 = vst.msk [vmem:[#allocation2 + $0x40] sm:$0xff] %vm131_vm0, %v11578_v1  ;;  %143 = vst.msk [vmem:[#allocation2 + $0x50] sm:$0xff] %vm131_vm0, %v11578_v1  ;;  %v181_v18 = vld [vmem:[%s11564_s0 + $0x40] sm:$0xff]  ;;  %v182_v19 = vld [vmem:[%s11564_s0 + $0x48] sm:$0xff]  ;;  %s9337_s28 = smov 10   ;;  %vm910_vm4 = vcmask 130048  }
  0x88   :  { %142 = vst.msk [vmem:[#allocation2 + $0x48] sm:$0x3] %vm133_vm1, %v11578_v1  ;;  %144 = vst.msk [vmem:[#allocation2 + $0x58] sm:$0x3] %vm133_vm1, %v11578_v1  ;;  %v183_v35 = vld [vmem:[%s11564_s0 + $0x50] sm:$0xff]  ;;  %v927_v39 = vld [vmem:[%s11565_s1] sm:$0xff] }
  0x89   :  { %145 = vst.msk [vmem:[#allocation2 + $0x60] sm:$0xff] %vm131_vm0, %v11578_v1  ;;  %147 = vst.msk [vmem:[#allocation2 + $0x70] sm:$0xff] %vm131_vm0, %v11578_v1  ;;  %v928_v40 = vld [vmem:[%s11565_s1 + $0x8] sm:$0xff]  ;;  %s9338_s18 = smov 12   ;;  %v929_v42 = vld [vmem:[%s11565_s1 + $0x10] sm:$0x3] }
  0x8a   :  { %146 = vst.msk [vmem:[#allocation2 + $0x68] sm:$0x3] %vm133_vm1, %v11578_v1  ;;  %148 = vst.msk [vmem:[#allocation2 + $0x78] sm:$0x3] %vm133_vm1, %v11578_v1  ;;  %v206_v5 = vld [vmem:[#allocation2] sm:$0xff]  ;;  %v7992_v41 = vpack.c.bf16 %v928_v40, %v927_v39  ;;  %vm986_vm5 = vcmask 1041408  }
  0x8b   :  { %149 = vst.msk [vmem:[#allocation2 + $0x80] sm:$0xff] %vm131_vm0, %v11578_v1  ;;  %151 = vst.msk [vmem:[#allocation2 + $0x90] sm:$0xff] %vm131_vm0, %v11578_v1  ;;  %v207_v6 = vld [vmem:[#allocation2 + $0x8] sm:$0x3]  ;;  %v376_v8 = vrot.slane %v206_v5, 2  ;;  %v279_v10 = vrot.slane %v206_v5, 1 }
  0x8c   :  { %150 = vst.msk [vmem:[#allocation2 + $0x88] sm:$0x3] %vm133_vm1, %v11578_v1  ;;  %152 = vst.msk [vmem:[#allocation2 + $0x98] sm:$0x3] %vm133_vm1, %v11578_v1  ;;  %v377_v9 = vrot.slane %v207_v6, 2  ;;  %v280_v11 = vrot.slane %v207_v6, 1  ;;  %7993 = vmatprep.subr.bf16.mxu1 %v7992_v41 }
  0x8d   :  { %153 = vst.msk [vmem:[#allocation2 + $0xa0] sm:$0xff] %vm131_vm0, %v11578_v1  ;;  %155 = vst.msk [vmem:[#allocation2 + $0xb0] sm:$0xff] %vm131_vm0, %v11578_v1  ;;  %7995 = vmatpush3.bf16.msra.mxu1 %v7992_v41  ;;  %s9339_s25 = smov 14   ;;  %s9340_s5 = smov 16   ;;  %v184_v50 = vld [vmem:[%s11564_s0 + $0x58] sm:$0xff]  ;;  %v185_v59 = vld [vmem:[%s11564_s0 + $0x60] sm:$0xff] }
  0x8e   :  { %154 = vst.msk [vmem:[#allocation2 + $0xa8] sm:$0x3] %vm133_vm1, %v11578_v1  ;;  %156 = vst.msk [vmem:[#allocation2 + $0xb8] sm:$0x3] %vm133_vm1, %v11578_v1  ;;  %v378_v16 = vsel %vm375_vm2, %v376_v8, %v377_v9  ;;  %v281_v17 = vsel %vm278_vm3, %v279_v10, %v280_v11  ;;  %7912 = vmatprep.subr.msk.mxu1 %vm986_vm5, %v929_v42  ;;  %v186_v6 = vld [vmem:[%s11564_s0 + $0x68] sm:$0xff]  ;;  %vm808_vm6 = vcmask 31744  }
  0x8f   :  { %157 = vst.msk [vmem:[#allocation2 + $0xc0] sm:$0xff] %vm131_vm0, %v11578_v1  ;;  %159 = vst.msk [vmem:[#allocation2 + $0xd0] sm:$0xff] %vm131_vm0, %v11578_v1  ;;  %424 = vrot.lane.b32.xlu1 %v378_v16, %s9334_s15  ;;  %327 = vrot.lane.b32.xlu0 %v281_v17, %s9335_s16  ;;  %vm825_vm7 = vcmask 48128   ;;  %vm842_vm8 = vcmask 64512   ;;  %vm859_vm9 = vcmask 80896   ;;  %vm876_vm10 = vcmask 97280  }
  0x90   :  { %158 = vst.msk [vmem:[#allocation2 + $0xc8] sm:$0x3] %vm133_vm1, %v11578_v1  ;;  %160 = vst.msk [vmem:[#allocation2 + $0xd8] sm:$0x3] %vm133_vm1, %v11578_v1  ;;  %vm893_vm11 = vcmask 113664   ;;  %vm937_vm12 = vcmask 146432  }
  0x91   :  { %161 = vst.msk [vmem:[#allocation2 + $0xe0] sm:$0xff] %vm131_vm0, %v11578_v1  ;;  %163 = vst.msk [vmem:[#allocation2 + $0xf0] sm:$0xff] %vm131_vm0, %v11578_v1  ;;  %7913 = vmatpush3.msk.msra.mxu1 %vm986_vm5, %v929_v42  ;;  %vm1152_vm13 = vcmask 123904   ;;  %s9342_s30 = smov 48   ;;  %s9343_s27 = smov 32   ;;  %vm1761_vm14 = vcmask 261120  }
  0x92   :  { %162 = vst.msk [vmem:[#allocation2 + $0xe8] sm:$0x3] %vm133_vm1, %v11578_v1  ;;  %164 = vst.msk [vmem:[#allocation2 + $0xf8] sm:$0x3] %vm133_vm1, %v11578_v1  ;;  %s9345_s2 = smov 80   ;;  %s9347_s24 = smov 112  }
  0x93   :  { %165 = vst.msk [vmem:[#allocation2 + $0x100] sm:$0xff] %vm131_vm0, %v11578_v1  ;;  %167 = vst.msk [vmem:[#allocation2 + $0x110] sm:$0xff] %vm131_vm0, %v11578_v1  ;;  %vm1778_vm15 = vcmask 392192   ;;  %vm1829_vm5 = vcmask 785408  }
  0x94   :  { %166 = vst.msk [vmem:[#allocation2 + $0x108] sm:$0x3] %vm133_vm1, %v11578_v1  ;;  %168 = vst.msk [vmem:[#allocation2 + $0x118] sm:$0x3] %vm133_vm1, %v11578_v1 }
  0x95   :  { %169 = vst.msk [vmem:[#allocation2 + $0x120] sm:$0xff] %vm131_vm0, %v11578_v1  ;;  %171 = vst.msk [vmem:[#allocation2 + $0x130] sm:$0xff] %vm131_vm0, %v11578_v1  ;;  %v227_v39 = vld [vmem:[#allocation2 + $0xa8] sm:$0x3] }
  0x96   :  { %170 = vst.msk [vmem:[#allocation2 + $0x128] sm:$0x3] %vm133_vm1, %v11578_v1  ;;  %172 = vst.msk [vmem:[#allocation2 + $0x138] sm:$0x3] %vm133_vm1, %v11578_v1  ;;  %vm1812_vm1 = vcmask 654336  }
  0x97   :  { %191 = vst.msk [vmem:[#allocation2 + $0x21] sm:$0xff] %vm131_vm0, %v174_v2  ;;  %190 = vst.msk [vmem:[#allocation2 + $0x11] sm:$0xff] %vm131_vm0, %v173_v3 }
  0x98   :  { %192 = vst.msk [vmem:[#allocation2 + $0x31] sm:$0xff] %vm131_vm0, %v175_v4  ;;  %193 = vst.msk [vmem:[#allocation2 + $0x41] sm:$0xff] %vm131_vm0, %v176_v7 }
  0x99   :  { %194 = vst.msk [vmem:[#allocation2 + $0x51] sm:$0xff] %vm131_vm0, %v177_v12  ;;  %195 = vst.msk [vmem:[#allocation2 + $0x61] sm:$0xff] %vm131_vm0, %v178_v13 }
  0x9a   :  { %196 = vst.msk [vmem:[#allocation2 + $0x71] sm:$0xff] %vm131_vm0, %v179_v14  ;;  %197 = vst.msk [vmem:[#allocation2 + $0x81] sm:$0xff] %vm131_vm0, %v180_v15  ;;  %v187_v14 = vld [vmem:[%s11564_s0 + $0x70] sm:$0xff] }
  0x9b   :  { %198 = vst.msk [vmem:[#allocation2 + $0xb1] sm:$0xff] %vm131_vm0, %v181_v18  ;;  %199 = vst.msk [vmem:[#allocation2 + $0xc1] sm:$0xff] %vm131_vm0, %v182_v19 }
  0x9c   :  { %200 = vst.msk [vmem:[#allocation2 + $0xd1] sm:$0xff] %vm131_vm0, %v183_v35  ;;  %201 = vst.msk [vmem:[#allocation2 + $0xe1] sm:$0xff] %vm131_vm0, %v184_v50  ;;  %v304_v50 = vrot.slane %v227_v39, 1 }
  0x9d   :  { %1151 = vst.msk [vmem:[#allocation3] sm:$0xff] %vm910_vm4, %v11578_v1  ;;  %1154 = vst.msk [vmem:[#allocation3 + $0x10] sm:$0xff] %vm910_vm4, %v11578_v1 }
  0x9e   :  { %v210_v20 = vld [vmem:[#allocation2 + $0x20] sm:$0xff]  ;;  %v208_v21 = vld [vmem:[#allocation2 + $0x10] sm:$0xff]  ;;  %v209_v22 = vld [vmem:[#allocation2 + $0x18] sm:$0x3]  ;;  %1156 = vst.msk [vmem:[#allocation3 + $0x20] sm:$0xff] %vm910_vm4, %v11578_v1 }
  0x9f   :  { %476 = vrot.lane.b32.xlu1 %v210_v20, %s9336_s7  ;;  %474 = vrot.lane.b32.xlu0 %v208_v21, %s9336_s7  ;;  %v379_v23 = vrot.slane %v208_v21, 2  ;;  %v380_v24 = vrot.slane %v209_v22, 2  ;;  %v282_v25 = vrot.slane %v208_v21, 1  ;;  %v283_v26 = vrot.slane %v209_v22, 1  ;;  %v211_v27 = vld [vmem:[#allocation2 + $0x28] sm:$0x3] }
  0xa0   :  { %v285_v28 = vrot.slane %v210_v20, 1  ;;  %v286_v29 = vrot.slane %v211_v27, 1  ;;  %v382_v33 = vrot.slane %v210_v20, 2  ;;  %v383_v34 = vrot.slane %v211_v27, 2  ;;  %v212_v37 = vld [vmem:[#allocation2 + $0x30] sm:$0xff]  ;;  %1158 = vst.msk [vmem:[#allocation3 + $0x30] sm:$0xff] %vm910_vm4, %v11578_v1 }
  0xa1   :  { %v381_v30 = vsel %vm375_vm2, %v379_v23, %v380_v24  ;;  %v284_v31 = vsel %vm278_vm3, %v282_v25, %v283_v26  ;;  %v213_v38 = vld [vmem:[#allocation2 + $0x38] sm:$0x3]  ;;  %1160 = vst.msk [vmem:[#allocation3 + $0x40] sm:$0xff] %vm910_vm4, %v11578_v1  ;;  %1162 = vst.msk [vmem:[#allocation3 + $0x50] sm:$0xff] %vm910_vm4, %v11578_v1  ;;  %v288_v43 = vrot.slane %v212_v37, 1  ;;  %v385_v46 = vrot.slane %v212_v37, 2 }
  0xa2   :  { %v287_v32 = vsel %vm278_vm3, %v285_v28, %v286_v29  ;;  %v384_v36 = vsel %vm375_vm2, %v382_v33, %v383_v34  ;;  %1164 = vst.msk [vmem:[#allocation3 + $0x60] sm:$0xff] %vm910_vm4, %v11578_v1  ;;  %1166 = vst.msk [vmem:[#allocation3 + $0x70] sm:$0xff] %vm910_vm4, %v11578_v1  ;;  %v289_v44 = vrot.slane %v213_v38, 1  ;;  %v386_v47 = vrot.slane %v213_v38, 2  ;;  %v214_v48 = vld [vmem:[#allocation2 + $0x40] sm:$0xff]  ;;  %v216_v57 = vld [vmem:[#allocation2 + $0x50] sm:$0xff] }
  0xa3   :  { %426 = vrot.lane.b32.xlu1 %v381_v30, %s9334_s15  ;;  %329 = vrot.lane.b32.xlu0 %v284_v31, %s9335_s16  ;;  %1168 = vst.msk [vmem:[#allocation3 + $0x80] sm:$0xff] %vm910_vm4, %v11578_v1  ;;  %1170 = vst.msk [vmem:[#allocation3 + $0x90] sm:$0xff] %vm910_vm4, %v11578_v1  ;;  %v215_v49 = vld [vmem:[#allocation2 + $0x48] sm:$0x3]  ;;  %v291_v52 = vrot.slane %v214_v48, 1  ;;  %v388_v55 = vrot.slane %v214_v48, 2 }
  0xa4   :  { %1172 = vst.msk [vmem:[#allocation3 + $0xa0] sm:$0xff] %vm910_vm4, %v11578_v1  ;;  %1174 = vst.msk [vmem:[#allocation3 + $0xb0] sm:$0xff] %vm910_vm4, %v11578_v1  ;;  %v290_v45 = vsel %vm278_vm3, %v288_v43, %v289_v44  ;;  %v387_v51 = vsel %vm375_vm2, %v385_v46, %v386_v47  ;;  %v292_v53 = vrot.slane %v215_v49, 1  ;;  %v389_v56 = vrot.slane %v215_v49, 2  ;;  %v217_v58 = vld [vmem:[#allocation2 + $0x58] sm:$0x3] }
  0xa5   :  { %1176 = vst.msk [vmem:[#allocation3 + $0xc0] sm:$0xff] %vm910_vm4, %v11578_v1  ;;  %1178 = vst.msk [vmem:[#allocation3 + $0xd0] sm:$0xff] %vm910_vm4, %v11578_v1  ;;  %v294_v61 = vrot.slane %v216_v57, 1  ;;  %v295_v62 = vrot.slane %v217_v58, 1  ;;  %v391_v0 = vrot.slane %v216_v57, 2  ;;  %v392_v2 = vrot.slane %v217_v58, 2 }
  0xa6   :  { %1180 = vst.msk [vmem:[#allocation3 + $0xe0] sm:$0xff] %vm910_vm4, %v11578_v1  ;;  %1182 = vst.msk [vmem:[#allocation3 + $0xf0] sm:$0xff] %vm910_vm4, %v11578_v1  ;;  %v293_v54 = vsel %vm278_vm3, %v291_v52, %v292_v53  ;;  %v390_v60 = vsel %vm375_vm2, %v388_v55, %v389_v56  ;;  %v218_v4 = vld [vmem:[#allocation2 + $0x60] sm:$0xff]  ;;  %v219_v5 = vld [vmem:[#allocation2 + $0x68] sm:$0x3] }
  0xa7   :  { %532 = vrot.lane.b32.xlu1 %v287_v32, %s9330_s19  ;;  %530 = vrot.lane.b32.xlu0 %v284_v31, %s9330_s19  ;;  %1184 = vst.msk [vmem:[#allocation3 + $0x100] sm:$0xff] %vm910_vm4, %v11578_v1  ;;  %1186 = vst.msk [vmem:[#allocation3 + $0x110] sm:$0xff] %vm910_vm4, %v11578_v1  ;;  %v296_v63 = vsel %vm278_vm3, %v294_v61, %v295_v62  ;;  %v393_v3 = vsel %vm375_vm2, %v391_v0, %v392_v2  ;;  %v297_v7 = vrot.slane %v218_v4, 1  ;;  %v220_v12 = vld [vmem:[#allocation2 + $0x70] sm:$0xff]  ;;  %v221_v13 = vld [vmem:[#allocation2 + $0x78] sm:$0x3] }
  0xa8   :  { %1188 = vst.msk [vmem:[#allocation3 + $0x120] sm:$0xff] %vm910_vm4, %v11578_v1  ;;  %1190 = vst.msk [vmem:[#allocation3 + $0x130] sm:$0xff] %vm910_vm4, %v11578_v1  ;;  %v298_v8 = vrot.slane %v219_v5, 1  ;;  %v394_v10 = vrot.slane %v218_v4, 2  ;;  %v395_v11 = vrot.slane %v219_v5, 2  ;;  %v300_v16 = vrot.slane %v220_v12, 1 }
  0xa9   :  { %202 = vst.msk [vmem:[#allocation2 + $0xf1] sm:$0xff] %vm131_vm0, %v185_v59  ;;  %203 = vst.msk [vmem:[#allocation2 + $0x101] sm:$0xff] %vm131_vm0, %v186_v6  ;;  %v301_v17 = vrot.slane %v221_v13, 1  ;;  %v397_v19 = vrot.slane %v220_v12, 2  ;;  %v222_v22 = vld [vmem:[#allocation2 + $0x80] sm:$0xff]  ;;  %v188_v24 = vld [vmem:[%s11564_s0 + $0x78] sm:$0xff] }
  0xaa   :  { %v299_v9 = vsel %vm278_vm3, %v297_v7, %v298_v8  ;;  %v396_v15 = vsel %vm375_vm2, %v394_v10, %v395_v11  ;;  %204 = vst.msk [vmem:[#allocation2 + $0x111] sm:$0xff] %vm131_vm0, %v187_v14  ;;  %v223_v23 = vld [vmem:[#allocation2 + $0x88] sm:$0x3]  ;;  %205 = vst.msk [vmem:[#allocation2 + $0x121] sm:$0xff] %vm131_vm0, %v188_v24  ;;  %v524_v25 = vrot.slane %v222_v22, 1  ;;  %v578_v28 = vrot.slane %v222_v22, 2 }
  0xab   :  { %586 = vrot.lane.b32.xlu1 %v384_v36, %s9337_s28  ;;  %584 = vrot.lane.b32.xlu0 %v381_v30, %s9337_s28  ;;  %v302_v18 = vsel %vm278_vm3, %v300_v16, %v301_v17  ;;  %v525_v26 = vrot.slane %v223_v23, 1  ;;  %v579_v29 = vrot.slane %v223_v23, 2  ;;  %v224_v30 = vld [vmem:[#allocation2 + $0x90] sm:$0xff]  ;;  %v225_v31 = vld [vmem:[#allocation2 + $0x98] sm:$0x3]  ;;  %v230_v61 = vld [vmem:[#allocation2 + $0xc0] sm:$0xff] }
  0xac   :  { %v684_v33 = vrot.slane %v224_v30, 1  ;;  %v685_v34 = vrot.slane %v225_v31, 1  ;;  %v228_v38 = vld [vmem:[#allocation2 + $0xb0] sm:$0xff]  ;;  %v738_v40 = vrot.slane %v224_v30, 2  ;;  %v739_v42 = vrot.slane %v225_v31, 2  ;;  %v9145_v6 = vld [vmem:[#allocation2] sm:$0xff] }
  0xad   :  { %v526_v27 = vsel %vm278_vm3, %v524_v25, %v525_v26  ;;  %v231_v62 = vld [vmem:[#allocation2 + $0xc8] sm:$0x3]  ;;  %1157 = vst.msk [vmem:[#allocation3 + $0x28] sm:$0x3] %vm1152_vm13, %v11578_v1  ;;  %1153 = vst.msk [vmem:[#allocation3 + $0x8] sm:$0x3] %vm1152_vm13, %v11578_v1 }
  0xae   :  { %v686_v41 = vsel %vm278_vm3, %v684_v33, %v685_v34  ;;  %v740_v47 = vsel %vm375_vm2, %v738_v40, %v739_v42  ;;  %v310_v5 = vrot.slane %v231_v62, 1  ;;  %1155 = vst.msk [vmem:[#allocation3 + $0x18] sm:$0x3] %vm1152_vm13, %v11578_v1  ;;  %1159 = vst.msk [vmem:[#allocation3 + $0x38] sm:$0x3] %vm1152_vm13, %v11578_v1  ;;  %s9344_s0 = smov 64  }
  0xaf   :  { %636 = vrot.lane.b32.xlu1 %v212_v37, %s9338_s18  ;;  %634 = vrot.lane.b32.xlu0 %v210_v20, %s9338_s18  ;;  %v398_v20 = vrot.slane %v221_v13, 2  ;;  %v407_v13 = vrot.slane %v231_v62, 2  ;;  %1161 = vst.msk [vmem:[#allocation3 + $0x48] sm:$0x3] %vm1152_vm13, %v11578_v1  ;;  %1163 = vst.msk [vmem:[#allocation3 + $0x58] sm:$0x3] %vm1152_vm13, %v11578_v1 }
  0xb0   :  { %1165 = vst.msk [vmem:[#allocation3 + $0x68] sm:$0x3] %vm1152_vm13, %v11578_v1  ;;  %1167 = vst.msk [vmem:[#allocation3 + $0x78] sm:$0x3] %vm1152_vm13, %v11578_v1 }
  0xb1   :  { %v399_v21 = vsel %vm375_vm2, %v397_v19, %v398_v20  ;;  %1169 = vst.msk [vmem:[#allocation3 + $0x88] sm:$0x3] %vm1152_vm13, %v11578_v1  ;;  %1171 = vst.msk [vmem:[#allocation3 + $0x98] sm:$0x3] %vm1152_vm13, %v11578_v1 }
  0xb2   :  { %1173 = vst.msk [vmem:[#allocation3 + $0xa8] sm:$0x3] %vm1152_vm13, %v11578_v1  ;;  %1175 = vst.msk [vmem:[#allocation3 + $0xb8] sm:$0x3] %vm1152_vm13, %v11578_v1 }
  0xb3   :  { %331 = vrot.lane.b32.xlu1 %v287_v32, %s9335_s16  ;;  %690 = vrot.lane.b32.xlu0 %v287_v32, %s9339_s25  ;;  %v580_v32 = vsel %vm375_vm2, %v578_v28, %v579_v29  ;;  %v9812_v28 = vld [vmem:[#allocation2 + $0xd0] sm:$0xff]  ;;  %1177 = vst.msk [vmem:[#allocation3 + $0xc8] sm:$0x3] %vm1152_vm13, %v11578_v1  ;;  %1179 = vst.msk [vmem:[#allocation3 + $0xd8] sm:$0x3] %vm1152_vm13, %v11578_v1 }
  0xb4   :  { %1181 = vst.msk [vmem:[#allocation3 + $0xe8] sm:$0x3] %vm1152_vm13, %v11578_v1  ;;  %1183 = vst.msk [vmem:[#allocation3 + $0xf8] sm:$0x3] %vm1152_vm13, %v11578_v1 }
  0xb5   :  { %1185 = vst.msk [vmem:[#allocation3 + $0x108] sm:$0x3] %vm1152_vm13, %v11578_v1  ;;  %1187 = vst.msk [vmem:[#allocation3 + $0x118] sm:$0x3] %vm1152_vm13, %v11578_v1 }
  0xb6   :  { %1189 = vst.msk [vmem:[#allocation3 + $0x128] sm:$0x3] %vm1152_vm13, %v11578_v1  ;;  %1191 = vst.msk [vmem:[#allocation3 + $0x138] sm:$0x3] %vm1152_vm13, %v11578_v1 }
  0xb7   :  { %744 = vrot.lane.b32.xlu1 %v384_v36, %s9340_s5  ;;  %692 = vrot.lane.b32.xlu0 %v290_v45, %s9339_s25 }
  0xbb   :  { %428 = vrot.lane.b32.xlu1 %v384_v36, %s9334_s15  ;;  %333 = vrot.lane.b32.xlu0 %v290_v45, %s9335_s16 }
  0xbf   :  { %430 = vrot.lane.b32.xlu1 %v387_v51, %s9334_s15  ;;  %746 = vrot.lane.b32.xlu0 %v387_v51, %s9340_s5 }
  0xc3   :  { %480 = vrot.lane.b32.xlu1 %v214_v48, %s9336_s7  ;;  %478 = vrot.lane.b32.xlu0 %v212_v37, %s9336_s7  ;;  %v226_v37 = vld [vmem:[#allocation2 + $0xa0] sm:$0xff] }
  0xc4   :  { %v303_v46 = vrot.slane %v226_v37, 1  ;;  %v400_v53 = vrot.slane %v226_v37, 2 }
  0xc6   :  { %v305_v56 = vsel %vm278_vm3, %v303_v46, %v304_v50  ;;  %v235_v50 = vld [vmem:[#allocation2 + $0xe8] sm:$0x3] }
  0xc7   :  { %536 = vrot.lane.b32.xlu1 %v293_v54, %s9330_s19  ;;  %534 = vrot.lane.b32.xlu0 %v290_v45, %s9330_s19  ;;  %v229_v45 = vld [vmem:[#allocation2 + $0xb8] sm:$0x3] }
  0xc8   :  { %v307_v49 = vrot.slane %v229_v45, 1  ;;  %v404_v58 = vrot.slane %v229_v45, 2  ;;  %v409_v45 = vrot.slane %v9812_v28, 2 }
  0xcb   :  { %590 = vrot.lane.b32.xlu1 %v390_v60, %s9337_s28  ;;  %588 = vrot.lane.b32.xlu0 %v387_v51, %s9337_s28 }
  0xcf   :  { %640 = vrot.lane.b32.xlu1 %v216_v57, %s9338_s18  ;;  %638 = vrot.lane.b32.xlu0 %v214_v48, %s9338_s18  ;;  %v306_v48 = vrot.slane %v228_v38, 1 }
  0xd1   :  { %v308_v55 = vsel %vm278_vm3, %v306_v48, %v307_v49  ;;  %v9837_v49 = vld [vmem:[#allocation2 + $0xe0] sm:$0xff] }
  0xd2   :  { %v412_v62 = vrot.slane %v9837_v49, 2 }
  0xd3   :  { %696 = vrot.lane.b32.xlu1 %v296_v63, %s9339_s25  ;;  %694 = vrot.lane.b32.xlu0 %v293_v54, %s9339_s25 }
  0xd7   :  { %335 = vrot.lane.b32.xlu1 %v293_v54, %s9335_s16  ;;  %748 = vrot.lane.b32.xlu0 %v390_v60, %s9340_s5  ;;  %v401_v54 = vrot.slane %v227_v39, 2 }
  0xd9   :  { %v402_v0 = vsel %vm375_vm2, %v400_v53, %v401_v54  ;;  %v315_v54 = vrot.slane %v9837_v49, 1 }
  0xdb   :  { %337 = vrot.lane.b32.xlu1 %v296_v63, %s9335_s16  ;;  %750 = vrot.lane.b32.xlu0 %v393_v3, %s9340_s5 }
  0xdf   :  { %434 = vrot.lane.b32.xlu1 %v393_v3, %s9334_s15  ;;  %432 = vrot.lane.b32.xlu0 %v390_v60, %s9334_s15 }
  0xe3   :  { %484 = vrot.lane.b32.xlu1 %v218_v4, %s9336_s7  ;;  %482 = vrot.lane.b32.xlu0 %v216_v57, %s9336_s7  ;;  %v403_v57 = vrot.slane %v228_v38, 2 }
  0xe7   :  { %540 = vrot.lane.b32.xlu1 %v299_v9, %s9330_s19  ;;  %538 = vrot.lane.b32.xlu0 %v296_v63, %s9330_s19  ;;  %v405_v63 = vsel %vm375_vm2, %v403_v57, %v404_v58  ;;  %v9147_v58 = vld [vmem:[#allocation2 + $0x20] sm:$0xff] }
  0xeb   :  { %594 = vrot.lane.b32.xlu1 %v396_v15, %s9337_s28  ;;  %592 = vrot.lane.b32.xlu0 %v393_v3, %s9337_s28 }
  0xef   :  { %644 = vrot.lane.b32.xlu1 %v220_v12, %s9338_s18  ;;  %642 = vrot.lane.b32.xlu0 %v218_v4, %s9338_s18  ;;  %v309_v4 = vrot.slane %v230_v61, 1 }
  0xf1   :  { %v311_v11 = vsel %vm278_vm3, %v309_v4, %v310_v5  ;;  %v9148_v5 = vld [vmem:[#allocation2 + $0x30] sm:$0xff] }
  0xf3   :  { %700 = vrot.lane.b32.xlu1 %v302_v18, %s9339_s25  ;;  %698 = vrot.lane.b32.xlu0 %v299_v9, %s9339_s25 }
  0xf7   :  { %339 = vrot.lane.b32.xlu1 %v299_v9, %s9335_s16  ;;  %752 = vrot.lane.b32.xlu0 %v396_v15, %s9340_s5 }
  0xfb   :  { %341 = vrot.lane.b32.xlu1 %v302_v18, %s9335_s16  ;;  %754 = vrot.lane.b32.xlu0 %v399_v21, %s9340_s5 }
  0xff   :  { %438 = vrot.lane.b32.xlu1 %v399_v21, %s9334_s15  ;;  %436 = vrot.lane.b32.xlu0 %v396_v15, %s9334_s15  ;;  %v9146_v15 = vld [vmem:[#allocation2 + $0x10] sm:$0xff] }
 0x101   :  { %v425_v35 = vpop.permute.xlu1 %424  ;;  %v328_v36 = vpop.permute.xlu0 %327 }
 0x102   :  { %v792_v7 = vsel %vm131_vm0, %v9145_v6, %v328_v36  ;;  %v312_v36 = vrot.slane %v9812_v28, 1 }
 0x103   :  { %488 = vrot.lane.b32.xlu1 %v222_v22, %s9336_s7  ;;  %486 = vrot.lane.b32.xlu0 %v220_v12, %s9336_s7  ;;  %v809_v10 = vsel %vm808_vm6, %v792_v7, %v425_v35  ;;  %v406_v12 = vrot.slane %v230_v61, 2 }
 0x105   :  { %v408_v23 = vsel %vm375_vm2, %v406_v12, %v407_v13 }
 0x107   :  { %544 = vrot.lane.b32.xlu1 %v526_v27, %s9330_s19  ;;  %542 = vrot.lane.b32.xlu0 %v302_v18, %s9330_s19 }
 0x10b   :  { %598 = vrot.lane.b32.xlu1 %v580_v32, %s9337_s28  ;;  %596 = vrot.lane.b32.xlu0 %v399_v21, %s9337_s28 }
 0x10f   :  { %648 = vrot.lane.b32.xlu1 %v224_v30, %s9338_s18  ;;  %646 = vrot.lane.b32.xlu0 %v222_v22, %s9338_s18  ;;  %v233_v30 = vld [vmem:[#allocation2 + $0xd8] sm:$0x3] }
 0x110   :  { %v313_v37 = vrot.slane %v233_v30, 1  ;;  %v410_v46 = vrot.slane %v233_v30, 2 }
 0x111   :  { %v9781_v43 = vpop.permute.xlu1 %476  ;;  %v475_v44 = vpop.permute.xlu0 %474 }
 0x112   :  { %v826_v14 = vsel %vm825_vm7, %v809_v10, %v475_v44  ;;  %v314_v42 = vsel %vm278_vm3, %v312_v36, %v313_v37 }
 0x113   :  { %704 = vrot.lane.b32.xlu1 %v686_v41, %s9339_s25  ;;  %702 = vrot.lane.b32.xlu0 %v526_v27, %s9339_s25 }
 0x115   :  { %v427_v51 = vpop.permute.xlu1 %426  ;;  %v330_v52 = vpop.permute.xlu0 %329 }
 0x116   :  { %v793_v16 = vsel %vm131_vm0, %v9146_v15, %v330_v52 }
 0x117   :  { %758 = vrot.lane.b32.xlu1 %v740_v47, %s9340_s5  ;;  %756 = vrot.lane.b32.xlu0 %v580_v32, %s9340_s5  ;;  %v810_v21 = vsel %vm808_vm6, %v793_v16, %v427_v51  ;;  %v411_v51 = vsel %vm375_vm2, %v409_v45, %v410_v46  ;;  %v9149_v46 = vld [vmem:[#allocation2 + $0x40] sm:$0xff] }
 0x118   :  { %v827_v29 = vsel %vm825_vm7, %v810_v21, %v9781_v43 }
 0x119   :  { %v533_v59 = vpop.permute.xlu1 %532  ;;  %v531_v60 = vpop.permute.xlu0 %530 }
 0x11a   :  { %v843_v19 = vsel %vm842_vm8, %v826_v14, %v531_v60  ;;  %v844_v33 = vsel %vm842_vm8, %v827_v29, %v533_v59 }
 0x11b   :  { %345 = vrot.lane.b32.xlu1 %v308_v55, %s9335_s16  ;;  %343 = vrot.lane.b32.xlu0 %v305_v56, %s9335_s16 }
 0x11d   :  { %v587_v2 = vpop.permute.xlu1 %586  ;;  %v585_v3 = vpop.permute.xlu0 %584 }
 0x11e   :  { %v860_v20 = vsel %vm859_vm9, %v843_v19, %v585_v3  ;;  %v861_v34 = vsel %vm859_vm9, %v844_v33, %v587_v2 }
 0x11f   :  { %442 = vrot.lane.b32.xlu1 %v405_v63, %s9334_s15  ;;  %440 = vrot.lane.b32.xlu0 %v402_v0, %s9334_s15 }
 0x121   :  { %v637_v8 = vpop.permute.xlu1 %636  ;;  %v635_v9 = vpop.permute.xlu0 %634 }
 0x122   :  { %v877_v22 = vsel %vm876_vm10, %v860_v20, %v635_v9  ;;  %v878_v35 = vsel %vm876_vm10, %v861_v34, %v637_v8  ;;  %v9857_v8 = vld [vmem:[#allocation2 + $0xf0] sm:$0xff]  ;;  %v237_v9 = vld [vmem:[#allocation2 + $0xf8] sm:$0x3] }
 0x123   :  { %492 = vrot.lane.b32.xlu1 %v230_v61, %s9336_s7  ;;  %490 = vrot.lane.b32.xlu0 %v228_v38, %s9336_s7  ;;  %v318_v21 = vrot.slane %v9857_v8, 1 }
 0x125   :  { %v332_v17 = vpop.permute.xlu1 %331  ;;  %v691_v18 = vpop.permute.xlu0 %690 }
 0x126   :  { %v894_v24 = vsel %vm893_vm11, %v877_v22, %v691_v18  ;;  %v794_v59 = vsel %vm131_vm0, %v9147_v58, %v332_v17  ;;  %v319_v22 = vrot.slane %v237_v9, 1 }
 0x127   :  { %548 = vrot.lane.b32.xlu1 %v311_v11, %s9330_s19  ;;  %546 = vrot.lane.b32.xlu0 %v308_v55, %s9330_s19  ;;  %v316_v55 = vrot.slane %v235_v50, 1 }
 0x129   :  { %v745_v25 = vpop.permute.xlu1 %744  ;;  %v693_v26 = vpop.permute.xlu0 %692 }
 0x12a   :  { %v911_v27 = vsel %vm910_vm4, %v894_v24, %v745_v25  ;;  %v895_v38 = vsel %vm893_vm11, %v878_v35, %v693_v26 }
 0x12b   :  { %602 = vrot.lane.b32.xlu1 %v408_v23, %s9337_s28  ;;  %600 = vrot.lane.b32.xlu0 %v405_v63, %s9337_s28  ;;  %v413_v63 = vrot.slane %v235_v50, 2 }
 0x12c   :  { %7914 = vmatprep.mubr.msk.f32.mxu1 %vm937_vm12, %v911_v27  ;;  %v320_v27 = vsel %vm278_vm3, %v318_v21, %v319_v22 }
 0x12d   :  { %v429_v31 = vpop.permute.xlu1 %428  ;;  %v334_v32 = vpop.permute.xlu0 %333  ;;  %v414_v12 = vsel %vm375_vm2, %v412_v62, %v413_v63 }
 0x12e   :  { %v811_v60 = vsel %vm808_vm6, %v794_v59, %v429_v31  ;;  %v795_v6 = vsel %vm131_vm0, %v9148_v5, %v334_v32  ;;  %v415_v31 = vrot.slane %v9857_v8, 2  ;;  %v416_v32 = vrot.slane %v237_v9, 2  ;;  %v241_v5 = vld [vmem:[#allocation2 + $0x118] sm:$0x3] }
 0x12f   :  { %652 = vrot.lane.b32.xlu1 %v9812_v28, %s9338_s18  ;;  %650 = vrot.lane.b32.xlu0 %v230_v61, %s9338_s18  ;;  %v317_v61 = vsel %vm278_vm3, %v315_v54, %v316_v55 }
 0x130   :  { %v417_v35 = vsel %vm375_vm2, %v415_v31, %v416_v32  ;;  %v243_v31 = vld [vmem:[#allocation2 + $0x128] sm:$0x3] }
 0x131   :  { %v431_v39 = vpop.permute.xlu1 %430  ;;  %v747_v40 = vpop.permute.xlu0 %746 }
 0x132   :  { %v912_v41 = vsel %vm910_vm4, %v895_v38, %v747_v40  ;;  %v812_v10 = vsel %vm808_vm6, %v795_v6, %v431_v39  ;;  %v9888_v40 = vld [vmem:[#allocation2 + $0x100] sm:$0xff] }
 0x133   :  { %347 = vrot.lane.b32.xlu1 %v311_v11, %s9335_s16  ;;  %706 = vrot.lane.b32.xlu0 %v311_v11, %s9339_s25 }
 0x134   :  { %7915 = vmatmul.mubr.msk.f32.vlgmr.msra.gmra.mrb[0].mxu1 %vm937_vm12, %v912_v41  ;;  %v239_v41 = vld [vmem:[#allocation2 + $0x108] sm:$0x3] }
 0x135   :  { %v481_v43 = vpop.permute.xlu1 %480  ;;  %v479_v44 = vpop.permute.xlu0 %478 }
 0x136   :  { %v828_v0 = vsel %vm825_vm7, %v811_v60, %v479_v44  ;;  %v829_v13 = vsel %vm825_vm7, %v812_v10, %v481_v43  ;;  %v322_v43 = vrot.slane %v239_v41, 1 }
 0x137   :  { %760 = vrot.lane.b32.xlu1 %v408_v23, %s9340_s5  ;;  %708 = vrot.lane.b32.xlu0 %v314_v42, %s9339_s25 }
 0x139   :  { %v537_v47 = vpop.permute.xlu1 %536  ;;  %v535_v48 = vpop.permute.xlu0 %534 }
 0x13a   :  { %v845_v4 = vsel %vm842_vm8, %v828_v0, %v535_v48  ;;  %v846_v17 = vsel %vm842_vm8, %v829_v13, %v537_v47 }
 0x13b   :  { %444 = vrot.lane.b32.xlu1 %v408_v23, %s9334_s15  ;;  %349 = vrot.lane.b32.xlu0 %v314_v42, %s9335_s16 }
 0x13d   :  { %v591_v52 = vpop.permute.xlu1 %590  ;;  %v589_v53 = vpop.permute.xlu0 %588 }
 0x13e   :  { %v862_v7 = vsel %vm859_vm9, %v845_v4, %v589_v53  ;;  %v863_v19 = vsel %vm859_vm9, %v846_v17, %v591_v52  ;;  %v419_v52 = vrot.slane %v239_v41, 2  ;;  %v9912_v4 = vld [vmem:[#allocation2 + $0x110] sm:$0xff] }
 0x13f   :  { %446 = vrot.lane.b32.xlu1 %v411_v51, %s9334_s15  ;;  %762 = vrot.lane.b32.xlu0 %v411_v51, %s9340_s5 }
 0x141   :  { %v641_v56 = vpop.permute.xlu1 %640  ;;  %v639_v57 = vpop.permute.xlu0 %638 }
 0x142   :  { %v879_v11 = vsel %vm876_vm10, %v862_v7, %v639_v57  ;;  %v880_v20 = vsel %vm876_vm10, %v863_v19, %v641_v56  ;;  %v9150_v57 = vld [vmem:[#allocation2 + $0x50] sm:$0xff]  ;;  %v422_v19 = vrot.slane %v241_v5, 2 }
 0x143   :  { %496 = vrot.lane.b32.xlu1 %v9837_v49, %s9336_s7  ;;  %494 = vrot.lane.b32.xlu0 %v9812_v28, %s9336_s7 }
 0x145   :  { %v697_v2 = vpop.permute.xlu1 %696  ;;  %v695_v3 = vpop.permute.xlu0 %694 }
 0x146   :  { %v896_v14 = vsel %vm893_vm11, %v879_v11, %v695_v3  ;;  %v897_v23 = vsel %vm893_vm11, %v880_v20, %v697_v2  ;;  %v324_v11 = vrot.slane %v9912_v4, 1 }
 0x147   :  { %552 = vrot.lane.b32.xlu1 %v317_v61, %s9330_s19  ;;  %550 = vrot.lane.b32.xlu0 %v314_v42, %s9330_s19  ;;  %v321_v42 = vrot.slane %v9888_v40, 1 }
 0x149   :  { %v336_v15 = vpop.permute.xlu1 %335  ;;  %v749_v16 = vpop.permute.xlu0 %748  ;;  %v323_v50 = vsel %vm278_vm3, %v321_v42, %v322_v43 }
 0x14a   :  { %v913_v18 = vsel %vm910_vm4, %v896_v14, %v749_v16  ;;  %v796_v47 = vsel %vm131_vm0, %v9149_v46, %v336_v15 }
 0x14b   :  { %606 = vrot.lane.b32.xlu1 %v414_v12, %s9337_s28  ;;  %604 = vrot.lane.b32.xlu0 %v411_v51, %s9337_s28  ;;  %v418_v51 = vrot.slane %v9888_v40, 2 }
 0x14c   :  { %7917 = vmatprep.mubr.msk.f32.mxu1 %vm937_vm12, %v913_v18  ;;  %v421_v18 = vrot.slane %v9912_v4, 2 }
 0x14d   :  { %v338_v24 = vpop.permute.xlu1 %337  ;;  %v751_v25 = vpop.permute.xlu0 %750  ;;  %v420_v62 = vsel %vm375_vm2, %v418_v51, %v419_v52 }
 0x14e   :  { %v914_v26 = vsel %vm910_vm4, %v897_v23, %v751_v25  ;;  %v797_v58 = vsel %vm131_vm0, %v9150_v57, %v338_v24  ;;  %v423_v22 = vsel %vm375_vm2, %v421_v18, %v422_v19 }
 0x14f   :  { %656 = vrot.lane.b32.xlu1 %v9857_v8, %s9338_s18  ;;  %654 = vrot.lane.b32.xlu0 %v9837_v49, %s9338_s18 }
 0x150   :  { %7918 = vmatmul.mubr.msk.f32.gmra.mrb[2].mxu1 %vm937_vm12, %v914_v26 }
 0x151   :  { %v435_v29 = vpop.permute.xlu1 %434  ;;  %v433_v30 = vpop.permute.xlu0 %432 }
 0x152   :  { %v813_v48 = vsel %vm808_vm6, %v796_v47, %v433_v30  ;;  %v814_v60 = vsel %vm808_vm6, %v797_v58, %v435_v29  ;;  %v9938_v30 = vld [vmem:[#allocation2 + $0x120] sm:$0xff] }
 0x153   :  { %712 = vrot.lane.b32.xlu1 %v320_v27, %s9339_s25  ;;  %710 = vrot.lane.b32.xlu0 %v317_v61, %s9339_s25  ;;  %v527_v32 = vrot.slane %v9938_v30, 1  ;;  %v581_v46 = vrot.slane %v9938_v30, 2 }
 0x155   :  { %v485_v33 = vpop.permute.xlu1 %484  ;;  %v483_v34 = vpop.permute.xlu0 %482 }
 0x156   :  { %v830_v53 = vsel %vm825_vm7, %v813_v48, %v483_v34  ;;  %v831_v63 = vsel %vm825_vm7, %v814_v60, %v485_v33  ;;  %v528_v33 = vrot.slane %v243_v31, 1 }
 0x157   :  { %351 = vrot.lane.b32.xlu1 %v317_v61, %s9335_s16  ;;  %764 = vrot.lane.b32.xlu0 %v414_v12, %s9340_s5 }
 0x158   :  { %v529_v43 = vsel %vm278_vm3, %v527_v32, %v528_v33 }
 0x159   :  { %v541_v36 = vpop.permute.xlu1 %540  ;;  %v539_v37 = vpop.permute.xlu0 %538 }
 0x15a   :  { %v847_v56 = vsel %vm842_vm8, %v830_v53, %v539_v37  ;;  %v848_v6 = vsel %vm842_vm8, %v831_v63, %v541_v36  ;;  %v9151_v36 = vld [vmem:[#allocation2 + $0x60] sm:$0xff] }
 0x15b   :  { %353 = vrot.lane.b32.xlu1 %v320_v27, %s9335_s16  ;;  %766 = vrot.lane.b32.xlu0 %v417_v35, %s9340_s5 }
 0x15d   :  { %v595_v38 = vpop.permute.xlu1 %594  ;;  %v593_v39 = vpop.permute.xlu0 %592 }
 0x15e   :  { %v864_v59 = vsel %vm859_vm9, %v847_v56, %v593_v39  ;;  %v865_v9 = vsel %vm859_vm9, %v848_v6, %v595_v38  ;;  %v9152_v38 = vld [vmem:[#allocation2 + $0x70] sm:$0xff] }
 0x15f   :  { %450 = vrot.lane.b32.xlu1 %v417_v35, %s9334_s15  ;;  %448 = vrot.lane.b32.xlu0 %v414_v12, %s9334_s15  ;;  %v325_v12 = vrot.slane %v241_v5, 1 }
 0x161   :  { %v645_v44 = vpop.permute.xlu1 %644  ;;  %v643_v45 = vpop.permute.xlu0 %642  ;;  %v326_v17 = vsel %vm278_vm3, %v324_v11, %v325_v12 }
 0x162   :  { %v881_v61 = vsel %vm876_vm10, %v864_v59, %v643_v45  ;;  %v882_v10 = vsel %vm876_vm10, %v865_v9, %v645_v44 }
 0x163   :  { %500 = vrot.lane.b32.xlu1 %v9888_v40, %s9336_s7  ;;  %498 = vrot.lane.b32.xlu0 %v9857_v8, %s9336_s7 }
 0x165   :  { %v701_v54 = vpop.permute.xlu1 %700  ;;  %v699_v55 = vpop.permute.xlu0 %698 }
 0x166   :  { %v898_v0 = vsel %vm893_vm11, %v881_v61, %v699_v55  ;;  %v899_v13 = vsel %vm893_vm11, %v882_v10, %v701_v54 }
 0x167   :  { %556 = vrot.lane.b32.xlu1 %v323_v50, %s9330_s19  ;;  %554 = vrot.lane.b32.xlu0 %v320_v27, %s9330_s19 }
 0x169   :  { %v340_v2 = vpop.permute.xlu1 %339  ;;  %v753_v3 = vpop.permute.xlu0 %752 }
 0x16a   :  { %v915_v7 = vsel %vm910_vm4, %v898_v0, %v753_v3  ;;  %v798_v37 = vsel %vm131_vm0, %v9151_v36, %v340_v2  ;;  %v244_v0 = vld [vmem:[#allocation2 + $0x130] sm:$0xff]  ;;  %v245_v2 = vld [vmem:[#allocation2 + $0x138] sm:$0x3] }
 0x16b   :  { %610 = vrot.lane.b32.xlu1 %v420_v62, %s9337_s28  ;;  %608 = vrot.lane.b32.xlu0 %v417_v35, %s9337_s28  ;;  %v687_v6 = vrot.slane %v244_v0, 1  ;;  %v741_v9 = vrot.slane %v244_v0, 2 }
 0x16c   :  { %7920 = vmatprep.mubr.msk.f32.mxu1 %vm937_vm12, %v915_v7  ;;  %v688_v7 = vrot.slane %v245_v2, 1 }
 0x16d   :  { %v342_v14 = vpop.permute.xlu1 %341  ;;  %v755_v15 = vpop.permute.xlu0 %754 }
 0x16e   :  { %v916_v16 = vsel %vm910_vm4, %v899_v13, %v755_v15  ;;  %v799_v39 = vsel %vm131_vm0, %v9152_v38, %v342_v14  ;;  %v689_v12 = vsel %vm278_vm3, %v687_v6, %v688_v7  ;;  %v742_v13 = vrot.slane %v245_v2, 2 }
 0x16f   :  { %660 = vrot.lane.b32.xlu1 %v9912_v4, %s9338_s18  ;;  %658 = vrot.lane.b32.xlu0 %v9888_v40, %s9338_s18 }
 0x170   :  { %7921 = vmatmul.mubr.msk.f32.gmra.mrb[4].mxu1 %vm937_vm12, %v916_v16  ;;  %v743_v16 = vsel %vm375_vm2, %v741_v9, %v742_v13 }
 0x171   :  { %v439_v20 = vpop.permute.xlu1 %438  ;;  %v437_v21 = vpop.permute.xlu0 %436 }
 0x172   :  { %v816_v41 = vsel %vm808_vm6, %v799_v39, %v439_v20  ;;  %v815_v42 = vsel %vm808_vm6, %v798_v37, %v437_v21  ;;  %v9154_v37 = vld [vmem:[#allocation2 + $0xb0] sm:$0xff] }
 0x173   :  { %716 = vrot.lane.b32.xlu1 %v326_v17, %s9339_s25  ;;  %714 = vrot.lane.b32.xlu0 %v323_v50, %s9339_s25 }
 0x175   :  { %v489_v23 = vpop.permute.xlu1 %488  ;;  %v487_v24 = vpop.permute.xlu0 %486 }
 0x176   :  { %v833_v44 = vsel %vm825_vm7, %v816_v41, %v489_v23  ;;  %v832_v45 = vsel %vm825_vm7, %v815_v42, %v487_v24  ;;  %v9153_v23 = vld [vmem:[#allocation2 + $0xa0] sm:$0xff] }
 0x177   :  { %770 = vrot.lane.b32.xlu1 %v423_v22, %s9340_s5  ;;  %768 = vrot.lane.b32.xlu0 %v420_v62, %s9340_s5 }
 0x179   :  { %v545_v25 = vpop.permute.xlu1 %544  ;;  %v543_v26 = vpop.permute.xlu0 %542 }
 0x17a   :  { %v850_v51 = vsel %vm842_vm8, %v833_v44, %v545_v25  ;;  %v849_v52 = vsel %vm842_vm8, %v832_v45, %v543_v26 }
 0x17b   :  { %355 = vrot.lane.b32.xlu0 %v323_v50, %s9335_s16  ;;  %357 = vrot.lane.b32.xlu1 %v326_v17, %s9335_s16  ;;  %v582_v50 = vrot.slane %v243_v31, 2 }
 0x17d   :  { %v599_v27 = vpop.permute.xlu1 %598  ;;  %v597_v29 = vpop.permute.xlu0 %596  ;;  %v583_v61 = vsel %vm375_vm2, %v581_v46, %v582_v50 }
 0x17e   :  { %v867_v53 = vsel %vm859_vm9, %v850_v51, %v599_v27  ;;  %v866_v54 = vsel %vm859_vm9, %v849_v52, %v597_v29 }
 0x17f   :  { %452 = vrot.lane.b32.xlu0 %v420_v62, %s9334_s15  ;;  %454 = vrot.lane.b32.xlu1 %v423_v22, %s9334_s15 }
 0x181   :  { %v649_v34 = vpop.permute.xlu1 %648  ;;  %v647_v35 = vpop.permute.xlu0 %646 }
 0x182   :  { %v884_v55 = vsel %vm876_vm10, %v867_v53, %v649_v34  ;;  %v883_v56 = vsel %vm876_vm10, %v866_v54, %v647_v35 }
 0x183   :  { %502 = vrot.lane.b32.xlu0 %v9912_v4, %s9336_s7  ;;  %504 = vrot.lane.b32.xlu1 %v9938_v30, %s9336_s7 }
 0x185   :  { %v705_v47 = vpop.permute.xlu1 %704  ;;  %v703_v48 = vpop.permute.xlu0 %702 }
 0x186   :  { %v901_v57 = vsel %vm893_vm11, %v884_v55, %v705_v47  ;;  %v900_v58 = vsel %vm893_vm11, %v883_v56, %v703_v48 }
 0x187   :  { %558 = vrot.lane.b32.xlu0 %v326_v17, %s9330_s19  ;;  %560 = vrot.lane.b32.xlu1 %v529_v43, %s9330_s19 }
 0x189   :  { %v759_v59 = vpop.permute.xlu1 %758  ;;  %v757_v60 = vpop.permute.xlu0 %756 }
 0x18a   :  { %v918_v62 = vsel %vm910_vm4, %v901_v57, %v759_v59  ;;  %v917_v63 = vsel %vm910_vm4, %v900_v58, %v757_v60  ;;  %v9155_v60 = vld [vmem:[#allocation2 + $0xc0] sm:$0xff] }
 0x18b   :  { %612 = vrot.lane.b32.xlu0 %v423_v22, %s9337_s28  ;;  %7923 = vmatprep.mubr.msk.f32.mxu1 %vm937_vm12, %v917_v63 }
 0x18c   :  { %614 = vrot.lane.b32.xlu1 %v583_v61, %s9337_s28  ;;  %7924 = vmatmul.mubr.msk.f32.gmra.mrb[6].mxu1 %vm937_vm12, %v918_v62 }
 0x18d   :  { %v346_v3 = vpop.permute.xlu1 %345  ;;  %v344_v5 = vpop.permute.xlu0 %343 }
 0x18e   :  { %v800_v24 = vsel %vm131_vm0, %v9153_v23, %v344_v5  ;;  %v801_v38 = vsel %vm131_vm0, %v9154_v37, %v346_v3 }
 0x18f   :  { %662 = vrot.lane.b32.xlu0 %v9938_v30, %s9338_s18 }
 0x190   :  { %664 = vrot.lane.b32.xlu1 %v244_v0, %s9338_s18 }
 0x191   :  { %v443_v10 = vpop.permute.xlu1 %442  ;;  %v441_v11 = vpop.permute.xlu0 %440 }
 0x192   :  { %v817_v25 = vsel %vm808_vm6, %v800_v24, %v441_v11  ;;  %v818_v39 = vsel %vm808_vm6, %v801_v38, %v443_v10 }
 0x193   :  { %718 = vrot.lane.b32.xlu0 %v529_v43, %s9339_s25 }
 0x194   :  { %720 = vrot.lane.b32.xlu1 %v689_v12, %s9339_s25 }
 0x195   :  { %v493_v14 = vpop.permute.xlu1 %492  ;;  %v491_v15 = vpop.permute.xlu0 %490 }
 0x196   :  { %v834_v26 = vsel %vm825_vm7, %v817_v25, %v491_v15  ;;  %v835_v41 = vsel %vm825_vm7, %v818_v39, %v493_v14 }
 0x197   :  { %772 = vrot.lane.b32.xlu0 %v583_v61, %s9340_s5 }
 0x198   :  { %774 = vrot.lane.b32.xlu1 %v743_v16, %s9340_s5 }
 0x199   :  { %v549_v17 = vpop.permute.xlu1 %548  ;;  %v547_v18 = vpop.permute.xlu0 %546 }
 0x19a   :  { %v851_v30 = vsel %vm842_vm8, %v834_v26, %v547_v18  ;;  %v852_v44 = vsel %vm842_vm8, %v835_v41, %v549_v17 }
 0x19d   :  { %v603_v19 = vpop.permute.xlu1 %602  ;;  %v601_v20 = vpop.permute.xlu0 %600 }
 0x19e   :  { %v868_v31 = vsel %vm859_vm9, %v851_v30, %v601_v20  ;;  %v869_v45 = vsel %vm859_vm9, %v852_v44, %v603_v19 }
 0x1a1   :  { %v653_v21 = vpop.permute.xlu1 %652  ;;  %v651_v22 = vpop.permute.xlu0 %650 }
 0x1a2   :  { %v885_v32 = vsel %vm876_vm10, %v868_v31, %v651_v22  ;;  %v886_v46 = vsel %vm876_vm10, %v869_v45, %v653_v21 }
 0x1a5   :  { %v348_v27 = vpop.permute.xlu1 %347  ;;  %v707_v29 = vpop.permute.xlu0 %706 }
 0x1a6   :  { %v902_v33 = vsel %vm893_vm11, %v885_v32, %v707_v29  ;;  %v802_v61 = vsel %vm131_vm0, %v9155_v60, %v348_v27 }
 0x1a9   :  { %v761_v34 = vpop.permute.xlu1 %760  ;;  %v709_v35 = vpop.permute.xlu0 %708 }
 0x1aa   :  { %v919_v36 = vsel %vm910_vm4, %v902_v33, %v761_v34  ;;  %v903_v47 = vsel %vm893_vm11, %v886_v46, %v709_v35 }
 0x1ab   :  { %7926 = vmatprep.mubr.msk.f32.mxu1 %vm937_vm12, %v919_v36 }
 0x1ad   :  { %v445_v42 = vpop.permute.xlu1 %444  ;;  %v350_v43 = vpop.permute.xlu0 %349 }
 0x1ae   :  { %v819_v62 = vsel %vm808_vm6, %v802_v61, %v445_v42  ;;  %v803_v5 = vsel %vm131_vm0, %v9812_v28, %v350_v43 }
 0x1b1   :  { %v447_v48 = vpop.permute.xlu1 %446  ;;  %v763_v50 = vpop.permute.xlu0 %762 }
 0x1b2   :  { %v920_v51 = vsel %vm910_vm4, %v903_v47, %v763_v50  ;;  %v820_v7 = vsel %vm808_vm6, %v803_v5, %v447_v48 }
 0x1b3   :  { %7927 = vmatmul.mubr.msk.f32.gmra.mrb[8].mxu1 %vm937_vm12, %v920_v51 }
 0x1b5   :  { %v497_v52 = vpop.permute.xlu1 %496  ;;  %v495_v53 = vpop.permute.xlu0 %494 }
 0x1b6   :  { %v836_v63 = vsel %vm825_vm7, %v819_v62, %v495_v53  ;;  %v837_v10 = vsel %vm825_vm7, %v820_v7, %v497_v52 }
 0x1b9   :  { %v553_v54 = vpop.permute.xlu1 %552  ;;  %v551_v55 = vpop.permute.xlu0 %550 }
 0x1ba   :  { %v853_v3 = vsel %vm842_vm8, %v836_v63, %v551_v55  ;;  %v854_v14 = vsel %vm842_vm8, %v837_v10, %v553_v54 }
 0x1bd   :  { %v607_v56 = vpop.permute.xlu1 %606  ;;  %v605_v57 = vpop.permute.xlu0 %604 }
 0x1be   :  { %v870_v6 = vsel %vm859_vm9, %v853_v3, %v605_v57  ;;  %v871_v16 = vsel %vm859_vm9, %v854_v14, %v607_v56  ;;  %v10092_v14 = vld [vmem:[#allocation6] ss:$0 sm:$0xff] }
 0x1c1   :  { %v657_v58 = vpop.permute.xlu1 %656  ;;  %v655_v59 = vpop.permute.xlu0 %654 }
 0x1c2   :  { %v887_v9 = vsel %vm876_vm10, %v870_v6, %v655_v59  ;;  %v888_v28 = vsel %vm876_vm10, %v871_v16, %v657_v58 }
 0x1c5   :  { %v713_v0 = vpop.permute.xlu1 %712  ;;  %v711_v2 = vpop.permute.xlu0 %710 }
 0x1c6   :  { %v904_v11 = vsel %vm893_vm11, %v887_v9, %v711_v2  ;;  %v905_v17 = vsel %vm893_vm11, %v888_v28, %v713_v0 }
 0x1c9   :  { %v352_v12 = vpop.permute.xlu1 %351  ;;  %v765_v13 = vpop.permute.xlu0 %764 }
 0x1ca   :  { %v921_v15 = vsel %vm910_vm4, %v904_v11, %v765_v13  ;;  %v804_v32 = vsel %vm131_vm0, %v9837_v49, %v352_v12 }
 0x1cb   :  { %7929 = vmatprep.mubr.msk.f32.mxu1 %vm937_vm12, %v921_v15 }
 0x1cd   :  { %v354_v18 = vpop.permute.xlu1 %353  ;;  %v767_v19 = vpop.permute.xlu0 %766 }
 0x1ce   :  { %v922_v20 = vsel %vm910_vm4, %v905_v17, %v767_v19  ;;  %v805_v33 = vsel %vm131_vm0, %v9857_v8, %v354_v18 }
 0x1cf   :  { %7930 = vmatmul.mubr.msk.f32.gmra.mrb[10].mxu1 %vm937_vm12, %v922_v20 }
 0x1d1   :  { %v451_v21 = vpop.permute.xlu1 %450  ;;  %v449_v22 = vpop.permute.xlu0 %448 }
 0x1d2   :  { %v822_v34 = vsel %vm808_vm6, %v805_v33, %v451_v21  ;;  %v821_v35 = vsel %vm808_vm6, %v804_v32, %v449_v22  ;;  %v1863_v22 = vld [vmem:[%s11567_s3] sm:$0xff]  ;;  %v1210_v33 = vld [vmem:[#allocation3 + $0x8] sm:$0x3] }
 0x1d3   :  { %v10110_v32 = vld [vmem:[#allocation3] sm:$0xff] }
 0x1d5   :  { %v501_v23 = vpop.permute.xlu1 %500  ;;  %v499_v24 = vpop.permute.xlu0 %498 }
 0x1d6   :  { %v839_v36 = vsel %vm825_vm7, %v822_v34, %v501_v23  ;;  %v838_v37 = vsel %vm825_vm7, %v821_v35, %v499_v24  ;;  %v1864_v23 = vld [vmem:[%s11567_s3 + $0x8] sm:$0xff]  ;;  %v1865_v34 = vld [vmem:[%s11567_s3 + $0x10] sm:$0xff]  ;;  %v1866_v35 = vld [vmem:[%s11567_s3 + $0x18] sm:$0xff] }
 0x1d9   :  { %v557_v25 = vpop.permute.xlu1 %556  ;;  %v555_v26 = vpop.permute.xlu0 %554 }
 0x1da   :  { %v856_v41 = vsel %vm842_vm8, %v839_v36, %v557_v25  ;;  %v855_v42 = vsel %vm842_vm8, %v838_v37, %v555_v26  ;;  %v8000_v36 = vpack.c.bf16 %v1866_v35, %v1865_v34  ;;  %v1377_v37 = vrot.slane %v10110_v32, 2 }
 0x1dd   :  { %v611_v27 = vpop.permute.xlu1 %610  ;;  %v609_v29 = vpop.permute.xlu0 %608 }
 0x1de   :  { %v873_v43 = vsel %vm859_vm9, %v856_v41, %v611_v27  ;;  %v872_v49 = vsel %vm859_vm9, %v855_v42, %v609_v29  ;;  %v7997_v27 = vpack.c.bf16 %v1864_v23, %v1863_v22  ;;  %v1282_v41 = vrot.slane %v1210_v33, 1  ;;  %v1867_v42 = vld [vmem:[%s11567_s3 + $0x20] sm:$0xff] }
 0x1e1   :  { %v661_v30 = vpop.permute.xlu1 %660  ;;  %v659_v31 = vpop.permute.xlu0 %658 }
 0x1e2   :  { %v890_v8 = vsel %vm876_vm10, %v873_v43, %v661_v30  ;;  %v889_v44 = vsel %vm876_vm10, %v872_v49, %v659_v31  ;;  %v11580_v31 = vmov 0.0|0.0   ;;  %v1868_v43 = vld [vmem:[%s11567_s3 + $0x28] sm:$0xff] }
 0x1e3   :  { %7996 = vmatprep.subr.bf16.mxu1 %v11580_v31  ;;  %v8003_v49 = vpack.c.bf16 %v1868_v43, %v1867_v42 }
 0x1e4   :  { %7998 = vmatpush1.bf16.msra.mxu1 %v7997_v27 }
 0x1e5   :  { %v717_v38 = vpop.permute.xlu1 %716  ;;  %v715_v39 = vpop.permute.xlu0 %714  ;;  %7999 = vmatprep.subr.bf16.mxu1 %v11580_v31 }
 0x1e6   :  { %v907_v45 = vsel %vm893_vm11, %v890_v8, %v717_v38  ;;  %v906_v46 = vsel %vm893_vm11, %v889_v44, %v715_v39  ;;  %v1378_v38 = vrot.slane %v1210_v33, 2  ;;  %v1281_v39 = vrot.slane %v10110_v32, 1 }
 0x1e8   :  { %8001 = vmatpush1.bf16.msra.mxu1 %v8000_v36 }
 0x1e9   :  { %v771_v47 = vpop.permute.xlu1 %770  ;;  %v769_v48 = vpop.permute.xlu0 %768  ;;  %8002 = vmatprep.subr.bf16.mxu1 %v11580_v31 }
 0x1ea   :  { %v924_v50 = vsel %vm910_vm4, %v907_v45, %v771_v47  ;;  %v923_v51 = vsel %vm910_vm4, %v906_v46, %v769_v48  ;;  %v1379_v45 = vsel %vm375_vm2, %v1377_v37, %v1378_v38 }
 0x1eb   :  { %7932 = vmatprep.mubr.msk.f32.mxu1 %vm937_vm12, %v923_v51 }
 0x1ec   :  { %7933 = vmatmul.mubr.msk.f32.gmra.mrb[12].mxu1 %vm937_vm12, %v924_v50 }
 0x1ed   :  { %v356_v52 = vpop.permute.xlu0 %355  ;;  %v358_v53 = vpop.permute.xlu1 %357  ;;  %8004 = vmatpush1.bf16.msra.mxu1 %v8003_v49 }
 0x1ee   :  { %v806_v56 = vsel %vm131_vm0, %v9888_v40, %v356_v52  ;;  %v807_v59 = vsel %vm131_vm0, %v9912_v4, %v358_v53  ;;  %v1283_v52 = vsel %vm278_vm3, %v1281_v39, %v1282_v41  ;;  %8005 = vmatprep.subr.bf16.mxu1 %v11580_v31  ;;  %vm1795_vm0 = vcmask 523264  }
 0x1f1   :  { %v453_v54 = vpop.permute.xlu0 %452  ;;  %v455_v55 = vpop.permute.xlu1 %454 }
 0x1f2   :  { %v823_v60 = vsel %vm808_vm6, %v806_v56, %v453_v54  ;;  %v824_v61 = vsel %vm808_vm6, %v807_v59, %v455_v55  ;;  %vm1846_vm6 = vcmask 916480  }
 0x1f5   :  { %v503_v57 = vpop.permute.xlu0 %502  ;;  %v505_v58 = vpop.permute.xlu1 %504 }
 0x1f6   :  { %v840_v0 = vsel %vm825_vm7, %v823_v60, %v503_v57  ;;  %v841_v2 = vsel %vm825_vm7, %v824_v61, %v505_v58  ;;  %v1869_v57 = vld [vmem:[%s11567_s3 + $0x30] sm:$0xff]  ;;  %v1870_v58 = vld [vmem:[%s11567_s3 + $0x38] sm:$0xff]  ;;  %vm2102_vm7 = vcmask 1041409  }
 0x1f9   :  { %v559_v62 = vpop.permute.xlu0 %558  ;;  %v561_v63 = vpop.permute.xlu1 %560 }
 0x1fa   :  { %v857_v5 = vsel %vm842_vm8, %v840_v0, %v559_v62  ;;  %v858_v40 = vsel %vm842_vm8, %v841_v2, %v561_v63  ;;  %v8006_v62 = vpack.c.bf16 %v1870_v58, %v1869_v57  ;;  %v1871_v63 = vld [vmem:[%s11567_s3 + $0x40] sm:$0xff]  ;;  %v1872_v0 = vld [vmem:[%s11567_s3 + $0x48] sm:$0xff]  ;;  %vm2104_vm8 = vcmask 1043459  }
 0x1fc   :  { %8007 = vmatpush1.bf16.msra.mxu1 %v8006_v62 }
 0x1fd   :  { %v613_v3 = vpop.permute.xlu0 %612  ;;  %8008 = vmatprep.subr.bf16.mxu1 %v11580_v31 }
 0x1fe   :  { %v615_v6 = vpop.permute.xlu1 %614  ;;  %v874_v7 = vsel %vm859_vm9, %v857_v5, %v613_v3 }
 0x1ff   :  { %v875_v4 = vsel %vm859_vm9, %v858_v40, %v615_v6  ;;  %vm2106_vm9 = vcmask 1045509  }
 0x201   :  { %v663_v9 = vpop.permute.xlu0 %662 }
 0x202   :  { %v665_v10 = vpop.permute.xlu1 %664  ;;  %v891_v11 = vsel %vm876_vm10, %v874_v7, %v663_v9  ;;  %v8009_v7 = vpack.c.bf16 %v1872_v0, %v1871_v63  ;;  %v1873_v9 = vld [vmem:[%s11567_s3 + $0x50] sm:$0xff] }
 0x203   :  { %v892_v12 = vsel %vm876_vm10, %v875_v4, %v665_v10  ;;  %v1874_v4 = vld [vmem:[%s11567_s3 + $0x58] sm:$0xff]  ;;  %vm2108_vm10 = vcmask 1047559  }
 0x204   :  { %8010 = vmatpush1.bf16.msra.mxu1 %v8009_v7 }
 0x205   :  { %v719_v13 = vpop.permute.xlu0 %718  ;;  %8011 = vmatprep.subr.bf16.mxu1 %v11580_v31 }
 0x206   :  { %v721_v15 = vpop.permute.xlu1 %720  ;;  %v908_v16 = vsel %vm893_vm11, %v891_v11, %v719_v13  ;;  %v1875_v13 = vld [vmem:[%s11567_s3 + $0x60] sm:$0xff] }
 0x207   :  { %v7916_v28 = vpop.f32.mrb[0].mxu1  ;;  %v909_v17 = vsel %vm893_vm11, %v892_v12, %v721_v15  ;;  %v8012_v12 = vpack.c.bf16 %v1874_v4, %v1873_v9  ;;  %v1876_v15 = vld [vmem:[%s11567_s3 + $0x68] sm:$0xff]  ;;  %vm2111_vm11 = vcmask 517120  }
 0x208   :  { %v1062_v18 = vadd.f32 %v7916_v28, %v10092_v14  ;;  %v1056_v19 = vpop.f32.mrb[1].mxu1 }
 0x209   :  { %v1057_v20 = vadd.f32 %v10092_v14, %v1056_v19  ;;  %v773_v21 = vpop.permute.xlu0 %772  ;;  %8013 = vmatpush1.bf16.msra.mxu1 %v8012_v12 }
 0x20a   :  { %v1136_v24 = vmax.f32 %v1062_v18, 0.0  ;;  %v925_v25 = vsel %vm910_vm4, %v908_v16, %v773_v21  ;;  %v775_v26 = vpop.permute.xlu1 %774  ;;  %v8015_v16 = vpack.c.bf16 %v1876_v15, %v1875_v13  ;;  %8014 = vmatprep.subr.bf16.mxu1 %v11580_v31  ;;  %v1878_v21 = vld [vmem:[%s11567_s3 + $0x78] sm:$0xff] }
 0x20b   :  { %v1135_v29 = vmax.f32 %v1057_v20, 0.0  ;;  %v926_v30 = vsel %vm910_vm4, %v909_v17, %v775_v26  ;;  %7935 = vmatprep.mubr.msk.f32.mxu1 %vm937_vm12, %v925_v25  ;;  %v1877_v20 = vld [vmem:[%s11567_s3 + $0x70] sm:$0xff]  ;;  %v1879_v25 = vld [vmem:[%s11567_s3 + $0x80] sm:$0xff]  ;;  %v1880_v26 = vld [vmem:[%s11567_s3 + $0x88] sm:$0xff]  ;;  %s9346_s3 = smov 96  }
 0x20c   :  { %1194 = vst.msk [vmem:[#allocation3 + $0x21] sm:$0xff] %vm910_vm4, %v1136_v24  ;;  %7936 = vmatmul.mubr.msk.f32.gmra.mrb[14].mxu1 %vm937_vm12, %v926_v30  ;;  %v8018_v23 = vpack.c.bf16 %v1878_v21, %v1877_v20  ;;  %v8021_v27 = vpack.c.bf16 %v1880_v26, %v1879_v25  ;;  %v10271_v26 = vld [vmem:[#allocation3 + $0x90] sm:$0xff] }
 0x20d   :  { %1193 = vst.msk [vmem:[#allocation3 + $0x11] sm:$0xff] %vm910_vm4, %v1135_v29  ;;  %8016 = vmatpush1.bf16.msra.mxu1 %v8015_v16 }
 0x20e   :  { %8017 = vmatprep.subr.bf16.mxu1 %v11580_v31 }
 0x211   :  { %8019 = vmatpush1.bf16.msra.mxu1 %v8018_v23 }
 0x212   :  { %8020 = vmatprep.subr.bf16.mxu1 %v11580_v31 }
 0x213   :  { %v10129_v8 = vld [vmem:[#allocation3 + $0x20] sm:$0xff]  ;;  %v1214_v44 = vld [vmem:[#allocation3 + $0x28] sm:$0x3] }
 0x214   :  { %v10132_v46 = vld [vmem:[#allocation3 + $0x10] sm:$0xff]  ;;  %v1212_v47 = vld [vmem:[#allocation3 + $0x18] sm:$0x3]  ;;  %v1288_v48 = vrot.slane %v1214_v44, 1  ;;  %v1383_v50 = vrot.slane %v10129_v8, 2  ;;  %v1384_v51 = vrot.slane %v1214_v44, 2 }
 0x215   :  { %v8177_v53 = vpack.i.bf16 %v10129_v8, %v10132_v46  ;;  %v1380_v54 = vrot.slane %v10132_v46, 2  ;;  %v1381_v55 = vrot.slane %v1212_v47, 2  ;;  %v1284_v56 = vrot.slane %v10132_v46, 1  ;;  %8022 = vmatpush1.bf16.msra.mxu1 %v8021_v27  ;;  %v10273_v27 = vld [vmem:[#allocation3 + $0x98] sm:$0x3] }
 0x216   :  { %v10147_v59 = vsel %vm375_vm2, %v1383_v50, %v1384_v51  ;;  %v1285_v60 = vrot.slane %v1212_v47, 1  ;;  %v1287_v61 = vrot.slane %v10129_v8, 1 }
 0x217   :  { %8178 = vrot.lane.b32.xlu0 %v8177_v53, %s9342_s30  ;;  %v1382_v2 = vsel %vm375_vm2, %v1380_v54, %v1381_v55  ;;  %7296 = vmatprep.mubr.msk.f32.mxu1 %vm910_vm4, %v10147_v59 }
 0x218   :  { %v8187_v3 = vpack.i.bf16 %v1382_v2, %v1379_v45  ;;  %v1286_v5 = vsel %vm278_vm3, %v1284_v56, %v1285_v60  ;;  %v1289_v40 = vsel %vm278_vm3, %v1287_v61, %v1288_v48  ;;  %v8197_v11 = vpack.i.bf16 %v10147_v59, %v1382_v2 }
 0x219   :  { %v8182_v6 = vpack.i.bf16 %v1286_v5, %v1283_v52  ;;  %v8192_v10 = vpack.i.bf16 %v1289_v40, %v1286_v5 }
 0x21a   :  { %8188 = vrot.lane.b32.xlu1 %v8187_v3, %s9343_s27 }
 0x21b   :  { %8183 = vrot.lane.b32.xlu0 %v8182_v6, %s9340_s5 }
 0x21e   :  { %8193 = vrot.lane.b32.xlu1 %v8192_v10, %s9344_s0 }
 0x21f   :  { %8198 = vrot.lane.b32.xlu0 %v8197_v11, %s9345_s2 }
 0x223   :  { %v7919_v28 = vpop.f32.mrb[2].mxu1 }
 0x224   :  { %v1072_v17 = vadd.f32 %v7919_v28, %v10092_v14  ;;  %v1066_v18 = vpop.f32.mrb[3].mxu1 }
 0x225   :  { %v1067_v19 = vadd.f32 %v10092_v14, %v1066_v18 }
 0x226   :  { %v1138_v22 = vmax.f32 %v1072_v17, 0.0 }
 0x227   :  { %v1137_v24 = vmax.f32 %v1067_v19, 0.0 }
 0x228   :  { %1196 = vst.msk [vmem:[#allocation3 + $0x41] sm:$0xff] %vm910_vm4, %v1138_v22 }
 0x229   :  { %1195 = vst.msk [vmem:[#allocation3 + $0x31] sm:$0xff] %vm910_vm4, %v1137_v24 }
 0x22f   :  { %v10206_v36 = vld [vmem:[#allocation3 + $0x40] sm:$0xff]  ;;  %v1218_v39 = vld [vmem:[#allocation3 + $0x48] sm:$0x3] }
 0x230   :  { %v10201_v29 = vld [vmem:[#allocation3 + $0x30] sm:$0xff]  ;;  %v1216_v30 = vld [vmem:[#allocation3 + $0x38] sm:$0x3]  ;;  %v1293_v44 = vrot.slane %v10206_v36, 1  ;;  %v1294_v45 = vrot.slane %v1218_v39, 1  ;;  %v1389_v47 = vrot.slane %v10206_v36, 2 }
 0x231   :  { %v8202_v33 = vpack.i.bf16 %v10201_v29, %v10129_v8  ;;  %v1290_v34 = vrot.slane %v10201_v29, 1  ;;  %v1291_v35 = vrot.slane %v1216_v30, 1  ;;  %v1386_v37 = vrot.slane %v10201_v29, 2 }
 0x232   :  { %v1387_v38 = vrot.slane %v1216_v30, 2  ;;  %v8207_v43 = vpack.i.bf16 %v10206_v36, %v10201_v29  ;;  %v1390_v48 = vrot.slane %v1218_v39, 2  ;;  %v1295_v51 = vsel %vm278_vm3, %v1293_v44, %v1294_v45 }
 0x233   :  { %8203 = vrot.lane.b32.xlu1 %v8202_v33, %s9346_s3  ;;  %v1292_v41 = vsel %vm278_vm3, %v1290_v34, %v1291_v35  ;;  %v1685_v34 = vrot.slane %v10271_v26, 1 }
 0x234   :  { %v8212_v42 = vpack.i.bf16 %v1292_v41, %v1289_v40  ;;  %v10214_v49 = vsel %vm375_vm2, %v1386_v37, %v1387_v38  ;;  %v10225_v52 = vsel %vm375_vm2, %v1389_v47, %v1390_v48  ;;  %v8227_v53 = vpack.i.bf16 %v1295_v51, %v1292_v41 }
 0x235   :  { %v8222_v50 = vpack.i.bf16 %v10214_v49, %v10147_v59  ;;  %v8232_v54 = vpack.i.bf16 %v10225_v52, %v10214_v49 }
 0x236   :  { %8213 = vrot.lane.b32.xlu0 %v8212_v42, %s9347_s24 }
 0x237   :  { %8208 = vrot.lane.b32.xlu1 %v8207_v43, %s9342_s30  ;;  %v1686_v43 = vrot.slane %v10273_v27, 1 }
 0x23a   :  { %8223 = vrot.lane.b32.xlu0 %v8222_v50, %s9343_s27 }
 0x23b   :  { %8218 = vrot.lane.b32.xlu1 %v8212_v42, %s9340_s5 }
 0x23e   :  { %8228 = vrot.lane.b32.xlu0 %v8227_v53, %s9344_s0 }
 0x23f   :  { %8233 = vrot.lane.b32.xlu1 %v8232_v54, %s9345_s2 }
 0x243   :  { %v7922_v55 = vpop.f32.mrb[4].mxu1 }
 0x244   :  { %v1082_v56 = vadd.f32 %v7922_v55, %v10092_v14  ;;  %v1076_v57 = vpop.f32.mrb[5].mxu1 }
 0x245   :  { %v1077_v58 = vadd.f32 %v10092_v14, %v1076_v57 }
 0x246   :  { %v1140_v59 = vmax.f32 %v1082_v56, 0.0  ;;  %v1687_v56 = vsel %vm278_vm3, %v1685_v34, %v1686_v43 }
 0x247   :  { %v1139_v60 = vmax.f32 %v1077_v58, 0.0 }
 0x248   :  { %1198 = vst.msk [vmem:[#allocation3 + $0x61] sm:$0xff] %vm910_vm4, %v1140_v59 }
 0x249   :  { %1197 = vst.msk [vmem:[#allocation3 + $0x51] sm:$0xff] %vm910_vm4, %v1139_v60 }
 0x24f   :  { %v10241_v3 = vld [vmem:[#allocation3 + $0x60] sm:$0xff]  ;;  %v1222_v40 = vld [vmem:[#allocation3 + $0x68] sm:$0x3] }
 0x250   :  { %v10236_v61 = vld [vmem:[#allocation3 + $0x50] sm:$0xff]  ;;  %v1220_v62 = vld [vmem:[#allocation3 + $0x58] sm:$0x3]  ;;  %v1299_v11 = vrot.slane %v10241_v3, 1  ;;  %v1300_v12 = vrot.slane %v1222_v40, 1  ;;  %v1395_v13 = vrot.slane %v10241_v3, 2 }
 0x251   :  { %v8237_v63 = vpack.i.bf16 %v10236_v61, %v10206_v36  ;;  %v1296_v0 = vrot.slane %v10236_v61, 1  ;;  %v1297_v2 = vrot.slane %v1220_v62, 1  ;;  %v1392_v5 = vrot.slane %v10236_v61, 2 }
 0x252   :  { %v1393_v6 = vrot.slane %v1220_v62, 2  ;;  %v8242_v4 = vpack.i.bf16 %v10241_v3, %v10236_v61  ;;  %v1396_v15 = vrot.slane %v1222_v40, 2  ;;  %v1301_v28 = vsel %vm278_vm3, %v1299_v11, %v1300_v12  ;;  %v1230_v11 = vld [vmem:[#allocation3 + $0xa8] sm:$0x3] }
 0x253   :  { %8238 = vrot.lane.b32.xlu0 %v8237_v63, %s9346_s3  ;;  %v1298_v7 = vsel %vm278_vm3, %v1296_v0, %v1297_v2 }
 0x254   :  { %v8247_v9 = vpack.i.bf16 %v1298_v7, %v1295_v51  ;;  %v10249_v10 = vsel %vm375_vm2, %v1392_v5, %v1393_v6  ;;  %v10260_v17 = vsel %vm375_vm2, %v1395_v13, %v1396_v15  ;;  %v8262_v18 = vpack.i.bf16 %v1301_v28, %v1298_v7 }
 0x255   :  { %v8257_v16 = vpack.i.bf16 %v10249_v10, %v10225_v52  ;;  %v8267_v19 = vpack.i.bf16 %v10260_v17, %v10249_v10  ;;  %v1402_v13 = vrot.slane %v1230_v11, 2 }
 0x256   :  { %8248 = vrot.lane.b32.xlu1 %v8247_v9, %s9347_s24 }
 0x257   :  { %8243 = vrot.lane.b32.xlu0 %v8242_v4, %s9342_s30  ;;  %v10311_v4 = vld [vmem:[#allocation3 + $0xa0] sm:$0xff] }
 0x258   :  { %v1401_v12 = vrot.slane %v10311_v4, 2 }
 0x25a   :  { %8258 = vrot.lane.b32.xlu1 %v8257_v16, %s9343_s27  ;;  %v1305_v16 = vrot.slane %v10311_v4, 1 }
 0x25b   :  { %8253 = vrot.lane.b32.xlu0 %v8247_v9, %s9340_s5 }
 0x25e   :  { %8263 = vrot.lane.b32.xlu1 %v8262_v18, %s9344_s0 }
 0x25f   :  { %8268 = vrot.lane.b32.xlu0 %v8267_v19, %s9345_s2  ;;  %v7925_v20 = vpop.f32.mrb[6].mxu1 }
 0x260   :  { %v1092_v21 = vadd.f32 %v7925_v20, %v10092_v14  ;;  %v1086_v22 = vpop.f32.mrb[7].mxu1 }
 0x261   :  { %v1087_v23 = vadd.f32 %v10092_v14, %v1086_v22  ;;  %v1403_v22 = vsel %vm375_vm2, %v1401_v12, %v1402_v13 }
 0x262   :  { %v1142_v24 = vmax.f32 %v1092_v21, 0.0 }
 0x263   :  { %v1141_v25 = vmax.f32 %v1087_v23, 0.0 }
 0x264   :  { %1200 = vst.msk [vmem:[#allocation3 + $0x81] sm:$0xff] %vm910_vm4, %v1142_v24 }
 0x265   :  { %1199 = vst.msk [vmem:[#allocation3 + $0x71] sm:$0xff] %vm910_vm4, %v1141_v25 }
 0x26b   :  { %v1225_v30 = vld [vmem:[#allocation3 + $0x80] sm:$0xff]  ;;  %v1226_v33 = vld [vmem:[#allocation3 + $0x88] sm:$0x3] }
 0x26c   :  { %v8272_v35 = vpack.i.bf16 %v10271_v26, %v1225_v30  ;;  %v10277_v37 = vld [vmem:[#allocation3 + $0x70] sm:$0xff]  ;;  %v1224_v38 = vld [vmem:[#allocation3 + $0x78] sm:$0x3]  ;;  %v1525_v47 = vrot.slane %v1225_v30, 1  ;;  %v1526_v48 = vrot.slane %v1226_v33, 1  ;;  %v1579_v59 = vrot.slane %v1225_v30, 2 }
 0x26d   :  { %v8277_v39 = vpack.i.bf16 %v10277_v37, %v10241_v3  ;;  %v1302_v41 = vrot.slane %v10277_v37, 1  ;;  %v1303_v42 = vrot.slane %v1224_v38, 1  ;;  %v1398_v44 = vrot.slane %v10277_v37, 2 }
 0x26e   :  { %8273 = vrot.lane.b32.xlu0 %v8272_v35, %s9346_s3  ;;  %v1399_v45 = vrot.slane %v1224_v38, 2  ;;  %v8282_v53 = vpack.i.bf16 %v1225_v30, %v10277_v37  ;;  %v1527_v55 = vsel %vm278_vm3, %v1525_v47, %v1526_v48  ;;  %v1580_v60 = vrot.slane %v1226_v33, 2 }
 0x26f   :  { %8278 = vrot.lane.b32.xlu1 %v8277_v39, %s9346_s3  ;;  %v1304_v50 = vsel %vm278_vm3, %v1302_v41, %v1303_v42  ;;  %v8287_v58 = vpack.i.bf16 %v1687_v56, %v1527_v55 }
 0x270   :  { %v8292_v51 = vpack.i.bf16 %v1304_v50, %v1301_v28  ;;  %v10289_v54 = vsel %vm375_vm2, %v1398_v44, %v1399_v45  ;;  %v8307_v62 = vpack.i.bf16 %v1527_v55, %v1304_v50  ;;  %v10301_v63 = vsel %vm375_vm2, %v1579_v59, %v1580_v60 }
 0x271   :  { %v8302_v57 = vpack.i.bf16 %v10289_v54, %v10260_v17  ;;  %v8312_v0 = vpack.i.bf16 %v10301_v63, %v10289_v54  ;;  %v1306_v28 = vrot.slane %v1230_v11, 1 }
 0x272   :  { %8293 = vrot.lane.b32.xlu0 %v8292_v51, %s9347_s24 }
 0x273   :  { %8283 = vrot.lane.b32.xlu1 %v8282_v53, %s9342_s30  ;;  %v1307_v34 = vsel %vm278_vm3, %v1305_v16, %v1306_v28 }
 0x276   :  { %8303 = vrot.lane.b32.xlu0 %v8302_v57, %s9343_s27 }
 0x277   :  { %8288 = vrot.lane.b32.xlu1 %v8287_v58, %s9347_s24 }
 0x27a   :  { %8308 = vrot.lane.b32.xlu0 %v8307_v62, %s9344_s0 }
 0x27b   :  { %8298 = vrot.lane.b32.xlu1 %v8292_v51, %s9340_s5 }
 0x27f   :  { %8313 = vrot.lane.b32.xlu1 %v8312_v0, %s9345_s2 }
 0x286   :  { %v7928_v2 = vpop.f32.mrb[8].mxu1 }
 0x287   :  { %v1102_v5 = vadd.f32 %v7928_v2, %v10092_v14  ;;  %v1096_v6 = vpop.f32.mrb[9].mxu1 }
 0x288   :  { %v1097_v40 = vadd.f32 %v10092_v14, %v1096_v6 }
 0x289   :  { %v1144_v7 = vmax.f32 %v1102_v5, 0.0  ;;  %v10314_v15 = vpop.permute.xlu0 %8178 }
 0x28a   :  { %v1143_v9 = vmax.f32 %v1097_v40, 0.0  ;;  %v8180_v0 = vunpack.i.l.bf16 %v10314_v15  ;;  %v8181_v16 = vunpack.i.h.bf16 %v10314_v15 }
 0x28b   :  { %1202 = vst.msk [vmem:[#allocation3 + $0xc1] sm:$0xff] %vm910_vm4, %v1144_v7 }
 0x28c   :  { %1201 = vst.msk [vmem:[#allocation3 + $0xb1] sm:$0xff] %vm910_vm4, %v1143_v9  ;;  %v8189_v50 = vpop.permute.xlu1 %8188 }
 0x28d   :  { %v8184_v41 = vpop.permute.xlu0 %8183  ;;  %v8190_v59 = vunpack.i.l.bf16 %v8189_v50  ;;  %v8191_v5 = vunpack.i.h.bf16 %v8189_v50 }
 0x28e   :  { %v8185_v51 = vunpack.i.l.bf16 %v8184_v41  ;;  %v8186_v57 = vunpack.i.h.bf16 %v8184_v41 }
 0x290   :  { %v1745_v58 = vsel %vm910_vm4, %v10110_v32, %v8185_v51  ;;  %v8194_v60 = vpop.permute.xlu1 %8193  ;;  %v1746_v2 = vsel %vm910_vm4, %v10132_v46, %v8186_v57 }
 0x291   :  { %v1762_v62 = vsel %vm1761_vm14, %v1745_v58, %v8190_v59  ;;  %v8195_v6 = vunpack.i.l.bf16 %v8194_v60  ;;  %v8199_v40 = vpop.permute.xlu0 %8198  ;;  %v1763_v12 = vsel %vm1761_vm14, %v1746_v2, %v8191_v5 }
 0x292   :  { %v10317_v18 = vld [vmem:[#allocation3 + $0xc0] sm:$0xff]  ;;  %v1234_v19 = vld [vmem:[#allocation3 + $0xc8] sm:$0x3]  ;;  %v1779_v32 = vsel %vm1778_vm15, %v1762_v62, %v8180_v0  ;;  %v8200_v28 = vunpack.i.l.bf16 %v8199_v40 }
 0x293   :  { %v10319_v20 = vld [vmem:[#allocation3 + $0xb0] sm:$0xff]  ;;  %v1232_v21 = vld [vmem:[#allocation3 + $0xb8] sm:$0x3]  ;;  %v1311_v23 = vrot.slane %v10317_v18, 1  ;;  %v1312_v33 = vrot.slane %v1234_v19, 1  ;;  %v1407_v39 = vrot.slane %v10317_v18, 2 }
 0x294   :  { %v8317_v24 = vpack.i.bf16 %v10317_v18, %v10319_v20  ;;  %v1404_v25 = vrot.slane %v10319_v20, 2  ;;  %v1405_v30 = vrot.slane %v1232_v21, 2  ;;  %v1308_v35 = vrot.slane %v10319_v20, 1 }
 0x295   :  { %v1309_v38 = vrot.slane %v1232_v21, 1  ;;  %v1408_v43 = vrot.slane %v1234_v19, 2  ;;  %v10333_v48 = vsel %vm278_vm3, %v1311_v23, %v1312_v33  ;;  %v8196_v21 = vunpack.i.h.bf16 %v8194_v60 }
 0x296   :  { %8318 = vrot.lane.b32.xlu0 %v8317_v24, %s9342_s30  ;;  %v1406_v42 = vsel %vm375_vm2, %v1404_v25, %v1405_v30  ;;  %v1780_v25 = vsel %vm1778_vm15, %v1763_v12, %v8181_v16  ;;  %v8201_v33 = vunpack.i.h.bf16 %v8199_v40 }
 0x297   :  { %v8327_v44 = vpack.i.bf16 %v1406_v42, %v1403_v22  ;;  %v1310_v45 = vsel %vm278_vm3, %v1308_v35, %v1309_v38  ;;  %v10337_v53 = vsel %vm375_vm2, %v1407_v39, %v1408_v43  ;;  %v1796_v22 = vsel %vm1795_vm0, %v1779_v32, %v8195_v6 }
 0x298   :  { %v8322_v47 = vpack.i.bf16 %v1310_v45, %v1307_v34  ;;  %v8332_v55 = vpack.i.bf16 %v10333_v48, %v1310_v45  ;;  %v8337_v56 = vpack.i.bf16 %v10337_v53, %v1406_v42  ;;  %v1813_v15 = vsel %vm1812_vm1, %v1796_v22, %v8200_v28 }
 0x299   :  { %8328 = vrot.lane.b32.xlu1 %v8327_v44, %s9343_s27  ;;  %v1797_v35 = vsel %vm1795_vm0, %v1780_v25, %v8196_v21 }
 0x29a   :  { %8323 = vrot.lane.b32.xlu0 %v8322_v47, %s9340_s5  ;;  %v1814_v43 = vsel %vm1812_vm1, %v1797_v35, %v8201_v33 }
 0x29d   :  { %8333 = vrot.lane.b32.xlu1 %v8332_v55, %s9344_s0 }
 0x29e   :  { %8338 = vrot.lane.b32.xlu0 %v8337_v56, %s9345_s2 }
 0x2a2   :  { %v7931_v7 = vpop.f32.mrb[10].mxu1 }
 0x2a3   :  { %v1112_v9 = vadd.f32 %v7931_v7, %v10092_v14  ;;  %v1106_v11 = vpop.f32.mrb[11].mxu1 }
 0x2a4   :  { %v1107_v13 = vadd.f32 %v10092_v14, %v1106_v11 }
 0x2a5   :  { %v1146_v19 = vmax.f32 %v1112_v9, 0.0  ;;  %v8204_v46 = vpop.permute.xlu1 %8203 }
 0x2a6   :  { %v1145_v23 = vmax.f32 %v1107_v13, 0.0  ;;  %v8205_v24 = vunpack.i.l.bf16 %v8204_v46  ;;  %v8206_v38 = vunpack.i.h.bf16 %v8204_v46 }
 0x2a7   :  { %1204 = vst.msk [vmem:[#allocation3 + $0xe1] sm:$0xff] %vm910_vm4, %v1146_v19 }
 0x2a8   :  { %1203 = vst.msk [vmem:[#allocation3 + $0xd1] sm:$0xff] %vm910_vm4, %v1145_v23  ;;  %v8214_v30 = vpop.permute.xlu0 %8213  ;;  %v1830_v39 = vsel %vm1829_vm5, %v1813_v15, %v8205_v24  ;;  %v1831_v45 = vsel %vm1829_vm5, %v1814_v43, %v8206_v38 }
 0x2a9   :  { %v8215_v34 = vunpack.i.l.bf16 %v8214_v30  ;;  %v8216_v41 = vunpack.i.h.bf16 %v8214_v30  ;;  %v8209_v51 = vpop.permute.xlu1 %8208 }
 0x2aa   :  { %v8210_v25 = vunpack.i.l.bf16 %v8209_v51 }
 0x2ab   :  { %v1847_v42 = vsel %vm1846_vm6, %v1830_v39, %v8215_v34  ;;  %v1848_v47 = vsel %vm1846_vm6, %v1831_v45, %v8216_v41 }
 0x2ac   :  { %1985 = vmatmul.mubr.f32.vlgmr.msra.gmra.mrb[16].mxu1 %v1847_v42  ;;  %v8224_v7 = vpop.permute.xlu0 %8223 }
 0x2ad   :  { %7297 = vmatprep.mubr.msk.f32.mxu1 %vm910_vm4, %v10214_v49  ;;  %v8219_v2 = vpop.permute.xlu1 %8218  ;;  %v8225_v13 = vunpack.i.l.bf16 %v8224_v7  ;;  %v8226_v33 = vunpack.i.h.bf16 %v8224_v7 }
 0x2ae   :  { %v10366_v44 = vld [vmem:[#allocation3 + $0xe0] sm:$0xff]  ;;  %v1238_v62 = vld [vmem:[#allocation3 + $0xe8] sm:$0x3]  ;;  %v8220_v32 = vunpack.i.l.bf16 %v8219_v2 }
 0x2af   :  { %1655 = vrot.lane.b32.xlu0 %v10366_v44, %s9346_s3  ;;  %v10372_v50 = vld [vmem:[#allocation3 + $0xd0] sm:$0xff]  ;;  %v1236_v56 = vld [vmem:[#allocation3 + $0xd8] sm:$0x3]  ;;  %v1318_v40 = vrot.slane %v1238_v62, 1  ;;  %v1413_v46 = vrot.slane %v10366_v44, 2  ;;  %v1414_v21 = vrot.slane %v1238_v62, 2 }
 0x2b0   :  { %1990 = vmatmul.mubr.f32.gmra.mrb[18].mxu1 %v1848_v47  ;;  %v8342_v55 = vpack.i.bf16 %v10372_v50, %v10317_v18  ;;  %v1314_v49 = vrot.slane %v10372_v50, 1  ;;  %v1315_v57 = vrot.slane %v1236_v56, 1  ;;  %v8347_v58 = vpack.i.bf16 %v10366_v44, %v10372_v50  ;;  %v8229_v28 = vpop.permute.xlu0 %8228 }
 0x2b1   :  { %7298 = vmatprep.mubr.msk.f32.mxu1 %vm910_vm4, %v10225_v52  ;;  %v1410_v59 = vrot.slane %v10372_v50, 2  ;;  %v1411_v60 = vrot.slane %v1236_v56, 2  ;;  %v1317_v52 = vrot.slane %v10366_v44, 1  ;;  %v1747_v12 = vsel %vm910_vm4, %v10129_v8, %v8220_v32  ;;  %v8234_v34 = vpop.permute.xlu1 %8233 }
 0x2b2   :  { %8343 = vrot.lane.b32.xlu1 %v8342_v55, %s9346_s3  ;;  %v1316_v0 = vsel %vm278_vm3, %v1314_v49, %v1315_v57  ;;  %v1764_v22 = vsel %vm1761_vm14, %v1747_v12, %v8225_v13  ;;  %v8230_v15 = vunpack.i.l.bf16 %v8229_v28  ;;  %v10410_v41 = vsel %vm375_vm2, %v1413_v46, %v1414_v21 }
 0x2b3   :  { %v8352_v5 = vpack.i.bf16 %v1316_v0, %v10333_v48  ;;  %v10388_v6 = vsel %vm375_vm2, %v1410_v59, %v1411_v60  ;;  %v1319_v11 = vsel %vm278_vm3, %v1317_v52, %v1318_v40  ;;  %v8221_v48 = vunpack.i.h.bf16 %v8219_v2 }
 0x2b4   :  { %v8362_v9 = vpack.i.bf16 %v10388_v6, %v10337_v53  ;;  %v8367_v16 = vpack.i.bf16 %v1319_v11, %v1316_v0  ;;  %v1781_v38 = vsel %vm1778_vm15, %v1764_v22, %v8210_v25  ;;  %v8235_v43 = vunpack.i.l.bf16 %v8234_v34 }
 0x2b5   :  { %8353 = vrot.lane.b32.xlu0 %v8352_v5, %s9347_s24  ;;  %v1748_v8 = vsel %vm910_vm4, %v10201_v29, %v8221_v48  ;;  %v8211_v29 = vunpack.i.h.bf16 %v8209_v51  ;;  %v8231_v47 = vunpack.i.h.bf16 %v8229_v28  ;;  %v1798_v55 = vsel %vm1795_vm0, %v1781_v38, %v8230_v15 }
 0x2b6   :  { %8348 = vrot.lane.b32.xlu1 %v8347_v58, %s9342_s30  ;;  %v1765_v42 = vsel %vm1761_vm14, %v1748_v8, %v8226_v33  ;;  %v8236_v58 = vunpack.i.h.bf16 %v8234_v34  ;;  %v1815_v60 = vsel %vm1812_vm1, %v1798_v55, %v8235_v43 }
 0x2b7   :  { %v1782_v49 = vsel %vm1778_vm15, %v1765_v42, %v8211_v29 }
 0x2b8   :  { %v1799_v62 = vsel %vm1795_vm0, %v1782_v49, %v8231_v47 }
 0x2b9   :  { %8363 = vrot.lane.b32.xlu0 %v8362_v9, %s9343_s27  ;;  %v1816_v32 = vsel %vm1812_vm1, %v1799_v62, %v8236_v58 }
 0x2ba   :  { %8358 = vrot.lane.b32.xlu1 %v8352_v5, %s9340_s5 }
 0x2bd   :  { %8368 = vrot.lane.b32.xlu0 %v8367_v16, %s9344_s0 }
 0x2be   :  { %1605 = vrot.lane.b32.xlu1 %v10388_v6, %s9345_s2 }
 0x2bf   :  { %v7934_v19 = vpop.f32.mrb[12].mxu1 }
 0x2c0   :  { %v1122_v23 = vadd.f32 %v7934_v19, %v10092_v14  ;;  %v1116_v24 = vpop.f32.mrb[13].mxu1 }
 0x2c1   :  { %v1117_v30 = vadd.f32 %v10092_v14, %v1116_v24  ;;  %1607 = vrot.lane.b32.xlu0 %v10410_v41, %s9345_s2 }
 0x2c2   :  { %v1148_v35 = vmax.f32 %v1122_v23, 0.0  ;;  %1711 = vrot.lane.b32.xlu1 %v1319_v11, %s9347_s24 }
 0x2c3   :  { %v1147_v39 = vmax.f32 %v1117_v30, 0.0 }
 0x2c4   :  { %1206 = vst.msk [vmem:[#allocation3 + $0x101] sm:$0xff] %vm910_vm4, %v1148_v35 }
 0x2c5   :  { %1205 = vst.msk [vmem:[#allocation3 + $0xf1] sm:$0xff] %vm910_vm4, %v1147_v39  ;;  %v8239_v45 = vpop.permute.xlu0 %8238 }
 0x2c6   :  { %v8240_v56 = vunpack.i.l.bf16 %v8239_v45  ;;  %v8241_v0 = vunpack.i.h.bf16 %v8239_v45 }
 0x2c8   :  { %v8249_v57 = vpop.permute.xlu1 %8248  ;;  %v1832_v51 = vsel %vm1829_vm5, %v1815_v60, %v8240_v56  ;;  %v1833_v12 = vsel %vm1829_vm5, %v1816_v32, %v8241_v0 }
 0x2c9   :  { %v8250_v59 = vunpack.i.l.bf16 %v8249_v57  ;;  %v8251_v2 = vunpack.i.h.bf16 %v8249_v57  ;;  %v8244_v52 = vpop.permute.xlu0 %8243 }
 0x2ca   :  { %v8245_v38 = vunpack.i.l.bf16 %v8244_v52  ;;  %v8246_v49 = vunpack.i.h.bf16 %v8244_v52 }
 0x2cb   :  { %v1849_v5 = vsel %vm1846_vm6, %v1832_v51, %v8250_v59  ;;  %v1850_v13 = vsel %vm1846_vm6, %v1833_v12, %v8251_v2  ;;  %v1241_v22 = vld [vmem:[#allocation3 + $0x100] sm:$0xff]  ;;  %v1242_v23 = vld [vmem:[#allocation3 + $0x108] sm:$0x3] }
 0x2cc   :  { %1995 = vmatmul.mubr.f32.gmra.mrb[20].mxu1 %v1849_v5  ;;  %v10423_v40 = vld [vmem:[#allocation3 + $0xf0] sm:$0xff]  ;;  %v1240_v7 = vld [vmem:[#allocation3 + $0xf8] sm:$0x3]  ;;  %v8259_v46 = vpop.permute.xlu1 %8258  ;;  %v1324_v24 = vrot.slane %v1242_v23, 1  ;;  %v1419_v5 = vrot.slane %v1241_v22, 2 }
 0x2cd   :  { %7299 = vmatprep.mubr.msk.f32.mxu1 %vm910_vm4, %v10249_v10  ;;  %1657 = vrot.lane.b32.xlu1 %v10423_v40, %s9346_s3  ;;  %v1320_v9 = vrot.slane %v10423_v40, 1  ;;  %v1321_v48 = vrot.slane %v1240_v7, 1  ;;  %v8254_v10 = vpop.permute.xlu0 %8253  ;;  %v1416_v28 = vrot.slane %v10423_v40, 2  ;;  %v1417_v19 = vrot.slane %v1240_v7, 2 }
 0x2ce   :  { %v8255_v21 = vunpack.i.l.bf16 %v8254_v10  ;;  %v8256_v25 = vunpack.i.h.bf16 %v8254_v10  ;;  %v8260_v30 = vunpack.i.l.bf16 %v8259_v46  ;;  %v1420_v7 = vrot.slane %v1242_v23, 2 }
 0x2cf   :  { %v1322_v16 = vsel %vm278_vm3, %v1320_v9, %v1321_v48 }
 0x2d0   :  { %2000 = vmatmul.mubr.f32.gmra.mrb[22].mxu1 %v1850_v13  ;;  %1713 = vrot.lane.b32.xlu0 %v1322_v16, %s9347_s24  ;;  %v1749_v8 = vsel %vm910_vm4, %v10206_v36, %v8255_v21  ;;  %v8264_v33 = vpop.permute.xlu1 %8263  ;;  %v1750_v39 = vsel %vm910_vm4, %v10236_v61, %v8256_v25  ;;  %v8261_v36 = vunpack.i.h.bf16 %v8259_v46 }
 0x2d1   :  { %7300 = vmatprep.mubr.msk.f32.mxu1 %vm910_vm4, %v10260_v17  ;;  %1353 = vrot.lane.b32.xlu1 %v1319_v11, %s9340_s5  ;;  %v10445_v17 = vsel %vm375_vm2, %v1416_v28, %v1417_v19  ;;  %v1323_v11 = vrot.slane %v1241_v22, 1  ;;  %v1766_v15 = vsel %vm1761_vm14, %v1749_v8, %v8260_v30  ;;  %v8269_v34 = vpop.permute.xlu0 %8268  ;;  %v8265_v42 = vunpack.i.l.bf16 %v8264_v33 }
 0x2d2   :  { %v1783_v29 = vsel %vm1778_vm15, %v1766_v15, %v8245_v38  ;;  %v1767_v45 = vsel %vm1761_vm14, %v1750_v39, %v8261_v36  ;;  %v8270_v57 = vunpack.i.l.bf16 %v8269_v34  ;;  %v8266_v59 = vunpack.i.h.bf16 %v8264_v33 }
 0x2d3   :  { %v10454_v35 = vsel %vm278_vm3, %v1323_v11, %v1324_v24  ;;  %v1800_v60 = vsel %vm1795_vm0, %v1783_v29, %v8265_v42  ;;  %v1784_v51 = vsel %vm1778_vm15, %v1767_v45, %v8246_v49  ;;  %v10480_v19 = vsel %vm375_vm2, %v1419_v5, %v1420_v7 }
 0x2d4   :  { %1449 = vrot.lane.b32.xlu0 %v10410_v41, %s9343_s27  ;;  %v1817_v48 = vsel %vm1812_vm1, %v1800_v60, %v8270_v57  ;;  %v1801_v12 = vsel %vm1795_vm0, %v1784_v51, %v8266_v59  ;;  %v1739_v38 = vrot.slane %v10271_v26, 2  ;;  %v1740_v29 = vrot.slane %v10273_v27, 2 }
 0x2d5   :  { %1499 = vrot.lane.b32.xlu1 %v10423_v40, %s9342_s30 }
 0x2d8   :  { %1555 = vrot.lane.b32.xlu0 %v1322_v16, %s9344_s0 }
 0x2d9   :  { %1609 = vrot.lane.b32.xlu1 %v10445_v17, %s9345_s2 }
 0x2dc   :  { %1659 = vrot.lane.b32.xlu0 %v1241_v22, %s9346_s3 }
 0x2dd   :  { %1715 = vrot.lane.b32.xlu1 %v10454_v35, %s9347_s24 }
 0x2df   :  { %v7937_v43 = vpop.f32.mrb[14].mxu1 }
 0x2e0   :  { %v1132_v47 = vadd.f32 %v7937_v43, %v10092_v14  ;;  %1501 = vrot.lane.b32.xlu0 %v1241_v22, %s9342_s30  ;;  %v1126_v55 = vpop.f32.mrb[15].mxu1  ;;  %v10464_v56 = vpop.permute.xlu0 %8273 }
 0x2e1   :  { %v1127_v61 = vadd.f32 %v10092_v14, %v1126_v55  ;;  %v8279_v58 = vpop.permute.xlu1 %8278  ;;  %1557 = vrot.lane.b32.xlu1 %v10454_v35, %s9344_s0  ;;  %v8271_v14 = vunpack.i.h.bf16 %v8269_v34  ;;  %v8276_v5 = vunpack.i.h.bf16 %v10464_v56 }
 0x2e2   :  { %v1150_v62 = vmax.f32 %v1132_v47, 0.0  ;;  %v8280_v0 = vunpack.i.l.bf16 %v8279_v58  ;;  %v8281_v13 = vunpack.i.h.bf16 %v8279_v58 }
 0x2e3   :  { %v1149_v2 = vmax.f32 %v1127_v61, 0.0  ;;  %v1818_v22 = vsel %vm1812_vm1, %v1801_v12, %v8271_v14 }
 0x2e4   :  { %1208 = vst.msk [vmem:[#allocation3 + $0x121] sm:$0xff] %vm910_vm4, %v1150_v62  ;;  %1355 = vrot.lane.b32.xlu0 %v1322_v16, %s9340_s5  ;;  %v8294_v52 = vpop.permute.xlu0 %8293  ;;  %v1834_v10 = vsel %vm1829_vm5, %v1817_v48, %v8280_v0  ;;  %v1835_v23 = vsel %vm1829_vm5, %v1818_v22, %v8281_v13 }
 0x2e5   :  { %1207 = vst.msk [vmem:[#allocation3 + $0x111] sm:$0xff] %vm910_vm4, %v1149_v2  ;;  %v8295_v32 = vunpack.i.l.bf16 %v8294_v52  ;;  %v8284_v9 = vpop.permute.xlu1 %8283  ;;  %1451 = vrot.lane.b32.xlu1 %v10445_v17, %s9343_s27  ;;  %v8296_v28 = vunpack.i.h.bf16 %v8294_v52  ;;  %v1741_v52 = vsel %vm375_vm2, %v1739_v38, %v1740_v29 }
 0x2e6   :  { %v8286_v43 = vunpack.i.h.bf16 %v8284_v9  ;;  %v8285_v45 = vunpack.i.l.bf16 %v8284_v9 }
 0x2e7   :  { %v1851_v16 = vsel %vm1846_vm6, %v1834_v10, %v8295_v32  ;;  %v1852_v11 = vsel %vm1846_vm6, %v1835_v23, %v8296_v28 }
 0x2e8   :  { %1611 = vrot.lane.b32.xlu0 %v10480_v19, %s9345_s2  ;;  %v8304_v46 = vpop.permute.xlu0 %8303  ;;  %2005 = vmatmul.mubr.f32.gmra.mrb[24].mxu1 %v1851_v16 }
 0x2e9   :  { %v8289_v21 = vpop.permute.xlu1 %8288  ;;  %7301 = vmatprep.mubr.msk.f32.mxu1 %vm910_vm4, %v10289_v54  ;;  %v8306_v39 = vunpack.i.h.bf16 %v8304_v46  ;;  %v8305_v36 = vunpack.i.l.bf16 %v8304_v46 }
 0x2ea   :  { %v8290_v0 = vunpack.i.l.bf16 %v8289_v21  ;;  %v8291_v9 = vunpack.i.h.bf16 %v8289_v21 }
 0x2ec   :  { %2010 = vmatmul.mubr.f32.gmra.mrb[26].mxu1 %v1852_v11  ;;  %v10490_v24 = vld [vmem:[#allocation3 + $0x110] sm:$0xff]  ;;  %v10492_v25 = vld [vmem:[#allocation3 + $0x118] sm:$0x3]  ;;  %v8309_v33 = vpop.permute.xlu0 %8308 }
 0x2ed   :  { %v8299_v8 = vpop.permute.xlu1 %8298  ;;  %1661 = vrot.lane.b32.xlu1 %v10490_v24, %s9346_s3  ;;  %7302 = vmatprep.mubr.msk.f32.mxu1 %vm910_vm4, %v10301_v63  ;;  %v1326_v54 = vrot.slane %v10490_v24, 1  ;;  %v1327_v30 = vrot.slane %v10492_v25, 1  ;;  %v8311_v55 = vunpack.i.h.bf16 %v8309_v33  ;;  %v8310_v26 = vunpack.i.l.bf16 %v8309_v33 }
 0x2ee   :  { %v8301_v15 = vunpack.i.h.bf16 %v8299_v8  ;;  %v8300_v34 = vunpack.i.l.bf16 %v8299_v8 }
 0x2ef   :  { %v10502_v42 = vsel %vm278_vm3, %v1326_v54, %v1327_v30 }
 0x2f0   :  { %v1752_v63 = vsel %vm910_vm4, %v10277_v37, %v8301_v15  ;;  %v1751_v47 = vsel %vm910_vm4, %v10241_v3, %v8300_v34  ;;  %1717 = vrot.lane.b32.xlu0 %v10502_v42, %s9347_s24  ;;  %v8275_v37 = vunpack.i.l.bf16 %v10464_v56 }
 0x2f1   :  { %v1768_v49 = vsel %vm1761_vm14, %v1751_v47, %v8305_v36  ;;  %v1769_v57 = vsel %vm1761_vm14, %v1752_v63, %v8306_v39  ;;  %v8314_v61 = vpop.permute.xlu1 %8313 }
 0x2f2   :  { %v8316_v58 = vunpack.i.h.bf16 %v8314_v61  ;;  %v8315_v27 = vunpack.i.l.bf16 %v8314_v61  ;;  %v1785_v59 = vsel %vm1778_vm15, %v1768_v49, %v8285_v45  ;;  %v1786_v60 = vsel %vm1778_vm15, %v1769_v57, %v8286_v43 }
 0x2f3   :  { %v1802_v3 = vsel %vm1795_vm0, %v1785_v59, %v8310_v26  ;;  %v1803_v62 = vsel %vm1795_vm0, %v1786_v60, %v8311_v55 }
 0x2f4   :  { %v1819_v51 = vsel %vm1812_vm1, %v1802_v3, %v8315_v27  ;;  %v1820_v2 = vsel %vm1812_vm1, %v1803_v62, %v8316_v58 }
 0x2f5   :  { %v1836_v7 = vsel %vm1829_vm5, %v1819_v51, %v8275_v37  ;;  %v1837_v32 = vsel %vm1829_vm5, %v1820_v2, %v8276_v5 }
 0x2f6   :  { %v1853_v14 = vsel %vm1846_vm6, %v1836_v7, %v8290_v0  ;;  %v1854_v48 = vsel %vm1846_vm6, %v1837_v32, %v8291_v9 }
 0x2f7   :  { %2015 = vmatmul.mubr.f32.gmra.mrb[28].mxu1 %v1853_v14 }
 0x2f8   :  { %7303 = vmatprep.mubr.msk.f32.mxu1 %vm910_vm4, %v1741_v52 }
 0x2fb   :  { %2020 = vmatmul.mubr.f32.gmra.mrb[30].mxu1 %v1854_v48 }
 0x2fc   :  { %7304 = vmatprep.mubr.msk.f32.mxu1 %vm910_vm4, %v10337_v53 }
 0x308   :  { %v8319_v12 = vpop.permute.xlu0 %8318 }
 0x309   :  { %v8320_v11 = vunpack.i.l.bf16 %v8319_v12  ;;  %v8321_v38 = vunpack.i.h.bf16 %v8319_v12 }
 0x30b   :  { %v8329_v13 = vpop.permute.xlu1 %8328 }
 0x30c   :  { %v8324_v56 = vpop.permute.xlu0 %8323  ;;  %v8330_v46 = vunpack.i.l.bf16 %v8329_v13  ;;  %v8331_v54 = vunpack.i.h.bf16 %v8329_v13 }
 0x30d   :  { %v8325_v10 = vunpack.i.l.bf16 %v8324_v56  ;;  %v8326_v28 = vunpack.i.h.bf16 %v8324_v56 }
 0x30f   :  { %v1753_v16 = vsel %vm910_vm4, %v10311_v4, %v8325_v10  ;;  %v8334_v22 = vpop.permute.xlu1 %8333  ;;  %v1754_v8 = vsel %vm910_vm4, %v10319_v20, %v8326_v28 }
 0x310   :  { %v1770_v21 = vsel %vm1761_vm14, %v1753_v16, %v8330_v46  ;;  %v8339_v23 = vpop.permute.xlu0 %8338  ;;  %v8335_v30 = vunpack.i.l.bf16 %v8334_v22  ;;  %v1771_v15 = vsel %vm1761_vm14, %v1754_v8, %v8331_v54  ;;  %v8336_v4 = vunpack.i.h.bf16 %v8334_v22 }
 0x311   :  { %v1787_v33 = vsel %vm1778_vm15, %v1770_v21, %v8320_v11  ;;  %v8340_v39 = vunpack.i.l.bf16 %v8339_v23  ;;  %v1788_v45 = vsel %vm1778_vm15, %v1771_v15, %v8321_v38  ;;  %v8341_v47 = vunpack.i.h.bf16 %v8339_v23 }
 0x312   :  { %v1804_v36 = vsel %vm1795_vm0, %v1787_v33, %v8335_v30  ;;  %v1805_v26 = vsel %vm1795_vm0, %v1788_v45, %v8336_v4 }
 0x313   :  { %v1821_v55 = vsel %vm1812_vm1, %v1804_v36, %v8340_v39  ;;  %v1822_v62 = vsel %vm1812_vm1, %v1805_v26, %v8341_v47  ;;  %v1422_v36 = vrot.slane %v10490_v24, 2 }
 0x321   :  { %v1656_v34 = vpop.permute.xlu0 %1655 }
 0x324   :  { %v8344_v53 = vpop.permute.xlu1 %8343 }
 0x325   :  { %v8345_v29 = vunpack.i.l.bf16 %v8344_v53  ;;  %v8346_v49 = vunpack.i.h.bf16 %v8344_v53 }
 0x327   :  { %v8354_v63 = vpop.permute.xlu0 %8353  ;;  %v1838_v57 = vsel %vm1829_vm5, %v1821_v55, %v8345_v29  ;;  %v1839_v51 = vsel %vm1829_vm5, %v1822_v62, %v8346_v49  ;;  %v1423_v29 = vrot.slane %v10492_v25, 2 }
 0x328   :  { %v8349_v43 = vpop.permute.xlu1 %8348  ;;  %v8355_v20 = vunpack.i.l.bf16 %v8354_v63  ;;  %v8356_v58 = vunpack.i.h.bf16 %v8354_v63 }
 0x329   :  { %v8350_v0 = vunpack.i.l.bf16 %v8349_v43  ;;  %v8351_v16 = vunpack.i.h.bf16 %v8349_v43  ;;  %v10579_v47 = vsel %vm375_vm2, %v1422_v36, %v1423_v29  ;;  %v8383_v29 = vld [vmem:[#allocation10 + $0x730] ss:$8 sps:$4 sm:$0xff]  }
 0x32a   :  { %v1855_v27 = vsel %vm1846_vm6, %v1838_v57, %v8355_v20  ;;  %v1856_v7 = vsel %vm1846_vm6, %v1839_v51, %v8356_v58  ;;  %v10588_v58 = vld [vmem:[#allocation3 + $0x120] sm:$0xff] }
 0x32b   :  { %v8364_v60 = vpop.permute.xlu0 %8363  ;;  %2025 = vmatmul.mubr.f32.gmra.mrb[32].mxu1 %v1855_v27  ;;  %v10590_v27 = vld [vmem:[#allocation3 + $0x128] sm:$0x3] }
 0x32c   :  { %v8359_v61 = vpop.permute.xlu1 %8358  ;;  %v8365_v37 = vunpack.i.l.bf16 %v8364_v60  ;;  %7305 = vmatprep.mubr.msk.f32.mxu1 %vm910_vm4, %v10388_v6  ;;  %v8366_v12 = vunpack.i.h.bf16 %v8364_v60 }
 0x32d   :  { %v8360_v59 = vunpack.i.l.bf16 %v8359_v61  ;;  %v8361_v5 = vunpack.i.h.bf16 %v8359_v61 }
 0x32f   :  { %v1755_v3 = vsel %vm910_vm4, %v10317_v18, %v8360_v59  ;;  %v8369_v14 = vpop.permute.xlu0 %8368  ;;  %2030 = vmatmul.mubr.f32.gmra.mrb[34].mxu1 %v1856_v7  ;;  %v1756_v18 = vsel %vm910_vm4, %v10372_v50, %v8361_v5 }
 0x330   :  { %v1606_v2 = vpop.permute.xlu1 %1605  ;;  %v1772_v52 = vsel %vm1761_vm14, %v1755_v3, %v8365_v37  ;;  %v8370_v9 = vunpack.i.l.bf16 %v8369_v14  ;;  %7306 = vmatprep.mubr.msk.f32.mxu1 %vm910_vm4, %v10410_v41  ;;  %v1773_v10 = vsel %vm1761_vm14, %v1756_v18, %v8366_v12  ;;  %v8371_v46 = vunpack.i.h.bf16 %v8369_v14 }
 0x331   :  { %v1789_v32 = vsel %vm1778_vm15, %v1772_v52, %v8350_v0  ;;  %v1790_v50 = vsel %vm1778_vm15, %v1773_v10, %v8351_v16  ;;  %v1582_v37 = vrot.slane %v10588_v58, 2  ;;  %v1583_v3 = vrot.slane %v10590_v27, 2 }
 0x332   :  { %v1806_v6 = vsel %vm1795_vm0, %v1789_v32, %v8370_v9  ;;  %v1807_v22 = vsel %vm1795_vm0, %v1790_v50, %v8371_v46 }
 0x333   :  { %v1823_v56 = vsel %vm1812_vm1, %v1806_v6, %v1606_v2  ;;  %v1608_v41 = vpop.permute.xlu0 %1607  ;;  %v10598_v2 = vsel %vm375_vm2, %v1582_v37, %v1583_v3  ;;  %v8390_v37 = vld [vmem:[#allocation10 + $0x764] ss:$8 sps:$4 sm:$0xff]  }
 0x334   :  { %v1712_v48 = vpop.permute.xlu1 %1711  ;;  %v1840_v13 = vsel %vm1829_vm5, %v1823_v56, %v1656_v34  ;;  %v1824_v23 = vsel %vm1812_vm1, %v1807_v22, %v1608_v41  ;;  %v8372_v41 = vld [vmem:[#allocation10 + $0x704] ss:$8 sps:$4 sm:$0xff]   ;;  %v8374_v22 = vld [vmem:[#allocation10 + $0x700] ss:$8 sps:$4 sm:$0xff]  }
 0x335   :  { %v1857_v28 = vsel %vm1846_vm6, %v1840_v13, %v1712_v48  ;;  %6604 = vmatprep.subr.bf16.mxu0 %v8372_v41 }
 0x336   :  { %2035 = vmatmul.mubr.f32.gmra.mrb[36].mxu1 %v1857_v28  ;;  %6605 = vmatpush1.bf16.msra.mxu0 %v8374_v22  ;;  %v8399_v22 = vld [vmem:[#allocation10 + $0x784] ss:$8 sps:$4 sm:$0xff]  }
 0x337   :  { %7307 = vmatprep.mubr.msk.f32.mxu1 %vm910_vm4, %v10445_v17 }
 0x33f   :  { %v1658_v21 = vpop.permute.xlu1 %1657 }
 0x340   :  { %v1841_v11 = vsel %vm1829_vm5, %v1824_v23, %v1658_v21  ;;  %v8375_v21 = vld [vmem:[#allocation10 + $0x714] ss:$8 sps:$4 sm:$0xff]   ;;  %v8377_v23 = vld [vmem:[#allocation10 + $0x710] ss:$8 sps:$4 sm:$0xff]  }
 0x341   :  { %6606 = vmatprep.subr.bf16.mxu0 %v8375_v21 }
 0x342   :  { %v1714_v8 = vpop.permute.xlu0 %1713  ;;  %6607 = vmatpush1.bf16.msra.mxu0 %v8377_v23 }
 0x343   :  { %v1354_v54 = vpop.permute.xlu1 %1353  ;;  %v1858_v30 = vsel %vm1846_vm6, %v1841_v11, %v1714_v8  ;;  %v8378_v11 = vld [vmem:[#allocation10 + $0x724] ss:$8 sps:$4 sm:$0xff]   ;;  %v8396_v8 = vld [vmem:[#allocation10] ss:$8 sps:$4 sm:$0xff]  }
 0x344   :  { %2040 = vmatmul.mubr.f32.gmra.mrb[38].mxu1 %v1858_v30  ;;  %v1757_v17 = vsel %vm910_vm4, %v10366_v44, %v1354_v54  ;;  %v8398_v54 = vld [vmem:[#allocation10 + $0x4] ss:$8 sps:$4 sm:$0xff]   ;;  %v10613_v30 = vld [vmem:[#allocation8] ss:$0 sm:$0xff]  ;;  %6608 = vmatprep.subr.bf16.mxu0 %v8378_v11 }
 0x345   :  { %7308 = vmatprep.mubr.msk.f32.mxu1 %vm910_vm4, %v10480_v19  ;;  %6317 = vmatprep.subr.bf16.mxu1 %v8398_v54 }
 0x346   :  { %v1450_v53 = vpop.permute.xlu0 %1449  ;;  %6318 = vmatpush1.bf16.msra.mxu1 %v8396_v8 }
 0x347   :  { %v1774_v33 = vsel %vm1761_vm14, %v1757_v17, %v1450_v53  ;;  %v1500_v15 = vpop.permute.xlu1 %1499  ;;  %v8380_v17 = vld [vmem:[#allocation10 + $0x720] ss:$8 sps:$4 sm:$0xff]   ;;  %v8404_v53 = vld [vmem:[#allocation10 + $0x14] ss:$8 sps:$4 sm:$0xff]  }
 0x348   :  { %v1791_v34 = vsel %vm1778_vm15, %v1774_v33, %v1500_v15  ;;  %v8381_v33 = vld [vmem:[#allocation10 + $0x734] ss:$8 sps:$4 sm:$0xff]   ;;  %v8402_v15 = vld [vmem:[#allocation10 + $0x10] ss:$8 sps:$4 sm:$0xff]   ;;  %6319 = vmatprep.subr.bf16.mxu1 %v8404_v53  ;;  %6609 = vmatpush1.bf16.msra.mxu0 %v8380_v17 }
 0x349   :  { %6610 = vmatprep.subr.bf16.mxu0 %v8381_v33 }
 0x34a   :  { %v1556_v38 = vpop.permute.xlu0 %1555  ;;  %6320 = vmatpush1.bf16.msra.mxu1 %v8402_v15 }
 0x34b   :  { %v1808_v39 = vsel %vm1795_vm0, %v1791_v34, %v1556_v38  ;;  %v1610_v4 = vpop.permute.xlu1 %1609  ;;  %v9348_v34 = vmov 1983009808  }
 0x34c   :  { %v1825_v43 = vsel %vm1812_vm1, %v1808_v39, %v1610_v4  ;;  %v2084_v38 = vunpack.c.l.s4 %v9348_v34  ;;  %v2086_v39 = vlaneseq  ;;  %v8410_v4 = vld [vmem:[#allocation10 + $0x24] ss:$8 sps:$4 sm:$0xff]   ;;  %6611 = vmatpush1.bf16.msra.mxu0 %v8383_v29 }
 0x34d   :  { %6321 = vmatprep.subr.bf16.mxu1 %v8410_v4  ;;  %v8401_v4 = vld [vmem:[#allocation10 + $0x780] ss:$8 sps:$4 sm:$0xff]  }
 0x34e   :  { %v1660_v45 = vpop.permute.xlu0 %1659 }
 0x34f   :  { %v1842_v63 = vsel %vm1829_vm5, %v1825_v43, %v1660_v45  ;;  %v1716_v44 = vpop.permute.xlu1 %1715  ;;  %v8384_v43 = vld [vmem:[#allocation10 + $0x744] ss:$8 sps:$4 sm:$0xff]   ;;  %v8408_v45 = vld [vmem:[#allocation10 + $0x20] ss:$8 sps:$4 sm:$0xff]  }
 0x350   :  { %v1859_v20 = vsel %vm1846_vm6, %v1842_v63, %v1716_v44  ;;  %v2085_v63 = vunpack.c.0.s8 %v2084_v38  ;;  %v10616_v44 = vshrl.u32 %v2086_v39, 7  ;;  %6612 = vmatprep.subr.bf16.mxu0 %v8384_v43  ;;  %6322 = vmatpush1.bf16.msra.mxu1 %v8408_v45  ;;  %v8405_v45 = vld [vmem:[#allocation10 + $0x794] ss:$8 sps:$4 sm:$0xff]  }
 0x351   :  { %2045 = vmatmul.mubr.f32.gmra.mrb[40].mxu1 %v1859_v20 }
 0x352   :  { %v1502_v55 = vpop.permute.xlu0 %1501  ;;  %7309 = vmatprep.mubr.msk.f32.mxu1 %vm910_vm4, %v10579_v47 }
 0x353   :  { %v1558_v26 = vpop.permute.xlu1 %1557 }
 0x356   :  { %v1356_v24 = vpop.permute.xlu0 %1355 }
 0x357   :  { %v1758_v25 = vsel %vm910_vm4, %v10423_v40, %v1356_v24  ;;  %v1452_v49 = vpop.permute.xlu1 %1451  ;;  %v8386_v24 = vld [vmem:[#allocation10 + $0x740] ss:$8 sps:$4 sm:$0xff]  }
 0x358   :  { %v1775_v57 = vsel %vm1761_vm14, %v1758_v25, %v1452_v49  ;;  %v8387_v25 = vld [vmem:[#allocation10 + $0x754] ss:$8 sps:$4 sm:$0xff]   ;;  %v10621_v49 = vsub.s32 %v2085_v63, %v10616_v44  ;;  %6613 = vmatpush1.bf16.msra.mxu0 %v8386_v24 }
 0x359   :  { %v1792_v61 = vsel %vm1778_vm15, %v1775_v57, %v1502_v55  ;;  %6614 = vmatprep.subr.bf16.mxu0 %v8387_v25 }
 0x35a   :  { %v1809_v59 = vsel %vm1795_vm0, %v1792_v61, %v1558_v26  ;;  %v1612_v60 = vpop.permute.xlu0 %1611 }
 0x35b   :  { %v1826_v0 = vsel %vm1812_vm1, %v1809_v59, %v1612_v60  ;;  %v8389_v60 = vld [vmem:[#allocation10 + $0x750] ss:$8 sps:$4 sm:$0xff]  }
 0x35c   :  { %6615 = vmatpush1.bf16.msra.mxu0 %v8389_v60 }
 0x35d   :  { %6616 = vmatprep.subr.bf16.mxu0 %v8390_v37 }
 0x35f   :  { %v1662_v62 = vpop.permute.xlu1 %1661 }
 0x360   :  { %v1843_v40 = vsel %vm1829_vm5, %v1826_v0, %v1662_v62 }
 0x362   :  { %v1718_v51 = vpop.permute.xlu0 %1717 }
 0x363   :  { %v1860_v5 = vsel %vm1846_vm6, %v1843_v40, %v1718_v51 }
 0x364   :  { %2050 = vmatmul.mubr.f32.gmra.mrb[42].mxu1 %v1860_v5  ;;  %v8392_v5 = vld [vmem:[#allocation10 + $0x760] ss:$8 sps:$4 sm:$0xff]  }
 0x365   :  { %7310 = vmatprep.mubr.msk.f32.mxu1 %vm910_vm4, %v10598_v2  ;;  %6617 = vmatpush1.bf16.msra.mxu0 %v8392_v5 }
 0x37f   :  { %v1986_v7 = vpop.f32.mrb[16].mxu1 }
 0x380   :  { %v1988_v52 = vpop.f32.mrb[17].mxu1  ;;  %v1987_v36 = vadd.f32 %v10613_v30, %v1986_v7 }
 0x381   :  { %v1528_v52 = vrot.slane %v10588_v58, 1 }
 0x382   :  { %v2065_v55 = vmax.f32 %v1987_v36, 0.0 }
 0x383   :  { %v1991_v14 = vpop.f32.mrb[18].mxu1 }
 0x384   :  { %v1993_v32 = vpop.f32.mrb[19].mxu1  ;;  %v1992_v20 = vadd.f32 %v10613_v30, %v1991_v14  ;;  %v2147_v61 = vcombine.high %v2065_v55, %v2065_v55  ;;  %v10624_v3 = vrot.slane %v2065_v55, %v10621_v49  ;;  %v1529_v14 = vrot.slane %v10590_v27, 1 }
 0x385   :  { %v8393_v32 = vld [vmem:[#allocation10 + $0x774] ss:$8 sps:$4 sm:$0xff]  }
 0x386   :  { %v2066_v57 = vmax.f32 %v1992_v20, 0.0  ;;  %v10627_v0 = vrot.slane %v2147_v61, %v10621_v49  ;;  %6618 = vmatprep.subr.bf16.mxu0 %v8393_v32 }
 0x388   :  { %v2263_v62 = vcombine.high %v2066_v57, %v2066_v57  ;;  %v10632_v7 = vrot.slane %v2066_v57, %v10621_v49  ;;  %v2172_v23 = vrot.slane %v10627_v0, 1 }
 0x38a   :  { %v10660_v41 = vcombine.high %v10632_v7, %v10632_v7  ;;  %v2230_v53 = vrot.slane %v10632_v7, 1 }
 0x38c   :  { %v2252_v36 = vrot.slane %v10660_v41, 1 }
 0x39f   :  { %v10603_v9 = vpop.f32.mrb[20].mxu1 }
 0x3a0   :  { %v1998_v18 = vpop.f32.mrb[21].mxu1  ;;  %v1997_v40 = vadd.f32 %v10613_v30, %v10603_v9 }
 0x3a1   :  { %v10638_v18 = vcombine.high %v10624_v3, %v10624_v3 }
 0x3a3   :  { %v2001_v6 = vpop.f32.mrb[22].mxu1  ;;  %v2136_v21 = vrot.slane %v10638_v18, 1 }
 0x3a4   :  { %v2003_v48 = vpop.f32.mrb[23].mxu1  ;;  %v2002_v26 = vadd.f32 %v10613_v30, %v2001_v6  ;;  %v10641_v6 = vrot.slane %v2263_v62, %v10621_v49 }
 0x3a5   :  { %v10647_v48 = vcombine.high %v10627_v0, %v10627_v0 }
 0x3a6   :  { %v2068_v59 = vmax.f32 %v2002_v26, 0.0  ;;  %v10669_v11 = vcombine.high %v10641_v6, %v10641_v6  ;;  %v2288_v29 = vrot.slane %v10641_v6, 1 }
 0x3a7   :  { %v2194_v17 = vrot.slane %v10647_v48, 1 }
 0x3a8   :  { %v2495_v51 = vcombine.high %v2068_v59, %v2068_v59  ;;  %v10652_v27 = vrot.slane %v2068_v59, %v10621_v49  ;;  %v2310_v63 = vrot.slane %v10669_v11, 1 }
 0x3aa   :  { %v10682_v38 = vcombine.high %v10652_v27, %v10652_v27  ;;  %v2462_v60 = vrot.slane %v10652_v27, 1 }
 0x3ac   :  { %v2484_v37 = vrot.slane %v10682_v38, 1 }
 0x3bb   :  { %v10605_v12 = vpop.f32.mrb[24].mxu1 }
 0x3bc   :  { %v2008_v56 = vpop.f32.mrb[25].mxu1  ;;  %v2007_v9 = vadd.f32 %v10613_v30, %v10605_v12  ;;  %v10663_v12 = vsel %vm278_vm3, %v1528_v52, %v1529_v14 }
 0x3bd   :  { %v10649_v56 = vmax.f32 %v1997_v40, 0.0 }
 0x3be   :  { %v10671_v8 = vmax.f32 %v2007_v9, 0.0  ;;  %v8411_v9 = vld [vmem:[#allocation10 + $0x7a4] ss:$8 sps:$4 sm:$0xff]  }
 0x3bf   :  { %v10607_v13 = vpop.f32.mrb[26].mxu1  ;;  %v10677_v33 = vrot.slane %v10649_v56, %v10621_v49 }
 0x3c0   :  { %v2013_v10 = vpop.f32.mrb[27].mxu1  ;;  %v10695_v55 = vrot.slane %v10671_v8, %v10621_v49 }
 0x3c1   :  { %v10655_v10 = vrot.slane %v2495_v51, %v10621_v49  ;;  %v10699_v24 = vcombine.high %v10677_v33, %v10677_v33  ;;  %v8407_v51 = vld [vmem:[#allocation10 + $0x790] ss:$8 sps:$4 sm:$0xff]  }
 0x3c3   :  { %v10686_v39 = vcombine.high %v10655_v10, %v10655_v10  ;;  %v2520_v62 = vrot.slane %v10655_v10, 1 }
 0x3c5   :  { %v2542_v40 = vrot.slane %v10686_v39, 1 }
 0x3ca   :  { %v10609_v28 = vpop.f32.mrb[28].mxu1 }
 0x3cb   :  { %v2018_v16 = vpop.f32.mrb[29].mxu1 }
 0x3cc   :  { %v8395_v16 = vld [vmem:[#allocation10 + $0x770] ss:$8 sps:$4 sm:$0xff]  }
 0x3cd   :  { %6619 = vmatpush1.bf16.msra.mxu0 %v8395_v16  ;;  %v2578_v16 = vrot.slane %v10695_v55, 1 }
 0x3ce   :  { %v10611_v46 = vpop.f32.mrb[30].mxu1  ;;  %6620 = vmatprep.subr.bf16.mxu0 %v8399_v22  ;;  %v2611_v22 = vcombine.high %v10671_v8, %v10671_v8 }
 0x3cf   :  { %v2023_v50 = vpop.f32.mrb[31].mxu1 }
 0x3d0   :  { %v2113_v50 = vrot.slane %v10624_v3, 1 }
 0x3d1   :  { %6621 = vmatpush1.bf16.msra.mxu0 %v8401_v4 }
 0x3d2   :  { %6622 = vmatprep.subr.bf16.mxu0 %v8405_v45 }
 0x3d5   :  { %6623 = vmatpush1.bf16.msra.mxu0 %v8407_v51 }
 0x3d6   :  { %6624 = vmatprep.subr.bf16.mxu0 %v8411_v9 }
 0x3fe   :  { %v2026_v54 = vpop.f32.mrb[32].mxu1 }
 0x3ff   :  { %v2027_v15 = vadd.f32 %v10613_v30, %v2026_v54  ;;  %v2028_v34 = vpop.f32.mrb[33].mxu1  ;;  %v10714_v54 = vadd.f32 %v10613_v30, %v10607_v13  ;;  %v8413_v13 = vld [vmem:[#allocation10 + $0x7a0] ss:$8 sps:$4 sm:$0xff]  }
 0x400   :  { %6625 = vmatpush1.bf16.msra.mxu0 %v8413_v13 }
 0x401   :  { %v2073_v43 = vmax.f32 %v2027_v15, 0.0 }
 0x402   :  { %v2031_v26 = vpop.f32.mrb[34].mxu1 }
 0x403   :  { %v2096_v25 = vrot.slane %v2073_v43, %v10621_v49  ;;  %v2155_v57 = vcombine.high %v2073_v43, %v2073_v43  ;;  %v2032_v61 = vadd.f32 %v10613_v30, %v2031_v26  ;;  %v2033_v59 = vpop.f32.mrb[35].mxu1 }
 0x405   :  { %v2162_v5 = vrot.slane %v2155_v57, %v10621_v49  ;;  %v2074_v52 = vmax.f32 %v2032_v61, 0.0  ;;  %v2116_v14 = vsel %vm2102_vm7, %v2096_v25, %v2113_v50  ;;  %v2126_v32 = vcombine.high %v2096_v25, %v2096_v25 }
 0x406   :  { %v2117_v15 = vsel %vm2104_vm8, %v2096_v25, %v2116_v14 }
 0x407   :  { %v2220_v34 = vrot.slane %v2074_v52, %v10621_v49  ;;  %v2271_v4 = vcombine.high %v2074_v52, %v2074_v52  ;;  %v2118_v43 = vsel %vm2106_vm9, %v2096_v25, %v2117_v15  ;;  %v2139_v50 = vsel %vm2102_vm7, %v2126_v32, %v2136_v21 }
 0x408   :  { %v10721_v45 = vsel %vm2108_vm10, %v2096_v25, %v2118_v43  ;;  %v2140_v26 = vsel %vm2104_vm8, %v2126_v32, %v2139_v50  ;;  %v2175_v8 = vsel %vm2102_vm7, %v2162_v5, %v2172_v23  ;;  %v2184_v57 = vcombine.high %v2162_v5, %v2162_v5 }
 0x409   :  { %v10726_v61 = vrot.slane %v2271_v4, %v10621_v49  ;;  %v2036_v59 = vpop.f32.mrb[36].mxu1  ;;  %v2141_v52 = vsel %vm2106_vm9, %v2126_v32, %v2140_v26  ;;  %v2176_v14 = vsel %vm2104_vm8, %v2162_v5, %v2175_v8  ;;  %v2233_v21 = vsel %vm2102_vm7, %v2220_v34, %v2230_v53 }
 0x40a   :  { %v2038_v15 = vpop.f32.mrb[37].mxu1  ;;  %v10732_v43 = vsel %vm2108_vm10, %v2126_v32, %v2141_v52  ;;  %v2177_v23 = vsel %vm2106_vm9, %v2162_v5, %v2176_v14  ;;  %v2197_v51 = vsel %vm2102_vm7, %v2184_v57, %v2194_v17  ;;  %v2101_v4 = vrot.slane %v2096_v25, 7 }
 0x40b   :  { %v10739_v50 = vsel %vm2108_vm10, %v2162_v5, %v2177_v23  ;;  %v2198_v26 = vsel %vm2104_vm8, %v2184_v57, %v2197_v51  ;;  %v2234_v8 = vsel %vm2104_vm8, %v2220_v34, %v2233_v21  ;;  %v2242_v53 = vcombine.high %v2220_v34, %v2220_v34 }
 0x40c   :  { %v2037_v9 = vadd.f32 %v10613_v30, %v2036_v59  ;;  %v2199_v52 = vsel %vm2106_vm9, %v2184_v57, %v2198_v26  ;;  %v2235_v15 = vsel %vm2106_vm9, %v2220_v34, %v2234_v8  ;;  %v2291_v14 = vsel %vm2102_vm7, %v10726_v61, %v2288_v29 }
 0x40d   :  { %v10749_v17 = vsel %vm2108_vm10, %v2184_v57, %v2199_v52  ;;  %v10752_v25 = vsel %vm2108_vm10, %v2220_v34, %v2235_v15  ;;  %v2255_v21 = vsel %vm2102_vm7, %v2242_v53, %v2252_v36  ;;  %v2292_v59 = vsel %vm2104_vm8, %v10726_v61, %v2291_v14 }
 0x40e   :  { %v10761_v23 = vcombine.high %v10695_v55, %v10695_v55  ;;  %v10764_v29 = vrot.slane %v2611_v22, %v10621_v49  ;;  %v2256_v13 = vsel %vm2104_vm8, %v2242_v53, %v2255_v21  ;;  %v2293_v51 = vsel %vm2106_vm9, %v10726_v61, %v2292_v59 }
 0x40f   :  { %v2257_v26 = vsel %vm2106_vm9, %v2242_v53, %v2256_v13  ;;  %v10772_v36 = vsel %vm2108_vm10, %v10726_v61, %v2293_v51  ;;  %v2300_v8 = vcombine.high %v10726_v61, %v10726_v61  ;;  %v2103_v52 = vsel %vm2102_vm7, %v2101_v4, %v10624_v3 }
 0x410   :  { %v10778_v15 = vmax.f32 %v2037_v9, 0.0  ;;  %v10781_v22 = vsel %vm2108_vm10, %v2242_v53, %v2257_v26  ;;  %v2105_v14 = vsel %vm2104_vm8, %v2101_v4, %v2103_v52  ;;  %v2129_v21 = vrot.slane %v2126_v32, 7 }
 0x411   :  { %v2313_v59 = vsel %vm2102_vm7, %v2300_v8, %v2310_v63  ;;  %v2107_v13 = vsel %vm2106_vm9, %v2101_v4, %v2105_v14  ;;  %v2165_v51 = vrot.slane %v2162_v5, 7  ;;  %v2187_v1 = vrot.slane %v2184_v57, 7  ;;  %v8416_v14 = vld [vmem:[#allocation10 + $0x34] ss:$8 sps:$4 sm:$0xff]  }
 0x412   :  { %v2314_v31 = vsel %vm2104_vm8, %v2300_v8, %v2313_v59  ;;  %v2109_v3 = vsel %vm2108_vm10, %v2101_v4, %v2107_v13  ;;  %v2130_v9 = vsel %vm2102_vm7, %v2129_v21, %v10638_v18  ;;  %v2223_v26 = vrot.slane %v2220_v34, 7  ;;  %v8414_v4 = vld [vmem:[#allocation10 + $0x30] ss:$8 sps:$4 sm:$0xff]   ;;  %6323 = vmatprep.subr.bf16.mxu1 %v8416_v14 }
 0x413   :  { %v2315_v20 = vsel %vm2106_vm9, %v2300_v8, %v2314_v31  ;;  %2112 = vst.msk [vmem:[#allocation4] sm:$0x3] %vm2111_vm11, %v2109_v3  ;;  %v2131_v32 = vsel %vm2104_vm8, %v2129_v21, %v2130_v9  ;;  %v2166_v63 = vsel %vm2102_vm7, %v2165_v51, %v10627_v0  ;;  %v2188_v5 = vsel %vm2102_vm7, %v2187_v1, %v10647_v48  ;;  %v8417_v3 = vld [vmem:[#allocation10 + $0x7b4] ss:$8 sps:$4 sm:$0xff]   ;;  %v8419_v0 = vld [vmem:[#allocation10 + $0x7b0] ss:$8 sps:$4 sm:$0xff]  }
 0x414   :  { %v10800_v52 = vsel %vm2108_vm10, %v2300_v8, %v2315_v20  ;;  %v2132_v18 = vsel %vm2106_vm9, %v2129_v21, %v2131_v32  ;;  %v2167_v31 = vsel %vm2104_vm8, %v2165_v51, %v2166_v63  ;;  %v2189_v34 = vsel %vm2104_vm8, %v2187_v1, %v2188_v5  ;;  %6626 = vmatprep.subr.bf16.mxu0 %v8417_v3 }
 0x415   :  { %v2133_v9 = vsel %vm2108_vm10, %v2129_v21, %v2132_v18  ;;  %v2168_v48 = vsel %vm2106_vm9, %v2165_v51, %v2167_v31  ;;  %v2190_v20 = vsel %vm2106_vm9, %v2187_v1, %v2189_v34  ;;  %v2224_v5 = vsel %vm2102_vm7, %v2223_v26, %v10632_v7  ;;  %6324 = vmatpush1.bf16.msra.mxu1 %v8414_v4  ;;  %v8423_v4 = vld [vmem:[#allocation10 + $0x7c4] ss:$8 sps:$4 sm:$0xff]  }
 0x416   :  { %2135 = vst.msk [vmem:[#allocation4 + $0x2] sm:$0x3] %vm2111_vm11, %v2133_v9  ;;  %v2169_v32 = vsel %vm2108_vm10, %v2165_v51, %v2168_v48  ;;  %v2191_v63 = vsel %vm2108_vm10, %v2187_v1, %v2190_v20  ;;  %v2225_v21 = vsel %vm2104_vm8, %v2223_v26, %v2224_v5  ;;  %v10818_v14 = vrot.slane %v10726_v61, 7  ;;  %6627 = vmatpush1.bf16.msra.mxu0 %v8419_v0  ;;  %v8422_v51 = vld [vmem:[#allocation10 + $0x44] ss:$8 sps:$4 sm:$0xff]  }
 0x417   :  { %v2041_v57 = vpop.f32.mrb[38].mxu1  ;;  %2171 = vst.msk [vmem:[#allocation4 + $0x4] sm:$0x3] %vm2111_vm11, %v2169_v32  ;;  %2193 = vst.msk [vmem:[#allocation4 + $0x6] sm:$0x3] %vm2111_vm11, %v2191_v63  ;;  %v10820_v18 = vrot.slane %v2300_v8, 7  ;;  %v10824_v1 = vcombine.high %v10764_v29, %v10764_v29  ;;  %v10828_v7 = vrot.slane %v10778_v15, %v10621_v49  ;;  %v2226_v31 = vsel %vm2106_vm9, %v2223_v26, %v2225_v21 }
 0x418   :  { %v2042_v59 = vadd.f32 %v10613_v30, %v2041_v57  ;;  %v2043_v13 = vpop.f32.mrb[39].mxu1  ;;  %v2245_v57 = vrot.slane %v2242_v53, 7  ;;  %v8420_v53 = vld [vmem:[#allocation10 + $0x40] ss:$8 sps:$4 sm:$0xff]   ;;  %v2227_v3 = vsel %vm2108_vm10, %v2223_v26, %v2226_v31  ;;  %v10837_v48 = vmax.f32 %v10714_v54, 0.0  ;;  %6325 = vmatprep.subr.bf16.mxu1 %v8422_v51  ;;  %6628 = vmatprep.subr.bf16.mxu0 %v8423_v4 }
 0x419   :  { %2229 = vst.msk [vmem:[#allocation4 + $0x8] sm:$0x3] %vm2111_vm11, %v2227_v3  ;;  %v2304_v20 = vsel %vm2102_vm7, %v10820_v18, %v10669_v11  ;;  %6326 = vmatpush1.bf16.msra.mxu1 %v8420_v53  ;;  %v8429_v21 = vld [vmem:[#allocation10 + $0x7d4] ss:$8 sps:$4 sm:$0xff]  }
 0x41a   :  { %v2076_v13 = vmax.f32 %v2042_v59, 0.0  ;;  %v2246_v61 = vsel %vm2102_vm7, %v2245_v57, %v10660_v41  ;;  %v8425_v59 = vld [vmem:[#allocation10 + $0x7c0] ss:$8 sps:$4 sm:$0xff]   ;;  %v2282_v41 = vsel %vm2102_vm7, %v10818_v14, %v10641_v6  ;;  %v10857_v11 = vsel %vm2104_vm8, %v10820_v18, %v2304_v20 }
 0x41b   :  { %v2247_v9 = vsel %vm2104_vm8, %v2245_v57, %v2246_v61  ;;  %6629 = vmatpush1.bf16.msra.mxu0 %v8425_v59  ;;  %v2283_v51 = vsel %vm2104_vm8, %v10818_v14, %v2282_v41  ;;  %v8426_v61 = vld [vmem:[#allocation10 + $0x50] ss:$8 sps:$4 sm:$0xff]  }
 0x41c   :  { %v2452_v8 = vrot.slane %v2076_v13, %v10621_v49  ;;  %v2503_v34 = vcombine.high %v2076_v13, %v2076_v13  ;;  %v2248_v0 = vsel %vm2106_vm9, %v2245_v57, %v2247_v9  ;;  %v8428_v13 = vld [vmem:[#allocation10 + $0x54] ss:$8 sps:$4 sm:$0xff]   ;;  %v8431_v9 = vld [vmem:[#allocation10 + $0x7d0] ss:$8 sps:$4 sm:$0xff]   ;;  %6630 = vmatprep.subr.bf16.mxu0 %v8429_v21 }
 0x41d   :  { %v2249_v6 = vsel %vm2108_vm10, %v2245_v57, %v2248_v0  ;;  %6327 = vmatprep.subr.bf16.mxu1 %v8428_v13  ;;  %v8435_v13 = vld [vmem:[#allocation10 + $0x7e4] ss:$8 sps:$4 sm:$0xff]  }
 0x41e   :  { %v2510_v26 = vrot.slane %v2503_v34, %v10621_v49  ;;  %v2465_v54 = vsel %vm2102_vm7, %v2452_v8, %v2462_v60  ;;  %v2474_v32 = vcombine.high %v2452_v8, %v2452_v8  ;;  %v2455_v63 = vrot.slane %v2452_v8, 7  ;;  %2251 = vst.msk [vmem:[#allocation4 + $0xa] sm:$0x3] %vm2111_vm11, %v2249_v6  ;;  %6328 = vmatpush1.bf16.msra.mxu1 %v8426_v61 }
 0x41f   :  { %v2466_v5 = vsel %vm2104_vm8, %v2452_v8, %v2465_v54  ;;  %6631 = vmatpush1.bf16.msra.mxu0 %v8431_v9 }
 0x420   :  { %v2467_v4 = vsel %vm2106_vm9, %v2452_v8, %v2466_v5  ;;  %v2487_v60 = vsel %vm2102_vm7, %v2474_v32, %v2484_v37  ;;  %v2523_v53 = vsel %vm2102_vm7, %v2510_v26, %v2520_v62  ;;  %v2532_v31 = vcombine.high %v2510_v26, %v2510_v26  ;;  %v8434_v5 = vld [vmem:[#allocation10 + $0x64] ss:$8 sps:$4 sm:$0xff]   ;;  %6632 = vmatprep.subr.bf16.mxu0 %v8435_v13 }
 0x421   :  { %v2468_v57 = vsel %vm2108_vm10, %v2452_v8, %v2467_v4  ;;  %v2488_v34 = vsel %vm2104_vm8, %v2474_v32, %v2487_v60  ;;  %v2524_v59 = vsel %vm2104_vm8, %v2510_v26, %v2523_v53  ;;  %v2456_v3 = vsel %vm2102_vm7, %v2455_v63, %v10652_v27  ;;  %6329 = vmatprep.subr.bf16.mxu1 %v8434_v5 }
 0x422   :  { %2469 = vrot.lane.b32.xlu1 %v2468_v57, %s9344_s0  ;;  %v2489_v37 = vsel %vm2106_vm9, %v2474_v32, %v2488_v34  ;;  %v2525_v62 = vsel %vm2106_vm9, %v2510_v26, %v2524_v59  ;;  %v2545_v0 = vsel %vm2102_vm7, %v2532_v31, %v2542_v40  ;;  %v2457_v8 = vsel %vm2104_vm8, %v2455_v63, %v2456_v3  ;;  %v8432_v57 = vld [vmem:[#allocation10 + $0x60] ss:$8 sps:$4 sm:$0xff]  }
 0x423   :  { %v2490_v41 = vsel %vm2108_vm10, %v2474_v32, %v2489_v37  ;;  %v2526_v20 = vsel %vm2108_vm10, %v2510_v26, %v2525_v62  ;;  %v2546_v27 = vsel %vm2104_vm8, %v2532_v31, %v2545_v0  ;;  %v2458_v54 = vsel %vm2106_vm9, %v2455_v63, %v2457_v8  ;;  %v8437_v37 = vld [vmem:[#allocation10 + $0x7e0] ss:$8 sps:$4 sm:$0xff]   ;;  %v8440_v8 = vld [vmem:[#allocation10 + $0x74] ss:$8 sps:$4 sm:$0xff]   ;;  %6330 = vmatpush1.bf16.msra.mxu1 %v8432_v57 }
 0x424   :  { %v2046_v6 = vpop.f32.mrb[40].mxu1  ;;  %2491 = vrot.lane.b32.xlu0 %v2490_v41, %s9344_s0  ;;  %v2547_v4 = vsel %vm2106_vm9, %v2532_v31, %v2546_v27  ;;  %v2459_v40 = vsel %vm2108_vm10, %v2455_v63, %v2458_v54  ;;  %v2477_v60 = vrot.slane %v2474_v32, 7  ;;  %v2513_v53 = vrot.slane %v2510_v26, 7  ;;  %v8441_v27 = vld [vmem:[#allocation10 + $0x7f4] ss:$8 sps:$4 sm:$0xff]   ;;  %6633 = vmatpush1.bf16.msra.mxu0 %v8437_v37 }
 0x425   :  { %v2047_v34 = vadd.f32 %v10613_v30, %v2046_v6  ;;  %v2048_v59 = vpop.f32.mrb[41].mxu1  ;;  %v2548_v3 = vsel %vm2108_vm10, %v2532_v31, %v2547_v4  ;;  %2461 = vst.msk [vmem:[#allocation4 + $0x18] sm:$0x3] %vm2111_vm11, %v2459_v40  ;;  %v2535_v21 = vrot.slane %v2532_v31, 7  ;;  %v2284_v62 = vsel %vm2106_vm9, %v10818_v14, %v2283_v51  ;;  %v8443_v6 = vld [vmem:[#allocation10 + $0x7f0] ss:$8 sps:$4 sm:$0xff]   ;;  %6331 = vmatprep.subr.bf16.mxu1 %v8440_v8 }
 0x426   :  { %v2600_v63 = vrot.slane %v10761_v23, 1  ;;  %2527 = vrot.lane.b32.xlu1 %v2526_v20, %s9344_s0  ;;  %v2478_v26 = vsel %vm2102_vm7, %v2477_v60, %v10682_v38  ;;  %v2514_v32 = vsel %vm2102_vm7, %v2513_v53, %v10655_v10  ;;  %v2285_v31 = vsel %vm2108_vm10, %v10818_v14, %v2284_v62  ;;  %v8438_v20 = vld [vmem:[#allocation10 + $0x70] ss:$8 sps:$4 sm:$0xff]   ;;  %6634 = vmatprep.subr.bf16.mxu0 %v8441_v27  ;;  %v8446_v59 = vld [vmem:[#allocation10 + $0x84] ss:$8 sps:$4 sm:$0xff]  }
 0x427   :  { %v2077_v61 = vmax.f32 %v2047_v34, 0.0  ;;  %v2479_v9 = vsel %vm2104_vm8, %v2477_v60, %v2478_v26  ;;  %v2515_v0 = vsel %vm2104_vm8, %v2513_v53, %v2514_v32  ;;  %v2536_v51 = vsel %vm2102_vm7, %v2535_v21, %v10686_v39  ;;  %2287 = vst.msk [vmem:[#allocation4 + $0xc] sm:$0x3] %vm2111_vm11, %v2285_v31  ;;  %6332 = vmatpush1.bf16.msra.mxu1 %v8438_v20  ;;  %v8444_v32 = vld [vmem:[#allocation10 + $0x80] ss:$8 sps:$4 sm:$0xff]  }
 0x428   :  { %v2636_v38 = vrot.slane %v10764_v29, 1  ;;  %2549 = vrot.lane.b32.xlu0 %v2548_v3, %s9344_s0  ;;  %v2480_v10 = vsel %vm2106_vm9, %v2477_v60, %v2479_v9  ;;  %v2516_v41 = vsel %vm2106_vm9, %v2513_v53, %v2515_v0  ;;  %v2537_v14 = vsel %vm2104_vm8, %v2535_v21, %v2536_v51  ;;  %6635 = vmatpush1.bf16.msra.mxu0 %v8443_v6  ;;  %v8450_v31 = vld [vmem:[#allocation10 + $0x804] ss:$8 sps:$4 sm:$0xff]   ;;  %v8451_v6 = vld [vmem:[#allocation10 + $0x90] ss:$8 sps:$4 sm:$0xff]  }
 0x429   :  { %v2568_v54 = vrot.slane %v2077_v61, %v10621_v49  ;;  %v2619_v5 = vcombine.high %v2077_v61, %v2077_v61  ;;  %v2481_v39 = vsel %vm2108_vm10, %v2477_v60, %v2480_v10  ;;  %v2517_v13 = vsel %vm2108_vm10, %v2513_v53, %v2516_v41  ;;  %v10942_v61 = vld [vmem:[#allocation3 + $0x110] sm:$0xff]  ;;  %6333 = vmatprep.subr.bf16.mxu1 %v8446_v59  ;;  %v8453_v41 = vld [vmem:[#allocation10 + $0x94] ss:$8 sps:$4 sm:$0xff]  }
 0x42a   :  { %v2658_v4 = vrot.slane %v10824_v1, 1  ;;  %v2387_v40 = vcombine.high %v10778_v15, %v10778_v15  ;;  %1357 = vrot.lane.b32.xlu1 %v10454_v35, %s9340_s5  ;;  %2483 = vst.msk [vmem:[#allocation4 + $0x1a] sm:$0x3] %vm2111_vm11, %v2481_v39  ;;  %2519 = vst.msk [vmem:[#allocation4 + $0x1c] sm:$0x3] %vm2111_vm11, %v2517_v13  ;;  %v2538_v57 = vsel %vm2106_vm9, %v2535_v21, %v2537_v14  ;;  %6645 = vmatprep.subr.bf16.mxu0 %v8450_v31 }
 0x42b   :  { %v2306_v60 = vsel %vm2106_vm9, %v10820_v18, %v10857_v11  ;;  %v2626_v53 = vrot.slane %v2619_v5, %v10621_v49  ;;  %v2581_v15 = vsel %vm2102_vm7, %v2568_v54, %v2578_v16  ;;  %v2590_v34 = vcombine.high %v2568_v54, %v2568_v54  ;;  %6334 = vmatpush1.bf16.msra.mxu1 %v8444_v32  ;;  %v8459_v59 = vld [vmem:[#allocation10 + $0xa4] ss:$8 sps:$4 sm:$0xff]  }
 0x42c   :  { %v2539_v35 = vsel %vm2108_vm10, %v2535_v21, %v2538_v57  ;;  %1453 = vrot.lane.b32.xlu0 %v10480_v19, %s9343_s27  ;;  %v2582_v3 = vsel %vm2104_vm8, %v2568_v54, %v2581_v15  ;;  %v2571_v11 = vrot.slane %v2568_v54, 7  ;;  %v2307_v37 = vsel %vm2108_vm10, %v10820_v18, %v2306_v60  ;;  %6335 = vmatprep.subr.bf16.mxu1 %v8453_v41 }
 0x42d   :  { %2541 = vst.msk [vmem:[#allocation4 + $0x1e] sm:$0x3] %vm2111_vm11, %v2539_v35  ;;  %v10936_v16 = vcombine.high %v10828_v7, %v10828_v7  ;;  %v2583_v21 = vsel %vm2106_vm9, %v2568_v54, %v2582_v3  ;;  %v2603_v62 = vsel %vm2102_vm7, %v2590_v34, %v2600_v63  ;;  %v2639_v26 = vsel %vm2102_vm7, %v2626_v53, %v2636_v38 }
 0x42e   :  { %v2648_v19 = vcombine.high %v2626_v53, %v2626_v53  ;;  %2309 = vst.msk [vmem:[#allocation4 + $0xe] sm:$0x3] %vm2111_vm11, %v2307_v37  ;;  %1503 = vrot.lane.b32.xlu1 %v10942_v61, %s9342_s30  ;;  %v2584_v18 = vsel %vm2108_vm10, %v2568_v54, %v2583_v21  ;;  %v2604_v9 = vsel %vm2104_vm8, %v2590_v34, %v2603_v62  ;;  %v2593_v39 = vrot.slane %v2590_v34, 7 }
 0x42f   :  { %v2640_v0 = vsel %vm2104_vm8, %v2626_v53, %v2639_v26  ;;  %v2572_v63 = vsel %vm2102_vm7, %v2571_v11, %v10695_v55  ;;  %v2605_v51 = vsel %vm2106_vm9, %v2590_v34, %v2604_v9  ;;  %v2629_v13 = vrot.slane %v2626_v53, 7  ;;  %6336 = vmatpush1.bf16.msra.mxu1 %v8451_v6  ;;  %v8457_v26 = vld [vmem:[#allocation10 + $0xa0] ss:$8 sps:$4 sm:$0xff]  }
 0x430   :  { %v2641_v8 = vsel %vm2106_vm9, %v2626_v53, %v2640_v0  ;;  %v2661_v38 = vsel %vm2102_vm7, %v2648_v19, %v2658_v4  ;;  %v2573_v10 = vsel %vm2104_vm8, %v2571_v11, %v2572_v63  ;;  %1559 = vrot.lane.b32.xlu0 %v10502_v42, %s9344_s0  ;;  %v2606_v14 = vsel %vm2108_vm10, %v2590_v34, %v2605_v51  ;;  %v8465_v0 = vld [vmem:[#allocation10 + $0xb4] ss:$8 sps:$4 sm:$0xff]  }
 0x431   :  { %v10959_v20 = vsel %vm2108_vm10, %v2626_v53, %v2641_v8  ;;  %v2662_v55 = vsel %vm2104_vm8, %v2648_v19, %v2661_v38  ;;  %v2574_v27 = vsel %vm2106_vm9, %v2571_v11, %v2573_v10  ;;  %v11582_v4 = vcombine.high %v10649_v56, %v10649_v56  ;;  %6337 = vmatprep.subr.bf16.mxu1 %v8459_v59 }
 0x432   :  { %v2663_v54 = vsel %vm2106_vm9, %v2648_v19, %v2662_v55  ;;  %v2575_v5 = vsel %vm2108_vm10, %v2571_v11, %v2574_v27  ;;  %v2727_v60 = vcombine.high %v10837_v48, %v10837_v48  ;;  %1613 = vrot.lane.b32.xlu1 %v10579_v47, %s9345_s2  ;;  %v2651_v53 = vrot.slane %v2648_v19, 7  ;;  %v8463_v27 = vld [vmem:[#allocation10 + $0xb0] ss:$8 sps:$4 sm:$0xff]  }
 0x433   :  { %v10969_v57 = vrot.slane %v11582_v4, %v10621_v49  ;;  %v10976_v15 = vsel %vm2108_vm10, %v2648_v19, %v2663_v54  ;;  %2577 = vst.msk [vmem:[#allocation4 + $0x20] sm:$0x3] %vm2111_vm11, %v2575_v5  ;;  %v10980_v34 = vrot.slane %v2387_v40, %v10621_v49  ;;  %v2594_v56 = vsel %vm2102_vm7, %v2593_v39, %v10761_v23 }
 0x434   :  { %v2630_v35 = vsel %vm2102_vm7, %v2629_v13, %v10764_v29  ;;  %v2339_v3 = vrot.slane %v10828_v7, 7  ;;  %1663 = vrot.lane.b32.xlu0 %v10588_v58, %s9346_s3  ;;  %v2595_v11 = vsel %vm2104_vm8, %v2593_v39, %v2594_v56  ;;  %v2652_v40 = vsel %vm2102_vm7, %v2651_v53, %v10824_v1  ;;  %6338 = vmatpush1.bf16.msra.mxu1 %v8457_v26 }
 0x435   :  { %v2631_v37 = vsel %vm2104_vm8, %v2629_v13, %v2630_v35  ;;  %v2361_v21 = vrot.slane %v10936_v16, 7  ;;  %v10996_v23 = vrot.slane %v10837_v48, %v10621_v49  ;;  %v2596_v29 = vsel %vm2106_vm9, %v2593_v39, %v2595_v11  ;;  %6339 = vmatprep.subr.bf16.mxu1 %v8465_v0 }
 0x436   :  { %v2632_v62 = vsel %vm2106_vm9, %v2629_v13, %v2631_v37  ;;  %v2653_v58 = vsel %vm2104_vm8, %v2651_v53, %v2652_v40  ;;  %1719 = vrot.lane.b32.xlu1 %v10663_v12, %s9347_s24  ;;  %v2597_v19 = vsel %vm2108_vm10, %v2593_v39, %v2596_v29  ;;  %v11007_v48 = vrot.slane %v2727_v60, %v10621_v49  ;;  %v8471_v60 = vld [vmem:[#allocation10 + $0xc4] ss:$8 sps:$4 sm:$0xff]   ;;  %v8469_v40 = vld [vmem:[#allocation10 + $0xc0] ss:$8 sps:$4 sm:$0xff]  }
 0x437   :  { %v2633_v1 = vsel %vm2108_vm10, %v2629_v13, %v2632_v62  ;;  %v2654_v32 = vsel %vm2106_vm9, %v2651_v53, %v2653_v58  ;;  %v2051_v31 = vpop.f32.mrb[42].mxu1  ;;  %2599 = vst.msk [vmem:[#allocation4 + $0x22] sm:$0x3] %vm2111_vm11, %v2597_v19  ;;  %v2340_v63 = vsel %vm2102_vm7, %v2339_v3, %v10677_v33  ;;  %v2397_v51 = vrot.slane %v10980_v34, 7 }
 0x438   :  { %2635 = vst.msk [vmem:[#allocation4 + $0x24] sm:$0x3] %vm2111_vm11, %v2633_v1  ;;  %v2655_v9 = vsel %vm2108_vm10, %v2651_v53, %v2654_v32  ;;  %v2052_v8 = vadd.f32 %v10613_v30, %v2051_v31  ;;  %v2053_v38 = vpop.f32.mrb[43].mxu1  ;;  %2585 = vrot.lane.b32.xlu0 %v2584_v18, %s9344_s0  ;;  %v2341_v10 = vsel %vm2104_vm8, %v2339_v3, %v2340_v63  ;;  %v2694_v56 = vrot.slane %v10996_v23, 1  ;;  %v8477_v32 = vld [vmem:[#allocation10 + $0xd4] ss:$8 sps:$4 sm:$0xff]  }
 0x439   :  { %2657 = vst.msk [vmem:[#allocation4 + $0x26] sm:$0x3] %vm2111_vm11, %v2655_v9  ;;  %v2362_v41 = vsel %vm2102_vm7, %v2361_v21, %v10699_v24  ;;  %v11023_v55 = vcombine.high %v10996_v23, %v10996_v23  ;;  %v11027_v54 = vcombine.high %v10980_v34, %v10980_v34  ;;  %v2342_v30 = vsel %vm2106_vm9, %v2339_v3, %v2341_v10 }
 0x43a   :  { %v2363_v18 = vsel %vm2104_vm8, %v2361_v21, %v2362_v41  ;;  %v2078_v5 = vmax.f32 %v2052_v8, 0.0  ;;  %2607 = vrot.lane.b32.xlu1 %v2606_v14, %s9344_s0  ;;  %v2343_v39 = vsel %vm2108_vm10, %v2339_v3, %v2342_v30  ;;  %v11036_v6 = vcombine.high %v10969_v57, %v10969_v57  ;;  %6340 = vmatpush1.bf16.msra.mxu1 %v8463_v27  ;;  %v8475_v41 = vld [vmem:[#allocation10 + $0xd0] ss:$8 sps:$4 sm:$0xff]  }
 0x43b   :  { %v2364_v13 = vsel %vm2106_vm9, %v2361_v21, %v2363_v18  ;;  %v11040_v4 = vcombine.high %v11007_v48, %v11007_v48  ;;  %2345 = vst.msk [vmem:[#allocation4 + $0x10] sm:$0x3] %vm2111_vm11, %v2343_v39  ;;  %v2398_v14 = vsel %vm2102_vm7, %v2397_v51, %v10969_v57  ;;  %v2716_v11 = vrot.slane %v11023_v55, 1  ;;  %6341 = vmatprep.subr.bf16.mxu1 %v8471_v60 }
 0x43c   :  { %v2365_v53 = vsel %vm2108_vm10, %v2361_v21, %v2364_v13  ;;  %v2684_v35 = vrot.slane %v2078_v5, %v10621_v49  ;;  %v2735_v59 = vcombine.high %v2078_v5, %v2078_v5  ;;  %2643 = vrot.lane.b32.xlu0 %v10959_v20, %s9344_s0  ;;  %v2399_v3 = vsel %vm2104_vm8, %v2397_v51, %v2398_v14 }
 0x43d   :  { %2367 = vst.msk [vmem:[#allocation4 + $0x12] sm:$0x3] %vm2111_vm11, %v2365_v53  ;;  %v2752_v37 = vrot.slane %v11007_v48, 1  ;;  %v2400_v21 = vsel %vm2106_vm9, %v2397_v51, %v2399_v3  ;;  %v2419_v29 = vrot.slane %v11027_v54, 7  ;;  %v2774_v19 = vrot.slane %v11040_v4, 1 }
 0x43e   :  { %v2742_v62 = vrot.slane %v2735_v59, %v10621_v49  ;;  %2665 = vrot.lane.b32.xlu1 %v10976_v15, %s9344_s0  ;;  %v2697_v20 = vsel %vm2102_vm7, %v2684_v35, %v2694_v56  ;;  %v2706_v58 = vcombine.high %v2684_v35, %v2684_v35  ;;  %v2687_v26 = vrot.slane %v2684_v35, 7  ;;  %6342 = vmatpush1.bf16.msra.mxu1 %v8469_v40  ;;  %v8483_v53 = vld [vmem:[#allocation10 + $0xe4] ss:$8 sps:$4 sm:$0xff]   ;;  %v8481_v3 = vld [vmem:[#allocation10 + $0xe0] ss:$8 sps:$4 sm:$0xff]  }
 0x43f   :  { %v2698_v1 = vsel %vm2104_vm8, %v2684_v35, %v2697_v20  ;;  %v2401_v31 = vsel %vm2108_vm10, %v2397_v51, %v2400_v21  ;;  %v2420_v9 = vsel %vm2102_vm7, %v2419_v29, %v11036_v6  ;;  %6343 = vmatprep.subr.bf16.mxu1 %v8477_v32  ;;  %v8487_v32 = vld [vmem:[#allocation10 + $0xf0] ss:$8 sps:$4 sm:$0xff]  }
 0x440   :  { %2120 = vrot.lane.b32.xlu0 %v10721_v45, %s9344_s0  ;;  %v2699_v15 = vsel %vm2106_vm9, %v2684_v35, %v2698_v1  ;;  %v2719_v0 = vsel %vm2102_vm7, %v2706_v58, %v2716_v11  ;;  %v2755_v63 = vsel %vm2102_vm7, %v2742_v62, %v2752_v37  ;;  %v2764_v8 = vcombine.high %v2742_v62, %v2742_v62 }
 0x441   :  { %2403 = vst.msk [vmem:[#allocation4 + $0x14] sm:$0x3] %vm2111_vm11, %v2401_v31  ;;  %v11072_v38 = vsel %vm2108_vm10, %v2684_v35, %v2699_v15  ;;  %v2720_v51 = vsel %vm2104_vm8, %v2706_v58, %v2719_v0  ;;  %v2756_v10 = vsel %vm2104_vm8, %v2742_v62, %v2755_v63  ;;  %v2688_v45 = vsel %vm2102_vm7, %v2687_v26, %v10996_v23  ;;  %v8495_v0 = vld [vmem:[#allocation10 + $0x104] ss:$8 sps:$4 sm:$0xff]  }
 0x442   :  { %2143 = vrot.lane.b32.xlu1 %v10732_v43, %s9344_s0  ;;  %v2721_v27 = vsel %vm2106_vm9, %v2706_v58, %v2720_v51  ;;  %v2757_v30 = vsel %vm2106_vm9, %v2742_v62, %v2756_v10  ;;  %v2777_v18 = vsel %vm2102_vm7, %v2764_v8, %v2774_v19  ;;  %v2709_v5 = vrot.slane %v2706_v58, 7  ;;  %6344 = vmatpush1.bf16.msra.mxu1 %v8475_v41  ;;  %v9158_v51 = vld [vmem:[#allocation3 + $0x100] sm:$0xff] }
 0x443   :  { %v2722_v39 = vsel %vm2108_vm10, %v2706_v58, %v2721_v27  ;;  %v2758_v13 = vsel %vm2108_vm10, %v2742_v62, %v2757_v30  ;;  %v2778_v60 = vsel %vm2104_vm8, %v2764_v8, %v2777_v18  ;;  %v2689_v23 = vsel %vm2104_vm8, %v2687_v26, %v2688_v45  ;;  %6345 = vmatprep.subr.bf16.mxu1 %v8483_v53 }
 0x444   :  { %2179 = vrot.lane.b32.xlu0 %v10739_v50, %s9344_s0  ;;  %v2779_v43 = vsel %vm2106_vm9, %v2764_v8, %v2778_v60  ;;  %v2690_v14 = vsel %vm2106_vm9, %v2687_v26, %v2689_v23  ;;  %v2710_v56 = vsel %vm2102_vm7, %v2709_v5, %v11023_v55  ;;  %v2745_v35 = vrot.slane %v2742_v62, 7  ;;  %v8489_v50 = vld [vmem:[#allocation10 + $0xf4] ss:$8 sps:$4 sm:$0xff]  }
 0x445   :  { %v2780_v59 = vsel %vm2108_vm10, %v2764_v8, %v2779_v43  ;;  %v2691_v11 = vsel %vm2108_vm10, %v2687_v26, %v2690_v14  ;;  %v2711_v37 = vsel %vm2104_vm8, %v2709_v5, %v2710_v56  ;;  %v2767_v40 = vrot.slane %v2764_v8, 7 }
 0x446   :  { %2201 = vrot.lane.b32.xlu1 %v10749_v17, %s9344_s0  ;;  %2693 = vst.msk [vmem:[#allocation4 + $0x28] sm:$0x3] %vm2111_vm11, %v2691_v11  ;;  %v2712_v21 = vsel %vm2106_vm9, %v2709_v5, %v2711_v37  ;;  %v2746_v55 = vsel %vm2102_vm7, %v2745_v35, %v11007_v48  ;;  %v2421_v62 = vsel %vm2104_vm8, %v2419_v29, %v2420_v9  ;;  %v8448_v37 = vld [vmem:[#allocation10 + $0x800] ss:$8 sps:$4 sm:$0xff]  }
 0x447   :  { %v2713_v20 = vsel %vm2108_vm10, %v2709_v5, %v2712_v21  ;;  %v2747_v58 = vsel %vm2104_vm8, %v2745_v35, %v2746_v55  ;;  %v2768_v26 = vsel %vm2102_vm7, %v2767_v40, %v11040_v4  ;;  %v2422_v17 = vsel %vm2106_vm9, %v2419_v29, %v2421_v62  ;;  %6346 = vmatpush1.bf16.msra.mxu1 %v8481_v3  ;;  %v1248_v4 = vld [vmem:[#allocation3 + $0x138] sm:$0x3] }
 0x448   :  { %1359 = vrot.lane.b32.xlu0 %v10502_v42, %s9340_s5  ;;  %2715 = vst.msk [vmem:[#allocation4 + $0x2a] sm:$0x3] %vm2111_vm11, %v2713_v20  ;;  %v2748_v19 = vsel %vm2106_vm9, %v2745_v35, %v2747_v58  ;;  %v2769_v48 = vsel %vm2104_vm8, %v2767_v40, %v2768_v26  ;;  %v2423_v1 = vsel %vm2108_vm10, %v2419_v29, %v2422_v17  ;;  %v1247_v42 = vld [vmem:[#allocation3 + $0x130] sm:$0xff]  ;;  %v9157_v29 = vld [vmem:[#allocation3 + $0x120] sm:$0xff]  ;;  %v1689_v8 = vrot.slane %v1248_v4, 1 }
 0x449   :  { %v2749_v31 = vsel %vm2108_vm10, %v2745_v35, %v2748_v19  ;;  %v2770_v9 = vsel %vm2106_vm9, %v2767_v40, %v2769_v48  ;;  %2425 = vst.msk [vmem:[#allocation4 + $0x16] sm:$0x3] %vm2111_vm11, %v2423_v1  ;;  %6347 = vmatprep.subr.bf16.mxu1 %v8489_v50  ;;  %v1688_v63 = vrot.slane %v1247_v42, 1  ;;  %v1743_v60 = vrot.slane %v1248_v4, 2  ;;  %v8456_v21 = vld [vmem:[#allocation10 + $0x814] ss:$8 sps:$4 sm:$0xff]  }
 0x44a   :  { %1455 = vrot.lane.b32.xlu1 %v10579_v47, %s9343_s27  ;;  %2751 = vst.msk [vmem:[#allocation4 + $0x2c] sm:$0x3] %vm2111_vm11, %v2749_v31  ;;  %v2771_v15 = vsel %vm2108_vm10, %v2767_v40, %v2770_v9  ;;  %v8454_v62 = vld [vmem:[#allocation10 + $0x810] ss:$8 sps:$4 sm:$0xff]   ;;  %v8462_v58 = vld [vmem:[#allocation10 + $0x824] ss:$8 sps:$4 sm:$0xff]  }
 0x44b   :  { %2773 = vst.msk [vmem:[#allocation4 + $0x2e] sm:$0x3] %vm2111_vm11, %v2771_v15  ;;  %6348 = vmatpush1.bf16.msra.mxu1 %v8487_v32  ;;  %v1690_v47 = vsel %vm278_vm3, %v1688_v63, %v1689_v8  ;;  %vm2123_vm3 = vcmask 1041920   ;;  %v8460_v17 = vld [vmem:[#allocation10 + $0x820] ss:$8 sps:$4 sm:$0xff]  }
 0x44c   :  { %1505 = vrot.lane.b32.xlu0 %v9157_v29, %s9342_s30  ;;  %6358 = vmatprep.subr.bf16.mxu1 %v8495_v0  ;;  %v8468_v48 = vld [vmem:[#allocation10 + $0x834] ss:$8 sps:$4 sm:$0xff]   ;;  %v8466_v32 = vld [vmem:[#allocation10 + $0x830] ss:$8 sps:$4 sm:$0xff]   ;;  %v8474_v9 = vld [vmem:[#allocation10 + $0x844] ss:$8 sps:$4 sm:$0xff]  }
 0x44d   :  { %v8472_v15 = vld [vmem:[#allocation10 + $0x840] ss:$8 sps:$4 sm:$0xff]   ;;  %v8480_v63 = vld [vmem:[#allocation10 + $0x854] ss:$8 sps:$4 sm:$0xff]  }
 0x44e   :  { %1561 = vrot.lane.b32.xlu1 %v10663_v12, %s9344_s0 }
 0x450   :  { %1615 = vrot.lane.b32.xlu0 %v10598_v2, %s9345_s2 }
 0x452   :  { %1665 = vrot.lane.b32.xlu1 %v1247_v42, %s9346_s3 }
 0x454   :  { %1721 = vrot.lane.b32.xlu0 %v1690_v47, %s9347_s24 }
 0x456   :  { %2701 = vrot.lane.b32.xlu1 %v11072_v38, %s9344_s0 }
 0x458   :  { %2723 = vrot.lane.b32.xlu0 %v2722_v39, %s9344_s0  ;;  %v1742_v39 = vrot.slane %v1247_v42, 2 }
 0x45a   :  { %2759 = vrot.lane.b32.xlu1 %v2758_v13, %s9344_s0 }
 0x45c   :  { %2781 = vrot.lane.b32.xlu0 %v2780_v59, %s9344_s0  ;;  %v1744_v59 = vsel %vm375_vm2, %v1742_v39, %v1743_v60  ;;  %vm9349_vm2 = vmmov 0  }
 0x45e   :  { %2237 = vrot.lane.b32.xlu1 %v10752_v25, %s9344_s0 }
 0x460   :  { %2259 = vrot.lane.b32.xlu0 %v10781_v22, %s9344_s0 }
 0x462   :  { %2295 = vrot.lane.b32.xlu1 %v10772_v36, %s9344_s0 }
 0x464   :  { %2317 = vrot.lane.b32.xlu0 %v10800_v52, %s9344_s0 }
 0x494   :  { %v2470_v2 = vpop.permute.xlu1 %2469 }
 0x495   :  { %2472 = vst.msk [vmem:[#allocation4 + $0x18] sm:$0x3] %vm2123_vm3, %v2470_v2 }
 0x496   :  { %v2492_v12 = vpop.permute.xlu0 %2491 }
 0x497   :  { %2494 = vst.msk [vmem:[#allocation4 + $0x1a] sm:$0x3] %vm2123_vm3, %v2492_v12 }
 0x498   :  { %v2528_v38 = vpop.permute.xlu1 %2527 }
 0x499   :  { %2530 = vst.msk [vmem:[#allocation4 + $0x1c] sm:$0x3] %vm2123_vm3, %v2528_v38  ;;  %v8478_v38 = vld [vmem:[#allocation10 + $0x850] ss:$8 sps:$4 sm:$0xff]  }
 0x49a   :  { %v2550_v25 = vpop.permute.xlu0 %2549 }
 0x49b   :  { %2552 = vst.msk [vmem:[#allocation4 + $0x1e] sm:$0x3] %vm2123_vm3, %v2550_v25 }
 0x49c   :  { %v1358_v22 = vpop.permute.xlu1 %1357 }
 0x49d   :  { %v1759_v36 = vsel %vm910_vm4, %v9158_v51, %v1358_v22  ;;  %v8486_v51 = vld [vmem:[#allocation10 + $0x864] ss:$8 sps:$4 sm:$0xff]  }
 0x49e   :  { %v1454_v10 = vpop.permute.xlu0 %1453 }
 0x49f   :  { %v1776_v52 = vsel %vm1761_vm14, %v1759_v36, %v1454_v10 }
 0x4a0   :  { %v1504_v41 = vpop.permute.xlu1 %1503 }
 0x4a1   :  { %v1793_v45 = vsel %vm1778_vm15, %v1776_v52, %v1504_v41  ;;  %v8484_v41 = vld [vmem:[#allocation10 + $0x860] ss:$8 sps:$4 sm:$0xff]  }
 0x4a2   :  { %v1560_v27 = vpop.permute.xlu0 %1559  ;;  %v3020_v30 = vld [vmem:[#allocation4 + $0x18] sm:$0xff] }
 0x4a3   :  { %v1810_v18 = vsel %vm1795_vm0, %v1793_v45, %v1560_v27  ;;  %v3084_v5 = vcombine.high %v3020_v30, %v3020_v30 }
 0x4a4   :  { %v1614_v13 = vpop.permute.xlu1 %1613 }
 0x4a5   :  { %v1827_v53 = vsel %vm1812_vm1, %v1810_v18, %v1614_v13  ;;  %v3098_v23 = vrot.slane %v3084_v5, %v10621_v49  ;;  %v8492_v18 = vld [vmem:[#allocation10 + $0x874] ss:$8 sps:$4 sm:$0xff]  }
 0x4a6   :  { %v1664_v43 = vpop.permute.xlu0 %1663 }
 0x4a7   :  { %v1844_v14 = vsel %vm1829_vm5, %v1827_v53, %v1664_v43  ;;  %v3100_v56 = vcombine.high %v3098_v23, %v3098_v23  ;;  %v3215_v50 = vpack.c.bf16 %v3098_v23, %v3098_v23  ;;  %v8490_v23 = vld [vmem:[#allocation10 + $0x870] ss:$8 sps:$4 sm:$0xff]  }
 0x4a8   :  { %v1720_v35 = vpop.permute.xlu1 %1719 }
 0x4a9   :  { %v1861_v3 = vsel %vm1846_vm6, %v1844_v14, %v1720_v35  ;;  %v3216_v11 = vpack.c.bf16 %v3100_v56, %v3100_v56  ;;  %v8498_v14 = vld [vmem:[#allocation10 + $0x884] ss:$8 sps:$4 sm:$0xff]  }
 0x4aa   :  { %v2586_v40 = vpop.permute.xlu0 %2585  ;;  %2055 = vmatmul.mubr.f32.gmra.mrb[44].mxu1 %v1861_v3 }
 0x4ab   :  { %2588 = vst.msk [vmem:[#allocation4 + $0x20] sm:$0x3] %vm2123_vm3, %v2586_v40  ;;  %6636 = vmatprep.mubr.bf16.mxu0 %v3216_v11  ;;  %7311 = vmatprep.mubr.msk.f32.mxu1 %vm910_vm4, %v1744_v59  ;;  %v8493_v11 = vld [vmem:[#allocation10 + $0x100] ss:$8 sps:$4 sm:$0xff]  }
 0x4ac   :  { %v2608_v55 = vpop.permute.xlu1 %2607  ;;  %6637 = vmatmul.mubr.bf16.vlgmr.msra.gmra.mrb[0].mxu0 %v3215_v50 }
 0x4ad   :  { %2610 = vst.msk [vmem:[#allocation4 + $0x22] sm:$0x3] %vm2123_vm3, %v2608_v55  ;;  %6646 = vmatpush1.bf16.msra.mxu0 %v8448_v37  ;;  %v8496_v37 = vld [vmem:[#allocation10 + $0x880] ss:$8 sps:$4 sm:$0xff]   ;;  %v8504_v55 = vld [vmem:[#allocation10 + $0x894] ss:$8 sps:$4 sm:$0xff]  }
 0x4ae   :  { %v2644_v20 = vpop.permute.xlu0 %2643  ;;  %6647 = vmatprep.subr.bf16.mxu0 %v8456_v21  ;;  %v8501_v21 = vld [vmem:[#allocation10 + $0x114] ss:$8 sps:$4 sm:$0xff]  }
 0x4af   :  { %2646 = vst.msk [vmem:[#allocation4 + $0x24] sm:$0x3] %vm2123_vm3, %v2644_v20 }
 0x4b0   :  { %v2666_v26 = vpop.permute.xlu1 %2665 }
 0x4b1   :  { %2668 = vst.msk [vmem:[#allocation4 + $0x26] sm:$0x3] %vm2123_vm3, %v2666_v26  ;;  %6648 = vmatpush1.bf16.msra.mxu0 %v8454_v62  ;;  %v8502_v26 = vld [vmem:[#allocation10 + $0x890] ss:$8 sps:$4 sm:$0xff]  }
 0x4b2   :  { %v2121_v19 = vpop.permute.xlu0 %2120  ;;  %6649 = vmatprep.subr.bf16.mxu0 %v8462_v58  ;;  %v8499_v58 = vld [vmem:[#allocation10 + $0x110] ss:$8 sps:$4 sm:$0xff]  }
 0x4b3   :  { %2124 = vst.msk [vmem:[#allocation4] sm:$0x3] %vm2123_vm3, %v2121_v19  ;;  %v8507_v19 = vld [vmem:[#allocation10 + $0x124] ss:$8 sps:$4 sm:$0xff]  }
 0x4b4   :  { %v2144_v1 = vpop.permute.xlu1 %2143 }
 0x4b5   :  { %6650 = vmatpush1.bf16.msra.mxu0 %v8460_v17  ;;  %2146 = vst.msk [vmem:[#allocation4 + $0x2] sm:$0x3] %vm2123_vm3, %v2144_v1 }
 0x4b6   :  { %v2180_v31 = vpop.permute.xlu0 %2179  ;;  %6651 = vmatprep.subr.bf16.mxu0 %v8468_v48  ;;  %v8510_v48 = vld [vmem:[#allocation10 + $0x8a4] ss:$8 sps:$4 sm:$0xff]  }
 0x4b7   :  { %2182 = vst.msk [vmem:[#allocation4 + $0x4] sm:$0x3] %vm2123_vm3, %v2180_v31  ;;  %v8508_v31 = vld [vmem:[#allocation10 + $0x8a0] ss:$8 sps:$4 sm:$0xff]  }
 0x4b8   :  { %v2202_v42 = vpop.permute.xlu1 %2201  ;;  %v11164_v4 = vld [vmem:[#allocation4 + $0x20] sm:$0xff] }
 0x4b9   :  { %6652 = vmatpush1.bf16.msra.mxu0 %v8466_v32  ;;  %2204 = vst.msk [vmem:[#allocation4 + $0x6] sm:$0x3] %vm2123_vm3, %v2202_v42  ;;  %v11169_v0 = vrot.slane %v11164_v4, %v10621_v49  ;;  %v8505_v32 = vld [vmem:[#allocation10 + $0x120] ss:$8 sps:$4 sm:$0xff]   ;;  %v8513_v42 = vld [vmem:[#allocation10 + $0x134] ss:$8 sps:$4 sm:$0xff]  }
 0x4ba   :  { %v1360_v29 = vpop.permute.xlu0 %1359  ;;  %6653 = vmatprep.subr.bf16.mxu0 %v8474_v9 }
 0x4bb   :  { %v1760_v8 = vsel %vm910_vm4, %v10942_v61, %v1360_v29  ;;  %v3116_v47 = vcombine.high %v11169_v0, %v11169_v0  ;;  %vm7267_vm4 = vcmask 1024  }
 0x4bc   :  { %v1456_v2 = vpop.permute.xlu1 %1455 }
 0x4bd   :  { %6654 = vmatpush1.bf16.msra.mxu0 %v8472_v15  ;;  %v1777_v12 = vsel %vm1761_vm14, %v1760_v8, %v1456_v2  ;;  %v3218_v25 = vpack.c.bf16 %v3116_v47, %v3116_v47  ;;  %v8516_v15 = vld [vmem:[#allocation10 + $0x8b4] ss:$8 sps:$4 sm:$0xff]   ;;  %v8514_v8 = vld [vmem:[#allocation10 + $0x8b0] ss:$8 sps:$4 sm:$0xff]   ;;  %v8519_v2 = vld [vmem:[#allocation10 + $0x144] ss:$8 sps:$4 sm:$0xff]  }
 0x4be   :  { %v1506_v22 = vpop.permute.xlu0 %1505  ;;  %6655 = vmatprep.subr.bf16.mxu0 %v8480_v63  ;;  %v8511_v63 = vld [vmem:[#allocation10 + $0x130] ss:$8 sps:$4 sm:$0xff]  }
 0x4bf   :  { %v1794_v36 = vsel %vm1778_vm15, %v1777_v12, %v1506_v22  ;;  %6677 = vmatprep.mubr.bf16.mxu0 %v3218_v25  ;;  %v8522_v12 = vld [vmem:[#allocation10 + $0x8c4] ss:$8 sps:$4 sm:$0xff]   ;;  %v8520_v25 = vld [vmem:[#allocation10 + $0x8c0] ss:$8 sps:$4 sm:$0xff]   ;;  %v8525_v22 = vld [vmem:[#allocation10 + $0x154] ss:$8 sps:$4 sm:$0xff]  }
 0x4c0   :  { %v1562_v10 = vpop.permute.xlu1 %1561  ;;  %v3017_v52 = vld [vmem:[#allocation4] sm:$0xff] }
 0x4c1   :  { %6656 = vmatpush1.bf16.msra.mxu0 %v8478_v38  ;;  %v1811_v61 = vsel %vm1795_vm0, %v1794_v36, %v1562_v10  ;;  %v3040_v45 = vrot.slane %v3017_v52, %v10621_v49  ;;  %v3033_v27 = vcombine.high %v3017_v52, %v3017_v52  ;;  %v8517_v38 = vld [vmem:[#allocation10 + $0x140] ss:$8 sps:$4 sm:$0xff]   ;;  %v8523_v36 = vld [vmem:[#allocation10 + $0x150] ss:$8 sps:$4 sm:$0xff]   ;;  %v8531_v52 = vld [vmem:[#allocation10 + $0x164] ss:$8 sps:$4 sm:$0xff]  }
 0x4c2   :  { %v1616_v30 = vpop.permute.xlu0 %1615  ;;  %6657 = vmatprep.subr.bf16.mxu0 %v8486_v51  ;;  %v8528_v51 = vld [vmem:[#allocation10 + $0x8d4] ss:$8 sps:$4 sm:$0xff]   ;;  %v8526_v10 = vld [vmem:[#allocation10 + $0x8d0] ss:$8 sps:$4 sm:$0xff]  }
 0x4c3   :  { %v1828_v5 = vsel %vm1812_vm1, %v1811_v61, %v1616_v30  ;;  %v3048_v39 = vcombine.high %v3040_v45, %v3040_v45  ;;  %v11181_v60 = vrot.slane %v3033_v27, %v10621_v49  ;;  %v3201_v40 = vpack.c.bf16 %v3040_v45, %v3040_v45  ;;  %v8534_v61 = vld [vmem:[#allocation10 + $0x8e4] ss:$8 sps:$4 sm:$0xff]   ;;  %v8529_v45 = vld [vmem:[#allocation10 + $0x160] ss:$8 sps:$4 sm:$0xff]   ;;  %v8537_v30 = vld [vmem:[#allocation10 + $0x174] ss:$8 sps:$4 sm:$0xff]  }
 0x4c4   :  { %v1666_v13 = vpop.permute.xlu1 %1665  ;;  %v8532_v27 = vld [vmem:[#allocation10 + $0x8e0] ss:$8 sps:$4 sm:$0xff]  }
 0x4c5   :  { %6658 = vmatpush1.bf16.msra.mxu0 %v8484_v41  ;;  %v1845_v53 = vsel %vm1829_vm5, %v1828_v5, %v1666_v13  ;;  %v3202_v35 = vpack.c.bf16 %v3048_v39, %v3048_v39  ;;  %v3049_v3 = vcombine.high %v11181_v60, %v11181_v60  ;;  %v3101_v41 = vcombine.high %v11164_v4, %v11164_v4  ;;  %v8535_v39 = vld [vmem:[#allocation10 + $0x170] ss:$8 sps:$4 sm:$0xff]  }
 0x4c6   :  { %v1722_v43 = vpop.permute.xlu0 %1721  ;;  %6659 = vmatprep.subr.bf16.mxu0 %v8492_v18  ;;  %v8540_v18 = vld [vmem:[#allocation10 + $0x8f4] ss:$8 sps:$4 sm:$0xff]   ;;  %v8538_v13 = vld [vmem:[#allocation10 + $0x8f0] ss:$8 sps:$4 sm:$0xff]  }
 0x4c7   :  { %v1862_v56 = vsel %vm1846_vm6, %v1845_v53, %v1722_v43  ;;  %v3204_v20 = vpack.c.bf16 %v3049_v3, %v3049_v3  ;;  %v11198_v5 = vrot.slane %v3101_v41, %v10621_v49  ;;  %v8543_v53 = vld [vmem:[#allocation10 + $0x184] ss:$8 sps:$4 sm:$0xff]   ;;  %v8541_v43 = vld [vmem:[#allocation10 + $0x180] ss:$8 sps:$4 sm:$0xff]   ;;  %v8597_v41 = vld [vmem:[#allocation10 + $0x214] ss:$8 sps:$4 sm:$0xff]  }
 0x4c8   :  { %v2702_v59 = vpop.permute.xlu1 %2701  ;;  %2060 = vmatmul.mubr.f32.gmra.mrb[46].mxu1 %v1862_v56  ;;  %v3217_v56 = vpack.c.bf16 %v11169_v0, %v11169_v0  ;;  %v8561_v0 = vld [vmem:[#allocation10 + $0x1b4] ss:$8 sps:$4 sm:$0xff]  }
 0x4c9   :  { %6660 = vmatpush1.bf16.msra.mxu0 %v8490_v23  ;;  %2704 = vst.msk [vmem:[#allocation4 + $0x28] sm:$0x3] %vm2123_vm3, %v2702_v59  ;;  %6349 = vmatprep.mubr.bf16.mxu1 %v3202_v35  ;;  %v8546_v23 = vld [vmem:[#allocation10 + $0x904] ss:$8 sps:$4 sm:$0xff]   ;;  %v3117_v4 = vcombine.high %v11198_v5, %v11198_v5  ;;  %v8549_v35 = vld [vmem:[#allocation10 + $0x194] ss:$8 sps:$4 sm:$0xff]  }
 0x4ca   :  { %v2724_v50 = vpop.permute.xlu0 %2723  ;;  %6661 = vmatprep.subr.bf16.mxu0 %v8498_v14  ;;  %v8544_v14 = vld [vmem:[#allocation10 + $0x900] ss:$8 sps:$4 sm:$0xff]   ;;  %v8552_v59 = vld [vmem:[#allocation10 + $0x914] ss:$8 sps:$4 sm:$0xff]  }
 0x4cb   :  { %2726 = vst.msk [vmem:[#allocation4 + $0x2a] sm:$0x3] %vm2123_vm3, %v2724_v50  ;;  %v3220_v3 = vpack.c.bf16 %v3117_v4, %v3117_v4  ;;  %v8558_v50 = vld [vmem:[#allocation10 + $0x924] ss:$8 sps:$4 sm:$0xff]   ;;  %v8612_v4 = vld [vmem:[#allocation10 + $0x9b4] ss:$8 sps:$4 sm:$0xff]  }
 0x4cc   :  { %v2760_v62 = vpop.permute.xlu1 %2759  ;;  %6350 = vmatmul.mubr.bf16.vlgmr.msra.gmra.mrb[48].mxu1 %v3201_v40  ;;  %v8555_v40 = vld [vmem:[#allocation10 + $0x1a4] ss:$8 sps:$4 sm:$0xff]  }
 0x4cd   :  { %6662 = vmatpush1.bf16.msra.mxu0 %v8496_v37  ;;  %2762 = vst.msk [vmem:[#allocation4 + $0x2c] sm:$0x3] %vm2123_vm3, %v2760_v62  ;;  %6359 = vmatpush1.bf16.msra.mxu1 %v8493_v11  ;;  %v8547_v11 = vld [vmem:[#allocation10 + $0x190] ss:$8 sps:$4 sm:$0xff]   ;;  %v8564_v62 = vld [vmem:[#allocation10 + $0x934] ss:$8 sps:$4 sm:$0xff]  }
 0x4ce   :  { %6390 = vmatprep.mubr.bf16.mxu1 %v3204_v20  ;;  %v2782_v17 = vpop.permute.xlu0 %2781  ;;  %6360 = vmatprep.subr.bf16.mxu1 %v8501_v21  ;;  %v8550_v37 = vld [vmem:[#allocation10 + $0x910] ss:$8 sps:$4 sm:$0xff]   ;;  %v8553_v21 = vld [vmem:[#allocation10 + $0x1a0] ss:$8 sps:$4 sm:$0xff]  }
 0x4cf   :  { %2784 = vst.msk [vmem:[#allocation4 + $0x2e] sm:$0x3] %vm2123_vm3, %v2782_v17  ;;  %6663 = vmatprep.subr.bf16.mxu0 %v8504_v55  ;;  %v8556_v55 = vld [vmem:[#allocation10 + $0x920] ss:$8 sps:$4 sm:$0xff]   ;;  %v8559_v20 = vld [vmem:[#allocation10 + $0x1b0] ss:$8 sps:$4 sm:$0xff]  }
 0x4d0   :  { %v2238_v1 = vpop.permute.xlu1 %2237  ;;  %v8570_v17 = vld [vmem:[#allocation10 + $0x944] ss:$8 sps:$4 sm:$0xff]  }
 0x4d1   :  { %6664 = vmatpush1.bf16.msra.mxu0 %v8502_v26  ;;  %2240 = vst.msk [vmem:[#allocation4 + $0x8] sm:$0x3] %vm2123_vm3, %v2238_v1  ;;  %6361 = vmatpush1.bf16.msra.mxu1 %v8499_v58  ;;  %v8562_v58 = vld [vmem:[#allocation10 + $0x930] ss:$8 sps:$4 sm:$0xff]   ;;  %v8567_v26 = vld [vmem:[#allocation10 + $0x1c4] ss:$8 sps:$4 sm:$0xff]  }
 0x4d2   :  { %v2260_v9 = vpop.permute.xlu0 %2259  ;;  %6362 = vmatprep.subr.bf16.mxu1 %v8507_v19  ;;  %6665 = vmatprep.subr.bf16.mxu0 %v8510_v48  ;;  %v8565_v19 = vld [vmem:[#allocation10 + $0x1c0] ss:$8 sps:$4 sm:$0xff]   ;;  %v8573_v1 = vld [vmem:[#allocation10 + $0x1d4] ss:$8 sps:$4 sm:$0xff]  }
 0x4d3   :  { %2262 = vst.msk [vmem:[#allocation4 + $0xa] sm:$0x3] %vm2123_vm3, %v2260_v9  ;;  %v8568_v48 = vld [vmem:[#allocation10 + $0x940] ss:$8 sps:$4 sm:$0xff]   ;;  %v8574_v9 = vld [vmem:[#allocation10 + $0x950] ss:$8 sps:$4 sm:$0xff]  }
 0x4d4   :  { %v2296_v29 = vpop.permute.xlu1 %2295 }
 0x4d5   :  { %6666 = vmatpush1.bf16.msra.mxu0 %v8508_v31  ;;  %2298 = vst.msk [vmem:[#allocation4 + $0xc] sm:$0x3] %vm2123_vm3, %v2296_v29  ;;  %6363 = vmatpush1.bf16.msra.mxu1 %v8505_v32  ;;  %v8576_v32 = vld [vmem:[#allocation10 + $0x954] ss:$8 sps:$4 sm:$0xff]   ;;  %v8571_v31 = vld [vmem:[#allocation10 + $0x1d0] ss:$8 sps:$4 sm:$0xff]  }
 0x4d6   :  { %v2318_v47 = vpop.permute.xlu0 %2317  ;;  %6364 = vmatprep.subr.bf16.mxu1 %v8513_v42  ;;  %6667 = vmatprep.subr.bf16.mxu0 %v8516_v15  ;;  %v8579_v42 = vld [vmem:[#allocation10 + $0x1e4] ss:$8 sps:$4 sm:$0xff]  }
 0x4d7   :  { %2320 = vst.msk [vmem:[#allocation4 + $0xe] sm:$0x3] %vm2123_vm3, %v2318_v47  ;;  %v8582_v15 = vld [vmem:[#allocation10 + $0x964] ss:$8 sps:$4 sm:$0xff]   ;;  %v8585_v47 = vld [vmem:[#allocation10 + $0x1f4] ss:$8 sps:$4 sm:$0xff]  }
 0x4d9   :  { %6365 = vmatpush1.bf16.msra.mxu1 %v8511_v63  ;;  %6668 = vmatpush1.bf16.msra.mxu0 %v8514_v8  ;;  %v8577_v63 = vld [vmem:[#allocation10 + $0x1e0] ss:$8 sps:$4 sm:$0xff]  }
 0x4da   :  { %6366 = vmatprep.subr.bf16.mxu1 %v8519_v2  ;;  %6669 = vmatprep.subr.bf16.mxu0 %v8522_v12  ;;  %v8580_v8 = vld [vmem:[#allocation10 + $0x960] ss:$8 sps:$4 sm:$0xff]   ;;  %v8588_v2 = vld [vmem:[#allocation10 + $0x974] ss:$8 sps:$4 sm:$0xff]  }
 0x4dd   :  { %6367 = vmatpush1.bf16.msra.mxu1 %v8517_v38  ;;  %6670 = vmatpush1.bf16.msra.mxu0 %v8520_v25  ;;  %v8583_v38 = vld [vmem:[#allocation10 + $0x1f0] ss:$8 sps:$4 sm:$0xff]  }
 0x4de   :  { %6368 = vmatprep.subr.bf16.mxu1 %v8525_v22  ;;  %6671 = vmatprep.subr.bf16.mxu0 %v8528_v51  ;;  %v11204_v29 = vld [vmem:[#allocation4 + $0x8] sm:$0xff]  ;;  %v8586_v25 = vld [vmem:[#allocation10 + $0x970] ss:$8 sps:$4 sm:$0xff]  }
 0x4df   :  { %v11208_v12 = vrot.slane %v11204_v29, %v10621_v49  ;;  %v8591_v22 = vld [vmem:[#allocation10 + $0x204] ss:$8 sps:$4 sm:$0xff]  }
 0x4e0   :  { %v8594_v51 = vld [vmem:[#allocation10 + $0x984] ss:$8 sps:$4 sm:$0xff]  }
 0x4e1   :  { %6369 = vmatpush1.bf16.msra.mxu1 %v8523_v36  ;;  %6672 = vmatpush1.bf16.msra.mxu0 %v8526_v10  ;;  %v3065_v36 = vcombine.high %v11208_v12, %v11208_v12  ;;  %v8589_v10 = vld [vmem:[#allocation10 + $0x200] ss:$8 sps:$4 sm:$0xff]  }
 0x4e2   :  { %6370 = vmatprep.subr.bf16.mxu1 %v8531_v52  ;;  %6673 = vmatprep.subr.bf16.mxu0 %v8534_v61  ;;  %v3203_v52 = vpack.c.bf16 %v11181_v60, %v11181_v60  ;;  %v8592_v61 = vld [vmem:[#allocation10 + $0x980] ss:$8 sps:$4 sm:$0xff]  }
 0x4e3   :  { %v8604_v60 = vld [vmem:[#allocation10 + $0x9a0] ss:$8 sps:$4 sm:$0xff]  }
 0x4e5   :  { %6371 = vmatpush1.bf16.msra.mxu1 %v8529_v45  ;;  %6674 = vmatpush1.bf16.msra.mxu0 %v8532_v27  ;;  %v3206_v45 = vpack.c.bf16 %v3065_v36, %v3065_v36  ;;  %v8600_v27 = vld [vmem:[#allocation10 + $0x994] ss:$8 sps:$4 sm:$0xff]   ;;  %v8652_v36 = vld [vmem:[#allocation10 + $0xa20] ss:$8 sps:$4 sm:$0xff]  }
 0x4e6   :  { %6372 = vmatprep.subr.bf16.mxu1 %v8537_v30  ;;  %6675 = vmatprep.subr.bf16.mxu0 %v8540_v18  ;;  %v8595_v30 = vld [vmem:[#allocation10 + $0x210] ss:$8 sps:$4 sm:$0xff]  }
 0x4e7   :  { %v8598_v18 = vld [vmem:[#allocation10 + $0x990] ss:$8 sps:$4 sm:$0xff]  }
 0x4e9   :  { %6373 = vmatpush1.bf16.msra.mxu1 %v8535_v39  ;;  %6676 = vmatpush1.bf16.msra.mxu0 %v8538_v13  ;;  %v8603_v39 = vld [vmem:[#allocation10 + $0x224] ss:$8 sps:$4 sm:$0xff]  }
 0x4ea   :  { %6374 = vmatprep.subr.bf16.mxu1 %v8543_v53  ;;  %6686 = vmatprep.subr.bf16.mxu0 %v8546_v23  ;;  %v8606_v13 = vld [vmem:[#allocation10 + $0x9a4] ss:$8 sps:$4 sm:$0xff]   ;;  %v8601_v53 = vld [vmem:[#allocation10 + $0x220] ss:$8 sps:$4 sm:$0xff]   ;;  %v8609_v23 = vld [vmem:[#allocation10 + $0x234] ss:$8 sps:$4 sm:$0xff]  }
 0x4ec   :  { %6678 = vmatmul.mubr.bf16.vlgmr.msra.gmra.mrb[0].mxu0 %v3217_v56  ;;  %v8615_v56 = vld [vmem:[#allocation10 + $0x244] ss:$8 sps:$4 sm:$0xff]  }
 0x4ed   :  { %6375 = vmatpush1.bf16.msra.mxu1 %v8541_v43  ;;  %6687 = vmatpush1.bf16.msra.mxu0 %v8544_v14  ;;  %v8607_v43 = vld [vmem:[#allocation10 + $0x230] ss:$8 sps:$4 sm:$0xff]  }
 0x4ee   :  { %6718 = vmatprep.mubr.bf16.mxu0 %v3220_v3  ;;  %6376 = vmatprep.subr.bf16.mxu1 %v8549_v35  ;;  %v8610_v14 = vld [vmem:[#allocation10 + $0x9b0] ss:$8 sps:$4 sm:$0xff]   ;;  %v8618_v35 = vld [vmem:[#allocation10 + $0x9c4] ss:$8 sps:$4 sm:$0xff]   ;;  %v8616_v3 = vld [vmem:[#allocation10 + $0x9c0] ss:$8 sps:$4 sm:$0xff]  }
 0x4ef   :  { %6688 = vmatprep.subr.bf16.mxu0 %v8552_v59  ;;  %v8613_v59 = vld [vmem:[#allocation10 + $0x240] ss:$8 sps:$4 sm:$0xff]  }
 0x4f1   :  { %6377 = vmatpush1.bf16.msra.mxu1 %v8547_v11  ;;  %6689 = vmatpush1.bf16.msra.mxu0 %v8550_v37  ;;  %v8621_v11 = vld [vmem:[#allocation10 + $0x254] ss:$8 sps:$4 sm:$0xff]  }
 0x4f2   :  { %6378 = vmatprep.subr.bf16.mxu1 %v8555_v40  ;;  %6690 = vmatprep.subr.bf16.mxu0 %v8558_v50  ;;  %v8624_v37 = vld [vmem:[#allocation10 + $0x9d4] ss:$8 sps:$4 sm:$0xff]   ;;  %v8619_v40 = vld [vmem:[#allocation10 + $0x250] ss:$8 sps:$4 sm:$0xff]  }
 0x4f3   :  { %v8622_v50 = vld [vmem:[#allocation10 + $0x9d0] ss:$8 sps:$4 sm:$0xff]  }
 0x4f5   :  { %6379 = vmatpush1.bf16.msra.mxu1 %v8553_v21  ;;  %6691 = vmatpush1.bf16.msra.mxu0 %v8556_v55  ;;  %v8627_v21 = vld [vmem:[#allocation10 + $0x264] ss:$8 sps:$4 sm:$0xff]  }
 0x4f6   :  { %6380 = vmatprep.subr.bf16.mxu1 %v8561_v0  ;;  %6692 = vmatprep.subr.bf16.mxu0 %v8564_v62  ;;  %v8630_v55 = vld [vmem:[#allocation10 + $0x9e4] ss:$8 sps:$4 sm:$0xff]   ;;  %v8625_v0 = vld [vmem:[#allocation10 + $0x260] ss:$8 sps:$4 sm:$0xff]  }
 0x4f7   :  { %v11214_v62 = vld [vmem:[#allocation4 + $0x28] sm:$0xff] }
 0x4f9   :  { %6381 = vmatpush1.bf16.msra.mxu1 %v8559_v20  ;;  %6693 = vmatpush1.bf16.msra.mxu0 %v8562_v58  ;;  %v8628_v20 = vld [vmem:[#allocation10 + $0x9e0] ss:$8 sps:$4 sm:$0xff]   ;;  %v8633_v58 = vld [vmem:[#allocation10 + $0x274] ss:$8 sps:$4 sm:$0xff]  }
 0x4fa   :  { %6382 = vmatprep.subr.bf16.mxu1 %v8567_v26  ;;  %6694 = vmatprep.subr.bf16.mxu0 %v8570_v17  ;;  %v8636_v26 = vld [vmem:[#allocation10 + $0x9f4] ss:$8 sps:$4 sm:$0xff]   ;;  %v11218_v17 = vrot.slane %v11214_v62, %v10621_v49 }
 0x4fd   :  { %6383 = vmatpush1.bf16.msra.mxu1 %v8565_v19  ;;  %6695 = vmatpush1.bf16.msra.mxu0 %v8568_v48  ;;  %v8631_v19 = vld [vmem:[#allocation10 + $0x270] ss:$8 sps:$4 sm:$0xff]  }
 0x4fe   :  { %6384 = vmatprep.subr.bf16.mxu1 %v8573_v1  ;;  %6696 = vmatprep.subr.bf16.mxu0 %v8576_v32  ;;  %v8634_v48 = vld [vmem:[#allocation10 + $0x9f0] ss:$8 sps:$4 sm:$0xff]   ;;  %v8639_v1 = vld [vmem:[#allocation10 + $0x284] ss:$8 sps:$4 sm:$0xff]  }
 0x4ff   :  { %v8642_v32 = vld [vmem:[#allocation10 + $0xa04] ss:$8 sps:$4 sm:$0xff]  }
 0x501   :  { %6385 = vmatpush1.bf16.msra.mxu1 %v8571_v31  ;;  %6697 = vmatpush1.bf16.msra.mxu0 %v8574_v9  ;;  %v3133_v31 = vcombine.high %v11218_v17, %v11218_v17  ;;  %v8637_v9 = vld [vmem:[#allocation10 + $0x280] ss:$8 sps:$4 sm:$0xff]  }
 0x502   :  { %6386 = vmatprep.subr.bf16.mxu1 %v8579_v42  ;;  %6698 = vmatprep.subr.bf16.mxu0 %v8582_v15  ;;  %v8640_v42 = vld [vmem:[#allocation10 + $0xa00] ss:$8 sps:$4 sm:$0xff]   ;;  %v3219_v15 = vpack.c.bf16 %v11198_v5, %v11198_v5  ;;  %v8657_v5 = vld [vmem:[#allocation10 + $0x2b4] ss:$8 sps:$4 sm:$0xff]  }
 0x505   :  { %6387 = vmatpush1.bf16.msra.mxu1 %v8577_v63  ;;  %6699 = vmatpush1.bf16.msra.mxu0 %v8580_v8  ;;  %v8645_v63 = vld [vmem:[#allocation10 + $0x294] ss:$8 sps:$4 sm:$0xff]  }
 0x506   :  { %6388 = vmatprep.subr.bf16.mxu1 %v8585_v47  ;;  %6700 = vmatprep.subr.bf16.mxu0 %v8588_v2  ;;  %v8648_v8 = vld [vmem:[#allocation10 + $0xa14] ss:$8 sps:$4 sm:$0xff]   ;;  %v3222_v47 = vpack.c.bf16 %v3133_v31, %v3133_v31  ;;  %v8643_v2 = vld [vmem:[#allocation10 + $0x290] ss:$8 sps:$4 sm:$0xff]  }
 0x507   :  { %v8706_v31 = vld [vmem:[#allocation10 + $0x334] ss:$8 sps:$4 sm:$0xff]  }
 0x509   :  { %6389 = vmatpush1.bf16.msra.mxu1 %v8583_v38  ;;  %6701 = vmatpush1.bf16.msra.mxu0 %v8586_v25  ;;  %v8646_v38 = vld [vmem:[#allocation10 + $0xa10] ss:$8 sps:$4 sm:$0xff]   ;;  %v8651_v25 = vld [vmem:[#allocation10 + $0x2a4] ss:$8 sps:$4 sm:$0xff]  }
 0x50a   :  { %6399 = vmatprep.subr.bf16.mxu1 %v8591_v22  ;;  %6702 = vmatprep.subr.bf16.mxu0 %v8594_v51  ;;  %v8654_v22 = vld [vmem:[#allocation10 + $0xa24] ss:$8 sps:$4 sm:$0xff]   ;;  %v8649_v51 = vld [vmem:[#allocation10 + $0x2a0] ss:$8 sps:$4 sm:$0xff]  }
 0x50c   :  { %6391 = vmatmul.mubr.bf16.vlgmr.msra.gmra.mrb[48].mxu1 %v3203_v52  ;;  %v8655_v52 = vld [vmem:[#allocation10 + $0x2b0] ss:$8 sps:$4 sm:$0xff]  }
 0x50d   :  { %6400 = vmatpush1.bf16.msra.mxu1 %v8589_v10  ;;  %6431 = vmatprep.mubr.bf16.mxu1 %v3206_v45  ;;  %v8660_v10 = vld [vmem:[#allocation10 + $0xa34] ss:$8 sps:$4 sm:$0xff]   ;;  %v8666_v45 = vld [vmem:[#allocation10 + $0xa44] ss:$8 sps:$4 sm:$0xff]  }
 0x50e   :  { %6703 = vmatpush1.bf16.msra.mxu0 %v8592_v61  ;;  %6401 = vmatprep.subr.bf16.mxu1 %v8597_v41  ;;  %v8658_v61 = vld [vmem:[#allocation10 + $0xa30] ss:$8 sps:$4 sm:$0xff]   ;;  %v8663_v41 = vld [vmem:[#allocation10 + $0x2c4] ss:$8 sps:$4 sm:$0xff]  }
 0x50f   :  { %6704 = vmatprep.subr.bf16.mxu0 %v8600_v27  ;;  %v8661_v27 = vld [vmem:[#allocation10 + $0x2c0] ss:$8 sps:$4 sm:$0xff]  }
 0x511   :  { %6402 = vmatpush1.bf16.msra.mxu1 %v8595_v30  ;;  %v8664_v30 = vld [vmem:[#allocation10 + $0xa40] ss:$8 sps:$4 sm:$0xff]  }
 0x512   :  { %6705 = vmatpush1.bf16.msra.mxu0 %v8598_v18  ;;  %6403 = vmatprep.subr.bf16.mxu1 %v8603_v39  ;;  %v8669_v18 = vld [vmem:[#allocation10 + $0x2d4] ss:$8 sps:$4 sm:$0xff]  }
 0x513   :  { %6706 = vmatprep.subr.bf16.mxu0 %v8606_v13  ;;  %v8672_v39 = vld [vmem:[#allocation10 + $0xa54] ss:$8 sps:$4 sm:$0xff]   ;;  %v8667_v13 = vld [vmem:[#allocation10 + $0x2d0] ss:$8 sps:$4 sm:$0xff]  }
 0x515   :  { %6404 = vmatpush1.bf16.msra.mxu1 %v8601_v53  ;;  %v8670_v53 = vld [vmem:[#allocation10 + $0xa50] ss:$8 sps:$4 sm:$0xff]  }
 0x516   :  { %6707 = vmatpush1.bf16.msra.mxu0 %v8604_v60  ;;  %6405 = vmatprep.subr.bf16.mxu1 %v8609_v23  ;;  %v8675_v60 = vld [vmem:[#allocation10 + $0x2e4] ss:$8 sps:$4 sm:$0xff]  }
 0x517   :  { %6708 = vmatprep.subr.bf16.mxu0 %v8612_v4  ;;  %v8678_v23 = vld [vmem:[#allocation10 + $0xa64] ss:$8 sps:$4 sm:$0xff]   ;;  %v3050_v4 = vcombine.high %v11204_v29, %v11204_v29 }
 0x519   :  { %6406 = vmatpush1.bf16.msra.mxu1 %v8607_v43  ;;  %v8673_v43 = vld [vmem:[#allocation10 + $0x2e0] ss:$8 sps:$4 sm:$0xff]  }
 0x51a   :  { %6709 = vmatpush1.bf16.msra.mxu0 %v8610_v14  ;;  %6407 = vmatprep.subr.bf16.mxu1 %v8615_v56  ;;  %v8676_v14 = vld [vmem:[#allocation10 + $0xa60] ss:$8 sps:$4 sm:$0xff]   ;;  %v8681_v56 = vld [vmem:[#allocation10 + $0x2f4] ss:$8 sps:$4 sm:$0xff]  }
 0x51b   :  { %6710 = vmatprep.subr.bf16.mxu0 %v8618_v35  ;;  %v8684_v35 = vld [vmem:[#allocation10 + $0xa74] ss:$8 sps:$4 sm:$0xff]  }
 0x51d   :  { %6408 = vmatpush1.bf16.msra.mxu1 %v8613_v59  ;;  %v11227_v59 = vrot.slane %v3050_v4, %v10621_v49  ;;  %v8743_v4 = vld [vmem:[#allocation10 + $0x394] ss:$8 sps:$4 sm:$0xff]  }
 0x51e   :  { %6711 = vmatpush1.bf16.msra.mxu0 %v8616_v3  ;;  %6409 = vmatprep.subr.bf16.mxu1 %v8621_v11  ;;  %v8679_v3 = vld [vmem:[#allocation10 + $0x2f0] ss:$8 sps:$4 sm:$0xff]  }
 0x51f   :  { %6712 = vmatprep.subr.bf16.mxu0 %v8624_v37  ;;  %v8682_v11 = vld [vmem:[#allocation10 + $0xa70] ss:$8 sps:$4 sm:$0xff]   ;;  %v8687_v37 = vld [vmem:[#allocation10 + $0x304] ss:$8 sps:$4 sm:$0xff]   ;;  %v3066_v29 = vcombine.high %v11227_v59, %v11227_v59 }
 0x521   :  { %6410 = vmatpush1.bf16.msra.mxu1 %v8619_v40  ;;  %v8690_v40 = vld [vmem:[#allocation10 + $0xa84] ss:$8 sps:$4 sm:$0xff]  }
 0x522   :  { %6713 = vmatpush1.bf16.msra.mxu0 %v8622_v50  ;;  %6411 = vmatprep.subr.bf16.mxu1 %v8627_v21  ;;  %v8685_v50 = vld [vmem:[#allocation10 + $0x300] ss:$8 sps:$4 sm:$0xff]   ;;  %v3205_v21 = vpack.c.bf16 %v11208_v12, %v11208_v12 }
 0x523   :  { %6714 = vmatprep.subr.bf16.mxu0 %v8630_v55  ;;  %v8688_v55 = vld [vmem:[#allocation10 + $0xa80] ss:$8 sps:$4 sm:$0xff]  }
 0x524   :  { %v8701_v12 = vld [vmem:[#allocation10 + $0xaa0] ss:$8 sps:$4 sm:$0xff]  }
 0x525   :  { %6412 = vmatpush1.bf16.msra.mxu1 %v8625_v0  ;;  %v8694_v0 = vld [vmem:[#allocation10 + $0x314] ss:$8 sps:$4 sm:$0xff]  }
 0x526   :  { %6715 = vmatpush1.bf16.msra.mxu0 %v8628_v20  ;;  %6413 = vmatprep.subr.bf16.mxu1 %v8633_v58  ;;  %v3208_v20 = vpack.c.bf16 %v3066_v29, %v3066_v29  ;;  %v8697_v58 = vld [vmem:[#allocation10 + $0xa94] ss:$8 sps:$4 sm:$0xff]   ;;  %v8750_v29 = vld [vmem:[#allocation10 + $0xb20] ss:$8 sps:$4 sm:$0xff]  }
 0x527   :  { %6716 = vmatprep.subr.bf16.mxu0 %v8636_v26  ;;  %v8692_v26 = vld [vmem:[#allocation10 + $0x310] ss:$8 sps:$4 sm:$0xff]  }
 0x529   :  { %6414 = vmatpush1.bf16.msra.mxu1 %v8631_v19  ;;  %v8695_v19 = vld [vmem:[#allocation10 + $0xa90] ss:$8 sps:$4 sm:$0xff]  }
 0x52a   :  { %6717 = vmatpush1.bf16.msra.mxu0 %v8634_v48  ;;  %6415 = vmatprep.subr.bf16.mxu1 %v8639_v1  ;;  %v8700_v48 = vld [vmem:[#allocation10 + $0x324] ss:$8 sps:$4 sm:$0xff]  }
 0x52b   :  { %6727 = vmatprep.subr.bf16.mxu0 %v8642_v32  ;;  %v8703_v1 = vld [vmem:[#allocation10 + $0xaa4] ss:$8 sps:$4 sm:$0xff]   ;;  %v8698_v32 = vld [vmem:[#allocation10 + $0x320] ss:$8 sps:$4 sm:$0xff]  }
 0x52d   :  { %6719 = vmatmul.mubr.bf16.vlgmr.msra.gmra.mrb[0].mxu0 %v3219_v15  ;;  %6416 = vmatpush1.bf16.msra.mxu1 %v8637_v9  ;;  %v8709_v9 = vld [vmem:[#allocation10 + $0xab4] ss:$8 sps:$4 sm:$0xff]   ;;  %v8707_v15 = vld [vmem:[#allocation10 + $0xab0] ss:$8 sps:$4 sm:$0xff]  }
 0x52e   :  { %6728 = vmatpush1.bf16.msra.mxu0 %v8640_v42  ;;  %6759 = vmatprep.mubr.bf16.mxu0 %v3222_v47  ;;  %v8704_v42 = vld [vmem:[#allocation10 + $0x330] ss:$8 sps:$4 sm:$0xff]   ;;  %v8710_v47 = vld [vmem:[#allocation10 + $0x340] ss:$8 sps:$4 sm:$0xff]  }
 0x52f   :  { %6417 = vmatprep.subr.bf16.mxu1 %v8645_v63  ;;  %6729 = vmatprep.subr.bf16.mxu0 %v8648_v8  ;;  %v8712_v63 = vld [vmem:[#allocation10 + $0x344] ss:$8 sps:$4 sm:$0xff]  }
 0x530   :  { %v8715_v8 = vld [vmem:[#allocation10 + $0xac4] ss:$8 sps:$4 sm:$0xff]  }
 0x531   :  { %6418 = vmatpush1.bf16.msra.mxu1 %v8643_v2  ;;  %v8713_v2 = vld [vmem:[#allocation10 + $0xac0] ss:$8 sps:$4 sm:$0xff]  }
 0x532   :  { %6730 = vmatpush1.bf16.msra.mxu0 %v8646_v38  ;;  %6419 = vmatprep.subr.bf16.mxu1 %v8651_v25  ;;  %v8718_v38 = vld [vmem:[#allocation10 + $0x354] ss:$8 sps:$4 sm:$0xff]  }
 0x533   :  { %6731 = vmatprep.subr.bf16.mxu0 %v8654_v22  ;;  %v8721_v25 = vld [vmem:[#allocation10 + $0xad4] ss:$8 sps:$4 sm:$0xff]   ;;  %v8716_v22 = vld [vmem:[#allocation10 + $0x350] ss:$8 sps:$4 sm:$0xff]  }
 0x535   :  { %6420 = vmatpush1.bf16.msra.mxu1 %v8649_v51  ;;  %v8719_v51 = vld [vmem:[#allocation10 + $0xad0] ss:$8 sps:$4 sm:$0xff]  }
 0x536   :  { %6732 = vmatpush1.bf16.msra.mxu0 %v8652_v36  ;;  %6421 = vmatprep.subr.bf16.mxu1 %v8657_v5  ;;  %v8724_v36 = vld [vmem:[#allocation10 + $0x364] ss:$8 sps:$4 sm:$0xff]  }
 0x537   :  { %6733 = vmatprep.subr.bf16.mxu0 %v8660_v10  ;;  %v8727_v5 = vld [vmem:[#allocation10 + $0xae4] ss:$8 sps:$4 sm:$0xff]   ;;  %v3118_v10 = vcombine.high %v11214_v62, %v11214_v62 }
 0x539   :  { %6422 = vmatpush1.bf16.msra.mxu1 %v8655_v52  ;;  %v8722_v52 = vld [vmem:[#allocation10 + $0x360] ss:$8 sps:$4 sm:$0xff]  }
 0x53a   :  { %6734 = vmatpush1.bf16.msra.mxu0 %v8658_v61  ;;  %6423 = vmatprep.subr.bf16.mxu1 %v8663_v41  ;;  %v8725_v61 = vld [vmem:[#allocation10 + $0xae0] ss:$8 sps:$4 sm:$0xff]   ;;  %v8730_v41 = vld [vmem:[#allocation10 + $0x374] ss:$8 sps:$4 sm:$0xff]  }
 0x53b   :  { %6735 = vmatprep.subr.bf16.mxu0 %v8666_v45  ;;  %v8733_v45 = vld [vmem:[#allocation10 + $0xaf4] ss:$8 sps:$4 sm:$0xff]  }
 0x53d   :  { %6424 = vmatpush1.bf16.msra.mxu1 %v8661_v27  ;;  %v11236_v27 = vrot.slane %v3118_v10, %v10621_v49  ;;  %v2404_v10 = vrot.slane %v10969_v57, 1 }
 0x53e   :  { %6736 = vmatpush1.bf16.msra.mxu0 %v8664_v30  ;;  %6425 = vmatprep.subr.bf16.mxu1 %v8669_v18  ;;  %v8728_v30 = vld [vmem:[#allocation10 + $0x370] ss:$8 sps:$4 sm:$0xff]  }
 0x53f   :  { %6737 = vmatprep.subr.bf16.mxu0 %v8672_v39  ;;  %v8731_v18 = vld [vmem:[#allocation10 + $0xaf0] ss:$8 sps:$4 sm:$0xff]   ;;  %v8736_v39 = vld [vmem:[#allocation10 + $0x384] ss:$8 sps:$4 sm:$0xff]   ;;  %v3134_v62 = vcombine.high %v11236_v27, %v11236_v27 }
 0x541   :  { %6426 = vmatpush1.bf16.msra.mxu1 %v8667_v13  ;;  %v8739_v13 = vld [vmem:[#allocation10 + $0xb04] ss:$8 sps:$4 sm:$0xff]  }
 0x542   :  { %6738 = vmatpush1.bf16.msra.mxu0 %v8670_v53  ;;  %6427 = vmatprep.subr.bf16.mxu1 %v8675_v60  ;;  %v8734_v53 = vld [vmem:[#allocation10 + $0x380] ss:$8 sps:$4 sm:$0xff]  }
 0x543   :  { %6739 = vmatprep.subr.bf16.mxu0 %v8678_v23  ;;  %v8737_v60 = vld [vmem:[#allocation10 + $0xb00] ss:$8 sps:$4 sm:$0xff]   ;;  %v3221_v23 = vpack.c.bf16 %v11218_v17, %v11218_v17 }
 0x544   :  { %v8747_v17 = vld [vmem:[#allocation10 + $0x3a0] ss:$8 sps:$4 sm:$0xff]  }
 0x545   :  { %6428 = vmatpush1.bf16.msra.mxu1 %v8673_v43  ;;  %v8746_v43 = vld [vmem:[#allocation10 + $0xb14] ss:$8 sps:$4 sm:$0xff]  }
 0x546   :  { %6740 = vmatpush1.bf16.msra.mxu0 %v8676_v14  ;;  %6429 = vmatprep.subr.bf16.mxu1 %v8681_v56  ;;  %v3224_v14 = vpack.c.bf16 %v3134_v62, %v3134_v62  ;;  %v8741_v56 = vld [vmem:[#allocation10 + $0x390] ss:$8 sps:$4 sm:$0xff]   ;;  %v8779_v62 = vld [vmem:[#allocation10 + $0x3f4] ss:$8 sps:$4 sm:$0xff]  }
 0x547   :  { %6741 = vmatprep.subr.bf16.mxu0 %v8684_v35  ;;  %v8744_v35 = vld [vmem:[#allocation10 + $0xb10] ss:$8 sps:$4 sm:$0xff]  }
 0x549   :  { %6430 = vmatpush1.bf16.msra.mxu1 %v8679_v3  ;;  %v8749_v3 = vld [vmem:[#allocation10 + $0x3a4] ss:$8 sps:$4 sm:$0xff]  }
 0x54a   :  { %6742 = vmatpush1.bf16.msra.mxu0 %v8682_v11  ;;  %6440 = vmatprep.subr.bf16.mxu1 %v8687_v37  ;;  %v11242_v11 = vld [vmem:[#allocation8] ss:$0 sm:$0xff] }
 0x54b   :  { %6743 = vmatprep.subr.bf16.mxu0 %v8690_v40  ;;  %v2017_v37 = vadd.f32 %v11242_v11, %v10609_v28  ;;  %v8752_v40 = vld [vmem:[#allocation10 + $0xb24] ss:$8 sps:$4 sm:$0xff]  }
 0x54c   :  { %6432 = vmatmul.mubr.bf16.vlgmr.msra.gmra.mrb[48].mxu1 %v3205_v21  ;;  %v8764_v28 = vld [vmem:[#allocation10 + $0xb44] ss:$8 sps:$4 sm:$0xff]  }
 0x54d   :  { %6441 = vmatpush1.bf16.msra.mxu1 %v8685_v50  ;;  %6472 = vmatprep.mubr.bf16.mxu1 %v3208_v20  ;;  %v8755_v50 = vld [vmem:[#allocation10 + $0x3b4] ss:$8 sps:$4 sm:$0xff]   ;;  %v2071_v21 = vmax.f32 %v2017_v37, 0.0  ;;  %v8756_v20 = vld [vmem:[#allocation10 + $0xb30] ss:$8 sps:$4 sm:$0xff]   ;;  %v2407_v37 = vsel %vm2102_vm7, %v10980_v34, %v2404_v10 }
 0x54e   :  { %6744 = vmatpush1.bf16.msra.mxu0 %v8688_v55  ;;  %6442 = vmatprep.subr.bf16.mxu1 %v8694_v0  ;;  %v8758_v55 = vld [vmem:[#allocation10 + $0xb34] ss:$8 sps:$4 sm:$0xff]   ;;  %v8753_v0 = vld [vmem:[#allocation10 + $0x3b0] ss:$8 sps:$4 sm:$0xff]  }
 0x54f   :  { %6745 = vmatprep.subr.bf16.mxu0 %v8697_v58  ;;  %v8761_v58 = vld [vmem:[#allocation10 + $0x3c4] ss:$8 sps:$4 sm:$0xff]  }
 0x551   :  { %6443 = vmatpush1.bf16.msra.mxu1 %v8692_v26  ;;  %v2843_v26 = vcombine.high %v2071_v21, %v2071_v21 }
 0x552   :  { %6746 = vmatpush1.bf16.msra.mxu0 %v8695_v19  ;;  %6444 = vmatprep.subr.bf16.mxu1 %v8700_v48  ;;  %v8759_v19 = vld [vmem:[#allocation10 + $0x3c0] ss:$8 sps:$4 sm:$0xff]   ;;  %v11247_v48 = vrot.slane %v2071_v21, %v10621_v49 }
 0x553   :  { %6747 = vmatprep.subr.bf16.mxu0 %v8703_v1  ;;  %v8762_v1 = vld [vmem:[#allocation10 + $0xb40] ss:$8 sps:$4 sm:$0xff]  }
 0x555   :  { %6445 = vmatpush1.bf16.msra.mxu1 %v8698_v32  ;;  %v8767_v32 = vld [vmem:[#allocation10 + $0x3d4] ss:$8 sps:$4 sm:$0xff]  }
 0x556   :  { %6748 = vmatpush1.bf16.msra.mxu0 %v8701_v12  ;;  %6446 = vmatprep.subr.bf16.mxu1 %v8706_v31  ;;  %v2346_v12 = vrot.slane %v10677_v33, 1  ;;  %v11251_v31 = vrot.slane %v2843_v26, %v10621_v49 }
 0x557   :  { %6749 = vmatprep.subr.bf16.mxu0 %v8709_v9  ;;  %v8770_v9 = vld [vmem:[#allocation10 + $0xb54] ss:$8 sps:$4 sm:$0xff]  }
 0x558   :  { %v2868_v57 = vrot.slane %v11251_v31, 1 }
 0x559   :  { %6447 = vmatpush1.bf16.msra.mxu1 %v8704_v42 }
 0x55a   :  { %6750 = vmatpush1.bf16.msra.mxu0 %v8707_v15  ;;  %6448 = vmatprep.subr.bf16.mxu1 %v8712_v63  ;;  %v8765_v15 = vld [vmem:[#allocation10 + $0x3d0] ss:$8 sps:$4 sm:$0xff]   ;;  %v2349_v63 = vsel %vm2102_vm7, %v10828_v7, %v2346_v12 }
 0x55b   :  { %6751 = vmatprep.subr.bf16.mxu0 %v8715_v8  ;;  %v2368_v8 = vrot.slane %v10699_v24, 1  ;;  %v2350_v24 = vsel %vm2104_vm8, %v10828_v7, %v2349_v63  ;;  %v8813_v63 = vld [vmem:[#allocation10 + $0x400] ss:$8 sps:$4 sm:$0xff]  }
 0x55d   :  { %6449 = vmatpush1.bf16.msra.mxu1 %v8710_v47  ;;  %v2821_v47 = vcombine.high %v11247_v48, %v11247_v48 }
 0x55e   :  { %6752 = vmatpush1.bf16.msra.mxu0 %v8713_v2  ;;  %6450 = vmatprep.subr.bf16.mxu1 %v8718_v38  ;;  %v8768_v38 = vld [vmem:[#allocation10 + $0xb50] ss:$8 sps:$4 sm:$0xff]  }
 0x55f   :  { %6753 = vmatprep.subr.bf16.mxu0 %v8721_v25  ;;  %v8773_v25 = vld [vmem:[#allocation10 + $0x3e4] ss:$8 sps:$4 sm:$0xff]  }
 0x561   :  { %6451 = vmatpush1.bf16.msra.mxu1 %v8716_v22  ;;  %v11261_v22 = vcombine.high %v11251_v31, %v11251_v31 }
 0x562   :  { %6754 = vmatpush1.bf16.msra.mxu0 %v8719_v51  ;;  %6452 = vmatprep.subr.bf16.mxu1 %v8724_v36  ;;  %v8776_v51 = vld [vmem:[#allocation10 + $0xb64] ss:$8 sps:$4 sm:$0xff]  }
 0x563   :  { %6755 = vmatprep.subr.bf16.mxu0 %v8727_v5  ;;  %v2371_v5 = vsel %vm2102_vm7, %v10936_v16, %v2368_v8 }
 0x565   :  { %6453 = vmatpush1.bf16.msra.mxu1 %v8722_v52  ;;  %v2426_v52 = vrot.slane %v11036_v6, 1  ;;  %v2890_v6 = vrot.slane %v11261_v22, 1 }
 0x566   :  { %6756 = vmatpush1.bf16.msra.mxu0 %v8725_v61  ;;  %6454 = vmatprep.subr.bf16.mxu1 %v8730_v41  ;;  %v11271_v61 = vadd.f32 %v11242_v11, %v10611_v46  ;;  %v8771_v41 = vld [vmem:[#allocation10 + $0x3e0] ss:$8 sps:$4 sm:$0xff]   ;;  %v2351_v46 = vsel %vm2106_vm9, %v10828_v7, %v2350_v24 }
 0x567   :  { %6757 = vmatprep.subr.bf16.mxu0 %v8733_v45  ;;  %v2810_v45 = vrot.slane %v11247_v48, 1 }
 0x569   :  { %6455 = vmatpush1.bf16.msra.mxu1 %v8728_v30  ;;  %v2832_v30 = vrot.slane %v2821_v47, 1 }
 0x56a   :  { %6758 = vmatpush1.bf16.msra.mxu0 %v8731_v18  ;;  %6456 = vmatprep.subr.bf16.mxu1 %v8736_v39 }
 0x56b   :  { %6768 = vmatprep.subr.bf16.mxu0 %v8739_v13  ;;  %v8774_v13 = vld [vmem:[#allocation10 + $0xb60] ss:$8 sps:$4 sm:$0xff]  }
 0x56d   :  { %6760 = vmatmul.mubr.bf16.vlgmr.msra.gmra.mrb[0].mxu0 %v3221_v23  ;;  %6457 = vmatpush1.bf16.msra.mxu1 %v8734_v53  ;;  %v8782_v53 = vld [vmem:[#allocation10 + $0xb74] ss:$8 sps:$4 sm:$0xff]  }
 0x56e   :  { %6769 = vmatpush1.bf16.msra.mxu0 %v8737_v60  ;;  %6800 = vmatprep.mubr.bf16.mxu0 %v3224_v14  ;;  %v11281_v60 = vsel %vm2104_vm8, %v10936_v16, %v2371_v5 }
 0x56f   :  { %6458 = vmatprep.subr.bf16.mxu1 %v8743_v4  ;;  %6770 = vmatprep.subr.bf16.mxu0 %v8746_v43 }
 0x571   :  { %6459 = vmatpush1.bf16.msra.mxu1 %v8741_v56  ;;  %v8777_v56 = vld [vmem:[#allocation10 + $0x3f0] ss:$8 sps:$4 sm:$0xff]  }
 0x572   :  { %6771 = vmatpush1.bf16.msra.mxu0 %v8744_v35  ;;  %6460 = vmatprep.subr.bf16.mxu1 %v8749_v3  ;;  %v3207_v3 = vpack.c.bf16 %v11227_v59, %v11227_v59 }
 0x573   :  { %6772 = vmatprep.subr.bf16.mxu0 %v8752_v40  ;;  %v11292_v40 = vsel %vm2102_vm7, %v11027_v54, %v2426_v52 }
 0x575   :  { %6461 = vmatpush1.bf16.msra.mxu1 %v8747_v17  ;;  %v8780_v17 = vld [vmem:[#allocation10 + $0xb70] ss:$8 sps:$4 sm:$0xff]  }
 0x576   :  { %6773 = vmatpush1.bf16.msra.mxu0 %v8750_v29  ;;  %6462 = vmatprep.subr.bf16.mxu1 %v8755_v50 }
 0x577   :  { %6774 = vmatprep.subr.bf16.mxu0 %v8758_v55 }
 0x579   :  { %6463 = vmatpush1.bf16.msra.mxu1 %v8753_v0 }
 0x57a   :  { %6775 = vmatpush1.bf16.msra.mxu0 %v8756_v20  ;;  %6464 = vmatprep.subr.bf16.mxu1 %v8761_v58  ;;  %v8785_v20 = vld [vmem:[#allocation10 + $0xb84] ss:$8 sps:$4 sm:$0xff]  }
 0x57b   :  { %6776 = vmatprep.subr.bf16.mxu0 %v8764_v28  ;;  %v8815_v28 = vld [vmem:[#allocation10 + $0x404] ss:$8 sps:$4 sm:$0xff]  }
 0x57d   :  { %6465 = vmatpush1.bf16.msra.mxu1 %v8759_v19  ;;  %v2056_v42 = vpop.f32.mrb[44].mxu1 }
 0x57e   :  { %6777 = vmatpush1.bf16.msra.mxu0 %v8762_v1  ;;  %v2057_v2 = vadd.f32 %v11242_v11, %v2056_v42  ;;  %v2058_v33 = vpop.f32.mrb[45].mxu1  ;;  %6466 = vmatprep.subr.bf16.mxu1 %v8767_v32 }
 0x57f   :  { %6778 = vmatprep.subr.bf16.mxu0 %v8770_v9 }
 0x580   :  { %v2079_v36 = vmax.f32 %v2057_v2, 0.0  ;;  %v8783_v2 = vld [vmem:[#allocation10 + $0xb80] ss:$8 sps:$4 sm:$0xff]  }
 0x581   :  { %6467 = vmatpush1.bf16.msra.mxu1 %v8765_v15 }
 0x582   :  { %v2800_v18 = vrot.slane %v2079_v36, %v10621_v49  ;;  %v2851_v39 = vcombine.high %v2079_v36, %v2079_v36  ;;  %6779 = vmatpush1.bf16.msra.mxu0 %v8768_v38  ;;  %6468 = vmatprep.subr.bf16.mxu1 %v8773_v25  ;;  %v8821_v36 = vld [vmem:[#allocation10 + $0x414] ss:$8 sps:$4 sm:$0xff]  }
 0x583   :  { %6780 = vmatprep.subr.bf16.mxu0 %v8776_v51  ;;  %v8788_v51 = vld [vmem:[#allocation10 + $0xb94] ss:$8 sps:$4 sm:$0xff]  }
 0x584   :  { %v2858_v23 = vrot.slane %v2851_v39, %v10621_v49  ;;  %v2813_v4 = vsel %vm2102_vm7, %v2800_v18, %v2810_v45  ;;  %v2822_v43 = vcombine.high %v2800_v18, %v2800_v18  ;;  %v2803_v14 = vrot.slane %v2800_v18, 7  ;;  %v8819_v39 = vld [vmem:[#allocation10 + $0x410] ss:$8 sps:$4 sm:$0xff]  }
 0x585   :  { %6469 = vmatpush1.bf16.msra.mxu1 %v8771_v41  ;;  %v2814_v35 = vsel %vm2104_vm8, %v2800_v18, %v2813_v4 }
 0x586   :  { %6781 = vmatpush1.bf16.msra.mxu0 %v8774_v13  ;;  %6470 = vmatprep.subr.bf16.mxu1 %v8779_v62  ;;  %v2815_v29 = vsel %vm2106_vm9, %v2800_v18, %v2814_v35  ;;  %v2835_v50 = vsel %vm2102_vm7, %v2822_v43, %v2832_v30  ;;  %v2871_v21 = vsel %vm2102_vm7, %v2858_v23, %v2868_v57  ;;  %v2825_v55 = vrot.slane %v2822_v43, 7  ;;  %v8786_v57 = vld [vmem:[#allocation10 + $0xb90] ss:$8 sps:$4 sm:$0xff]   ;;  %v8789_v35 = vld [vmem:[#allocation10 + $0xba0] ss:$8 sps:$4 sm:$0xff]  }
 0x587   :  { %6782 = vmatprep.subr.bf16.mxu0 %v8782_v53  ;;  %v2816_v59 = vsel %vm2108_vm10, %v2800_v18, %v2815_v29  ;;  %v2836_v0 = vsel %vm2104_vm8, %v2822_v43, %v2835_v50  ;;  %v2872_v58 = vsel %vm2104_vm8, %v2858_v23, %v2871_v21  ;;  %v2880_v26 = vcombine.high %v2858_v23, %v2858_v23  ;;  %v8791_v53 = vld [vmem:[#allocation10 + $0xba4] ss:$8 sps:$4 sm:$0xff]   ;;  %v8831_v50 = vld [vmem:[#allocation10 + $0x430] ss:$8 sps:$4 sm:$0xff]  }
 0x588   :  { %2817 = vrot.lane.b32.xlu1 %v2816_v59, %s9344_s0  ;;  %v2837_v19 = vsel %vm2106_vm9, %v2822_v43, %v2836_v0  ;;  %v2873_v1 = vsel %vm2106_vm9, %v2858_v23, %v2872_v58  ;;  %v2804_v32 = vsel %vm2102_vm7, %v2803_v14, %v11247_v48  ;;  %v2826_v12 = vsel %vm2102_vm7, %v2825_v55, %v2821_v47  ;;  %v8792_v21 = vld [vmem:[#allocation10 + $0xbb0] ss:$8 sps:$4 sm:$0xff]   ;;  %v8797_v59 = vld [vmem:[#allocation10 + $0xbc4] ss:$8 sps:$4 sm:$0xff]   ;;  %v8837_v0 = vld [vmem:[#allocation10 + $0x440] ss:$8 sps:$4 sm:$0xff]  }
 0x589   :  { %6471 = vmatpush1.bf16.msra.mxu1 %v8777_v56  ;;  %v2838_v9 = vsel %vm2108_vm10, %v2822_v43, %v2837_v19  ;;  %v2874_v42 = vsel %vm2108_vm10, %v2858_v23, %v2873_v1  ;;  %v2893_v15 = vsel %vm2102_vm7, %v2880_v26, %v2890_v6  ;;  %v2805_v8 = vsel %vm2104_vm8, %v2803_v14, %v2804_v32  ;;  %v8825_v56 = vld [vmem:[#allocation10 + $0x420] ss:$8 sps:$4 sm:$0xff]   ;;  %v8845_v58 = vld [vmem:[#allocation10 + $0x454] ss:$8 sps:$4 sm:$0xff]  }
 0x58a   :  { %6783 = vmatpush1.bf16.msra.mxu0 %v8780_v17  ;;  %2839 = vrot.lane.b32.xlu0 %v2838_v9, %s9344_s0  ;;  %v2894_v33 = vsel %vm2104_vm8, %v2880_v26, %v2893_v15  ;;  %v2806_v48 = vsel %vm2106_vm9, %v2803_v14, %v2805_v8  ;;  %v2827_v47 = vsel %vm2104_vm8, %v2825_v55, %v2826_v12  ;;  %v2861_v38 = vrot.slane %v2858_v23, 7  ;;  %v8794_v17 = vld [vmem:[#allocation10 + $0xbb4] ss:$8 sps:$4 sm:$0xff]   ;;  %v8843_v12 = vld [vmem:[#allocation10 + $0x450] ss:$8 sps:$4 sm:$0xff]  }
 0x58b   :  { %6784 = vmatprep.subr.bf16.mxu0 %v8785_v20  ;;  %v2895_v25 = vsel %vm2106_vm9, %v2880_v26, %v2894_v33  ;;  %6481 = vmatprep.subr.bf16.mxu1 %v8815_v28  ;;  %v2807_v24 = vsel %vm2108_vm10, %v2803_v14, %v2806_v48  ;;  %v2828_v5 = vsel %vm2106_vm9, %v2825_v55, %v2827_v47  ;;  %v2883_v10 = vrot.slane %v2880_v26, 7  ;;  %v8795_v20 = vld [vmem:[#allocation10 + $0xbc0] ss:$8 sps:$4 sm:$0xff]   ;;  %v8800_v28 = vld [vmem:[#allocation10 + $0xbd4] ss:$8 sps:$4 sm:$0xff]  }
 0x58c   :  { %6473 = vmatmul.mubr.bf16.vlgmr.msra.gmra.mrb[48].mxu1 %v3207_v3  ;;  %2875 = vrot.lane.b32.xlu1 %v2874_v42, %s9344_s0  ;;  %v2896_v52 = vsel %vm2108_vm10, %v2880_v26, %v2895_v25  ;;  %2809 = vst.msk [vmem:[#allocation4 + $0x30] sm:$0x3] %vm2111_vm11, %v2807_v24  ;;  %v2829_v41 = vsel %vm2108_vm10, %v2825_v55, %v2828_v5  ;;  %v8839_v55 = vld [vmem:[#allocation10 + $0x444] ss:$8 sps:$4 sm:$0xff]   ;;  %v8798_v42 = vld [vmem:[#allocation10 + $0xbd0] ss:$8 sps:$4 sm:$0xff]  }
 0x58d   :  { %v2862_v45 = vsel %vm2102_vm7, %v2861_v38, %v11251_v31  ;;  %v2352_v30 = vsel %vm2108_vm10, %v10828_v7, %v2351_v46  ;;  %v2408_v18 = vsel %vm2104_vm8, %v10980_v34, %v2407_v37  ;;  %6482 = vmatpush1.bf16.msra.mxu1 %v8813_v63  ;;  %2831 = vst.msk [vmem:[#allocation4 + $0x32] sm:$0x3] %vm2111_vm11, %v2829_v41  ;;  %v2072_v37 = vmax.f32 %v11271_v61, 0.0  ;;  %v8851_v15 = vld [vmem:[#allocation10 + $0x464] ss:$8 sps:$4 sm:$0xff]  }
 0x58e   :  { %v2863_v13 = vsel %vm2104_vm8, %v2861_v38, %v2862_v45  ;;  %v2884_v62 = vsel %vm2102_vm7, %v2883_v10, %v11261_v22  ;;  %6785 = vmatpush1.bf16.msra.mxu0 %v8783_v2  ;;  %2897 = vrot.lane.b32.xlu0 %v2896_v52, %s9344_s0  ;;  %v2373_v7 = vsel %vm2106_vm9, %v10936_v16, %v11281_v60  ;;  %v8827_v22 = vld [vmem:[#allocation10 + $0x424] ss:$8 sps:$4 sm:$0xff]   ;;  %v8806_v41 = vld [vmem:[#allocation10 + $0xbf4] ss:$8 sps:$4 sm:$0xff]  }
 0x58f   :  { %v2864_v31 = vsel %vm2106_vm9, %v2861_v38, %v2863_v13  ;;  %v2885_v6 = vsel %vm2104_vm8, %v2883_v10, %v2884_v62  ;;  %6786 = vmatprep.subr.bf16.mxu0 %v8788_v51  ;;  %v2430_v46 = vsel %vm2104_vm8, %v11027_v54, %v11292_v40  ;;  %6483 = vmatprep.subr.bf16.mxu1 %v8821_v36  ;;  %v8803_v8 = vld [vmem:[#allocation10 + $0xbe4] ss:$8 sps:$4 sm:$0xff]   ;;  %v8801_v51 = vld [vmem:[#allocation10 + $0xbe0] ss:$8 sps:$4 sm:$0xff]  }
 0x590   :  { %v2865_v23 = vsel %vm2108_vm10, %v2861_v38, %v2864_v31  ;;  %v2886_v4 = vsel %vm2106_vm9, %v2883_v10, %v2885_v6  ;;  %2353 = vrot.lane.b32.xlu1 %v2352_v30, %s9344_s0  ;;  %v2409_v60 = vsel %vm2106_vm9, %v10980_v34, %v2408_v18  ;;  %v2374_v14 = vsel %vm2108_vm10, %v10936_v16, %v2373_v7  ;;  %v8833_v16 = vld [vmem:[#allocation10 + $0x434] ss:$8 sps:$4 sm:$0xff]   ;;  %v8849_v38 = vld [vmem:[#allocation10 + $0x460] ss:$8 sps:$4 sm:$0xff]   ;;  %v8855_v6 = vld [vmem:[#allocation10 + $0x470] ss:$8 sps:$4 sm:$0xff]  }
 0x591   :  { %2867 = vst.msk [vmem:[#allocation4 + $0x34] sm:$0x3] %vm2111_vm11, %v2865_v23  ;;  %v2887_v43 = vsel %vm2108_vm10, %v2883_v10, %v2886_v4  ;;  %6484 = vmatpush1.bf16.msra.mxu1 %v8819_v39  ;;  %v2431_v3 = vsel %vm2106_vm9, %v11027_v54, %v2430_v46  ;;  %v2410_v40 = vsel %vm2108_vm10, %v10980_v34, %v2409_v60  ;;  %v8857_v30 = vld [vmem:[#allocation10 + $0x474] ss:$8 sps:$4 sm:$0xff]  }
 0x592   :  { %2889 = vst.msk [vmem:[#allocation4 + $0x36] sm:$0x3] %vm2111_vm11, %v2887_v43  ;;  %6787 = vmatpush1.bf16.msra.mxu0 %v8786_v57  ;;  %2375 = vrot.lane.b32.xlu0 %v2374_v14, %s9344_s0  ;;  %v2432_v29 = vsel %vm2108_vm10, %v11027_v54, %v2431_v3  ;;  %v2959_v61 = vcombine.high %v2072_v37, %v2072_v37 }
 0x593   :  { %6788 = vmatprep.subr.bf16.mxu0 %v8791_v53  ;;  %6485 = vmatprep.subr.bf16.mxu1 %v8827_v22  ;;  %v2909_v34 = vrot.slane %v2072_v37, %v10621_v49  ;;  %v3223_v45 = vpack.c.bf16 %v11236_v27, %v11236_v27  ;;  %v8804_v27 = vld [vmem:[#allocation10 + $0xbf0] ss:$8 sps:$4 sm:$0xff]  }
 0x594   :  { %2411 = vrot.lane.b32.xlu1 %v2410_v40, %s9344_s0  ;;  %v11362_v54 = vrot.slane %v2959_v61, %v10621_v49 }
 0x595   :  { %6486 = vmatpush1.bf16.msra.mxu1 %v8825_v56  ;;  %v2937_v32 = vcombine.high %v2909_v34, %v2909_v34  ;;  %v2926_v2 = vrot.slane %v2909_v34, 1  ;;  %v8809_v56 = vld [vmem:[#allocation10 + $0xc04] ss:$8 sps:$4 sm:$0xff]  }
 0x596   :  { %6789 = vmatpush1.bf16.msra.mxu0 %v8789_v35  ;;  %2433 = vrot.lane.b32.xlu0 %v2432_v29, %s9344_s0  ;;  %v11367_v63 = vcombine.high %v11362_v54, %v11362_v54  ;;  %v2984_v47 = vrot.slane %v11362_v54, 1  ;;  %v8863_v35 = vld [vmem:[#allocation10 + $0x484] ss:$8 sps:$4 sm:$0xff]  }
 0x597   :  { %6790 = vmatprep.subr.bf16.mxu0 %v8794_v17  ;;  %6487 = vmatprep.subr.bf16.mxu1 %v8833_v16 }
 0x598   :  { %v3006_v10 = vrot.slane %v11367_v63, 1 }
 0x599   :  { %6488 = vmatpush1.bf16.msra.mxu1 %v8831_v50  ;;  %v8861_v50 = vld [vmem:[#allocation10 + $0x480] ss:$8 sps:$4 sm:$0xff]  }
 0x59a   :  { %6791 = vmatpush1.bf16.msra.mxu0 %v8792_v21  ;;  %6489 = vmatprep.subr.bf16.mxu1 %v8839_v55 }
 0x59b   :  { %v2061_v26 = vpop.f32.mrb[46].mxu1  ;;  %6792 = vmatprep.subr.bf16.mxu0 %v8797_v59  ;;  %v8807_v59 = vld [vmem:[#allocation10 + $0xc00] ss:$8 sps:$4 sm:$0xff]  }
 0x59c   :  { %v2062_v19 = vadd.f32 %v11242_v11, %v2061_v26  ;;  %v2063_v1 = vpop.f32.mrb[47].mxu1  ;;  %v2948_v11 = vrot.slane %v2937_v32, 1  ;;  %v8812_v26 = vld [vmem:[#allocation10 + $0xc14] ss:$8 sps:$4 sm:$0xff]  }
 0x59d   :  { %6490 = vmatpush1.bf16.msra.mxu1 %v8837_v0 }
 0x59e   :  { %v2080_v9 = vmax.f32 %v2062_v19, 0.0  ;;  %6793 = vmatpush1.bf16.msra.mxu0 %v8795_v20  ;;  %6491 = vmatprep.subr.bf16.mxu1 %v8845_v58 }
 0x59f   :  { %6794 = vmatprep.subr.bf16.mxu0 %v8800_v28 }
 0x5a0   :  { %v2916_v33 = vrot.slane %v2080_v9, %v10621_v49  ;;  %v2967_v48 = vcombine.high %v2080_v9, %v2080_v9 }
 0x5a1   :  { %6492 = vmatpush1.bf16.msra.mxu1 %v8843_v12  ;;  %v8867_v12 = vld [vmem:[#allocation10 + $0x490] ss:$8 sps:$4 sm:$0xff]  }
 0x5a2   :  { %v2974_v25 = vrot.slane %v2967_v48, %v10621_v49  ;;  %6795 = vmatpush1.bf16.msra.mxu0 %v8798_v42  ;;  %v2929_v36 = vsel %vm2102_vm7, %v2916_v33, %v2926_v2  ;;  %v2938_v24 = vcombine.high %v2916_v33, %v2916_v33  ;;  %6493 = vmatprep.subr.bf16.mxu1 %v8851_v15  ;;  %v2919_v5 = vrot.slane %v2916_v33, 7  ;;  %v8810_v42 = vld [vmem:[#allocation10 + $0xc10] ss:$8 sps:$4 sm:$0xff]   ;;  %v8875_v15 = vld [vmem:[#allocation10 + $0x4a4] ss:$8 sps:$4 sm:$0xff]  }
 0x5a3   :  { %6796 = vmatprep.subr.bf16.mxu0 %v8803_v8  ;;  %v2930_v52 = vsel %vm2104_vm8, %v2916_v33, %v2929_v36  ;;  %v8818_v8 = vld [vmem:[#allocation10 + $0xc24] ss:$8 sps:$4 sm:$0xff]   ;;  %v8873_v2 = vld [vmem:[#allocation10 + $0x4a0] ss:$8 sps:$4 sm:$0xff]   ;;  %v8881_v48 = vld [vmem:[#allocation10 + $0x4b4] ss:$8 sps:$4 sm:$0xff]  }
 0x5a4   :  { %v2931_v18 = vsel %vm2106_vm9, %v2916_v33, %v2930_v52  ;;  %v2951_v39 = vsel %vm2102_vm7, %v2938_v24, %v2948_v11  ;;  %v2987_v13 = vsel %vm2102_vm7, %v2974_v25, %v2984_v47  ;;  %v2996_v62 = vcombine.high %v2974_v25, %v2974_v25  ;;  %v8824_v11 = vld [vmem:[#allocation10 + $0xc34] ss:$8 sps:$4 sm:$0xff]   ;;  %v8879_v47 = vld [vmem:[#allocation10 + $0x4b0] ss:$8 sps:$4 sm:$0xff]   ;;  %v8885_v36 = vld [vmem:[#allocation10 + $0x4c0] ss:$8 sps:$4 sm:$0xff]  }
 0x5a5   :  { %v2932_v57 = vsel %vm2108_vm10, %v2916_v33, %v2931_v18  ;;  %v2952_v7 = vsel %vm2104_vm8, %v2938_v24, %v2951_v39  ;;  %v2988_v31 = vsel %vm2104_vm8, %v2974_v25, %v2987_v13  ;;  %6494 = vmatpush1.bf16.msra.mxu1 %v8849_v38  ;;  %v2920_v53 = vsel %vm2102_vm7, %v2919_v5, %v2909_v34  ;;  %v8869_v34 = vld [vmem:[#allocation10 + $0x494] ss:$8 sps:$4 sm:$0xff]   ;;  %v8816_v33 = vld [vmem:[#allocation10 + $0xc20] ss:$8 sps:$4 sm:$0xff]   ;;  %v8822_v38 = vld [vmem:[#allocation10 + $0xc30] ss:$8 sps:$4 sm:$0xff]  }
 0x5a6   :  { %6797 = vmatpush1.bf16.msra.mxu0 %v8801_v51  ;;  %2933 = vrot.lane.b32.xlu1 %v2932_v57, %s9344_s0  ;;  %v2953_v46 = vsel %vm2106_vm9, %v2938_v24, %v2952_v7  ;;  %v2989_v22 = vsel %vm2106_vm9, %v2974_v25, %v2988_v31  ;;  %v3009_v23 = vsel %vm2102_vm7, %v2996_v62, %v3006_v10  ;;  %v2941_v4 = vrot.slane %v2938_v24, 7  ;;  %v8830_v51 = vld [vmem:[#allocation10 + $0xc44] ss:$8 sps:$4 sm:$0xff]   ;;  %v8836_v10 = vld [vmem:[#allocation10 + $0xc54] ss:$8 sps:$4 sm:$0xff]  }
 0x5a7   :  { %6798 = vmatprep.subr.bf16.mxu0 %v8806_v41  ;;  %v2954_v60 = vsel %vm2108_vm10, %v2938_v24, %v2953_v46  ;;  %v2990_v43 = vsel %vm2108_vm10, %v2974_v25, %v2989_v22  ;;  %v3010_v14 = vsel %vm2104_vm8, %v2996_v62, %v3009_v23  ;;  %6495 = vmatprep.subr.bf16.mxu1 %v8857_v30  ;;  %v2977_v3 = vrot.slane %v2974_v25, 7  ;;  %v8887_v25 = vld [vmem:[#allocation10 + $0x4c4] ss:$8 sps:$4 sm:$0xff]   ;;  %v8828_v24 = vld [vmem:[#allocation10 + $0xc40] ss:$8 sps:$4 sm:$0xff]  }
 0x5a8   :  { %2955 = vrot.lane.b32.xlu0 %v2954_v60, %s9344_s0  ;;  %v3011_v37 = vsel %vm2106_vm9, %v2996_v62, %v3010_v14  ;;  %v2921_v40 = vsel %vm2104_vm8, %v2919_v5, %v2920_v53  ;;  %v2942_v17 = vsel %vm2102_vm7, %v2941_v4, %v2937_v32  ;;  %v2999_v16 = vrot.slane %v2996_v62, 7  ;;  %v8891_v52 = vld [vmem:[#allocation10 + $0x4d0] ss:$8 sps:$4 sm:$0xff]   ;;  %v8842_v30 = vld [vmem:[#allocation10 + $0xc64] ss:$8 sps:$4 sm:$0xff]  }
 0x5a9   :  { %v3012_v29 = vsel %vm2108_vm10, %v2996_v62, %v3011_v37  ;;  %6496 = vmatpush1.bf16.msra.mxu1 %v8855_v6  ;;  %v2922_v21 = vsel %vm2106_vm9, %v2919_v5, %v2921_v40  ;;  %v2943_v55 = vsel %vm2104_vm8, %v2941_v4, %v2942_v17  ;;  %v2978_v61 = vsel %vm2102_vm7, %v2977_v3, %v11362_v54  ;;  %v8834_v41 = vld [vmem:[#allocation10 + $0xc50] ss:$8 sps:$4 sm:$0xff]   ;;  %v8897_v18 = vld [vmem:[#allocation10 + $0x4e0] ss:$8 sps:$4 sm:$0xff]   ;;  %v8906_v13 = vld [vmem:[#allocation10 + $0x4f4] ss:$8 sps:$4 sm:$0xff]  }
 0x5aa   :  { %6799 = vmatpush1.bf16.msra.mxu0 %v8804_v27  ;;  %2991 = vrot.lane.b32.xlu1 %v2990_v43, %s9344_s0  ;;  %v2923_v0 = vsel %vm2108_vm10, %v2919_v5, %v2922_v21  ;;  %v2944_v20 = vsel %vm2106_vm9, %v2941_v4, %v2943_v55  ;;  %v2979_v58 = vsel %vm2104_vm8, %v2977_v3, %v2978_v61  ;;  %v8893_v5 = vld [vmem:[#allocation10 + $0x4d4] ss:$8 sps:$4 sm:$0xff]   ;;  %v8840_v39 = vld [vmem:[#allocation10 + $0xc60] ss:$8 sps:$4 sm:$0xff]   ;;  %v8904_v57 = vld [vmem:[#allocation10 + $0x4f0] ss:$8 sps:$4 sm:$0xff]  }
 0x5ab   :  { %6809 = vmatprep.subr.bf16.mxu0 %v8809_v56  ;;  %6497 = vmatprep.subr.bf16.mxu1 %v8863_v35  ;;  %2925 = vst.msk [vmem:[#allocation4 + $0x38] sm:$0x3] %vm2111_vm11, %v2923_v0  ;;  %v2945_v28 = vsel %vm2108_vm10, %v2941_v4, %v2944_v20  ;;  %v2980_v54 = vsel %vm2106_vm9, %v2977_v3, %v2979_v58  ;;  %v8848_v62 = vld [vmem:[#allocation10 + $0xc74] ss:$8 sps:$4 sm:$0xff]   ;;  %v8846_v7 = vld [vmem:[#allocation10 + $0xc70] ss:$8 sps:$4 sm:$0xff]  }
 0x5ac   :  { %v3000_v19 = vsel %vm2102_vm7, %v2999_v16, %v11367_v63  ;;  %3013 = vrot.lane.b32.xlu0 %v3012_v29, %s9344_s0  ;;  %2947 = vst.msk [vmem:[#allocation4 + $0x3a] sm:$0x3] %vm2111_vm11, %v2945_v28  ;;  %v2981_v1 = vsel %vm2108_vm10, %v2977_v3, %v2980_v54  ;;  %v8912_v31 = vld [vmem:[#allocation10 + $0x504] ss:$8 sps:$4 sm:$0xff]   ;;  %v8852_v53 = vld [vmem:[#allocation10 + $0xc80] ss:$8 sps:$4 sm:$0xff]  }
 0x5ad   :  { %v3001_v32 = vsel %vm2104_vm8, %v2999_v16, %v3000_v19  ;;  %6801 = vmatmul.mubr.bf16.vlgmr.msra.gmra.mrb[0].mxu0 %v3223_v45  ;;  %6498 = vmatpush1.bf16.msra.mxu1 %v8861_v50  ;;  %2983 = vst.msk [vmem:[#allocation4 + $0x3c] sm:$0x3] %vm2111_vm11, %v2981_v1  ;;  %v8899_v45 = vld [vmem:[#allocation10 + $0x4e4] ss:$8 sps:$4 sm:$0xff]   ;;  %v8860_v27 = vld [vmem:[#allocation10 + $0xc94] ss:$8 sps:$4 sm:$0xff]  }
 0x5ae   :  { %v3002_v9 = vsel %vm2106_vm9, %v2999_v16, %v3001_v32  ;;  %6810 = vmatpush1.bf16.msra.mxu0 %v8807_v59  ;;  %6499 = vmatprep.subr.bf16.mxu1 %v8869_v34  ;;  %v8854_v6 = vld [vmem:[#allocation10 + $0xc84] ss:$8 sps:$4 sm:$0xff]   ;;  %v8858_v46 = vld [vmem:[#allocation10 + $0xc90] ss:$8 sps:$4 sm:$0xff]   ;;  %v8864_v23 = vld [vmem:[#allocation10 + $0xca0] ss:$8 sps:$4 sm:$0xff]  }
 0x5af   :  { %v3003_v63 = vsel %vm2108_vm10, %v2999_v16, %v3002_v9  ;;  %6811 = vmatprep.subr.bf16.mxu0 %v8812_v26  ;;  %v8866_v22 = vld [vmem:[#allocation10 + $0xca4] ss:$8 sps:$4 sm:$0xff]   ;;  %v8872_v4 = vld [vmem:[#allocation10 + $0xcb4] ss:$8 sps:$4 sm:$0xff]   ;;  %v8870_v60 = vld [vmem:[#allocation10 + $0xcb0] ss:$8 sps:$4 sm:$0xff]  }
 0x5b0   :  { %3005 = vst.msk [vmem:[#allocation4 + $0x3e] sm:$0x3] %vm2111_vm11, %v3003_v63  ;;  %v8878_v43 = vld [vmem:[#allocation10 + $0xcc4] ss:$8 sps:$4 sm:$0xff]   ;;  %v8876_v14 = vld [vmem:[#allocation10 + $0xcc0] ss:$8 sps:$4 sm:$0xff]  }
 0x5b1   :  { %6500 = vmatpush1.bf16.msra.mxu1 %v8867_v12  ;;  %v8884_v56 = vld [vmem:[#allocation10 + $0xcd4] ss:$8 sps:$4 sm:$0xff]   ;;  %v8882_v35 = vld [vmem:[#allocation10 + $0xcd0] ss:$8 sps:$4 sm:$0xff]   ;;  %v8890_v3 = vld [vmem:[#allocation10 + $0xce4] ss:$8 sps:$4 sm:$0xff]  }
 0x5b2   :  { %6812 = vmatpush1.bf16.msra.mxu0 %v8810_v42  ;;  %6501 = vmatprep.subr.bf16.mxu1 %v8875_v15  ;;  %v8888_v37 = vld [vmem:[#allocation10 + $0xce0] ss:$8 sps:$4 sm:$0xff]   ;;  %v8896_v40 = vld [vmem:[#allocation10 + $0xcf4] ss:$8 sps:$4 sm:$0xff]   ;;  %v8894_v17 = vld [vmem:[#allocation10 + $0xcf0] ss:$8 sps:$4 sm:$0xff]  }
 0x5b3   :  { %6813 = vmatprep.subr.bf16.mxu0 %v8818_v8  ;;  %v8902_v16 = vld [vmem:[#allocation10 + $0xd04] ss:$8 sps:$4 sm:$0xff]   ;;  %v8900_v1 = vld [vmem:[#allocation10 + $0xd00] ss:$8 sps:$4 sm:$0xff]   ;;  %v8909_v9 = vld [vmem:[#allocation10 + $0xd14] ss:$8 sps:$4 sm:$0xff]  }
 0x5b4   :  { %v8907_v63 = vld [vmem:[#allocation10 + $0xd10] ss:$8 sps:$4 sm:$0xff]  }
 0x5b5   :  { %6502 = vmatpush1.bf16.msra.mxu1 %v8873_v2 }
 0x5b6   :  { %6814 = vmatpush1.bf16.msra.mxu0 %v8816_v33  ;;  %6503 = vmatprep.subr.bf16.mxu1 %v8881_v48  ;;  %v8915_v33 = vld [vmem:[#allocation10 + $0xd24] ss:$8 sps:$4 sm:$0xff]  }
 0x5b7   :  { %6815 = vmatprep.subr.bf16.mxu0 %v8824_v11 }
 0x5b9   :  { %6504 = vmatpush1.bf16.msra.mxu1 %v8879_v47 }
 0x5ba   :  { %6816 = vmatpush1.bf16.msra.mxu0 %v8822_v38  ;;  %6505 = vmatprep.subr.bf16.mxu1 %v8887_v25  ;;  %v8910_v38 = vld [vmem:[#allocation10 + $0x500] ss:$8 sps:$4 sm:$0xff]  }
 0x5bb   :  { %6817 = vmatprep.subr.bf16.mxu0 %v8830_v51  ;;  %v8913_v25 = vld [vmem:[#allocation10 + $0xd20] ss:$8 sps:$4 sm:$0xff]  }
 0x5bd   :  { %6506 = vmatpush1.bf16.msra.mxu1 %v8885_v36 }
 0x5be   :  { %6818 = vmatpush1.bf16.msra.mxu0 %v8828_v24  ;;  %6507 = vmatprep.subr.bf16.mxu1 %v8893_v5  ;;  %v8918_v24 = vld [vmem:[#allocation10 + $0x514] ss:$8 sps:$4 sm:$0xff]  }
 0x5bf   :  { %6819 = vmatprep.subr.bf16.mxu0 %v8836_v10  ;;  %v8921_v10 = vld [vmem:[#allocation10 + $0xd34] ss:$8 sps:$4 sm:$0xff]  }
 0x5c1   :  { %6508 = vmatpush1.bf16.msra.mxu1 %v8891_v52 }
 0x5c2   :  { %6820 = vmatpush1.bf16.msra.mxu0 %v8834_v41  ;;  %6509 = vmatprep.subr.bf16.mxu1 %v8899_v45  ;;  %v8916_v41 = vld [vmem:[#allocation10 + $0x510] ss:$8 sps:$4 sm:$0xff]  }
 0x5c3   :  { %6821 = vmatprep.subr.bf16.mxu0 %v8842_v30  ;;  %v8919_v45 = vld [vmem:[#allocation10 + $0xd30] ss:$8 sps:$4 sm:$0xff]  }
 0x5c5   :  { %6510 = vmatpush1.bf16.msra.mxu1 %v8897_v18  ;;  %v8924_v18 = vld [vmem:[#allocation10 + $0x524] ss:$8 sps:$4 sm:$0xff]  }
 0x5c6   :  { %6822 = vmatpush1.bf16.msra.mxu0 %v8840_v39  ;;  %6511 = vmatprep.subr.bf16.mxu1 %v8906_v13  ;;  %v8927_v39 = vld [vmem:[#allocation10 + $0xd44] ss:$8 sps:$4 sm:$0xff]  }
 0x5c7   :  { %6823 = vmatprep.subr.bf16.mxu0 %v8848_v62  ;;  %v8922_v62 = vld [vmem:[#allocation10 + $0x520] ss:$8 sps:$4 sm:$0xff]  }
 0x5c9   :  { %6512 = vmatpush1.bf16.msra.mxu1 %v8904_v57  ;;  %v8925_v57 = vld [vmem:[#allocation10 + $0xd40] ss:$8 sps:$4 sm:$0xff]  }
 0x5ca   :  { %6824 = vmatpush1.bf16.msra.mxu0 %v8846_v7  ;;  %6522 = vmatprep.subr.bf16.mxu1 %v8912_v31  ;;  %v8930_v31 = vld [vmem:[#allocation10 + $0x534] ss:$8 sps:$4 sm:$0xff]  }
 0x5cb   :  { %6825 = vmatprep.subr.bf16.mxu0 %v8854_v6  ;;  %v8933_v6 = vld [vmem:[#allocation10 + $0xd54] ss:$8 sps:$4 sm:$0xff]  }
 0x5ce   :  { %6826 = vmatpush1.bf16.msra.mxu0 %v8852_v53  ;;  %v8928_v53 = vld [vmem:[#allocation10 + $0x530] ss:$8 sps:$4 sm:$0xff]  }
 0x5cf   :  { %6827 = vmatprep.subr.bf16.mxu0 %v8860_v27  ;;  %v8931_v27 = vld [vmem:[#allocation10 + $0xd50] ss:$8 sps:$4 sm:$0xff]  }
 0x5d2   :  { %6828 = vmatpush1.bf16.msra.mxu0 %v8858_v46  ;;  %v8936_v46 = vld [vmem:[#allocation10 + $0x544] ss:$8 sps:$4 sm:$0xff]  }
 0x5d3   :  { %6829 = vmatprep.subr.bf16.mxu0 %v8866_v22  ;;  %v8939_v22 = vld [vmem:[#allocation10 + $0xd64] ss:$8 sps:$4 sm:$0xff]  }
 0x5d6   :  { %6830 = vmatpush1.bf16.msra.mxu0 %v8864_v23  ;;  %v8934_v23 = vld [vmem:[#allocation10 + $0x540] ss:$8 sps:$4 sm:$0xff]  }
 0x5d7   :  { %6831 = vmatprep.subr.bf16.mxu0 %v8872_v4  ;;  %v8937_v4 = vld [vmem:[#allocation10 + $0xd60] ss:$8 sps:$4 sm:$0xff]  }
 0x5da   :  { %6832 = vmatpush1.bf16.msra.mxu0 %v8870_v60  ;;  %v8942_v60 = vld [vmem:[#allocation10 + $0x554] ss:$8 sps:$4 sm:$0xff]  }
 0x5db   :  { %6833 = vmatprep.subr.bf16.mxu0 %v8878_v43  ;;  %v8945_v43 = vld [vmem:[#allocation10 + $0xd74] ss:$8 sps:$4 sm:$0xff]  }
 0x5de   :  { %6834 = vmatpush1.bf16.msra.mxu0 %v8876_v14  ;;  %v8940_v14 = vld [vmem:[#allocation10 + $0x550] ss:$8 sps:$4 sm:$0xff]  }
 0x5df   :  { %6835 = vmatprep.subr.bf16.mxu0 %v8884_v56  ;;  %v8943_v56 = vld [vmem:[#allocation10 + $0xd70] ss:$8 sps:$4 sm:$0xff]  }
 0x5e2   :  { %6836 = vmatpush1.bf16.msra.mxu0 %v8882_v35  ;;  %v8948_v35 = vld [vmem:[#allocation10 + $0x564] ss:$8 sps:$4 sm:$0xff]  }
 0x5e3   :  { %6837 = vmatprep.subr.bf16.mxu0 %v8890_v3  ;;  %v8951_v3 = vld [vmem:[#allocation10 + $0xd84] ss:$8 sps:$4 sm:$0xff]  }
 0x5e6   :  { %6838 = vmatpush1.bf16.msra.mxu0 %v8888_v37  ;;  %v8946_v37 = vld [vmem:[#allocation10 + $0x560] ss:$8 sps:$4 sm:$0xff]  }
 0x5e7   :  { %6839 = vmatprep.subr.bf16.mxu0 %v8896_v40  ;;  %v8949_v40 = vld [vmem:[#allocation10 + $0xd80] ss:$8 sps:$4 sm:$0xff]  }
 0x5ea   :  { %6840 = vmatpush1.bf16.msra.mxu0 %v8894_v17  ;;  %v8954_v17 = vld [vmem:[#allocation10 + $0x574] ss:$8 sps:$4 sm:$0xff]  }
 0x5eb   :  { %6850 = vmatprep.subr.bf16.mxu0 %v8902_v16  ;;  %v8957_v16 = vld [vmem:[#allocation10 + $0xd94] ss:$8 sps:$4 sm:$0xff]  }
 0x5fa   :  { %v2818_v29 = vpop.permute.xlu1 %2817 }
 0x5fb   :  { %2820 = vst.msk [vmem:[#allocation4 + $0x30] sm:$0x3] %vm2123_vm3, %v2818_v29  ;;  %v8952_v29 = vld [vmem:[#allocation10 + $0x570] ss:$8 sps:$4 sm:$0xff]  }
 0x5fc   :  { %v2840_v50 = vpop.permute.xlu0 %2839 }
 0x5fd   :  { %2842 = vst.msk [vmem:[#allocation4 + $0x32] sm:$0x3] %vm2123_vm3, %v2840_v50  ;;  %v8955_v50 = vld [vmem:[#allocation10 + $0xd90] ss:$8 sps:$4 sm:$0xff]  }
 0x5fe   :  { %v2876_v21 = vpop.permute.xlu1 %2875 }
 0x5ff   :  { %2878 = vst.msk [vmem:[#allocation4 + $0x34] sm:$0x3] %vm2123_vm3, %v2876_v21  ;;  %v8960_v21 = vld [vmem:[#allocation10 + $0x584] ss:$8 sps:$4 sm:$0xff]  }
 0x600   :  { %v2898_v55 = vpop.permute.xlu0 %2897 }
 0x601   :  { %2900 = vst.msk [vmem:[#allocation4 + $0x36] sm:$0x3] %vm2123_vm3, %v2898_v55  ;;  %v8963_v55 = vld [vmem:[#allocation10 + $0xda4] ss:$8 sps:$4 sm:$0xff]  }
 0x602   :  { %v2354_v61 = vpop.permute.xlu1 %2353 }
 0x603   :  { %2356 = vst.msk [vmem:[#allocation4 + $0x10] sm:$0x3] %vm2123_vm3, %v2354_v61  ;;  %v8958_v61 = vld [vmem:[#allocation10 + $0x580] ss:$8 sps:$4 sm:$0xff]  }
 0x604   :  { %v2376_v59 = vpop.permute.xlu0 %2375 }
 0x605   :  { %2378 = vst.msk [vmem:[#allocation4 + $0x12] sm:$0x3] %vm2123_vm3, %v2376_v59  ;;  %v8961_v59 = vld [vmem:[#allocation10 + $0xda0] ss:$8 sps:$4 sm:$0xff]  }
 0x606   :  { %v2412_v34 = vpop.permute.xlu1 %2411 }
 0x607   :  { %2414 = vst.msk [vmem:[#allocation4 + $0x14] sm:$0x3] %vm2123_vm3, %v2412_v34  ;;  %v8966_v34 = vld [vmem:[#allocation10 + $0x594] ss:$8 sps:$4 sm:$0xff]  }
 0x608   :  { %v2434_v0 = vpop.permute.xlu0 %2433  ;;  %v3023_v20 = vld [vmem:[#allocation4 + $0x30] sm:$0xff] }
 0x609   :  { %2436 = vst.msk [vmem:[#allocation4 + $0x16] sm:$0x3] %vm2123_vm3, %v2434_v0  ;;  %v3142_v58 = vrot.slane %v3023_v20, %v10621_v49  ;;  %v3135_v26 = vcombine.high %v3023_v20, %v3023_v20  ;;  %v8969_v0 = vld [vmem:[#allocation10 + $0xdb4] ss:$8 sps:$4 sm:$0xff]   ;;  %v8964_v20 = vld [vmem:[#allocation10 + $0x590] ss:$8 sps:$4 sm:$0xff]  }
 0x60b   :  { %v3150_v28 = vcombine.high %v3142_v58, %v3142_v58  ;;  %v11427_v54 = vrot.slane %v3135_v26, %v10621_v49  ;;  %v3225_v12 = vpack.c.bf16 %v3142_v58, %v3142_v58  ;;  %v8967_v58 = vld [vmem:[#allocation10 + $0xdb0] ss:$8 sps:$4 sm:$0xff]   ;;  %v8972_v26 = vld [vmem:[#allocation10 + $0x5a4] ss:$8 sps:$4 sm:$0xff]  }
 0x60d   :  { %v3226_v19 = vpack.c.bf16 %v3150_v28, %v3150_v28  ;;  %v3151_v32 = vcombine.high %v11427_v54, %v11427_v54  ;;  %v8975_v28 = vld [vmem:[#allocation10 + $0xdc4] ss:$8 sps:$4 sm:$0xff]  }
 0x60f   :  { %6841 = vmatprep.mubr.bf16.mxu0 %v3226_v19  ;;  %v3228_v42 = vpack.c.bf16 %v3151_v32, %v3151_v32  ;;  %v8970_v19 = vld [vmem:[#allocation10 + $0x5a0] ss:$8 sps:$4 sm:$0xff]   ;;  %v8978_v32 = vld [vmem:[#allocation10 + $0x5b4] ss:$8 sps:$4 sm:$0xff]  }
 0x610   :  { %6842 = vmatmul.mubr.bf16.vlgmr.msra.gmra.mrb[0].mxu0 %v3225_v12  ;;  %v3019_v15 = vld [vmem:[#allocation4 + $0x10] sm:$0xff]  ;;  %v8981_v12 = vld [vmem:[#allocation10 + $0xdd4] ss:$8 sps:$4 sm:$0xff]  }
 0x611   :  { %6851 = vmatpush1.bf16.msra.mxu0 %v8900_v1  ;;  %6882 = vmatprep.mubr.bf16.mxu0 %v3228_v42  ;;  %v3074_v8 = vrot.slane %v3019_v15, %v10621_v49  ;;  %v3067_v2 = vcombine.high %v3019_v15, %v3019_v15  ;;  %v8973_v1 = vld [vmem:[#allocation10 + $0xdc0] ss:$8 sps:$4 sm:$0xff]   ;;  %v8979_v42 = vld [vmem:[#allocation10 + $0xdd0] ss:$8 sps:$4 sm:$0xff]   ;;  %v8984_v15 = vld [vmem:[#allocation10 + $0x5c4] ss:$8 sps:$4 sm:$0xff]  }
 0x612   :  { %6852 = vmatprep.subr.bf16.mxu0 %v8909_v9  ;;  %v8976_v9 = vld [vmem:[#allocation10 + $0x5b0] ss:$8 sps:$4 sm:$0xff]  }
 0x613   :  { %v3082_v48 = vcombine.high %v3074_v8, %v3074_v8  ;;  %v11433_v11 = vrot.slane %v3067_v2, %v10621_v49  ;;  %v3209_v36 = vpack.c.bf16 %v3074_v8, %v3074_v8  ;;  %v8982_v8 = vld [vmem:[#allocation10 + $0x5c0] ss:$8 sps:$4 sm:$0xff]  }
 0x614   :  { %v8985_v2 = vld [vmem:[#allocation10 + $0xde0] ss:$8 sps:$4 sm:$0xff]  }
 0x615   :  { %6853 = vmatpush1.bf16.msra.mxu0 %v8907_v63  ;;  %v3210_v47 = vpack.c.bf16 %v3082_v48, %v3082_v48  ;;  %v3083_v51 = vcombine.high %v11433_v11, %v11433_v11  ;;  %v8987_v63 = vld [vmem:[#allocation10 + $0xde4] ss:$8 sps:$4 sm:$0xff]   ;;  %v8990_v48 = vld [vmem:[#allocation10 + $0x5d4] ss:$8 sps:$4 sm:$0xff]  }
 0x616   :  { %6854 = vmatprep.subr.bf16.mxu0 %v8915_v33 }
 0x617   :  { %6513 = vmatprep.mubr.bf16.mxu1 %v3210_v47  ;;  %v3212_v5 = vpack.c.bf16 %v3083_v51, %v3083_v51  ;;  %v8993_v47 = vld [vmem:[#allocation10 + $0xdf4] ss:$8 sps:$4 sm:$0xff]   ;;  %v8991_v51 = vld [vmem:[#allocation10 + $0xdf0] ss:$8 sps:$4 sm:$0xff]  }
 0x618   :  { %v2934_v52 = vpop.permute.xlu1 %2933  ;;  %6514 = vmatmul.mubr.bf16.vlgmr.msra.gmra.mrb[48].mxu1 %v3209_v36  ;;  %v8996_v36 = vld [vmem:[#allocation10 + $0x5e4] ss:$8 sps:$4 sm:$0xff]  }
 0x619   :  { %2936 = vst.msk [vmem:[#allocation4 + $0x38] sm:$0x3] %vm2123_vm3, %v2934_v52  ;;  %6523 = vmatpush1.bf16.msra.mxu1 %v8910_v38  ;;  %6855 = vmatpush1.bf16.msra.mxu0 %v8913_v25  ;;  %v8988_v25 = vld [vmem:[#allocation10 + $0x5d0] ss:$8 sps:$4 sm:$0xff]   ;;  %v8997_v52 = vld [vmem:[#allocation10 + $0xe00] ss:$8 sps:$4 sm:$0xff]  }
 0x61a   :  { %6554 = vmatprep.mubr.bf16.mxu1 %v3212_v5  ;;  %v2956_v30 = vpop.permute.xlu0 %2955  ;;  %6524 = vmatprep.subr.bf16.mxu1 %v8918_v24  ;;  %v8999_v24 = vld [vmem:[#allocation10 + $0xe04] ss:$8 sps:$4 sm:$0xff]  }
 0x61b   :  { %2958 = vst.msk [vmem:[#allocation4 + $0x3a] sm:$0x3] %vm2123_vm3, %v2956_v30  ;;  %6856 = vmatprep.subr.bf16.mxu0 %v8921_v10  ;;  %v8994_v10 = vld [vmem:[#allocation10 + $0x5e0] ss:$8 sps:$4 sm:$0xff]   ;;  %v9005_v30 = vld [vmem:[#allocation10 + $0xe14] ss:$8 sps:$4 sm:$0xff]  }
 0x61c   :  { %v2992_v13 = vpop.permute.xlu1 %2991 }
 0x61d   :  { %2994 = vst.msk [vmem:[#allocation4 + $0x3c] sm:$0x3] %vm2123_vm3, %v2992_v13  ;;  %6525 = vmatpush1.bf16.msra.mxu1 %v8916_v41  ;;  %6857 = vmatpush1.bf16.msra.mxu0 %v8919_v45  ;;  %v3227_v41 = vpack.c.bf16 %v11427_v54, %v11427_v54  ;;  %v9002_v45 = vld [vmem:[#allocation10 + $0x5f4] ss:$8 sps:$4 sm:$0xff]   ;;  %v9000_v13 = vld [vmem:[#allocation10 + $0x5f0] ss:$8 sps:$4 sm:$0xff]  }
 0x61e   :  { %v3014_v7 = vpop.permute.xlu0 %3013  ;;  %6526 = vmatprep.subr.bf16.mxu1 %v8924_v18  ;;  %6858 = vmatprep.subr.bf16.mxu0 %v8927_v39  ;;  %v11451_v18 = vld.sshfl [vmem:[#allocation4 + $0x18] sm:$0xff pattern:$0x76325410]  ;;  %v9006_v54 = vld [vmem:[#allocation10 + $0x600] ss:$8 sps:$4 sm:$0xff]  }
 0x61f   :  { %3016 = vst.msk [vmem:[#allocation4 + $0x3e] sm:$0x3] %vm2123_vm3, %v3014_v7  ;;  %v9011_v7 = vld [vmem:[#allocation10 + $0xe24] ss:$8 sps:$4 sm:$0xff]  }
 0x621   :  { %6527 = vmatpush1.bf16.msra.mxu1 %v8922_v62  ;;  %6859 = vmatpush1.bf16.msra.mxu0 %v8925_v57  ;;  %v9003_v62 = vld [vmem:[#allocation10 + $0xe10] ss:$8 sps:$4 sm:$0xff]   ;;  %v9008_v57 = vld [vmem:[#allocation10 + $0x604] ss:$8 sps:$4 sm:$0xff]  }
 0x622   :  { %6528 = vmatprep.subr.bf16.mxu1 %v8930_v31  ;;  %6860 = vmatprep.subr.bf16.mxu0 %v8933_v6  ;;  %v3099_v31 = vcombine.high %v11451_v18, %v11451_v18  ;;  %v3211_v6 = vpack.c.bf16 %v11433_v11, %v11433_v11  ;;  %v9021_v11 = vld [vmem:[#allocation10 + $0xe40] ss:$8 sps:$4 sm:$0xff]  }
 0x625   :  { %6529 = vmatpush1.bf16.msra.mxu1 %v8928_v53  ;;  %6861 = vmatpush1.bf16.msra.mxu0 %v8931_v27  ;;  %v9009_v53 = vld [vmem:[#allocation10 + $0xe20] ss:$8 sps:$4 sm:$0xff]   ;;  %v9014_v27 = vld [vmem:[#allocation10 + $0x614] ss:$8 sps:$4 sm:$0xff]  }
 0x626   :  { %6530 = vmatprep.subr.bf16.mxu1 %v8936_v46  ;;  %6862 = vmatprep.subr.bf16.mxu0 %v8939_v22  ;;  %v11441_v33 = vld [vmem:[#allocation4 + $0x38] sm:$0xff]  ;;  %v3214_v46 = vpack.c.bf16 %v3099_v31, %v3099_v31  ;;  %v9092_v31 = vld [vmem:[#allocation10 + $0x6e4] ss:$8 sps:$4 sm:$0xff]  }
 0x627   :  { %v11445_v38 = vrot.slane %v11441_v33, %v10621_v49  ;;  %v9017_v22 = vld [vmem:[#allocation10 + $0xe34] ss:$8 sps:$4 sm:$0xff]  }
 0x629   :  { %6531 = vmatpush1.bf16.msra.mxu1 %v8934_v23  ;;  %6863 = vmatpush1.bf16.msra.mxu0 %v8937_v4  ;;  %v3167_v5 = vcombine.high %v11445_v38, %v11445_v38  ;;  %v9012_v23 = vld [vmem:[#allocation10 + $0x610] ss:$8 sps:$4 sm:$0xff]  }
 0x62a   :  { %6532 = vmatprep.subr.bf16.mxu1 %v8942_v60  ;;  %6864 = vmatprep.subr.bf16.mxu0 %v8945_v43  ;;  %v9015_v4 = vld [vmem:[#allocation10 + $0xe30] ss:$8 sps:$4 sm:$0xff]   ;;  %v9020_v60 = vld [vmem:[#allocation10 + $0x624] ss:$8 sps:$4 sm:$0xff]  }
 0x62b   :  { %v3230_v39 = vpack.c.bf16 %v3167_v5, %v3167_v5  ;;  %v9023_v43 = vld [vmem:[#allocation10 + $0xe44] ss:$8 sps:$4 sm:$0xff]   ;;  %v9075_v5 = vld [vmem:[#allocation10 + $0xed0] ss:$8 sps:$4 sm:$0xff]  }
 0x62d   :  { %6533 = vmatpush1.bf16.msra.mxu1 %v8940_v14  ;;  %6865 = vmatpush1.bf16.msra.mxu0 %v8943_v56  ;;  %v9018_v14 = vld [vmem:[#allocation10 + $0x620] ss:$8 sps:$4 sm:$0xff]   ;;  %v9026_v56 = vld [vmem:[#allocation10 + $0x634] ss:$8 sps:$4 sm:$0xff]  }
 0x62e   :  { %6534 = vmatprep.subr.bf16.mxu1 %v8948_v35  ;;  %6866 = vmatprep.subr.bf16.mxu0 %v8951_v3  ;;  %v9029_v35 = vld [vmem:[#allocation10 + $0xe54] ss:$8 sps:$4 sm:$0xff]   ;;  %v9024_v3 = vld [vmem:[#allocation10 + $0x630] ss:$8 sps:$4 sm:$0xff]  }
 0x631   :  { %6535 = vmatpush1.bf16.msra.mxu1 %v8946_v37  ;;  %6867 = vmatpush1.bf16.msra.mxu0 %v8949_v40  ;;  %v9027_v37 = vld [vmem:[#allocation10 + $0xe50] ss:$8 sps:$4 sm:$0xff]   ;;  %v9032_v40 = vld [vmem:[#allocation10 + $0x644] ss:$8 sps:$4 sm:$0xff]  }
 0x632   :  { %6536 = vmatprep.subr.bf16.mxu1 %v8954_v17  ;;  %6868 = vmatprep.subr.bf16.mxu0 %v8957_v16  ;;  %v9035_v17 = vld [vmem:[#allocation10 + $0xe64] ss:$8 sps:$4 sm:$0xff]   ;;  %v9030_v16 = vld [vmem:[#allocation10 + $0x640] ss:$8 sps:$4 sm:$0xff]  }
 0x635   :  { %6537 = vmatpush1.bf16.msra.mxu1 %v8952_v29  ;;  %6869 = vmatpush1.bf16.msra.mxu0 %v8955_v50  ;;  %v9033_v29 = vld [vmem:[#allocation10 + $0xe60] ss:$8 sps:$4 sm:$0xff]   ;;  %v9038_v50 = vld [vmem:[#allocation10 + $0x654] ss:$8 sps:$4 sm:$0xff]  }
 0x636   :  { %6538 = vmatprep.subr.bf16.mxu1 %v8960_v21  ;;  %6870 = vmatprep.subr.bf16.mxu0 %v8963_v55  ;;  %v9041_v21 = vld [vmem:[#allocation10 + $0xe74] ss:$8 sps:$4 sm:$0xff]   ;;  %v9036_v55 = vld [vmem:[#allocation10 + $0x650] ss:$8 sps:$4 sm:$0xff]  }
 0x639   :  { %6539 = vmatpush1.bf16.msra.mxu1 %v8958_v61  ;;  %6871 = vmatpush1.bf16.msra.mxu0 %v8961_v59  ;;  %v9039_v61 = vld [vmem:[#allocation10 + $0xe70] ss:$8 sps:$4 sm:$0xff]   ;;  %v9044_v59 = vld [vmem:[#allocation10 + $0x664] ss:$8 sps:$4 sm:$0xff]  }
 0x63a   :  { %6540 = vmatprep.subr.bf16.mxu1 %v8966_v34  ;;  %6872 = vmatprep.subr.bf16.mxu0 %v8969_v0  ;;  %v9047_v34 = vld [vmem:[#allocation10 + $0xe84] ss:$8 sps:$4 sm:$0xff]   ;;  %v9042_v0 = vld [vmem:[#allocation10 + $0x660] ss:$8 sps:$4 sm:$0xff]  }
 0x63d   :  { %6541 = vmatpush1.bf16.msra.mxu1 %v8964_v20  ;;  %6873 = vmatpush1.bf16.msra.mxu0 %v8967_v58  ;;  %v9045_v20 = vld [vmem:[#allocation10 + $0xe80] ss:$8 sps:$4 sm:$0xff]   ;;  %v9050_v58 = vld [vmem:[#allocation10 + $0x674] ss:$8 sps:$4 sm:$0xff]  }
 0x63e   :  { %6542 = vmatprep.subr.bf16.mxu1 %v8972_v26  ;;  %6874 = vmatprep.subr.bf16.mxu0 %v8975_v28  ;;  %v9053_v26 = vld [vmem:[#allocation10 + $0xe94] ss:$8 sps:$4 sm:$0xff]   ;;  %v9048_v28 = vld [vmem:[#allocation10 + $0x670] ss:$8 sps:$4 sm:$0xff]  }
 0x641   :  { %6543 = vmatpush1.bf16.msra.mxu1 %v8970_v19  ;;  %6875 = vmatpush1.bf16.msra.mxu0 %v8973_v1  ;;  %v9051_v19 = vld [vmem:[#allocation10 + $0xe90] ss:$8 sps:$4 sm:$0xff]   ;;  %v9056_v1 = vld [vmem:[#allocation10 + $0x684] ss:$8 sps:$4 sm:$0xff]  }
 0x642   :  { %6544 = vmatprep.subr.bf16.mxu1 %v8978_v32  ;;  %6876 = vmatprep.subr.bf16.mxu0 %v8981_v12  ;;  %v9059_v32 = vld [vmem:[#allocation10 + $0xea4] ss:$8 sps:$4 sm:$0xff]   ;;  %v9054_v12 = vld [vmem:[#allocation10 + $0x680] ss:$8 sps:$4 sm:$0xff]  }
 0x645   :  { %6545 = vmatpush1.bf16.msra.mxu1 %v8976_v9  ;;  %6877 = vmatpush1.bf16.msra.mxu0 %v8979_v42  ;;  %v9057_v9 = vld [vmem:[#allocation10 + $0xea0] ss:$8 sps:$4 sm:$0xff]   ;;  %v9062_v42 = vld [vmem:[#allocation10 + $0x694] ss:$8 sps:$4 sm:$0xff]  }
 0x646   :  { %6546 = vmatprep.subr.bf16.mxu1 %v8984_v15  ;;  %6878 = vmatprep.subr.bf16.mxu0 %v8987_v63  ;;  %v9065_v15 = vld [vmem:[#allocation10 + $0xeb4] ss:$8 sps:$4 sm:$0xff]   ;;  %v9060_v63 = vld [vmem:[#allocation10 + $0x690] ss:$8 sps:$4 sm:$0xff]  }
 0x649   :  { %6547 = vmatpush1.bf16.msra.mxu1 %v8982_v8  ;;  %6879 = vmatpush1.bf16.msra.mxu0 %v8985_v2  ;;  %v9063_v8 = vld [vmem:[#allocation10 + $0xeb0] ss:$8 sps:$4 sm:$0xff]   ;;  %v9068_v2 = vld [vmem:[#allocation10 + $0x6a4] ss:$8 sps:$4 sm:$0xff]  }
 0x64a   :  { %6548 = vmatprep.subr.bf16.mxu1 %v8990_v48  ;;  %6880 = vmatprep.subr.bf16.mxu0 %v8993_v47  ;;  %v9071_v48 = vld [vmem:[#allocation10 + $0xec4] ss:$8 sps:$4 sm:$0xff]   ;;  %v9066_v47 = vld [vmem:[#allocation10 + $0x6a0] ss:$8 sps:$4 sm:$0xff]  }
 0x64d   :  { %6549 = vmatpush1.bf16.msra.mxu1 %v8988_v25  ;;  %6881 = vmatpush1.bf16.msra.mxu0 %v8991_v51  ;;  %v9069_v25 = vld [vmem:[#allocation10 + $0xec0] ss:$8 sps:$4 sm:$0xff]   ;;  %v9074_v51 = vld [vmem:[#allocation10 + $0x6b4] ss:$8 sps:$4 sm:$0xff]  }
 0x64e   :  { %6550 = vmatprep.subr.bf16.mxu1 %v8996_v36  ;;  %6891 = vmatprep.subr.bf16.mxu0 %v8999_v24  ;;  %v9077_v36 = vld [vmem:[#allocation10 + $0xed4] ss:$8 sps:$4 sm:$0xff]   ;;  %v9072_v24 = vld [vmem:[#allocation10 + $0x6b0] ss:$8 sps:$4 sm:$0xff]  }
 0x650   :  { %6883 = vmatmul.mubr.bf16.vlgmr.msra.gmra.mrb[0].mxu0 %v3227_v41  ;;  %v3152_v41 = vcombine.high %v11441_v33, %v11441_v33 }
 0x651   :  { %6551 = vmatpush1.bf16.msra.mxu1 %v8994_v10  ;;  %6892 = vmatpush1.bf16.msra.mxu0 %v8997_v52  ;;  %v9080_v10 = vld [vmem:[#allocation10 + $0x6c4] ss:$8 sps:$4 sm:$0xff]  }
 0x652   :  { %6923 = vmatprep.mubr.bf16.mxu0 %v3230_v39  ;;  %6552 = vmatprep.subr.bf16.mxu1 %v9002_v45  ;;  %v9083_v52 = vld [vmem:[#allocation10 + $0xee4] ss:$8 sps:$4 sm:$0xff]   ;;  %v9078_v45 = vld [vmem:[#allocation10 + $0x6c0] ss:$8 sps:$4 sm:$0xff]   ;;  %v9086_v39 = vld [vmem:[#allocation10 + $0x6d4] ss:$8 sps:$4 sm:$0xff]  }
 0x653   :  { %6893 = vmatprep.subr.bf16.mxu0 %v9005_v30  ;;  %v9081_v30 = vld [vmem:[#allocation10 + $0xee0] ss:$8 sps:$4 sm:$0xff]  }
 0x655   :  { %6553 = vmatpush1.bf16.msra.mxu1 %v9000_v13  ;;  %6894 = vmatpush1.bf16.msra.mxu0 %v9003_v62  ;;  %v9089_v13 = vld [vmem:[#allocation10 + $0xef4] ss:$8 sps:$4 sm:$0xff]   ;;  %v11460_v62 = vrot.slane %v3152_v41, %v10621_v49  ;;  %v3229_v49 = vpack.c.bf16 %v11445_v38, %v11445_v38 }
 0x656   :  { %6563 = vmatprep.subr.bf16.mxu1 %v9008_v57  ;;  %6895 = vmatprep.subr.bf16.mxu0 %v9011_v7  ;;  %v9084_v57 = vld [vmem:[#allocation10 + $0x6d0] ss:$8 sps:$4 sm:$0xff]   ;;  %v9108_v38 = vld [vmem:[#allocation10 + $0xf34] ss:$8 sps:$4 sm:$0xff]  }
 0x657   :  { %v9087_v7 = vld [vmem:[#allocation10 + $0xef0] ss:$8 sps:$4 sm:$0xff]   ;;  %v3168_v33 = vcombine.high %v11460_v62, %v11460_v62 }
 0x658   :  { %6555 = vmatmul.mubr.bf16.vlgmr.msra.gmra.mrb[48].mxu1 %v3211_v6  ;;  %v9090_v6 = vld [vmem:[#allocation10 + $0x6e0] ss:$8 sps:$4 sm:$0xff]  }
 0x659   :  { %6564 = vmatpush1.bf16.msra.mxu1 %v9006_v54  ;;  %6595 = vmatprep.mubr.bf16.mxu1 %v3214_v46  ;;  %v9095_v54 = vld [vmem:[#allocation10 + $0xf04] ss:$8 sps:$4 sm:$0xff]   ;;  %v9102_v46 = vld [vmem:[#allocation10 + $0xf14] ss:$8 sps:$4 sm:$0xff]  }
 0x65a   :  { %6896 = vmatpush1.bf16.msra.mxu0 %v9009_v53  ;;  %6565 = vmatprep.subr.bf16.mxu1 %v9014_v27  ;;  %v9093_v53 = vld [vmem:[#allocation10 + $0xf00] ss:$8 sps:$4 sm:$0xff]   ;;  %v9099_v27 = vld [vmem:[#allocation10 + $0x6f4] ss:$8 sps:$4 sm:$0xff]  }
 0x65b   :  { %6897 = vmatprep.subr.bf16.mxu0 %v9017_v22  ;;  %v3232_v22 = vpack.c.bf16 %v3168_v33, %v3168_v33  ;;  %v7000_v33 = vld [vmem:[#allocation13 + $0xc8] sm:$0xff] }
 0x65d   :  { %6566 = vmatpush1.bf16.msra.mxu1 %v9012_v23  ;;  %v9097_v23 = vld [vmem:[#allocation10 + $0x6f0] ss:$8 sps:$4 sm:$0xff]  }
 0x65e   :  { %6898 = vmatpush1.bf16.msra.mxu0 %v9015_v4  ;;  %6567 = vmatprep.subr.bf16.mxu1 %v9020_v60  ;;  %v9100_v4 = vld [vmem:[#allocation10 + $0xf10] ss:$8 sps:$4 sm:$0xff]   ;;  %v9105_v60 = vld [vmem:[#allocation10 + $0xf24] ss:$8 sps:$4 sm:$0xff]  }
 0x65f   :  { %6899 = vmatprep.subr.bf16.mxu0 %v9023_v43  ;;  %v3213_v43 = vpack.c.bf16 %v11451_v18, %v11451_v18  ;;  %v9120_v18 = vld [vmem:[#allocation10 + $0xf74] ss:$8 sps:$4 sm:$0xff]  }
 0x661   :  { %6568 = vmatpush1.bf16.msra.mxu1 %v9018_v14  ;;  %v9103_v14 = vld [vmem:[#allocation10 + $0xf20] ss:$8 sps:$4 sm:$0xff]  }
 0x662   :  { %6900 = vmatpush1.bf16.msra.mxu0 %v9021_v11  ;;  %6569 = vmatprep.subr.bf16.mxu1 %v9026_v56  ;;  %v9106_v11 = vld [vmem:[#allocation10 + $0xf30] ss:$8 sps:$4 sm:$0xff]   ;;  %v9111_v56 = vld [vmem:[#allocation10 + $0xf44] ss:$8 sps:$4 sm:$0xff]  }
 0x663   :  { %6901 = vmatprep.subr.bf16.mxu0 %v9029_v35  ;;  %v9109_v35 = vld [vmem:[#allocation10 + $0xf40] ss:$8 sps:$4 sm:$0xff]  }
 0x665   :  { %6570 = vmatpush1.bf16.msra.mxu1 %v9024_v3  ;;  %v9114_v3 = vld [vmem:[#allocation10 + $0xf54] ss:$8 sps:$4 sm:$0xff]  }
 0x666   :  { %6902 = vmatpush1.bf16.msra.mxu0 %v9027_v37  ;;  %6571 = vmatprep.subr.bf16.mxu1 %v9032_v40  ;;  %v9112_v37 = vld [vmem:[#allocation10 + $0xf50] ss:$8 sps:$4 sm:$0xff]   ;;  %v9117_v40 = vld [vmem:[#allocation10 + $0xf64] ss:$8 sps:$4 sm:$0xff]  }
 0x667   :  { %6903 = vmatprep.subr.bf16.mxu0 %v9035_v17  ;;  %v9115_v17 = vld [vmem:[#allocation10 + $0xf60] ss:$8 sps:$4 sm:$0xff]  }
 0x669   :  { %6572 = vmatpush1.bf16.msra.mxu1 %v9030_v16  ;;  %v9118_v16 = vld [vmem:[#allocation10 + $0xf70] ss:$8 sps:$4 sm:$0xff]  }
 0x66a   :  { %6904 = vmatpush1.bf16.msra.mxu0 %v9033_v29  ;;  %6573 = vmatprep.subr.bf16.mxu1 %v9038_v50  ;;  %v9123_v29 = vld [vmem:[#allocation10 + $0xf84] ss:$8 sps:$4 sm:$0xff]   ;;  %v9121_v50 = vld [vmem:[#allocation10 + $0xf80] ss:$8 sps:$4 sm:$0xff]  }
 0x66b   :  { %6905 = vmatprep.subr.bf16.mxu0 %v9041_v21  ;;  %v9126_v21 = vld [vmem:[#allocation10 + $0xf94] ss:$8 sps:$4 sm:$0xff]  }
 0x66d   :  { %6574 = vmatpush1.bf16.msra.mxu1 %v9036_v55  ;;  %v9124_v55 = vld [vmem:[#allocation10 + $0xf90] ss:$8 sps:$4 sm:$0xff]  }
 0x66e   :  { %6906 = vmatpush1.bf16.msra.mxu0 %v9039_v61  ;;  %6575 = vmatprep.subr.bf16.mxu1 %v9044_v59  ;;  %v9129_v61 = vld [vmem:[#allocation10 + $0xfa4] ss:$8 sps:$4 sm:$0xff]   ;;  %v9127_v59 = vld [vmem:[#allocation10 + $0xfa0] ss:$8 sps:$4 sm:$0xff]  }
 0x66f   :  { %6907 = vmatprep.subr.bf16.mxu0 %v9047_v34  ;;  %v9132_v34 = vld [vmem:[#allocation10 + $0xfb4] ss:$8 sps:$4 sm:$0xff]  }
 0x671   :  { %6576 = vmatpush1.bf16.msra.mxu1 %v9042_v0  ;;  %v9130_v0 = vld [vmem:[#allocation10 + $0xfb0] ss:$8 sps:$4 sm:$0xff]  }
 0x672   :  { %6908 = vmatpush1.bf16.msra.mxu0 %v9045_v20  ;;  %6577 = vmatprep.subr.bf16.mxu1 %v9050_v58  ;;  %v9135_v20 = vld [vmem:[#allocation10 + $0xfc4] ss:$8 sps:$4 sm:$0xff]   ;;  %v9133_v58 = vld [vmem:[#allocation10 + $0xfc0] ss:$8 sps:$4 sm:$0xff]  }
 0x673   :  { %6909 = vmatprep.subr.bf16.mxu0 %v9053_v26  ;;  %v9138_v26 = vld [vmem:[#allocation10 + $0xfd4] ss:$8 sps:$4 sm:$0xff]  }
 0x675   :  { %6578 = vmatpush1.bf16.msra.mxu1 %v9048_v28  ;;  %v9136_v28 = vld [vmem:[#allocation10 + $0xfd0] ss:$8 sps:$4 sm:$0xff]  }
 0x676   :  { %6910 = vmatpush1.bf16.msra.mxu0 %v9051_v19  ;;  %6579 = vmatprep.subr.bf16.mxu1 %v9056_v1  ;;  %v9141_v19 = vld [vmem:[#allocation10 + $0xfe4] ss:$8 sps:$4 sm:$0xff]   ;;  %v9139_v1 = vld [vmem:[#allocation10 + $0xfe0] ss:$8 sps:$4 sm:$0xff]  }
 0x677   :  { %6911 = vmatprep.subr.bf16.mxu0 %v9059_v32  ;;  %v9144_v32 = vld [vmem:[#allocation10 + $0xff4] ss:$8 sps:$4 sm:$0xff]  }
 0x679   :  { %6580 = vmatpush1.bf16.msra.mxu1 %v9054_v12  ;;  %v9142_v12 = vld [vmem:[#allocation10 + $0xff0] ss:$8 sps:$4 sm:$0xff]  }
 0x67a   :  { %6912 = vmatpush1.bf16.msra.mxu0 %v9057_v9  ;;  %6581 = vmatprep.subr.bf16.mxu1 %v9062_v42  ;;  %v3231_v9 = vpack.c.bf16 %v11460_v62, %v11460_v62  ;;  %v6991_v42 = vld [vmem:[#allocation13 + $0x80] sm:$0xff] }
 0x67b   :  { %6913 = vmatprep.subr.bf16.mxu0 %v9065_v15  ;;  %v6992_v15 = vld [vmem:[#allocation13 + $0x88] sm:$0xff] }
 0x67d   :  { %6582 = vmatpush1.bf16.msra.mxu1 %v9060_v63  ;;  %v6975_v63 = vld [vmem:[#allocation13] sm:$0xff] }
 0x67e   :  { %6914 = vmatpush1.bf16.msra.mxu0 %v9063_v8  ;;  %6583 = vmatprep.subr.bf16.mxu1 %v9068_v2  ;;  %v8023_v8 = vpack.c.bf16 %v6992_v15, %v6991_v42  ;;  %v6976_v2 = vld [vmem:[#allocation13 + $0x8] sm:$0xff]  ;;  %v7085_v42 = vld [vmem:[%s11573_s9] sm:$0xff] }
 0x67f   :  { %6915 = vmatprep.subr.bf16.mxu0 %v9071_v48  ;;  %v6993_v48 = vld [vmem:[#allocation13 + $0x90] sm:$0xff]  ;;  %v7086_v15 = vld [vmem:[%s11573_s9 + $0x8] sm:$0xff] }
 0x681   :  { %6584 = vmatpush1.bf16.msra.mxu1 %v9066_v47  ;;  %v6994_v47 = vld [vmem:[#allocation13 + $0x98] sm:$0xff] }
 0x682   :  { %6916 = vmatpush1.bf16.msra.mxu0 %v9069_v25  ;;  %6585 = vmatprep.subr.bf16.mxu1 %v9074_v51  ;;  %v8025_v25 = vpack.c.bf16 %v6976_v2, %v6975_v63  ;;  %v8027_v51 = vpack.c.bf16 %v6994_v47, %v6993_v48 }
 0x683   :  { %6917 = vmatprep.subr.bf16.mxu0 %v9077_v36  ;;  %v6977_v36 = vld [vmem:[#allocation13 + $0x10] sm:$0xff] }
 0x685   :  { %6586 = vmatpush1.bf16.msra.mxu1 %v9072_v24  ;;  %v6978_v24 = vld [vmem:[#allocation13 + $0x18] sm:$0xff] }
 0x686   :  { %6918 = vmatpush1.bf16.msra.mxu0 %v9075_v5  ;;  %6587 = vmatprep.subr.bf16.mxu1 %v9080_v10  ;;  %v6995_v5 = vld [vmem:[#allocation13 + $0xa0] sm:$0xff]  ;;  %v6996_v10 = vld [vmem:[#allocation13 + $0xa8] sm:$0xff] }
 0x687   :  { %6919 = vmatprep.subr.bf16.mxu0 %v9083_v52  ;;  %v8029_v52 = vpack.c.bf16 %v6978_v24, %v6977_v36  ;;  %v8031_v41 = vpack.c.bf16 %v6996_v10, %v6995_v5  ;;  %v7089_v24 = vld [vmem:[%s11573_s9 + $0x20] sm:$0xff]  ;;  %v7090_v5 = vld [vmem:[%s11573_s9 + $0x28] sm:$0xff] }
 0x688   :  { %v8062_v10 = vpack.c.bf16 %v7090_v5, %v7089_v24 }
 0x689   :  { %6588 = vmatpush1.bf16.msra.mxu1 %v9078_v45  ;;  %v6979_v45 = vld [vmem:[#allocation13 + $0x20] sm:$0xff] }
 0x68a   :  { %6920 = vmatpush1.bf16.msra.mxu0 %v9081_v30  ;;  %6589 = vmatprep.subr.bf16.mxu1 %v9086_v39  ;;  %v6980_v30 = vld [vmem:[#allocation13 + $0x28] sm:$0xff]  ;;  %v6997_v39 = vld [vmem:[#allocation13 + $0xb0] sm:$0xff] }
 0x68b   :  { %6921 = vmatprep.subr.bf16.mxu0 %v9089_v13  ;;  %v6998_v13 = vld [vmem:[#allocation13 + $0xb8] sm:$0xff]  ;;  %v8033_v62 = vpack.c.bf16 %v6980_v30, %v6979_v45 }
 0x68c   :  { %v7093_v30 = vld [vmem:[%s11573_s9 + $0x40] sm:$0xff] }
 0x68d   :  { %6590 = vmatpush1.bf16.msra.mxu1 %v9084_v57  ;;  %v8035_v57 = vpack.c.bf16 %v6998_v13, %v6997_v39  ;;  %v7094_v39 = vld [vmem:[%s11573_s9 + $0x48] sm:$0xff] }
 0x68e   :  { %6922 = vmatpush1.bf16.msra.mxu0 %v9087_v7  ;;  %6591 = vmatprep.subr.bf16.mxu1 %v9092_v31  ;;  %v6981_v7 = vld [vmem:[#allocation13 + $0x30] sm:$0xff]  ;;  %v6982_v31 = vld [vmem:[#allocation13 + $0x38] sm:$0xff]  ;;  %v8068_v13 = vpack.c.bf16 %v7094_v39, %v7093_v30 }
 0x68f   :  { %6932 = vmatprep.subr.bf16.mxu0 %v9095_v54  ;;  %v6999_v54 = vld [vmem:[#allocation13 + $0xc0] sm:$0xff] }
 0x691   :  { %6924 = vmatmul.mubr.bf16.vlgmr.msra.gmra.mrb[0].mxu0 %v3229_v49  ;;  %6592 = vmatpush1.bf16.msra.mxu1 %v9090_v6  ;;  %v8037_v6 = vpack.c.bf16 %v6982_v31, %v6981_v7  ;;  %v6983_v49 = vld [vmem:[#allocation13 + $0x40] sm:$0xff] }
 0x692   :  { %6933 = vmatpush1.bf16.msra.mxu0 %v9093_v53  ;;  %6964 = vmatprep.mubr.bf16.mxu0 %v3232_v22  ;;  %v8039_v53 = vpack.c.bf16 %v7000_v33, %v6999_v54  ;;  %v7002_v22 = vld [vmem:[#allocation13 + $0xd8] sm:$0xff]  ;;  %v7098_v54 = vld [vmem:[%s11573_s9 + $0x68] sm:$0xff]  ;;  %v7099_v33 = vld [vmem:[%s11573_s9 + $0x70] sm:$0xff] }
 0x693   :  { %6593 = vmatprep.subr.bf16.mxu1 %v9099_v27  ;;  %6934 = vmatprep.subr.bf16.mxu0 %v9102_v46  ;;  %v6984_v27 = vld [vmem:[#allocation13 + $0x48] sm:$0xff]  ;;  %v7001_v46 = vld [vmem:[#allocation13 + $0xd0] sm:$0xff]  ;;  %v7097_v31 = vld [vmem:[%s11573_s9 + $0x60] sm:$0xff] }
 0x695   :  { %6594 = vmatpush1.bf16.msra.mxu1 %v9097_v23  ;;  %v8041_v23 = vpack.c.bf16 %v6984_v27, %v6983_v49  ;;  %v11584_v49 = vmov 0.0  }
 0x696   :  { %6935 = vmatpush1.bf16.msra.mxu0 %v9100_v4  ;;  %8024 = vmatprep.subr.bf16.mxu1 %v8023_v8  ;;  %v8043_v4 = vpack.c.bf16 %v7002_v22, %v7001_v46  ;;  %v7824_v22 = vld [vmem:[#allocation14] ss:$0 sm:$0xff] }
 0x697   :  { %6936 = vmatprep.subr.bf16.mxu0 %v9105_v60  ;;  %v6985_v60 = vld [vmem:[#allocation13 + $0x50] sm:$0xff] }
 0x698   :  { %6596 = vmatmul.mubr.bf16.vlgmr.msra.gmra.mrb[48].mxu1 %v3213_v43  ;;  %v6986_v43 = vld [vmem:[#allocation13 + $0x58] sm:$0xff] }
 0x699   :  { %8026 = vmatpush3.bf16.msra.mxu1 %v8025_v25  ;;  %v7087_v25 = vld [vmem:[%s11573_s9 + $0x10] sm:$0xff] }
 0x69a   :  { %6937 = vmatpush1.bf16.msra.mxu0 %v9103_v14  ;;  %8028 = vmatprep.subr.bf16.mxu1 %v8027_v51  ;;  %v7003_v14 = vld [vmem:[#allocation13 + $0xe0] sm:$0xff]  ;;  %v7088_v51 = vld [vmem:[%s11573_s9 + $0x18] sm:$0xff] }
 0x69b   :  { %6938 = vmatprep.subr.bf16.mxu0 %v9108_v38  ;;  %v7004_v38 = vld [vmem:[#allocation13 + $0xe8] sm:$0xff]  ;;  %v8059_v36 = vpack.c.bf16 %v7088_v51, %v7087_v25 }
 0x69d   :  { %8030 = vmatpush3.bf16.msra.mxu1 %v8029_v52  ;;  %v7091_v52 = vld [vmem:[%s11573_s9 + $0x30] sm:$0xff] }
 0x69e   :  { %6939 = vmatpush1.bf16.msra.mxu0 %v9106_v11  ;;  %8032 = vmatprep.subr.bf16.mxu1 %v8031_v41  ;;  %v8045_v11 = vpack.c.bf16 %v6986_v43, %v6985_v60  ;;  %v7092_v41 = vld [vmem:[%s11573_s9 + $0x38] sm:$0xff]  ;;  %v7179_v60 = vld [vmem:[%s11575_s11] sm:$0xff]  ;;  %v7180_v43 = vld [vmem:[%s11575_s11 + $0x8] sm:$0xff] }
 0x69f   :  { %6940 = vmatprep.subr.bf16.mxu0 %v9111_v56  ;;  %v8047_v56 = vpack.c.bf16 %v7004_v38, %v7003_v14  ;;  %v8065_v45 = vpack.c.bf16 %v7092_v41, %v7091_v52  ;;  %v8080_v38 = vpack.c.bf16 %v7180_v43, %v7179_v60 }
 0x6a1   :  { %8034 = vmatpush3.bf16.msra.mxu1 %v8033_v62  ;;  %v7095_v62 = vld [vmem:[%s11573_s9 + $0x50] sm:$0xff] }
 0x6a2   :  { %6941 = vmatpush1.bf16.msra.mxu0 %v9109_v35  ;;  %8036 = vmatprep.subr.bf16.mxu1 %v8035_v57  ;;  %v6987_v35 = vld [vmem:[#allocation13 + $0x60] sm:$0xff]  ;;  %v7096_v57 = vld [vmem:[%s11573_s9 + $0x58] sm:$0xff] }
 0x6a3   :  { %6942 = vmatprep.subr.bf16.mxu0 %v9114_v3  ;;  %v6988_v3 = vld [vmem:[#allocation13 + $0x68] sm:$0xff]  ;;  %v8071_v7 = vpack.c.bf16 %v7096_v57, %v7095_v62 }
 0x6a5   :  { %8038 = vmatpush3.bf16.msra.mxu1 %v8037_v6  ;;  %v8074_v6 = vpack.c.bf16 %v7098_v54, %v7097_v31 }
 0x6a6   :  { %6943 = vmatpush1.bf16.msra.mxu0 %v9112_v37  ;;  %8040 = vmatprep.subr.bf16.mxu1 %v8039_v53  ;;  %v8049_v37 = vpack.c.bf16 %v6988_v3, %v6987_v35  ;;  %v7100_v53 = vld [vmem:[%s11573_s9 + $0x78] sm:$0xff] }
 0x6a7   :  { %6944 = vmatprep.subr.bf16.mxu0 %v9117_v40  ;;  %v7005_v40 = vld [vmem:[#allocation13 + $0xf0] sm:$0xff]  ;;  %v8077_v27 = vpack.c.bf16 %v7100_v53, %v7099_v33 }
 0x6a8   :  { %v7182_v35 = vld [vmem:[%s11575_s11 + $0x18] sm:$0xff] }
 0x6a9   :  { %8042 = vmatpush3.bf16.msra.mxu1 %v8041_v23 }
 0x6aa   :  { %6945 = vmatpush1.bf16.msra.mxu0 %v9115_v17  ;;  %8044 = vmatprep.subr.bf16.mxu1 %v8043_v4  ;;  %v7006_v17 = vld [vmem:[#allocation13 + $0xf8] sm:$0xff] }
 0x6ab   :  { %6946 = vmatprep.subr.bf16.mxu0 %v9120_v18  ;;  %v6989_v18 = vld [vmem:[#allocation13 + $0x70] sm:$0xff] }
 0x6ad   :  { %8046 = vmatpush3.bf16.msra.mxu1 %v8045_v11 }
 0x6ae   :  { %6947 = vmatpush1.bf16.msra.mxu0 %v9118_v16  ;;  %8048 = vmatprep.subr.bf16.mxu1 %v8047_v56  ;;  %v8051_v16 = vpack.c.bf16 %v7006_v17, %v7005_v40  ;;  %v7181_v56 = vld [vmem:[%s11575_s11 + $0x10] sm:$0xff]  ;;  %v7184_v40 = vld [vmem:[%s11575_s11 + $0x28] sm:$0xff] }
 0x6af   :  { %6948 = vmatprep.subr.bf16.mxu0 %v9123_v29  ;;  %v6990_v29 = vld [vmem:[#allocation13 + $0x78] sm:$0xff]  ;;  %v8083_v3 = vpack.c.bf16 %v7182_v35, %v7181_v56 }
 0x6b1   :  { %8050 = vmatpush3.bf16.msra.mxu1 %v8049_v37  ;;  %v7183_v37 = vld [vmem:[%s11575_s11 + $0x20] sm:$0xff] }
 0x6b2   :  { %6949 = vmatpush1.bf16.msra.mxu0 %v9121_v50  ;;  %v8053_v50 = vpack.c.bf16 %v6990_v29, %v6989_v18  ;;  %8052 = vmatprep.subr.bf16.mxu1 %v8051_v16  ;;  %v8086_v17 = vpack.c.bf16 %v7184_v40, %v7183_v37  ;;  %v7185_v18 = vld [vmem:[%s11575_s11 + $0x30] sm:$0xff]  ;;  %v7186_v16 = vld [vmem:[%s11575_s11 + $0x38] sm:$0xff] }
 0x6b3   :  { %6950 = vmatprep.subr.bf16.mxu0 %v9126_v21  ;;  %v11583_v21 = vmov 0.0|0.0   ;;  %v8089_v29 = vpack.c.bf16 %v7186_v16, %v7185_v18 }
 0x6b5   :  { %8054 = vmatpush3.bf16.msra.mxu1 %v8053_v50  ;;  %v7825_v50 = vld [vmem:[#allocation16] ss:$0 sm:$0xff] }
 0x6b6   :  { %6951 = vmatpush1.bf16.msra.mxu0 %v9124_v55  ;;  %8055 = vmatprep.subr.bf16.mxu1 %v11583_v21 }
 0x6b7   :  { %6952 = vmatprep.subr.bf16.mxu0 %v9129_v61 }
 0x6ba   :  { %6953 = vmatpush1.bf16.msra.mxu0 %v9127_v59 }
 0x6bb   :  { %6954 = vmatprep.subr.bf16.mxu0 %v9132_v34 }
 0x6be   :  { %6955 = vmatpush1.bf16.msra.mxu0 %v9130_v0  ;;  %v3749_v0 = vsub.s32 0, %v10616_v44 }
 0x6bf   :  { %6956 = vmatprep.subr.bf16.mxu0 %v9135_v20  ;;  %v3745_v20 = vld [vmem:[#allocation11] sm:$0x3] }
 0x6c2   :  { %6957 = vmatpush1.bf16.msra.mxu0 %v9133_v58  ;;  %v3753_v58 = vsub.s32 1, %v10616_v44  ;;  %v8056_v44 = vpack.c.bf16 %v7086_v15, %v7085_v42 }
 0x6c3   :  { %6958 = vmatprep.subr.bf16.mxu0 %v9138_v26  ;;  %v3750_v26 = vrot.slane %v3745_v20, %v3749_v0  ;;  %v7826_v0 = vld [vmem:[#allocation5] ss:$0 sm:$0xff] }
 0x6c6   :  { %6959 = vmatpush1.bf16.msra.mxu0 %v9136_v28  ;;  %v3754_v28 = vrot.slane %v3745_v20, %v3753_v58 }
 0x6c7   :  { %6960 = vmatprep.subr.bf16.mxu0 %v9141_v19 }
 0x6ca   :  { %6961 = vmatpush1.bf16.msra.mxu0 %v9139_v1 }
 0x6cb   :  { %6962 = vmatprep.subr.bf16.mxu0 %v9144_v32 }
 0x6ce   :  { %6963 = vmatpush1.bf16.msra.mxu0 %v9142_v12 }
 0x6d1   :  { %6965 = vmatmul.mubr.bf16.vlgmr.msra.gmra.mrb[0].mxu0 %v3231_v9 }
 0x76b   :  { %v6597_v55 = vpop.f32.mrb[48].mxu1 }
 0x76c   :  { %v6599_v61 = vpop.f32.mrb[49].mxu1  ;;  %v8091_v19 = vadd.f32 %v6597_v55, %v3750_v26 }
 0x76d   :  { %v6601_v59 = vpop.f32.mrb[50].mxu1  ;;  %v8093_v1 = vadd.f32 %v6599_v61, %v3754_v28 }
 0x76e   :  { %v6602_v34 = vpop.f32.mrb[51].mxu1 }
 0x7a4   :  { %v6966_v32 = vpop.f32.mrb[0].mxu0 }
 0x7a5   :  { %v8092_v12 = vadd.f32 %v8091_v19, %v6966_v32  ;;  %v6968_v9 = vpop.f32.mrb[1].mxu0 }
 0x7a6   :  { %v8094_v63 = vadd.f32 %v8093_v1, %v6968_v9  ;;  %v6970_v8 = vpop.f32.mrb[2].mxu0 }
 0x7a7   :  { %v6971_v2 = vpop.f32.mrb[3].mxu0  ;;  %v6973_v47 = vmax.f32 %v8092_v12, 0.0 }
 0x7a8   :  { %v6974_v48 = vmax.f32 %v8094_v63, 0.0 }
 0x7aa   :  { %7078 = vmatprep.mubr.f32.mxu1 %v6974_v48 }
 0x7ab   :  { %7079 = vmatmul.mubr.f32.vlgmr.msra.gmra.mrb[52].mxu1 %v6973_v47 }
 0x7ac   :  { %8057 = vmatpush3.bf16.msra.mxu1 %v8056_v44  ;;  %7970 = vmatprep.mubr.msk.f32.mxu1 %vm9349_vm2, %v11584_v49 }
 0x7ad   :  { %8058 = vmatprep.subr.bf16.mxu1 %v11583_v21 }
 0x7b0   :  { %8060 = vmatpush3.bf16.msra.mxu1 %v8059_v36 }
 0x7b1   :  { %8061 = vmatprep.subr.bf16.mxu1 %v11583_v21 }
 0x7b4   :  { %8063 = vmatpush3.bf16.msra.mxu1 %v8062_v10 }
 0x7b5   :  { %8064 = vmatprep.subr.bf16.mxu1 %v11583_v21 }
 0x7b8   :  { %8066 = vmatpush3.bf16.msra.mxu1 %v8065_v45 }
 0x7b9   :  { %8067 = vmatprep.subr.bf16.mxu1 %v11583_v21 }
 0x7bc   :  { %8069 = vmatpush3.bf16.msra.mxu1 %v8068_v13 }
 0x7bd   :  { %8070 = vmatprep.subr.bf16.mxu1 %v11583_v21 }
 0x7c0   :  { %8072 = vmatpush3.bf16.msra.mxu1 %v8071_v7 }
 0x7c1   :  { %8073 = vmatprep.subr.bf16.mxu1 %v11583_v21 }
 0x7c4   :  { %8075 = vmatpush3.bf16.msra.mxu1 %v8074_v6 }
 0x7c5   :  { %8076 = vmatprep.subr.bf16.mxu1 %v11583_v21 }
 0x7c8   :  { %8078 = vmatpush3.bf16.msra.mxu1 %v8077_v27 }
 0x7c9   :  { %8079 = vmatprep.subr.bf16.mxu1 %v11583_v21 }
 0x87e   :  { %v7879_v46 = vpop.f32.mrb[52].mxu1 }
 0x87f   :  { %v7880_v23 = vpop.f32.mrb[53].mxu1 }
 0x880   :  { %v7881_v4 = vadd.f32 %v7880_v23, %v7879_v46 }
 0x882   :  { %v7081_v14 = vadd.f32 %v7881_v4, %v7824_v22 }
 0x884   :  { %v7084_v11 = vmax.f32 %v7081_v14, 0.0 }
 0x886   :  { %7971 = vmatmul.mubr.f32.vlgmr.msra.gmra.mrb[54].mxu1 %v7084_v11 }
 0x887   :  { %8081 = vmatpush3.bf16.msra.mxu1 %v8080_v38  ;;  %7989 = vmatprep.mubr.msk.f32.mxu1 %vm9349_vm2, %v11584_v49 }
 0x888   :  { %8082 = vmatprep.subr.bf16.mxu1 %v11583_v21 }
 0x88b   :  { %8084 = vmatpush3.bf16.msra.mxu1 %v8083_v3 }
 0x88c   :  { %8085 = vmatprep.subr.bf16.mxu1 %v11583_v21 }
 0x88f   :  { %8087 = vmatpush3.bf16.msra.mxu1 %v8086_v17 }
 0x890   :  { %8088 = vmatprep.subr.bf16.mxu1 %v11583_v21 }
 0x893   :  { %8090 = vmatpush3.bf16.msra.mxu1 %v8089_v29 }
 0x959   :  { %v7174_v55 = vpop.f32.mrb[54].mxu1 }
 0x95a   :  { %v7175_v61 = vadd.f32 %v7825_v50, %v7174_v55  ;;  %v7972_v59 = vpop.f32.mrb[55].mxu1 }
 0x95c   :  { %v7178_v34 = vmax.f32 %v7175_v61, 0.0 }
 0x95e   :  { %7990 = vmatmul.mubr.msk.f32.vlgmr.msra.gmra.mrb[56].mxu1 %vm1795_vm0, %v7178_v34 }
 0xa31   :  { %v7263_v20 = vpop.f32.mrb[56].mxu1 }
 0xa32   :  { %v7264_v21 = vadd.f32 %v7826_v0, %v7263_v20  ;;  %v7991_v58 = vpop.f32.mrb[57].mxu1 }
 0xa34   :  { %7268 = vst.msk [vmem:[%s11577_s13] sm:$0x3] %vm7267_vm4, %v7264_v21 }
 0xa35   :  { %7273 = vsyncpa [#allocation7], 1 }
 0xa36   :  { %7274 = vsyncpa [#allocation9], 1 }
 0xa37   :  { %7275 = vsyncpa [#allocation12], 1 }
 0xa38   :  { %7276 = vsyncpa [#allocation15], 1 }

</bundles_post_ra>
